<compile_context>
chip_gen: v6e
topology: v6e:2x2x1
jax: 0.10.0
libtpu: 0.0.40
codegen_flags: <defaults>
</compile_context>

<pallas_src>
import functools

import jax
import jax.numpy as jnp
import numpy as np
from jax.experimental import pallas as pl
from jax.experimental.pallas import tpu as pltpu


def _bottleneck_kernel(x_ref, w1_ref, b1_ref, wd_ref, bd_ref, w2_ref, b2_ref,
                       o_ref, pad_ref, *, H, W):
    """x_ref:   VMEM (1, H*W, C_in)   input slab (channels on lanes)
       w1_ref:  VMEM (C_in, C_mid)    1x1 conv weights with BN folded in
       b1_ref:  VMEM (1, C_mid)       folded bias for conv1+BN
       wd_ref:  VMEM (9, C_mid)       depthwise taps (kh*3+kw) with BN folded
       bd_ref:  VMEM (1, C_mid)       folded bias for depthwise+BN
       w2_ref:  VMEM (C_mid, C_in)    final 1x1 conv weights
       b2_ref:  VMEM (1, C_in)        final conv bias
       o_ref:   VMEM (1, H*W, C_in)   output slab
       pad_ref: VMEM (H*W + 2W + 8, C_mid) zero-padded depthwise scratch
    """
    HW = H * W
    C_mid = w1_ref.shape[1]

    x = x_ref[0]                                                   # (HW, C_in)

    # ---- pointwise conv 64->384 + folded BN + ReLU6 (MXU) -------------------
    a = jnp.dot(x, w1_ref[...], preferred_element_type=jnp.float32)
    a = jnp.clip(a + b1_ref[...], 0.0, 6.0)                        # (HW, C_mid)

    # ---- depthwise 3x3 conv (padding=1) + folded BN + ReLU6 (VPU) -----------
    # Flat zero-padded buffer: data stored at offset W+1 so every tap is a
    # non-negative static slice; wrap-around taps are masked per column.
    pad_ref[...] = jnp.zeros_like(pad_ref)
    pad_ref[pl.ds(W + 1, HW), :] = a

    col = jax.lax.broadcasted_iota(jnp.int32, (HW, 1), 0) % W
    left_ok = (col > 0).astype(jnp.float32)        # kw==0 taps invalid at w==0
    right_ok = (col < W - 1).astype(jnp.float32)   # kw==2 taps invalid at w==W-1

    d = jnp.zeros((HW, C_mid), jnp.float32)
    for kh in range(3):
        for kw in range(3):
            wv = wd_ref[pl.ds(kh * 3 + kw, 1), :]                  # (1, C_mid)
            slab = pad_ref[pl.ds(kh * W + kw, HW), :]              # (HW, C_mid)
            if kw == 0:
                slab = slab * left_ok
            elif kw == 2:
                slab = slab * right_ok
            d = d + wv * slab
    d = jnp.clip(d + bd_ref[...], 0.0, 6.0)                        # (HW, C_mid)

    # ---- pointwise conv 384->64 + bias + residual add (MXU) -----------------
    y = jnp.dot(d, w2_ref[...], preferred_element_type=jnp.float32)
    o_ref[0] = y + b2_ref[...] + x


def bottleneck_residual(x, w1, b1, wd, bd, w2, b2, running_mean, running_var,
                        eps=1e-5):
    """x: (N, 64, H, W) f32; w1: (384, 64, 1, 1); wd: (384, 1, 3, 3);
       w2: (64, 384, 1, 1); biases/BN stats per the PyTorch module."""
    N, C_in, H, W = x.shape
    C_mid = w1.shape[0]
    HW = H * W

    inv_std = 1.0 / jnp.sqrt(running_var.astype(jnp.float32) + eps)

    # Fold BatchNorm (affine=False, eval mode) into the preceding convs.
    w1f = (w1.reshape(C_mid, C_in) * inv_std[:, None]).T           # (C_in, C_mid)
    b1f = ((b1 - running_mean) * inv_std).reshape(1, C_mid)
    wdf = (wd.reshape(C_mid, 9) * inv_std[:, None]).T              # (9, C_mid)
    bdf = ((bd - running_mean) * inv_std).reshape(1, C_mid)
    w2m = w2.reshape(C_in, C_mid).T                                # (C_mid, C_in)
    b2m = b2.reshape(1, C_in)

    # NCHW -> (N, H*W, C): channels on the lane axis (lane-dense slabs).
    x_mat = jnp.transpose(x, (0, 2, 3, 1)).reshape(N, HW, C_in)
    x_mat = x_mat.astype(jnp.float32)

    pad_rows = HW + 2 * W + 8
    kernel = functools.partial(_bottleneck_kernel, H=H, W=W)

    out_mat = pl.pallas_call(
        kernel,
        out_shape=jax.ShapeDtypeStruct((N, HW, C_in), jnp.float32),
        grid=(N,),
        in_specs=[
            pl.BlockSpec((1, HW, C_in), lambda n: (n, 0, 0)),      # x slab
            pl.BlockSpec((C_in, C_mid), lambda n: (0, 0)),         # w1 (folded)
            pl.BlockSpec((1, C_mid), lambda n: (0, 0)),            # b1 (folded)
            pl.BlockSpec((9, C_mid), lambda n: (0, 0)),            # dw taps
            pl.BlockSpec((1, C_mid), lambda n: (0, 0)),            # dw bias
            pl.BlockSpec((C_mid, C_in), lambda n: (0, 0)),         # w2
            pl.BlockSpec((1, C_in), lambda n: (0, 0)),             # b2
        ],
        out_specs=pl.BlockSpec((1, HW, C_in), lambda n: (n, 0, 0)),
        scratch_shapes=[pltpu.VMEM((pad_rows, C_mid), jnp.float32)],
        compiler_params=pltpu.CompilerParams(
            dimension_semantics=("parallel",)),
    )(x_mat, w1f, b1f, wdf, bdf, w2m, b2m)

    return jnp.transpose(out_mat.reshape(N, H, W, C_in), (0, 3, 1, 2))


def _reference(x, w1, b1, wd, bd, w2, b2, running_mean, running_var, eps=1e-5):
    inv = 1.0 / jnp.sqrt(running_var + eps)

    def bn(t):
        return (t - running_mean[None, :, None, None]) * inv[None, :, None, None]

    def relu6(t):
        return jnp.clip(t, 0.0, 6.0)

    dn = ("NCHW", "OIHW", "NCHW")
    y = jax.lax.conv_general_dilated(
        x, w1, (1, 1), "VALID", dimension_numbers=dn) + b1[None, :, None, None]
    y = relu6(bn(y))
    y = jax.lax.conv_general_dilated(
        y, wd, (1, 1), ((1, 1), (1, 1)), dimension_numbers=dn,
        feature_group_count=wd.shape[0]) + bd[None, :, None, None]
    y = relu6(bn(y))
    y = jax.lax.conv_general_dilated(
        y, w2, (1, 1), "VALID", dimension_numbers=dn) + b2[None, :, None, None]
    return y + x


if __name__ == "__main__":
    key = jax.random.PRNGKey(0)
    ks = jax.random.split(key, 9)

    # Small shapes consistent with the module: channels fixed by the convs
    # (64 -> 384 -> 64), small spatial / batch for the test.
    N, C_IN, C_MID, H, W = 2, 64, 384, 16, 16

    x = jax.random.normal(ks[0], (N, C_IN, H, W), dtype=jnp.float32)
    w1 = 0.05 * jax.random.normal(ks[1], (C_MID, C_IN, 1, 1), dtype=jnp.float32)
    b1 = 0.05 * jax.random.normal(ks[2], (C_MID,), dtype=jnp.float32)
    wd = 0.10 * jax.random.normal(ks[3], (C_MID, 1, 3, 3), dtype=jnp.float32)
    bd = 0.05 * jax.random.normal(ks[4], (C_MID,), dtype=jnp.float32)
    w2 = 0.05 * jax.random.normal(ks[5], (C_IN, C_MID, 1, 1), dtype=jnp.float32)
    b2 = 0.05 * jax.random.normal(ks[6], (C_IN,), dtype=jnp.float32)
    rm = 0.10 * jax.random.normal(ks[7], (C_MID,), dtype=jnp.float32)
    rv = 0.5 + jax.random.uniform(ks[8], (C_MID,), dtype=jnp.float32)

    out = bottleneck_residual(x, w1, b1, wd, bd, w2, b2, rm, rv)
    out = jax.block_until_ready(out)

    ref = _reference(x, w1, b1, wd, bd, w2, b2, rm, rv)
    assert out.shape == ref.shape, (out.shape, ref.shape)
    np.testing.assert_allclose(np.asarray(out), np.asarray(ref),
                               rtol=1e-2, atol=1e-2)
    print("KERNEL_OK")
</pallas_src>

<mosaic_0001>
module attributes {stable_mosaic.version = 11 : i64} {
  func.func @_bottleneck_kernel(%arg0: i32, %arg1: memref<1x256x64xf32, #tpu.memory_space<vmem>>, %arg2: memref<64x384xf32, #tpu.memory_space<vmem>>, %arg3: memref<1x384xf32, #tpu.memory_space<vmem>>, %arg4: memref<9x384xf32, #tpu.memory_space<vmem>>, %arg5: memref<1x384xf32, #tpu.memory_space<vmem>>, %arg6: memref<384x64xf32, #tpu.memory_space<vmem>>, %arg7: memref<1x64xf32, #tpu.memory_space<vmem>>, %arg8: memref<1x256x64xf32, #tpu.memory_space<vmem>>, %arg9: memref<296x384xf32, #tpu.memory_space<vmem>>) attributes {dimension_semantics = [#tpu.dimension_semantics<parallel>], iteration_bounds = array<i64: 2>, scalar_prefetch = 0 : i64, scratch_operands = 1 : i64, tpu.core_type = #tpu.core_type<tc>, window_params = [{transform_indices = @transform_0, window_bounds = array<i64: 1, 256, 64>}, {pipeline_mode = #tpu.pipeline_mode<synchronous>, transform_indices = @transform_1, window_bounds = array<i64: 64, 384>}, {pipeline_mode = #tpu.pipeline_mode<synchronous>, transform_indices = @transform_2, window_bounds = array<i64: 1, 384>}, {pipeline_mode = #tpu.pipeline_mode<synchronous>, transform_indices = @transform_3, window_bounds = array<i64: 9, 384>}, {pipeline_mode = #tpu.pipeline_mode<synchronous>, transform_indices = @transform_4, window_bounds = array<i64: 1, 384>}, {pipeline_mode = #tpu.pipeline_mode<synchronous>, transform_indices = @transform_5, window_bounds = array<i64: 384, 64>}, {pipeline_mode = #tpu.pipeline_mode<synchronous>, transform_indices = @transform_6, window_bounds = array<i64: 1, 64>}, {transform_indices = @transform_7, window_bounds = array<i64: 1, 256, 64>}]} {
    %c0 = arith.constant 0 : index
    %c0_0 = arith.constant 0 : index
    %c0_1 = arith.constant 0 : index
    %0 = vector.load %arg1[%c0, %c0_0, %c0_1] : memref<1x256x64xf32, #tpu.memory_space<vmem>>, vector<1x256x64xf32>
    %1 = vector.shape_cast %0 : vector<1x256x64xf32> to vector<256x64xf32>
    %c0_2 = arith.constant 0 : index
    %c0_3 = arith.constant 0 : index
    %2 = vector.load %arg2[%c0_2, %c0_3] : memref<64x384xf32, #tpu.memory_space<vmem>>, vector<64x384xf32>
    %cst = arith.constant dense<0.000000e+00> : vector<256x384xf32>
    %3 = tpu.matmul %1, %2, %cst {dimension_numbers = #tpu.dot_dimension_numbers<[1], [0], [0], [1], [0, 0, 1, 1], [], []>} : vector<256x64xf32>, vector<64x384xf32>, vector<256x384xf32> -> vector<256x384xf32>
    %c0_4 = arith.constant 0 : index
    %c0_5 = arith.constant 0 : index
    %4 = vector.load %arg3[%c0_4, %c0_5] : memref<1x384xf32, #tpu.memory_space<vmem>>, vector<1x384xf32>
    %5 = vector.broadcast %4 : vector<1x384xf32> to vector<256x384xf32>
    %6 = arith.addf %3, %5 : vector<256x384xf32>
    %cst_6 = arith.constant 0.000000e+00 : f32
    %cst_7 = arith.constant 6.000000e+00 : f32
    %7 = vector.broadcast %cst_6 : f32 to vector<256x384xf32>
    %8 = arith.maximumf %7, %6 : vector<256x384xf32>
    %9 = vector.broadcast %cst_7 : f32 to vector<256x384xf32>
    %10 = arith.minimumf %9, %8 : vector<256x384xf32>
    %cst_8 = arith.constant 0.000000e+00 : f32
    %11 = vector.broadcast %cst_8 : f32 to vector<296x384xf32>
    %c0_9 = arith.constant 0 : index
    %c0_10 = arith.constant 0 : index
    %12 = vector.load %arg9[%c0_9, %c0_10] : memref<296x384xf32, #tpu.memory_space<vmem>>, vector<296x384xf32>
    tpu.vector_store %arg9[%c0_9, %c0_10], %11 {strides = array<i32>} : memref<296x384xf32, #tpu.memory_space<vmem>>, vector<296x384xf32>,
    %c17 = arith.constant 17 : index
    %c0_11 = arith.constant 0 : index
    %13 = vector.load %arg9[%c17, %c0_11] : memref<296x384xf32, #tpu.memory_space<vmem>>, vector<256x384xf32>
    tpu.vector_store %arg9[%c17, %c0_11], %10 {strides = array<i32>} : memref<296x384xf32, #tpu.memory_space<vmem>>, vector<256x384xf32>,
    %14 = tpu.iota {dimensions = array<i32: 0>} : vector<256x1xi32>
    %c16_i32 = arith.constant 16 : i32
    %c0_i32 = arith.constant 0 : i32
    %15 = arith.cmpi eq, %c16_i32, %c0_i32 : i32
    %c1_i32 = arith.constant 1 : i32
    %16 = arith.select %15, %c1_i32, %c16_i32 : i32
    %17 = vector.broadcast %16 : i32 to vector<256x1xi32>
    %18 = arith.remsi %14, %17 : vector<256x1xi32>
    %c0_i32_12 = arith.constant 0 : i32
    %19 = vector.broadcast %c0_i32_12 : i32 to vector<256x1xi32>
    %20 = arith.cmpi ne, %18, %19 : vector<256x1xi32>
    %c0_i32_13 = arith.constant 0 : i32
    %21 = vector.broadcast %c0_i32_13 : i32 to vector<256x1xi32>
    %22 = arith.cmpi slt, %18, %21 : vector<256x1xi32>
    %c0_i32_14 = arith.constant 0 : i32
    %23 = arith.cmpi slt, %16, %c0_i32_14 : i32
    %24 = vector.broadcast %23 : i1 to vector<256x1xi1>
    %25 = vector.broadcast %24 : vector<256x1xi1> to vector<256x1xi1>
    %26 = arith.xori %22, %25 : vector<256x1xi1>
    %27 = arith.andi %26, %20 : vector<256x1xi1>
    %28 = vector.broadcast %16 : i32 to vector<256x1xi32>
    %29 = arith.addi %18, %28 : vector<256x1xi32>
    %30 = arith.select %27, %29, %18 : vector<256x1xi1>, vector<256x1xi32>
    %c0_i32_15 = arith.constant 0 : i32
    %31 = vector.broadcast %c0_i32_15 : i32 to vector<256x1xi32>
    %32 = arith.cmpi sgt, %30, %31 : vector<256x1xi32>
    %33 = arith.extui %32 : vector<256x1xi1> to vector<256x1xi32>
    %34 = arith.sitofp %33 : vector<256x1xi32> to vector<256x1xf32>
    %c15_i32 = arith.constant 15 : i32
    %35 = vector.broadcast %c15_i32 : i32 to vector<256x1xi32>
    %36 = arith.cmpi slt, %30, %35 : vector<256x1xi32>
    %37 = arith.extui %36 : vector<256x1xi1> to vector<256x1xi32>
    %38 = arith.sitofp %37 : vector<256x1xi32> to vector<256x1xf32>
    %cst_16 = arith.constant 0.000000e+00 : f32
    %39 = vector.broadcast %cst_16 : f32 to vector<256x384xf32>
    %c0_17 = arith.constant 0 : index
    %c0_18 = arith.constant 0 : index
    %40 = vector.load %arg4[%c0_17, %c0_18] : memref<9x384xf32, #tpu.memory_space<vmem>>, vector<1x384xf32>
    %c0_19 = arith.constant 0 : index
    %c0_20 = arith.constant 0 : index
    %41 = vector.load %arg9[%c0_19, %c0_20] : memref<296x384xf32, #tpu.memory_space<vmem>>, vector<256x384xf32>
    %42 = vector.broadcast %34 : vector<256x1xf32> to vector<256x384xf32>
    %43 = arith.mulf %41, %42 : vector<256x384xf32>
    %44 = vector.broadcast %40 : vector<1x384xf32> to vector<256x384xf32>
    %45 = arith.mulf %44, %43 : vector<256x384xf32>
    %46 = arith.addf %39, %45 : vector<256x384xf32>
    %c1 = arith.constant 1 : index
    %c0_21 = arith.constant 0 : index
    %47 = vector.load %arg4[%c1, %c0_21] : memref<9x384xf32, #tpu.memory_space<vmem>>, vector<1x384xf32>
    %c1_22 = arith.constant 1 : index
    %c0_23 = arith.constant 0 : index
    %48 = vector.load %arg9[%c1_22, %c0_23] : memref<296x384xf32, #tpu.memory_space<vmem>>, vector<256x384xf32>
    %49 = vector.broadcast %47 : vector<1x384xf32> to vector<256x384xf32>
    %50 = arith.mulf %49, %48 : vector<256x384xf32>
    %51 = arith.addf %46, %50 : vector<256x384xf32>
    %c2 = arith.constant 2 : index
    %c0_24 = arith.constant 0 : index
    %52 = vector.load %arg4[%c2, %c0_24] : memref<9x384xf32, #tpu.memory_space<vmem>>, vector<1x384xf32>
    %c2_25 = arith.constant 2 : index
    %c0_26 = arith.constant 0 : index
    %53 = vector.load %arg9[%c2_25, %c0_26] : memref<296x384xf32, #tpu.memory_space<vmem>>, vector<256x384xf32>
    %54 = vector.broadcast %38 : vector<256x1xf32> to vector<256x384xf32>
    %55 = arith.mulf %53, %54 : vector<256x384xf32>
    %56 = vector.broadcast %52 : vector<1x384xf32> to vector<256x384xf32>
    %57 = arith.mulf %56, %55 : vector<256x384xf32>
    %58 = arith.addf %51, %57 : vector<256x384xf32>
    %c3 = arith.constant 3 : index
    %c0_27 = arith.constant 0 : index
    %59 = vector.load %arg4[%c3, %c0_27] : memref<9x384xf32, #tpu.memory_space<vmem>>, vector<1x384xf32>
    %c16 = arith.constant 16 : index
    %c0_28 = arith.constant 0 : index
    %60 = vector.load %arg9[%c16, %c0_28] : memref<296x384xf32, #tpu.memory_space<vmem>>, vector<256x384xf32>
    %61 = vector.broadcast %34 : vector<256x1xf32> to vector<256x384xf32>
    %62 = arith.mulf %60, %61 : vector<256x384xf32>
    %63 = vector.broadcast %59 : vector<1x384xf32> to vector<256x384xf32>
    %64 = arith.mulf %63, %62 : vector<256x384xf32>
    %65 = arith.addf %58, %64 : vector<256x384xf32>
    %c4 = arith.constant 4 : index
    %c0_29 = arith.constant 0 : index
    %66 = vector.load %arg4[%c4, %c0_29] : memref<9x384xf32, #tpu.memory_space<vmem>>, vector<1x384xf32>
    %c17_30 = arith.constant 17 : index
    %c0_31 = arith.constant 0 : index
    %67 = vector.load %arg9[%c17_30, %c0_31] : memref<296x384xf32, #tpu.memory_space<vmem>>, vector<256x384xf32>
    %68 = vector.broadcast %66 : vector<1x384xf32> to vector<256x384xf32>
    %69 = arith.mulf %68, %67 : vector<256x384xf32>
    %70 = arith.addf %65, %69 : vector<256x384xf32>
    %c5 = arith.constant 5 : index
    %c0_32 = arith.constant 0 : index
    %71 = vector.load %arg4[%c5, %c0_32] : memref<9x384xf32, #tpu.memory_space<vmem>>, vector<1x384xf32>
    %c18 = arith.constant 18 : index
    %c0_33 = arith.constant 0 : index
    %72 = vector.load %arg9[%c18, %c0_33] : memref<296x384xf32, #tpu.memory_space<vmem>>, vector<256x384xf32>
    %73 = vector.broadcast %38 : vector<256x1xf32> to vector<256x384xf32>
    %74 = arith.mulf %72, %73 : vector<256x384xf32>
    %75 = vector.broadcast %71 : vector<1x384xf32> to vector<256x384xf32>
    %76 = arith.mulf %75, %74 : vector<256x384xf32>
    %77 = arith.addf %70, %76 : vector<256x384xf32>
    %c6 = arith.constant 6 : index
    %c0_34 = arith.constant 0 : index
    %78 = vector.load %arg4[%c6, %c0_34] : memref<9x384xf32, #tpu.memory_space<vmem>>, vector<1x384xf32>
    %c32 = arith.constant 32 : index
    %c0_35 = arith.constant 0 : index
    %79 = vector.load %arg9[%c32, %c0_35] : memref<296x384xf32, #tpu.memory_space<vmem>>, vector<256x384xf32>
    %80 = vector.broadcast %34 : vector<256x1xf32> to vector<256x384xf32>
    %81 = arith.mulf %79, %80 : vector<256x384xf32>
    %82 = vector.broadcast %78 : vector<1x384xf32> to vector<256x384xf32>
    %83 = arith.mulf %82, %81 : vector<256x384xf32>
    %84 = arith.addf %77, %83 : vector<256x384xf32>
    %c7 = arith.constant 7 : index
    %c0_36 = arith.constant 0 : index
    %85 = vector.load %arg4[%c7, %c0_36] : memref<9x384xf32, #tpu.memory_space<vmem>>, vector<1x384xf32>
    %c33 = arith.constant 33 : index
    %c0_37 = arith.constant 0 : index
    %86 = vector.load %arg9[%c33, %c0_37] : memref<296x384xf32, #tpu.memory_space<vmem>>, vector<256x384xf32>
    %87 = vector.broadcast %85 : vector<1x384xf32> to vector<256x384xf32>
    %88 = arith.mulf %87, %86 : vector<256x384xf32>
    %89 = arith.addf %84, %88 : vector<256x384xf32>
    %c8 = arith.constant 8 : index
    %c0_38 = arith.constant 0 : index
    %90 = vector.load %arg4[%c8, %c0_38] : memref<9x384xf32, #tpu.memory_space<vmem>>, vector<1x384xf32>
    %c34 = arith.constant 34 : index
    %c0_39 = arith.constant 0 : index
    %91 = vector.load %arg9[%c34, %c0_39] : memref<296x384xf32, #tpu.memory_space<vmem>>, vector<256x384xf32>
    %92 = vector.broadcast %38 : vector<256x1xf32> to vector<256x384xf32>
    %93 = arith.mulf %91, %92 : vector<256x384xf32>
    %94 = vector.broadcast %90 : vector<1x384xf32> to vector<256x384xf32>
    %95 = arith.mulf %94, %93 : vector<256x384xf32>
    %96 = arith.addf %89, %95 : vector<256x384xf32>
    %c0_40 = arith.constant 0 : index
    %c0_41 = arith.constant 0 : index
    %97 = vector.load %arg5[%c0_40, %c0_41] : memref<1x384xf32, #tpu.memory_space<vmem>>, vector<1x384xf32>
    %98 = vector.broadcast %97 : vector<1x384xf32> to vector<256x384xf32>
    %99 = arith.addf %96, %98 : vector<256x384xf32>
    %cst_42 = arith.constant 0.000000e+00 : f32
    %cst_43 = arith.constant 6.000000e+00 : f32
    %100 = vector.broadcast %cst_42 : f32 to vector<256x384xf32>
    %101 = arith.maximumf %100, %99 : vector<256x384xf32>
    %102 = vector.broadcast %cst_43 : f32 to vector<256x384xf32>
    %103 = arith.minimumf %102, %101 : vector<256x384xf32>
    %c0_44 = arith.constant 0 : index
    %c0_45 = arith.constant 0 : index
    %104 = vector.load %arg6[%c0_44, %c0_45] : memref<384x64xf32, #tpu.memory_space<vmem>>, vector<384x64xf32>
    %cst_46 = arith.constant dense<0.000000e+00> : vector<256x64xf32>
    %105 = tpu.matmul %103, %104, %cst_46 {dimension_numbers = #tpu.dot_dimension_numbers<[1], [0], [0], [1], [0, 0, 1, 1], [], []>} : vector<256x384xf32>, vector<384x64xf32>, vector<256x64xf32> -> vector<256x64xf32>
    %c0_47 = arith.constant 0 : index
    %c0_48 = arith.constant 0 : index
    %106 = vector.load %arg7[%c0_47, %c0_48] : memref<1x64xf32, #tpu.memory_space<vmem>>, vector<1x64xf32>
    %107 = vector.broadcast %106 : vector<1x64xf32> to vector<256x64xf32>
    %108 = arith.addf %105, %107 : vector<256x64xf32>
    %109 = arith.addf %108, %1 : vector<256x64xf32>
    %c0_49 = arith.constant 0 : index
    %c0_50 = arith.constant 0 : index
    %c0_51 = arith.constant 0 : index
    %110 = vector.load %arg8[%c0_49, %c0_50, %c0_51] : memref<1x256x64xf32, #tpu.memory_space<vmem>>, vector<1x256x64xf32>
    %111 = vector.shape_cast %110 : vector<1x256x64xf32> to vector<256x64xf32>
    %112 = vector.shape_cast %109 : vector<256x64xf32> to vector<1x256x64xf32>
    tpu.vector_store %arg8[%c0_49, %c0_50, %c0_51], %112 {strides = array<i32>} : memref<1x256x64xf32, #tpu.memory_space<vmem>>, vector<1x256x64xf32>,
    return
  }
  func.func @transform_0(%arg0: i32) -> (i32, i32, i32) {
    %c0_i32 = arith.constant 0 : i32
    %c0_i32_0 = arith.constant 0 : i32
    %c0_i32_1 = arith.constant 0 : i32
    return %arg0, %c0_i32, %c0_i32_0 : i32, i32, i32
  }
  func.func @transform_1(%arg0: i32) -> (i32, i32) {
    %c0_i32 = arith.constant 0 : i32
    %c0_i32_0 = arith.constant 0 : i32
    %c0_i32_1 = arith.constant 0 : i32
    return %c0_i32, %c0_i32_0 : i32, i32
  }
  func.func @transform_2(%arg0: i32) -> (i32, i32) {
    %c0_i32 = arith.constant 0 : i32
    %c0_i32_0 = arith.constant 0 : i32
    %c0_i32_1 = arith.constant 0 : i32
    return %c0_i32, %c0_i32_0 : i32, i32
  }
  func.func @transform_3(%arg0: i32) -> (i32, i32) {
    %c0_i32 = arith.constant 0 : i32
    %c0_i32_0 = arith.constant 0 : i32
    %c0_i32_1 = arith.constant 0 : i32
    return %c0_i32, %c0_i32_0 : i32, i32
  }
  func.func @transform_4(%arg0: i32) -> (i32, i32) {
    %c0_i32 = arith.constant 0 : i32
    %c0_i32_0 = arith.constant 0 : i32
    %c0_i32_1 = arith.constant 0 : i32
    return %c0_i32, %c0_i32_0 : i32, i32
  }
  func.func @transform_5(%arg0: i32) -> (i32, i32) {
    %c0_i32 = arith.constant 0 : i32
    %c0_i32_0 = arith.constant 0 : i32
    %c0_i32_1 = arith.constant 0 : i32
    return %c0_i32, %c0_i32_0 : i32, i32
  }
  func.func @transform_6(%arg0: i32) -> (i32, i32) {
    %c0_i32 = arith.constant 0 : i32
    %c0_i32_0 = arith.constant 0 : i32
    %c0_i32_1 = arith.constant 0 : i32
    return %c0_i32, %c0_i32_0 : i32, i32
  }
  func.func @transform_7(%arg0: i32) -> (i32, i32, i32) {
    %c0_i32 = arith.constant 0 : i32
    %c0_i32_0 = arith.constant 0 : i32
    %c0_i32_1 = arith.constant 0 : i32
    return %arg0, %c0_i32, %c0_i32_0 : i32, i32, i32
  }
}

</mosaic_0001>

<bundles_post_ra>
// kernel: tpu_custom_call.1
= control target key start
LH: loop header
LB: loop body
LE: loop exit
PB: predicated region body
PF: predicated region fallthrough
CT: control target
= control target key end

     0   :  { %s8987_s24 = smov 0   ;;  %s17815_s0 = inlined_call_operand.vmem [shape: f32[2,256,64], index: 0, kind: input, shape index: {}]   ;;  %s17816_s1 = inlined_call_operand.vmem [shape: f32[64,384], index: 1, kind: input, shape index: {}]   ;;  %s17817_s2 = inlined_call_operand.vmem [shape: f32[1,384], index: 2, kind: input, shape index: {}]   ;;  %s17818_s3 = inlined_call_operand.vmem [shape: f32[9,384], index: 3, kind: input, shape index: {}]   ;;  %s17819_s4 = inlined_call_operand.vmem [shape: f32[1,384], index: 4, kind: input, shape index: {}]   ;;  %s17820_s5 = inlined_call_operand.vmem [shape: f32[384,64], index: 5, kind: input, shape index: {}]   ;;  %s17821_s6 = inlined_call_operand.vmem [shape: f32[1,64], index: 6, kind: input, shape index: {}]   ;;  %s17822_s7 = inlined_call_operand.vmem [shape: f32[2,256,64], index: 7, kind: output, shape index: {}]  }
   0x1 LB: > { %s8456_s25 = sadd.s32 4294967295, %s8943_s24   ;;  %p8460_p0 = scmp.ge.s32.totalorder %s8943_s24, 1  ;;  %s8943_s24 = sphi %s8987_s24, %s17_s24  }
   0x2   : > { %p237_p1 = scmp.lt.s32.totalorder %s8943_s24, 3 }
   0x4   : > { %p238_p2 = pnand %p8460_p0, %p237_p1 }
   0x6   : > { %241 = sbr.rel (%p238_p2) target bundleno = 1637 (0x665), region = 48 }
   0xb   : > { %v333_v0 = vld [vmem:[%s17816_s1 + $0xb0] sm:$0xff]  ;;  %v332_v1 = vld [vmem:[%s17816_s1 + $0xa8] sm:$0xff]  ;;  %v330_v2 = vld [vmem:[%s17816_s1 + $0x98] sm:$0xff]  ;;  %p9006_p3 = scmp.lt.s32.totalorder %s8456_s25, 1  ;;  %v17829_v5 = vmov 0.0   ;;  %vm352_vm0 = vcmask 523264  }
   0xc   : > { %465 = vmatprep.subr.mxu0 %v333_v0  ;;  %v334_v3 = vld [vmem:[%s17816_s1 + $0xb8] sm:$0xff]  ;;  %v329_v4 = vld [vmem:[%s17816_s1 + $0x90] sm:$0xff]  ;;  %513 = vmatprep.mubr.f32.mxu0 %v17829_v5  ;;  %1123 = vst [vmem:[#allocation2 + $0x2b0] sm:$0xff] %v17829_v5  ;;  %1124 = vst [vmem:[#allocation2 + $0xd0] sm:$0xff] %v17829_v5  ;;  %vm3378_vm2 = vcmask 1041408   ;;  %vm2950_vm4 = vcmask 1046528  }
   0xd   : > { %1125 = vst [vmem:[#allocation2 + $0x10] sm:$0xff] %v17829_v5  ;;  %1129 = vst [vmem:[#allocation2 + $0x40] sm:$0xff] %v17829_v5  ;;  %466 = vmatpush1.msra.mxu0 %v332_v1  ;;  %8662 = vmatprep.subr.mxu1 %v334_v3  ;;  %v327_v6 = vld [vmem:[%s17816_s1 + $0x80] sm:$0xff]  ;;  %v326_v8 = vld [vmem:[%s17816_s1 + $0x78] sm:$0xff]  ;;  %s21039_s25 = smov (!%p9006_p3, %s8456_s25), 1  ;;  %vm3788_vm5 = vcmask 1045504  }
   0xe   : > { %1130 = vst [vmem:[#allocation2 + $0x100] sm:$0xff] %v17829_v5  ;;  %1131 = vst [vmem:[#allocation2 + $0x108] sm:$0xff] %v17829_v5  ;;  %v331_v7 = vld [vmem:[%s17816_s1 + $0xa0] sm:$0xff]  ;;  %467 = vmatprep.subr.mxu0 %v330_v2  ;;  %8663 = vmatpush3.msra.mxu1 %v334_v3  ;;  %v328_v9 = vld [vmem:[%s17816_s1 + $0x88] sm:$0xff]  ;;  %s8572_s15 = sshll.u32 %s21039_s25, 8  ;;  %vm1330_vm7 = vcmask 1040384  }
   0xf   : > { %1225 = vst [vmem:[#allocation2 + $0x248] sm:$0xff] %v17829_v5  ;;  %1226 = vst [vmem:[#allocation2 + $0x188] sm:$0xff] %v17829_v5  ;;  %468 = vmatpush1.msra.mxu0 %v329_v4  ;;  %8664 = vmatprep.subr.mxu1 %v331_v7  ;;  %v324_v10 = vld [vmem:[%s17816_s1 + $0x68] sm:$0xff]  ;;  %v323_v11 = vld [vmem:[%s17816_s1 + $0x60] sm:$0xff]  ;;  %s9089_s30 = scalar_lea.vmem %s17815_s0, %s8572_s15  ;;  %s17622_s23 = scalar_lea.vmem %s17822_s7, %s8572_s15 }
  0x10   : > { %1227 = vst [vmem:[#allocation2 + $0x218] sm:$0xff] %v17829_v5  ;;  %1231 = vst [vmem:[#allocation2 + $0x298] sm:$0xff] %v17829_v5  ;;  %469 = vmatprep.subr.mxu0 %v327_v6  ;;  %8665 = vmatpush3.msra.mxu1 %v331_v7  ;;  %v325_v12 = vld [vmem:[%s17816_s1 + $0x70] sm:$0xff]  ;;  %v320_v14 = vld [vmem:[%s17816_s1 + $0x48] sm:$0xff] }
  0x11   : > { %1232 = vst [vmem:[#allocation2 + $0x1a8] sm:$0xff] %v17829_v5  ;;  %1233 = vst [vmem:[#allocation2 + $0x148] sm:$0xff] %v17829_v5  ;;  %470 = vmatpush1.msra.mxu0 %v326_v8  ;;  %8666 = vmatprep.subr.mxu1 %v328_v9  ;;  %v321_v13 = vld [vmem:[%s17816_s1 + $0x50] sm:$0xff]  ;;  %v322_v15 = vld [vmem:[%s17816_s1 + $0x58] sm:$0xff] }
  0x12   : > { %471 = vmatprep.subr.mxu0 %v324_v10  ;;  %8667 = vmatpush3.msra.mxu1 %v328_v9  ;;  %v318_v16 = vld [vmem:[%s17816_s1 + $0x38] sm:$0xff]  ;;  %v317_v17 = vld [vmem:[%s17816_s1 + $0x30] sm:$0xff]  ;;  %v319_v18 = vld [vmem:[%s17816_s1 + $0x40] sm:$0xff] }
  0x13   : > { %472 = vmatpush1.msra.mxu0 %v323_v11  ;;  %8668 = vmatprep.subr.mxu1 %v325_v12  ;;  %v315_v19 = vld [vmem:[%s17816_s1 + $0x20] sm:$0xff]  ;;  %v314_v20 = vld [vmem:[%s17816_s1 + $0x18] sm:$0xff]  ;;  %v316_v21 = vld [vmem:[%s17816_s1 + $0x28] sm:$0xff] }
  0x14   : > { %473 = vmatprep.subr.mxu0 %v321_v13  ;;  %8669 = vmatpush3.msra.mxu1 %v325_v12  ;;  %v312_v22 = vld [vmem:[%s17816_s1 + $0x8] sm:$0xff]  ;;  %v311_v23 = vld [vmem:[%s17816_s1] sm:$0xff]  ;;  %v313_v24 = vld [vmem:[%s17816_s1 + $0x10] sm:$0xff] }
  0x15   : > { %474 = vmatpush1.msra.mxu0 %v320_v14  ;;  %8670 = vmatprep.subr.mxu1 %v322_v15  ;;  %v279_v25 = vld [vmem:[%s9089_s30] sm:$0xff]  ;;  %v280_v26 = vld [vmem:[%s9089_s30 + $0x8] sm:$0xff]  ;;  %v281_v27 = vld [vmem:[%s9089_s30 + $0x10] sm:$0xff] }
  0x16   : > { %475 = vmatprep.subr.mxu0 %v318_v16  ;;  %8671 = vmatpush3.msra.mxu1 %v322_v15  ;;  %v7879_v28 = vld [vmem:[%s17820_s5 + $0x178] sm:$0xff]  ;;  %v283_v31 = vld [vmem:[%s9089_s30 + $0x20] sm:$0xff]  ;;  %v7846_v32 = vld [vmem:[%s17820_s5 + $0x70] sm:$0xff] }
  0x17   : > { %476 = vmatpush1.msra.mxu0 %v317_v17  ;;  %8672 = vmatprep.subr.mxu1 %v319_v18  ;;  %v7847_v29 = vld [vmem:[%s17820_s5 + $0x78] sm:$0xff]  ;;  %v7845_v33 = vld [vmem:[%s17820_s5 + $0x68] sm:$0xff]  ;;  %v285_v35 = vld [vmem:[%s9089_s30 + $0x30] sm:$0xff] }
  0x18   : > { %477 = vmatprep.subr.mxu0 %v315_v19  ;;  %8673 = vmatpush3.msra.mxu1 %v319_v18  ;;  %v282_v30 = vld [vmem:[%s9089_s30 + $0x18] sm:$0xff]  ;;  %v284_v34 = vld [vmem:[%s9089_s30 + $0x28] sm:$0xff]  ;;  %v7844_v36 = vld [vmem:[%s17820_s5 + $0x60] sm:$0xff] }
  0x19   : > { %478 = vmatpush1.msra.mxu0 %v314_v20  ;;  %8674 = vmatprep.subr.mxu1 %v316_v21  ;;  %v7878_v37 = vld [vmem:[%s17820_s5 + $0x170] sm:$0xff]  ;;  %v286_v38 = vld [vmem:[%s9089_s30 + $0x38] sm:$0xff]  ;;  %v287_v39 = vld [vmem:[%s9089_s30 + $0x40] sm:$0xff] }
  0x1a   : > { %479 = vmatprep.subr.mxu0 %v312_v22  ;;  %8675 = vmatpush3.msra.mxu1 %v316_v21  ;;  %v7843_v40 = vld [vmem:[%s17820_s5 + $0x58] sm:$0xff]  ;;  %v7842_v41 = vld [vmem:[%s17820_s5 + $0x50] sm:$0xff]  ;;  %v288_v42 = vld [vmem:[%s9089_s30 + $0x48] sm:$0xff] }
  0x1b   : > { %480 = vmatpush1.msra.mxu0 %v311_v23  ;;  %8676 = vmatprep.subr.mxu1 %v313_v24  ;;  %v289_v43 = vld [vmem:[%s9089_s30 + $0x50] sm:$0xff]  ;;  %v7841_v44 = vld [vmem:[%s17820_s5 + $0x48] sm:$0xff]  ;;  %v7840_v45 = vld [vmem:[%s17820_s5 + $0x40] sm:$0xff] }
  0x1c   : > { %8465 = vmatmul.mubr.msk.f32.vlgmr.msra.gmra.mxu0 %vm352_vm0, %v279_v25  ;;  %8677 = vmatpush3.msra.mxu1 %v313_v24  ;;  %v290_v46 = vld [vmem:[%s9089_s30 + $0x58] sm:$0xff]  ;;  %v291_v47 = vld [vmem:[%s9089_s30 + $0x60] sm:$0xff]  ;;  %v7877_v48 = vld [vmem:[%s17820_s5 + $0x168] sm:$0xff] }
  0x1d   : > { %8678 = vmatprep.mubr.msk.f32.mxu1 %vm352_vm0, %v279_v25  ;;  %519 = vmatprep.mubr.f32.mxu0 %v17829_v5  ;;  %v292_v49 = vld [vmem:[%s9089_s30 + $0x68] sm:$0xff]  ;;  %v293_v50 = vld [vmem:[%s9089_s30 + $0x70] sm:$0xff]  ;;  %v294_v51 = vld [vmem:[%s9089_s30 + $0x78] sm:$0xff] }
  0x1e   : > { %8679 = vmatmul.mubr.msk.f32.vlgmr.msra.gmra.mxu1 %vm352_vm0, %v280_v26  ;;  %7887 = vmatprep.subr.mxu1 %v17829_v5  ;;  %v295_v52 = vld [vmem:[%s9089_s30 + $0x80] sm:$0xff]  ;;  %v296_v53 = vld [vmem:[%s9089_s30 + $0x88] sm:$0xff]  ;;  %v297_v54 = vld [vmem:[%s9089_s30 + $0x90] sm:$0xff] }
  0x1f   : > { %8681 = vmatprep.mubr.msk.f32.mxu1 %vm352_vm0, %v281_v27  ;;  %8726 = vmatprep.subr.mxu0 %v7879_v28  ;;  %v9199_v55 = vld [vmem:[%s9089_s30 + $0x98] sm:$0xff]  ;;  %v9203_v56 = vld [vmem:[%s9089_s30 + $0xa0] sm:$0xff]  ;;  %v9211_v57 = vld [vmem:[%s9089_s30 + $0xa8] sm:$0xff] }
  0x20   : > { %8466 = vmatmul.mubr.msk.f32.gmra.mxu0 %vm352_vm0, %v280_v26  ;;  %7888 = vmatpush1.msra.mxu1 %v7847_v29  ;;  %v9215_v58 = vld [vmem:[%s9089_s30 + $0xb0] sm:$0xff]  ;;  %v9223_v59 = vld [vmem:[%s9089_s30 + $0xb8] sm:$0xff]  ;;  %v9227_v60 = vld [vmem:[%s9089_s30 + $0xc0] sm:$0xff] }
  0x21   : > { %525 = vmatprep.mubr.f32.mxu0 %v17829_v5  ;;  %8727 = vmatpush3.msra.mxu0 %v7879_v28  ;;  %v9235_v61 = vld [vmem:[%s9089_s30 + $0xc8] sm:$0xff]  ;;  %v9239_v62 = vld [vmem:[%s9089_s30 + $0xd0] sm:$0xff]  ;;  %v9247_v63 = vld [vmem:[%s9089_s30 + $0xd8] sm:$0xff] }
  0x22   : > { %8682 = vmatmul.mubr.msk.f32.gmra.mxu1 %vm352_vm0, %v282_v30  ;;  %7889 = vmatprep.subr.mxu1 %v17829_v5  ;;  %v9251_v0 = vld [vmem:[%s9089_s30 + $0xe0] sm:$0xff]  ;;  %v9259_v1 = vld [vmem:[%s9089_s30 + $0xe8] sm:$0xff]  ;;  %v9263_v2 = vld [vmem:[%s9089_s30 + $0xf0] sm:$0xff] }
  0x23   : > { %8684 = vmatprep.mubr.msk.f32.mxu1 %vm352_vm0, %v283_v31  ;;  %7890 = vmatpush1.msra.mxu1 %v7846_v32  ;;  %v9271_v3 = vld [vmem:[%s9089_s30 + $0xf8] sm:$0xff]  ;;  %v7838_v6 = vld [vmem:[%s17820_s5 + $0x30] sm:$0xff]  ;;  %v7837_v7 = vld [vmem:[%s17820_s5 + $0x28] sm:$0xff] }
  0x24   : > { %8467 = vmatmul.mubr.msk.f32.gmra.mxu0 %vm352_vm0, %v281_v27  ;;  %7891 = vmatprep.subr.mxu1 %v17829_v5  ;;  %v7839_v4 = vld [vmem:[%s17820_s5 + $0x38] sm:$0xff]  ;;  %v7836_v8 = vld [vmem:[%s17820_s5 + $0x20] sm:$0xff]  ;;  %v7834_v10 = vld [vmem:[%s17820_s5 + $0x10] sm:$0xff] }
  0x25   : > { %531 = vmatprep.mubr.f32.mxu0 %v17829_v5  ;;  %7892 = vmatpush1.msra.mxu1 %v7845_v33  ;;  %v7835_v9 = vld [vmem:[%s17820_s5 + $0x18] sm:$0xff]  ;;  %v7833_v11 = vld [vmem:[%s17820_s5 + $0x8] sm:$0xff]  ;;  %v7832_v12 = vld [vmem:[%s17820_s5] sm:$0xff] }
  0x26   : > { %8685 = vmatmul.mubr.msk.f32.gmra.mxu1 %vm352_vm0, %v284_v34  ;;  %7893 = vmatprep.subr.mxu1 %v17829_v5  ;;  %v7863_v13 = vld [vmem:[%s17820_s5 + $0xf8] sm:$0xff]  ;;  %v7876_v14 = vld [vmem:[%s17820_s5 + $0x160] sm:$0xff]  ;;  %v7862_v15 = vld [vmem:[%s17820_s5 + $0xf0] sm:$0xff] }
  0x27   : > { %8687 = vmatprep.mubr.msk.f32.mxu1 %vm352_vm0, %v285_v35  ;;  %7894 = vmatpush1.msra.mxu1 %v7844_v36  ;;  %v7861_v16 = vld [vmem:[%s17820_s5 + $0xe8] sm:$0xff]  ;;  %v7860_v17 = vld [vmem:[%s17820_s5 + $0xe0] sm:$0xff]  ;;  %v7875_v18 = vld [vmem:[%s17820_s5 + $0x158] sm:$0xff] }
  0x28   : > { %8468 = vmatmul.mubr.msk.f32.gmra.mxu0 %vm352_vm0, %v282_v30  ;;  %7895 = vmatprep.subr.mxu1 %v17829_v5  ;;  %v7859_v19 = vld [vmem:[%s17820_s5 + $0xd8] sm:$0xff]  ;;  %v7874_v20 = vld [vmem:[%s17820_s5 + $0x150] sm:$0xff]  ;;  %v7857_v22 = vld [vmem:[%s17820_s5 + $0xc8] sm:$0xff] }
  0x29   : > { %537 = vmatprep.mubr.f32.mxu0 %v17829_v5  ;;  %8728 = vmatprep.subr.mxu0 %v7878_v37  ;;  %v7858_v21 = vld [vmem:[%s17820_s5 + $0xd0] sm:$0xff]  ;;  %v7873_v23 = vld [vmem:[%s17820_s5 + $0x148] sm:$0xff]  ;;  %v7856_v24 = vld [vmem:[%s17820_s5 + $0xc0] sm:$0xff] }
  0x2a   : > { %8688 = vmatmul.mubr.msk.f32.gmra.mxu1 %vm352_vm0, %v286_v38  ;;  %8729 = vmatpush3.msra.mxu0 %v7878_v37  ;;  %v7872_v25 = vld [vmem:[%s17820_s5 + $0x140] sm:$0xff]  ;;  %v7855_v26 = vld [vmem:[%s17820_s5 + $0xb8] sm:$0xff]  ;;  %v7854_v28 = vld [vmem:[%s17820_s5 + $0xb0] sm:$0xff] }
  0x2b   : > { %8690 = vmatprep.mubr.msk.f32.mxu1 %vm352_vm0, %v287_v39  ;;  %7896 = vmatpush1.msra.mxu1 %v7843_v40  ;;  %v7871_v27 = vld [vmem:[%s17820_s5 + $0x138] sm:$0xff]  ;;  %v7870_v29 = vld [vmem:[%s17820_s5 + $0x130] sm:$0xff]  ;;  %v7853_v30 = vld [vmem:[%s17820_s5 + $0xa8] sm:$0xff] }
  0x2c   : > { %8469 = vmatmul.mubr.msk.f32.gmra.mxu0 %vm352_vm0, %v283_v31  ;;  %7897 = vmatprep.subr.mxu1 %v17829_v5  ;;  %v7869_v31 = vld [vmem:[%s17820_s5 + $0x128] sm:$0xff]  ;;  %v7852_v32 = vld [vmem:[%s17820_s5 + $0xa0] sm:$0xff]  ;;  %v7850_v36 = vld [vmem:[%s17820_s5 + $0x90] sm:$0xff] }
  0x2d   : > { %543 = vmatprep.mubr.f32.mxu0 %v17829_v5  ;;  %7898 = vmatpush1.msra.mxu1 %v7842_v41  ;;  %v7868_v33 = vld [vmem:[%s17820_s5 + $0x120] sm:$0xff]  ;;  %v7866_v37 = vld [vmem:[%s17820_s5 + $0x110] sm:$0xff] }
  0x2e   : > { %8691 = vmatmul.mubr.msk.f32.gmra.mxu1 %vm352_vm0, %v288_v42  ;;  %7899 = vmatprep.subr.mxu1 %v17829_v5  ;;  %v7848_v40 = vld [vmem:[%s17820_s5 + $0x80] sm:$0xff] }
  0x2f   : > { %8693 = vmatprep.mubr.msk.f32.mxu1 %vm352_vm0, %v289_v43  ;;  %7900 = vmatpush1.msra.mxu1 %v7841_v44  ;;  %v7864_v41 = vld [vmem:[%s17820_s5 + $0x100] sm:$0xff] }
  0x30   : > { %8470 = vmatmul.mubr.msk.f32.gmra.mxu0 %vm352_vm0, %v284_v34  ;;  %7901 = vmatprep.subr.mxu1 %v17829_v5  ;;  %v7851_v34 = vld [vmem:[%s17820_s5 + $0x98] sm:$0xff] }
  0x31   : > { %549 = vmatprep.mubr.f32.mxu0 %v17829_v5  ;;  %7902 = vmatpush1.msra.mxu1 %v7840_v45 }
  0x32   : > { %8694 = vmatmul.mubr.msk.f32.gmra.mxu1 %vm352_vm0, %v290_v46  ;;  %7903 = vmatprep.subr.mxu1 %v17829_v5 }
  0x33   : > { %8696 = vmatprep.mubr.msk.f32.mxu1 %vm352_vm0, %v291_v47  ;;  %8730 = vmatprep.subr.mxu0 %v7877_v48 }
  0x34   : > { %8471 = vmatmul.mubr.msk.f32.gmra.mxu0 %vm352_vm0, %v285_v35  ;;  %7904 = vmatpush1.msra.mxu1 %v7839_v4  ;;  %v7867_v35 = vld [vmem:[%s17820_s5 + $0x118] sm:$0xff] }
  0x35   : > { %555 = vmatprep.mubr.f32.mxu0 %v17829_v5  ;;  %8731 = vmatpush3.msra.mxu0 %v7877_v48 }
  0x36   : > { %8697 = vmatmul.mubr.msk.f32.gmra.mxu1 %vm352_vm0, %v292_v49  ;;  %7905 = vmatprep.subr.mxu1 %v17829_v5 }
  0x37   : > { %8699 = vmatprep.mubr.msk.f32.mxu1 %vm352_vm0, %v293_v50  ;;  %7906 = vmatpush1.msra.mxu1 %v7838_v6 }
  0x38   : > { %8472 = vmatmul.mubr.msk.f32.gmra.mxu0 %vm352_vm0, %v286_v38  ;;  %7907 = vmatprep.subr.mxu1 %v17829_v5  ;;  %v7849_v38 = vld [vmem:[%s17820_s5 + $0x88] sm:$0xff] }
  0x39   : > { %561 = vmatprep.mubr.f32.mxu0 %v17829_v5  ;;  %7908 = vmatpush1.msra.mxu1 %v7837_v7  ;;  %v3340_v7 = vld [vmem:[#allocation2 + $0x2b0] sm:$0xfc] }
  0x3a   : > { %8700 = vmatmul.mubr.msk.f32.gmra.mxu1 %vm352_vm0, %v294_v51  ;;  %7909 = vmatprep.subr.mxu1 %v17829_v5 }
  0x3b   : > { %8702 = vmatprep.mubr.msk.f32.mxu1 %vm352_vm0, %v295_v52  ;;  %7910 = vmatpush1.msra.mxu1 %v7836_v8 }
  0x3c   : > { %8473 = vmatmul.mubr.msk.f32.gmra.mxu0 %vm352_vm0, %v287_v39  ;;  %7911 = vmatprep.subr.mxu1 %v17829_v5  ;;  %v7865_v39 = vld [vmem:[%s17820_s5 + $0x108] sm:$0xff] }
  0x3d   : > { %567 = vmatprep.mubr.f32.mxu0 %v17829_v5  ;;  %7912 = vmatpush1.msra.mxu1 %v7835_v9 }
  0x3e   : > { %8703 = vmatmul.mubr.msk.f32.gmra.mxu1 %vm352_vm0, %v296_v53  ;;  %7913 = vmatprep.subr.mxu1 %v17829_v5 }
  0x3f   : > { %8705 = vmatprep.mubr.msk.f32.mxu1 %vm352_vm0, %v297_v54  ;;  %7914 = vmatpush1.msra.mxu1 %v7834_v10 }
  0x40   : > { %8474 = vmatmul.mubr.msk.f32.gmra.mxu0 %vm352_vm0, %v288_v42  ;;  %7915 = vmatprep.subr.mxu1 %v17829_v5  ;;  %v337_v42 = vlaneseq }
  0x41   : > { %573 = vmatprep.mubr.f32.mxu0 %v17829_v5  ;;  %7916 = vmatpush1.msra.mxu1 %v7833_v11 }
  0x42   : > { %8706 = vmatmul.mubr.msk.f32.gmra.mxu1 %vm352_vm0, %v9199_v55  ;;  %7917 = vmatprep.subr.mxu1 %v17829_v5 }
  0x43   : > { %8708 = vmatprep.mubr.msk.f32.mxu1 %vm352_vm0, %v9203_v56  ;;  %7918 = vmatpush1.msra.mxu1 %v7832_v12 }
  0x44   : > { %8475 = vmatmul.mubr.msk.f32.gmra.mxu0 %vm352_vm0, %v289_v43  ;;  %7919 = vmatprep.subr.mxu1 %v17829_v5  ;;  %v9455_v43 = vshrl.u32 %v337_v42, 7 }
  0x45   : > { %579 = vmatprep.mubr.f32.mxu0 %v17829_v5  ;;  %7920 = vmatpush2.msra.mxu1 %v7863_v13 }
  0x46   : > { %8709 = vmatmul.mubr.msk.f32.gmra.mxu1 %vm352_vm0, %v9211_v57  ;;  %8732 = vmatprep.subr.mxu0 %v7876_v14  ;;  %19134 = vst [vmem:[#allocation3_spill] sm:$0xff] %v9455_v43  ;;  %v1720_v44 = vadd.s32 8, %v9455_v43  ;;  %v1755_v48 = vand.u32 15, %v9455_v43 }
  0x47   : > { %8711 = vmatprep.mubr.msk.f32.mxu1 %vm352_vm0, %v9215_v58  ;;  %7921 = vmatprep.subr.mxu1 %v17829_v5 }
  0x48   : > { %8476 = vmatmul.mubr.msk.f32.gmra.mxu0 %vm352_vm0, %v290_v46  ;;  %7922 = vmatpush2.msra.mxu1 %v7862_v15  ;;  %v1762_v45 = vand.u32 15, %v1720_v44  ;;  %vm2135_vm3 = vcmp.gt.s32.totalorder %v1755_v48, 0  ;;  %v3342_v15 = vld [vmem:[#allocation2 + $0x10] sm:$0xfc] }
  0x49   : > { %585 = vmatprep.mubr.f32.mxu0 %v17829_v5  ;;  %8733 = vmatpush3.msra.mxu0 %v7876_v14  ;;  %v2732_v14 = vld [vmem:[#allocation2 + $0x10] sm:$0xfe] }
  0x4a   : > { %8712 = vmatmul.mubr.msk.f32.gmra.mxu1 %vm352_vm0, %v9223_v59  ;;  %7923 = vmatprep.subr.mxu1 %v17829_v5  ;;  %vm2232_vm1 = vcmp.lt.s32.totalorder %v1762_v45, 15  ;;  %v8563_v44 = vld [vmem:[%s17818_s3 + $0x3] ss:$8 sm:$0x7] }
  0x4b   : > { %8714 = vmatprep.mubr.msk.f32.mxu1 %vm352_vm0, %v9227_v60  ;;  %7924 = vmatpush2.msra.mxu1 %v7861_v16  ;;  %v9459_v46 = vsel %vm2232_vm1, 1.0, %v17829_v5 }
  0x4c   : > { %8477 = vmatmul.mubr.msk.f32.gmra.mxu0 %vm352_vm0, %v291_v47  ;;  %7925 = vmatprep.subr.mxu1 %v17829_v5  ;;  %v9462_v47 = vsub.s32 1, %v9455_v43 }
  0x4d   : > { %591 = vmatprep.mubr.f32.mxu0 %v17829_v5  ;;  %7926 = vmatpush2.msra.mxu1 %v7860_v17 }
  0x4e   : > { %8715 = vmatmul.mubr.msk.f32.gmra.mxu1 %vm352_vm0, %v9235_v61  ;;  %7927 = vmatprep.subr.mxu1 %v17829_v5 }
  0x4f   : > { %8717 = vmatprep.mubr.msk.f32.mxu1 %vm352_vm0, %v9239_v62  ;;  %8734 = vmatprep.subr.mxu0 %v7875_v18 }
  0x50   : > { %8478 = vmatmul.mubr.msk.f32.gmra.mxu0 %vm352_vm0, %v292_v49  ;;  %7928 = vmatpush2.msra.mxu1 %v7859_v19  ;;  %v8561_v49 = vld [vmem:[%s17818_s3 + $0x1] ss:$8 sm:$0x7] }
  0x51   : > { %597 = vmatprep.mubr.f32.mxu0 %v17829_v5  ;;  %8735 = vmatpush3.msra.mxu0 %v7875_v18 }
  0x52   : > { %8718 = vmatmul.mubr.msk.f32.gmra.mxu1 %vm352_vm0, %v9247_v63  ;;  %8736 = vmatprep.subr.mxu0 %v7874_v20 }
  0x53   : > { %8720 = vmatprep.mubr.msk.f32.mxu1 %vm352_vm0, %v9251_v0  ;;  %7929 = vmatprep.subr.mxu1 %v17829_v5 }
  0x54   : > { %8479 = vmatmul.mubr.msk.f32.gmra.mxu0 %vm352_vm0, %v293_v50  ;;  %7930 = vmatpush2.msra.mxu1 %v7858_v21  ;;  %v9469_v50 = vrot.slane %v8561_v49, %v9462_v47 }
  0x55   : > { %603 = vmatprep.mubr.f32.mxu0 %v17829_v5  ;;  %8737 = vmatpush3.msra.mxu0 %v7874_v20 }
  0x56   : > { %8721 = vmatmul.mubr.msk.f32.gmra.mxu1 %vm352_vm0, %v9259_v1  ;;  %7931 = vmatprep.subr.mxu1 %v17829_v5  ;;  %19135 = vst [vmem:[#allocation4_spill] sm:$0xff] %v9469_v50 }
  0x57   : > { %8723 = vmatprep.mubr.msk.f32.mxu1 %vm352_vm0, %v9263_v2  ;;  %8738 = vmatprep.subr.mxu0 %v7873_v23 }
  0x58   : > { %8480 = vmatmul.mubr.msk.f32.gmra.mxu0 %vm352_vm0, %v294_v51  ;;  %7932 = vmatpush2.msra.mxu1 %v7857_v22  ;;  %v8946_v51 = vmov 1.0  }
  0x59   : > { %609 = vmatprep.mubr.f32.mxu0 %v17829_v5  ;;  %8739 = vmatpush3.msra.mxu0 %v7873_v23 }
  0x5a   : > { %8724 = vmatmul.mubr.msk.f32.gmra.mxu1 %vm352_vm0, %v9271_v3  ;;  %7933 = vmatprep.subr.mxu1 %v17829_v5 }
  0x5b   : > { %7934 = vmatpush2.msra.mxu1 %v7856_v24  ;;  %8740 = vmatprep.subr.mxu0 %v7872_v25 }
  0x5c   : > { %8481 = vmatmul.mubr.msk.f32.gmra.mxu0 %vm352_vm0, %v295_v52  ;;  %7935 = vmatprep.subr.mxu1 %v17829_v5  ;;  %v9471_v52 = vrot.slane %v8946_v51, 6 }
  0x5d   : > { %615 = vmatprep.mubr.f32.mxu0 %v17829_v5  ;;  %8741 = vmatpush3.msra.mxu0 %v7872_v25 }
  0x5e   : > { %7936 = vmatpush2.msra.mxu1 %v7855_v26  ;;  %8742 = vmatprep.subr.mxu0 %v7871_v27  ;;  %19136 = vst [vmem:[#allocation5_spill] sm:$0xff] %v9471_v52  ;;  %v3475_v19 = vmul.f32 %v9471_v52, %v3340_v7  ;;  %v3477_v24 = vmul.f32 %v9471_v52, %v3342_v15  ;;  %v1721_v15 = vadd.s32 16, %v9455_v43 }
  0x5f   : > { %7937 = vmatprep.subr.mxu1 %v17829_v5  ;;  %8743 = vmatpush3.msra.mxu0 %v7871_v27 }
  0x60   : > { %8482 = vmatmul.mubr.msk.f32.gmra.mxu0 %vm352_vm0, %v296_v53  ;;  %7938 = vmatpush2.msra.mxu1 %v7854_v28  ;;  %v3380_v53 = vrot.slane %v9459_v46, 6  ;;  %v8567_v46 = vld [vmem:[%s17818_s3 + $0x7] ss:$8 sm:$0x7] }
  0x61   : > { %621 = vmatprep.mubr.f32.mxu0 %v17829_v5  ;;  %8744 = vmatprep.subr.mxu0 %v7870_v29 }
  0x62   : > { %7939 = vmatprep.subr.mxu1 %v17829_v5  ;;  %8745 = vmatpush3.msra.mxu0 %v7870_v29 }
  0x63   : > { %7940 = vmatpush2.msra.mxu1 %v7853_v30  ;;  %8746 = vmatprep.subr.mxu0 %v7869_v31 }
  0x64   : > { %8483 = vmatmul.mubr.msk.f32.gmra.mxu0 %vm352_vm0, %v297_v54  ;;  %7941 = vmatprep.subr.mxu1 %v17829_v5  ;;  %v2731_v54 = vld [vmem:[#allocation2 + $0xd0] sm:$0xfe] }
  0x65   : > { %627 = vmatprep.mubr.f32.mxu0 %v17829_v5  ;;  %8747 = vmatpush3.msra.mxu0 %v7869_v31 }
  0x66   : > { %7942 = vmatpush2.msra.mxu1 %v7852_v32  ;;  %8748 = vmatprep.subr.mxu0 %v7868_v33 }
  0x67   : > { %7943 = vmatprep.subr.mxu1 %v17829_v5  ;;  %8749 = vmatpush3.msra.mxu0 %v7868_v33  ;;  %v1722_v33 = vadd.s32 24, %v9455_v43 }
  0x68   : > { %8484 = vmatmul.mubr.msk.f32.gmra.mxu0 %vm352_vm0, %v9199_v55  ;;  %7944 = vmatpush2.msra.mxu1 %v7851_v34  ;;  %v9475_v55 = vsub.s32 0, %v9455_v43 }
  0x69   : > { %633 = vmatprep.mubr.f32.mxu0 %v17829_v5  ;;  %8750 = vmatprep.subr.mxu0 %v7867_v35  ;;  %v1776_v51 = vand.u32 15, %v1722_v33 }
  0x6a   : > { %7945 = vmatprep.subr.mxu1 %v17829_v5  ;;  %8751 = vmatpush3.msra.mxu0 %v7867_v35  ;;  %v335_v35 = vld [vmem:[%s17817_s2] sm:$0x7] }
  0x6b   : > { %7946 = vmatpush2.msra.mxu1 %v7850_v36  ;;  %8752 = vmatprep.subr.mxu0 %v7866_v37  ;;  %vm2234_vm6 = vcmp.lt.s32.totalorder %v1776_v51, 15  ;;  %v9652_v51 = vrot.slane %v8567_v46, %v9475_v55 }
  0x6c   : > { %8485 = vmatmul.mubr.msk.f32.gmra.mxu0 %vm352_vm0, %v9203_v56  ;;  %7947 = vmatprep.subr.mxu1 %v17829_v5  ;;  %v3341_v56 = vld [vmem:[#allocation2 + $0xd0] sm:$0xfc] }
  0x6d   : > { %639 = vmatprep.mubr.f32.mxu0 %v17829_v5  ;;  %8753 = vmatpush3.msra.mxu0 %v7866_v37  ;;  %19164 = vst [vmem:[#allocation33_spill] sm:$0xff] %v9652_v51 }
  0x6e   : > { %7948 = vmatpush2.msra.mxu1 %v7849_v38  ;;  %8754 = vmatprep.subr.mxu0 %v7865_v39 }
  0x6f   : > { %7949 = vmatprep.subr.mxu1 %v17829_v5  ;;  %8755 = vmatpush3.msra.mxu0 %v7865_v39 }
  0x70   : > { %8486 = vmatmul.mubr.msk.f32.gmra.mxu0 %vm352_vm0, %v9211_v57  ;;  %7950 = vmatpush2.msra.mxu1 %v7848_v40  ;;  %v2327_v57 = vld [vmem:[%s17818_s3] ss:$8 sm:$0x7] }
  0x71   : > { %645 = vmatprep.mubr.f32.mxu0 %v17829_v5  ;;  %8756 = vmatprep.subr.mxu0 %v7864_v41  ;;  %v9507_v4 = vrot.slane %v2327_v57, %v9462_v47  ;;  %v9528_v20 = vrot.slane %v2327_v57, %v9475_v55 }
  0x72   : > { %8757 = vmatpush3.msra.mxu0 %v7864_v41 }
  0x73   : > { %19140 = vst [vmem:[#allocation9_spill] sm:$0xff] %v9507_v4  ;;  %19145 = vst [vmem:[#allocation14_spill] sm:$0xff] %v9528_v20 }
  0x74   : > { %8487 = vmatmul.mubr.msk.f32.gmra.mxu0 %vm352_vm0, %v9215_v58  ;;  %v9481_v58 = vrot.slane %v8561_v49, %v9475_v55 }
  0x75   : > { %651 = vmatprep.mubr.f32.mxu0 %v17829_v5 }
  0x76   : > { %19137 = vst [vmem:[#allocation6_spill] sm:$0xff] %v9481_v58  ;;  %v9524_v18 = vmul.f32 0.0, %v9481_v58 }
  0x78   : > { %8488 = vmatmul.mubr.msk.f32.gmra.mxu0 %vm352_vm0, %v9223_v59  ;;  %v2753_v59 = vmul.f32 %v9469_v50, %v2731_v54  ;;  %19144 = vst [vmem:[#allocation13_spill] sm:$0xff] %v9524_v18  ;;  %v17824_v30 = vrot.slane %v9524_v18, 1  ;;  %v9572_v54 = vrot.slane %v335_v35, %v9475_v55 }
  0x79   : > { %657 = vmatprep.mubr.f32.mxu0 %v17829_v5 }
  0x7a   : > { %v2954_v9 = vrot.slane %v2753_v59, 1  ;;  %19151 = vst [vmem:[#allocation20_spill] sm:$0xff] %v9572_v54  ;;  %v8564_v59 = vld [vmem:[%s17818_s3 + $0x4] ss:$8 sm:$0x7] }
  0x7c   : > { %8489 = vmatmul.mubr.msk.f32.gmra.mxu0 %vm352_vm0, %v9227_v60  ;;  %v8562_v60 = vld [vmem:[%s17818_s3 + $0x2] ss:$8 sm:$0x7] }
  0x7d   : > { %663 = vmatprep.mubr.f32.mxu0 %v17829_v5  ;;  %v9521_v17 = vrot.slane %v8562_v60, %v9475_v55 }
  0x7f   : > { %19143 = vst [vmem:[#allocation12_spill] sm:$0xff] %v9521_v17  ;;  %v3590_v31 = vmul.f32 %v9521_v17, %v3475_v19  ;;  %v9613_v19 = vrot.slane %v8564_v59, %v9462_v47 }
  0x80   : > { %8490 = vmatmul.mubr.msk.f32.gmra.mxu0 %vm352_vm0, %v9235_v61  ;;  %v9491_v61 = vsel %vm3378_vm2, %v9471_v52, %v3380_v53 }
  0x81   : > { %669 = vmatprep.mubr.f32.mxu0 %v17829_v5  ;;  %v3479_v6 = vmul.f32 0.0, %v9491_v61  ;;  %v3789_v48 = vrot.slane %v3590_v31, 2  ;;  %19156 = vst [vmem:[#allocation25_spill] sm:$0xff] %v9613_v19 }
  0x83   : > { %v9546_v32 = vmul.f32 %v9521_v17, %v3479_v6 }
  0x84   : > { %8491 = vmatmul.mubr.msk.f32.gmra.mxu0 %vm352_vm0, %v9239_v62  ;;  %v9494_v62 = vsel %vm2135_vm3, 1.0, %v17829_v5 }
  0x85   : > { %675 = vmatprep.mubr.f32.mxu0 %v17829_v5  ;;  %v2425_v8 = vmul.f32 0.0, %v9494_v62  ;;  %19148 = vst [vmem:[#allocation17_spill] sm:$0xff] %v9546_v32 }
  0x87   : > { %v2537_v21 = vmul.f32 %v9507_v4, %v2425_v8  ;;  %v2536_v42 = vmul.f32 %v9528_v20, %v2425_v8 }
  0x88   : > { %8492 = vmatmul.mubr.msk.f32.gmra.mxu0 %vm352_vm0, %v9247_v63  ;;  %v9497_v63 = vmul.f32 0.0, %v9469_v50 }
  0x89   : > { %681 = vmatprep.mubr.f32.mxu0 %v17829_v5 }
  0x8a   : > { %19138 = vst [vmem:[#allocation7_spill] sm:$0xff] %v9497_v63  ;;  %v17826_v11 = vrot.slane %v9497_v63, 1 }
  0x8c   : > { %8493 = vmatmul.mubr.msk.f32.gmra.mxu0 %vm352_vm0, %v9251_v0  ;;  %v3476_v0 = vmul.f32 %v9471_v52, %v3341_v56  ;;  %v2956_v26 = vsel %vm2950_vm4, %v2954_v9, %v17826_v11  ;;  %v9575_v56 = vrot.slane %v335_v35, %v9462_v47 }
  0x8d   : > { %687 = vmatprep.mubr.f32.mxu0 %v17829_v5  ;;  %v3243_v40 = vadd.f32 %v2956_v26, %v2537_v21 }
  0x8e   : > { %19152 = vst [vmem:[#allocation21_spill] sm:$0xff] %v9575_v56 }
  0x90   : > { %8494 = vmatmul.mubr.msk.f32.gmra.mxu0 %vm352_vm0, %v9259_v1  ;;  %v9501_v1 = vrot.slane %v8562_v60, %v9462_v47 }
  0x91   : > { %693 = vmatprep.mubr.f32.mxu0 %v17829_v5 }
  0x92   : > { %19139 = vst [vmem:[#allocation8_spill] sm:$0xff] %v9501_v1  ;;  %v3591_v12 = vmul.f32 %v9501_v1, %v3476_v0  ;;  %v9517_v13 = vmul.f32 %v9501_v1, %v3479_v6 }
  0x94   : > { %8495 = vmatmul.mubr.msk.f32.gmra.mxu0 %vm352_vm0, %v9263_v2  ;;  %v9504_v2 = vsub.s32 2, %v9455_v43  ;;  %19142 = vst [vmem:[#allocation11_spill] sm:$0xff] %v9517_v13  ;;  %v3792_v27 = vrot.slane %v3591_v12, 2  ;;  %v17825_v28 = vrot.slane %v9517_v13, 2 }
  0x95   : > { %699 = vmatprep.mubr.f32.mxu0 %v17829_v5 }
  0x96   : > { %v9512_v10 = vrot.slane %v8561_v49, %v9504_v2  ;;  %v9537_v25 = vrot.slane %v8562_v60, %v9504_v2  ;;  %v9550_v34 = vrot.slane %v2327_v57, %v9504_v2  ;;  %v3794_v41 = vsel %vm3788_vm5, %v3792_v27, %v17825_v28  ;;  %v8565_v60 = vld [vmem:[%s17818_s3 + $0x5] ss:$8 sm:$0x7]  ;;  %v8568_v27 = vld [vmem:[%s17818_s3 + $0x18] ss:$8 sm:$0x7] }
  0x97   : > { %v17823_v49 = vrot.slane %v9546_v32, 2  ;;  %v9578_v57 = vrot.slane %v335_v35, %v9504_v2  ;;  %v9625_v26 = vrot.slane %v8565_v60, %v9462_v47  ;;  %v9637_v35 = vrot.slane %v8567_v46, %v9462_v47 }
  0x98   : > { %8496 = vmatmul.mubr.msk.f32.gmra.mxu0 %vm352_vm0, %v9271_v3  ;;  %v2730_v3 = vld [vmem:[#allocation2 + $0x2b0] sm:$0xfe]  ;;  %19141 = vst [vmem:[#allocation10_spill] sm:$0xff] %v9512_v10  ;;  %v2754_v22 = vmul.f32 %v9512_v10, %v2732_v14  ;;  %v9533_v23 = vmul.f32 0.0, %v9512_v10  ;;  %19147 = vst [vmem:[#allocation16_spill] sm:$0xff] %v9537_v25  ;;  %v3592_v38 = vmul.f32 %v9537_v25, %v3477_v24 }
  0x99   : > { %v2752_v16 = vmul.f32 %v9481_v58, %v2730_v3  ;;  %19149 = vst [vmem:[#allocation18_spill] sm:$0xff] %v9550_v34  ;;  %v9558_v39 = vmul.f32 %v9537_v25, %v3479_v6  ;;  %19153 = vst [vmem:[#allocation22_spill] sm:$0xff] %v9578_v57  ;;  %v2538_v0 = vmul.f32 %v9550_v34, %v2425_v8  ;;  %v8566_v6 = vld [vmem:[%s17818_s3 + $0x6] ss:$8 sm:$0x7] }
  0x9a   : > { %19146 = vst [vmem:[#allocation15_spill] sm:$0xff] %v9533_v23  ;;  %v2957_v36 = vrot.slane %v2754_v22, 1  ;;  %v17828_v37 = vrot.slane %v9533_v23, 1  ;;  %v9591_v3 = vsel %vm3378_vm2, %v3380_v53, %v9471_v52  ;;  %v3795_v9 = vrot.slane %v3592_v38, 2  ;;  %19159 = vst [vmem:[#allocation28_spill] sm:$0xff] %v9625_v26 }
  0x9b   : > { %v2951_v29 = vrot.slane %v2752_v16, 1  ;;  %19150 = vst [vmem:[#allocation19_spill] sm:$0xff] %v9558_v39  ;;  %v17827_v12 = vrot.slane %v9558_v39, 2  ;;  %v9600_v14 = vadd.f32 %v3794_v41, %v3243_v40  ;;  %v9603_v8 = vrot.slane %v8563_v44, %v9462_v47  ;;  %19162 = vst [vmem:[#allocation31_spill] sm:$0xff] %v9637_v35  ;;  %v7527_v38 = vld [vmem:[%s17819_s4] sm:$0x7] }
  0x9c   : > { %v2959_v7 = vsel %vm2950_vm4, %v2957_v36, %v17828_v37  ;;  %v9610_v16 = vrot.slane %v8564_v59, %v9475_v55  ;;  %v3791_v21 = vsel %vm3788_vm5, %v3789_v48, %v17823_v49  ;;  %v9619_v22 = vrot.slane %v8563_v44, %v9475_v55 }
  0x9d   : > { %v2953_v45 = vsel %vm2950_vm4, %v2951_v29, %v17824_v30  ;;  %19154 = vst [vmem:[#allocation23_spill] sm:$0xff] %v9603_v8  ;;  %v9622_v24 = vrot.slane %v8565_v60, %v9475_v55  ;;  %v3244_v29 = vadd.f32 %v2959_v7, %v2538_v0  ;;  %v9631_v31 = vrot.slane %v8566_v6, %v9475_v55 }
  0x9e   : > { %v3242_v53 = vadd.f32 %v2953_v45, %v2536_v42  ;;  %19155 = vst [vmem:[#allocation24_spill] sm:$0xff] %v9610_v16  ;;  %19157 = vst [vmem:[#allocation26_spill] sm:$0xff] %v9619_v22  ;;  %v9634_v33 = vrot.slane %v8566_v6, %v9462_v47  ;;  %v3797_v36 = vsel %vm3788_vm5, %v3795_v9, %v17827_v12  ;;  %v1769_v42 = vand.u32 15, %v1721_v15 }
  0x9f   : > { %19158 = vst [vmem:[#allocation27_spill] sm:$0xff] %v9622_v24  ;;  %19160 = vst [vmem:[#allocation29_spill] sm:$0xff] %v9631_v31  ;;  %v9646_v40 = vrot.slane %v8564_v59, %v9504_v2  ;;  %v8546_v45 = vsel %vm2234_vm6, 1.0, %v17829_v5  ;;  %v9655_v0 = vrot.slane %v8568_v27, %v9462_v47  ;;  %v9658_v7 = vrot.slane %v8563_v44, %v9504_v2 }
  0xa0   : > { %19161 = vst [vmem:[#allocation30_spill] sm:$0xff] %v9634_v33  ;;  %v9648_v41 = vadd.f32 %v3791_v21, %v3242_v53  ;;  %v9661_v9 = vrot.slane %v8565_v60, %v9504_v2  ;;  %v9665_v53 = vrot.slane %v8568_v27, %v9475_v55  ;;  %v9667_v15 = vadd.f32 %v3797_v36, %v3244_v29 }
  0xa1   : > { %19163 = vst [vmem:[#allocation32_spill] sm:$0xff] %v9646_v40  ;;  %19165 = vst [vmem:[#allocation34_spill] sm:$0xff] %v9655_v0  ;;  %v9670_v21 = vrot.slane %v8567_v46, %v9504_v2  ;;  %v9673_v28 = vrot.slane %v7527_v38, %v9475_v55  ;;  %v9676_v44 = vrot.slane %v7527_v38, %v9462_v47  ;;  %vm2137_vm8 = vcmp.gt.s32.totalorder %v1769_v42, 0 }
  0xa2   : > { %19166 = vst [vmem:[#allocation35_spill] sm:$0xff] %v9658_v7  ;;  %19167 = vst [vmem:[#allocation36_spill] sm:$0xff] %v9661_v9  ;;  %v9679_v60 = vrot.slane %v8566_v6, %v9504_v2  ;;  %v9684_v37 = vrot.slane %v8568_v27, %v9504_v2  ;;  %v9687_v55 = vrot.slane %v7527_v38, %v9504_v2  ;;  %v9690_v47 = vmul.f32 0.0, %v9550_v34 }
  0xa3   : > { %19168 = vst [vmem:[#allocation37_spill] sm:$0xff] %v9665_v53  ;;  %19169 = vst [vmem:[#allocation38_spill] sm:$0xff] %v9670_v21  ;;  %v9693_v6 = vmul.f32 0.0, %v9507_v4  ;;  %v9698_v27 = vmul.f32 0.0, %v9528_v20  ;;  %v19178_v2 = vmov 0.0  }
  0xa4   : > { %19170 = vst [vmem:[#allocation39_spill] sm:$0xff] %v9673_v28  ;;  %19171 = vst [vmem:[#allocation40_spill] sm:$0xff] %v9676_v44  ;;  %v9701_v38 = vsel %vm2137_vm8, 1.0, %v19178_v2 }
  0xa5   : > { %19172 = vst [vmem:[#allocation41_spill] sm:$0xff] %v9679_v60  ;;  %19173 = vst [vmem:[#allocation42_spill] sm:$0xff] %v9684_v37 }
  0xa6   : > { %19174 = vst [vmem:[#allocation43_spill] sm:$0xff] %v9687_v55  ;;  %19175 = vst [vmem:[#allocation44_spill] sm:$0xff] %v9690_v47 }
  0xa7   : > { %19176 = vst [vmem:[#allocation45_spill] sm:$0xff] %v9693_v6  ;;  %19177 = vst [vmem:[#allocation46_spill] sm:$0xff] %v9698_v27 }
  0xa8   : > { %19179 = vst [vmem:[#allocation47_spill] sm:$0xff] %v9701_v38 }
  0xdc   : > { %v515_v48 = vpop.f32.mrf.mxu0 }
  0xdd   : > { %v516_v59 = vadd.f32 %v515_v48, %v9572_v54  ;;  %v3384_v48 = vrot.slane %v8546_v45, 6 }
  0xde   : > { %v517_v49 = vpop.f32.mrf.mxu0  ;;  %v8680_v30 = vpop.f32.mrf.mxu1 }
  0xdf   : > { %v931_v11 = vmax.f32 %v516_v59, 0.0  ;;  %v518_v29 = vadd.f32 %v517_v49, %v9575_v56  ;;  %v778_v36 = vadd.f32 %v8680_v30, %v9578_v57  ;;  %v9705_v34 = vsel %vm3378_vm2, %v9471_v52, %v3384_v48 }
  0xe0   : > { %v521_v46 = vpop.f32.mrf.mxu0  ;;  %v772_v12 = vpop.f32.mrf.mxu1  ;;  %19180 = vst [vmem:[#allocation48_spill] sm:$0xff] %v9705_v34  ;;  %v9711_v20 = vsel %vm3378_vm2, %v3384_v48, %v9471_v52 }
  0xe1   : > { %v1027_v45 = vmin.f32 %v931_v11, 6.0  ;;  %v932_v59 = vmax.f32 %v518_v29, 0.0  ;;  %v936_v49 = vmax.f32 %v778_v36, 0.0  ;;  %v522_v30 = vadd.f32 %v521_v46, %v9572_v54  ;;  %19181 = vst [vmem:[#allocation49_spill] sm:$0xff] %v9711_v20 }
  0xe2   : > { %v773_v42 = vadd.f32 %v772_v12, %v9578_v57  ;;  %v523_v5 = vpop.f32.mrf.mxu0  ;;  %v8683_v43 = vpop.f32.mrf.mxu1 }
  0xe3   : > { %v1331_v4 = vrot.slane %v1027_v45, 7  ;;  %v1028_v11 = vmin.f32 %v932_v59, 6.0  ;;  %v1032_v29 = vmin.f32 %v936_v49, 6.0  ;;  %v934_v36 = vmax.f32 %v522_v30, 0.0 }
  0xe4   : > { %v933_v32 = vmax.f32 %v773_v42, 0.0  ;;  %v524_v46 = vadd.f32 %v523_v5, %v9575_v56  ;;  %v788_v12 = vadd.f32 %v8683_v43, %v9578_v57  ;;  %v527_v17 = vpop.f32.mrf.mxu0  ;;  %v782_v18 = vpop.f32.mrf.mxu1 }
  0xe5   : > { %1619 = vst [vmem:[#allocation2 + $0x40] sm:$0xfe] %v1331_v4  ;;  %v1332_v2 = vrot.slane %v1028_v11, 7  ;;  %v1338_v38 = vrot.slane %v1032_v29, 7  ;;  %v1030_v27 = vmin.f32 %v934_v36, 6.0  ;;  %v528_v45 = vadd.f32 %v527_v17, %v9572_v54 }
  0xe6   : > { %v1029_v59 = vmin.f32 %v933_v32, 6.0  ;;  %v935_v49 = vmax.f32 %v524_v46, 0.0  ;;  %v942_v30 = vmax.f32 %v788_v12, 0.0  ;;  %v783_v42 = vadd.f32 %v782_v18, %v9578_v57  ;;  %v529_v5 = vpop.f32.mrf.mxu0  ;;  %v8686_v34 = vpop.f32.mrf.mxu1 }
  0xe7   : > { %1620 = vst [vmem:[#allocation2 + $0x100] sm:$0xfe] %v1332_v2  ;;  %v1334_v43 = vrot.slane %v1030_v27, 7  ;;  %v937_v58 = vmax.f32 %v528_v45, 0.0  ;;  %v530_v13 = vadd.f32 %v529_v5, %v9575_v56  ;;  %v798_v48 = vadd.f32 %v8686_v34, %v9578_v57 }
  0xe8   : > { %v1333_v20 = vrot.slane %v1029_v59, 7  ;;  %v1031_v11 = vmin.f32 %v935_v49, 6.0  ;;  %v9717_v29 = vmin.f32 %v942_v30, 6.0  ;;  %v939_v36 = vmax.f32 %v783_v42, 0.0  ;;  %v533_v17 = vpop.f32.mrf.mxu0  ;;  %v792_v32 = vpop.f32.mrf.mxu1 }
  0xe9   : > { %v1335_v46 = vsel %vm1330_vm7, %v1331_v4, %v1334_v43  ;;  %v1033_v12 = vmin.f32 %v937_v58, 6.0  ;;  %v938_v18 = vmax.f32 %v530_v13, 0.0  ;;  %v534_v6 = vadd.f32 %v533_v17, %v9572_v54 }
  0xea   : > { %1622 = vst [vmem:[#allocation2 + $0x88] sm:$0xff] %v1335_v46  ;;  %v9722_v27 = vsel %vm1330_vm7, %v1333_v20, %v1338_v38  ;;  %1621 = vst [vmem:[#allocation2 + $0x108] sm:$0xfe] %v1333_v20  ;;  %v1336_v45 = vrot.slane %v1031_v11, 7  ;;  %v1350_v34 = vrot.slane %v9717_v29, 7  ;;  %v1035_v59 = vmin.f32 %v939_v36, 6.0  ;;  %v535_v49 = vpop.f32.mrf.mxu0  ;;  %v8689_v30 = vpop.f32.mrf.mxu1 }
  0xeb   : > { %1624 = vst [vmem:[#allocation2 + $0x140] sm:$0xff] %v9722_v27  ;;  %v1340_v42 = vrot.slane %v1033_v12, 7  ;;  %v1034_v5 = vmin.f32 %v938_v18, 6.0  ;;  %v940_v4 = vmax.f32 %v534_v6, 0.0  ;;  %v948_v58 = vmax.f32 %v798_v48, 0.0 }
  0xec   : > { %v9727_v13 = vsel %vm1330_vm7, %v1332_v2, %v1336_v45  ;;  %v1344_v17 = vrot.slane %v1035_v59, 7  ;;  %v536_v46 = vadd.f32 %v535_v49, %v9575_v56  ;;  %v793_v20 = vadd.f32 %v792_v32, %v9578_v57  ;;  %v539_v11 = vpop.f32.mrf.mxu0  ;;  %v802_v59 = vpop.f32.mrf.mxu1 }
  0xed   : > { %1623 = vst [vmem:[#allocation2 + $0x310] sm:$0xff] %v9727_v13  ;;  %v9733_v29 = vsel %vm1330_vm7, %v1334_v43, %v1340_v42  ;;  %v1342_v36 = vrot.slane %v1034_v5, 7  ;;  %v1036_v1 = vmin.f32 %v940_v4, 6.0  ;;  %v9735_v12 = vmin.f32 %v948_v58, 6.0 }
  0xee   : > { %1625 = vst [vmem:[#allocation2 + $0xf8] sm:$0xff] %v9733_v29  ;;  %v9739_v6 = vsel %vm1330_vm7, %v1338_v38, %v1344_v17  ;;  %v9742_v2 = vsel %vm1330_vm7, %v1344_v17, %v1350_v34  ;;  %v941_v48 = vmax.f32 %v536_v46, 0.0  ;;  %v945_v32 = vmax.f32 %v793_v20, 0.0  ;;  %v541_v18 = vpop.f32.mrf.mxu0  ;;  %v8692_v23 = vpop.f32.mrf.mxu1 }
  0xef   : > { %1627 = vst [vmem:[#allocation2 + $0x2d0] sm:$0xff] %v9739_v6  ;;  %1630 = vst [vmem:[#allocation2 + $0x2c8] sm:$0xff] %v9742_v2  ;;  %v9747_v43 = vsel %vm1330_vm7, %v1336_v45, %v1342_v36  ;;  %v1346_v49 = vrot.slane %v1036_v1, 7  ;;  %v1362_v5 = vrot.slane %v9735_v12, 7  ;;  %v540_v38 = vadd.f32 %v539_v11, %v9572_v54 }
  0xf0   : > { %1626 = vst [vmem:[#allocation2 + $0x50] sm:$0xff] %v9747_v43  ;;  %v1037_v4 = vmin.f32 %v941_v48, 6.0  ;;  %v1041_v58 = vmin.f32 %v945_v32, 6.0  ;;  %v542_v17 = vadd.f32 %v541_v18, %v9575_v56  ;;  %v545_v46 = vpop.f32.mrf.mxu0  ;;  %v808_v20 = vadd.f32 %v8689_v30, %v9578_v57 }
  0xf1   : > { %v1347_v63 = vsel %vm1330_vm7, %v1340_v42, %v1346_v49  ;;  %v943_v28 = vmax.f32 %v540_v38, 0.0  ;;  %v546_v45 = vadd.f32 %v545_v46, %v9572_v54  ;;  %v803_v1 = vadd.f32 %v802_v59, %v9578_v57 }
  0xf2   : > { %1628 = vst [vmem:[#allocation2 + $0x320] sm:$0xff] %v1347_v63  ;;  %v1348_v12 = vrot.slane %v1037_v4, 7  ;;  %v1356_v50 = vrot.slane %v1041_v58, 7  ;;  %v944_v11 = vmax.f32 %v542_v17, 0.0  ;;  %v954_v53 = vmax.f32 %v808_v20, 0.0  ;;  %v547_v39 = vpop.f32.mrf.mxu0 }
  0xf3   : > { %v1039_v48 = vmin.f32 %v943_v28, 6.0  ;;  %v946_v32 = vmax.f32 %v546_v45, 0.0  ;;  %v548_v18 = vadd.f32 %v547_v39, %v9575_v56  ;;  %v951_v47 = vmax.f32 %v803_v1, 0.0 }
  0xf4   : > { %v9759_v30 = vsel %vm1330_vm7, %v1342_v36, %v1348_v12  ;;  %v1357_v42 = vsel %vm1330_vm7, %v1350_v34, %v1356_v50  ;;  %v1363_v38 = vsel %vm1330_vm7, %v1356_v50, %v1362_v5  ;;  %v1040_v59 = vmin.f32 %v944_v11, 6.0  ;;  %v551_v63 = vpop.f32.mrf.mxu0 }
  0xf5   : > { %1629 = vst [vmem:[#allocation2 + $0x28] sm:$0xff] %v9759_v30  ;;  %1633 = vst [vmem:[#allocation2 + $0x150] sm:$0xff] %v1357_v42  ;;  %v1352_v4 = vrot.slane %v1039_v48, 7  ;;  %v1042_v28 = vmin.f32 %v946_v32, 6.0  ;;  %v9764_v58 = vmin.f32 %v954_v53, 6.0  ;;  %v947_v39 = vmax.f32 %v548_v18, 0.0  ;;  %v812_v42 = vpop.f32.mrf.mxu1 }
  0xf6   : > { %1636 = vst [vmem:[#allocation2 + $0x348] sm:$0xff] %v1363_v38  ;;  %v1354_v17 = vrot.slane %v1040_v59, 7  ;;  %v1047_v46 = vmin.f32 %v951_v47, 6.0  ;;  %v552_v36 = vadd.f32 %v551_v63, %v9572_v54  ;;  %v553_v20 = vpop.f32.mrf.mxu0  ;;  %v818_v34 = vadd.f32 %v8692_v23, %v9578_v57 }
  0xf7   : > { %v1353_v50 = vsel %vm1330_vm7, %v1346_v49, %v1352_v4  ;;  %v1358_v45 = vrot.slane %v1042_v28, 7  ;;  %v17857_v1 = vrot.slane %v9764_v58, 7  ;;  %v1043_v11 = vmin.f32 %v947_v39, 6.0  ;;  %v8695_v63 = vpop.f32.mrf.mxu1 }
  0xf8   : > { %1631 = vst [vmem:[#allocation2 + $0x190] sm:$0xff] %v1353_v50  ;;  %v1355_v48 = vsel %vm1330_vm7, %v1348_v12, %v1354_v17  ;;  %v1368_v53 = vrot.slane %v1047_v46, 7  ;;  %v949_v32 = vmax.f32 %v552_v36, 0.0  ;;  %v554_v18 = vadd.f32 %v553_v20, %v9575_v56  ;;  %v557_v47 = vpop.f32.mrf.mxu0 }
  0xf9   : > { %1632 = vst [vmem:[#allocation2 + $0x1a0] sm:$0xff] %v1355_v48  ;;  %v1359_v38 = vsel %vm1330_vm7, %v1352_v4, %v1358_v45  ;;  %v1360_v59 = vrot.slane %v1043_v11, 7  ;;  %v558_v23 = vadd.f32 %v557_v47, %v9572_v54  ;;  %v960_v49 = vmax.f32 %v818_v34, 0.0 }
  0xfa   : > { %1634 = vst [vmem:[#allocation2 + $0x2d8] sm:$0xff] %v1359_v38  ;;  %v1369_v28 = vsel %vm1330_vm7, %v1362_v5, %v1368_v53  ;;  %v1375_v12 = vsel %vm1330_vm7, %v1368_v53, %v17857_v1  ;;  %v1045_v39 = vmin.f32 %v949_v32, 6.0  ;;  %v950_v46 = vmax.f32 %v554_v18, 0.0  ;;  %v559_v36 = vpop.f32.mrf.mxu0 }
  0xfb   : > { %v1361_v20 = vsel %vm1330_vm7, %v1354_v17, %v1360_v59  ;;  %1639 = vst [vmem:[#allocation2 + $0x258] sm:$0xff] %v1369_v28  ;;  %1642 = vst [vmem:[#allocation2 + $0x1e0] sm:$0xff] %v1375_v12  ;;  %v952_v4 = vmax.f32 %v558_v23, 0.0  ;;  %v9779_v50 = vmin.f32 %v960_v49, 6.0  ;;  %v560_v34 = vadd.f32 %v559_v36, %v9575_v56  ;;  %v822_v28 = vpop.f32.mrf.mxu1 }
  0xfc   : > { %1635 = vst [vmem:[#allocation2 + $0x270] sm:$0xff] %v1361_v20  ;;  %v1364_v11 = vrot.slane %v1045_v39, 7  ;;  %v1046_v48 = vmin.f32 %v950_v46, 6.0  ;;  %v813_v5 = vadd.f32 %v812_v42, %v9578_v57  ;;  %v563_v47 = vpop.f32.mrf.mxu0  ;;  %v828_v53 = vadd.f32 %v8695_v63, %v9578_v57 }
  0xfd   : > { %v1048_v32 = vmin.f32 %v952_v4, 6.0  ;;  %v1386_v18 = vrot.slane %v9779_v50, 7  ;;  %v953_v38 = vmax.f32 %v560_v34, 0.0  ;;  %v564_v17 = vadd.f32 %v563_v47, %v9572_v54  ;;  %v8698_v63 = vpop.f32.mrf.mxu1 }
  0xfe   : > { %v1365_v23 = vsel %vm1330_vm7, %v1358_v45, %v1364_v11  ;;  %v1366_v49 = vrot.slane %v1046_v48, 7  ;;  %v957_v12 = vmax.f32 %v813_v5, 0.0  ;;  %v565_v36 = vpop.f32.mrf.mxu0  ;;  %v966_v20 = vmax.f32 %v828_v53, 0.0 }
  0xff   : > { %1637 = vst [vmem:[#allocation2 + $0x118] sm:$0xff] %v1365_v23  ;;  %v1370_v39 = vrot.slane %v1048_v32, 7  ;;  %v1049_v46 = vmin.f32 %v953_v38, 6.0  ;;  %v955_v42 = vmax.f32 %v564_v17, 0.0  ;;  %v566_v1 = vadd.f32 %v565_v36, %v9575_v56 }
 0x100   : > { %v1367_v4 = vsel %vm1330_vm7, %v1360_v59, %v1366_v49  ;;  %v1053_v50 = vmin.f32 %v957_v12, 6.0  ;;  %v569_v34 = vpop.f32.mrf.mxu0  ;;  %v9789_v55 = vmin.f32 %v966_v20, 6.0  ;;  %v823_v47 = vadd.f32 %v822_v28, %v9578_v57 }
 0x101   : > { %1638 = vst [vmem:[#allocation2 + $0x198] sm:$0xff] %v1367_v4  ;;  %v1371_v45 = vsel %vm1330_vm7, %v1364_v11, %v1370_v39  ;;  %v1372_v48 = vrot.slane %v1049_v46, 7  ;;  %v1051_v5 = vmin.f32 %v955_v42, 6.0  ;;  %v956_v53 = vmax.f32 %v566_v1, 0.0  ;;  %v832_v4 = vpop.f32.mrf.mxu1 }
 0x102   : > { %1640 = vst [vmem:[#allocation2 + $0xd8] sm:$0xff] %v1371_v45  ;;  %v1380_v32 = vrot.slane %v1053_v50, 7  ;;  %v570_v38 = vadd.f32 %v569_v34, %v9572_v54  ;;  %v1398_v17 = vrot.slane %v9789_v55, 7  ;;  %v571_v23 = vpop.f32.mrf.mxu0  ;;  %v963_v59 = vmax.f32 %v823_v47, 0.0 }
 0x103   : > { %v1373_v12 = vsel %vm1330_vm7, %v1366_v49, %v1372_v48  ;;  %v1376_v36 = vrot.slane %v1051_v5, 7  ;;  %v1052_v20 = vmin.f32 %v956_v53, 6.0  ;;  %v572_v28 = vadd.f32 %v571_v23, %v9575_v56 }
 0x104   : > { %1641 = vst [vmem:[#allocation2 + $0x128] sm:$0xff] %v1373_v12  ;;  %v19182_v11 = vrot.slane %v9764_v58, 7  ;;  %v1387_v46 = vsel %vm1330_vm7, %v1380_v32, %v1386_v18  ;;  %v958_v42 = vmax.f32 %v570_v38, 0.0  ;;  %v1059_v50 = vmin.f32 %v963_v59, 6.0  ;;  %v575_v34 = vpop.f32.mrf.mxu0 }
 0x105   : > { %1648 = vst [vmem:[#allocation2 + $0x90] sm:$0xff] %v1387_v46  ;;  %v1377_v47 = vsel %vm1330_vm7, %v1370_v39, %v1376_v36  ;;  %v1378_v49 = vrot.slane %v1052_v20, 7  ;;  %v959_v45 = vmax.f32 %v572_v28, 0.0  ;;  %v576_v5 = vadd.f32 %v575_v34, %v9572_v54  ;;  %v9807_v46 = vld [vmem:[#allocation2 + $0x100] sm:$0xff] }
 0x106   : > { %v1381_v1 = vsel %vm1330_vm7, %v19182_v11, %v1380_v32  ;;  %1643 = vst [vmem:[#allocation2 + $0x370] sm:$0xff] %v1377_v47  ;;  %v1054_v53 = vmin.f32 %v958_v42, 6.0  ;;  %v1392_v23 = vrot.slane %v1059_v50, 7  ;;  %v577_v12 = vpop.f32.mrf.mxu0  ;;  %v838_v58 = vadd.f32 %v8698_v63, %v9578_v57 }
 0x107   : > { %1645 = vst [vmem:[#allocation2 + $0x290] sm:$0xff] %v1381_v1  ;;  %v833_v11 = vadd.f32 %v832_v4, %v9578_v57  ;;  %v1379_v32 = vsel %vm1330_vm7, %v1372_v48, %v1378_v49  ;;  %v1055_v38 = vmin.f32 %v959_v45, 6.0  ;;  %v961_v59 = vmax.f32 %v576_v5, 0.0 }
 0x108   : > { %v578_v1 = vadd.f32 %v577_v12, %v9575_v56  ;;  %1644 = vst [vmem:[#allocation2 + $0x8] sm:$0xff] %v1379_v32  ;;  %v1382_v39 = vrot.slane %v1054_v53, 7  ;;  %v1393_v20 = vsel %vm1330_vm7, %v1386_v18, %v1392_v23  ;;  %v1399_v28 = vsel %vm1330_vm7, %v1392_v23, %v1398_v17  ;;  %v581_v42 = vpop.f32.mrf.mxu0  ;;  %v4491_v12 = vld [vmem:[#allocation2 + $0x100] sm:$0xfe] }
 0x109   : > { %v972_v63 = vmax.f32 %v838_v58, 0.0  ;;  %v1384_v50 = vrot.slane %v1055_v38, 7  ;;  %1651 = vst [vmem:[#allocation2 + $0xe8] sm:$0xff] %v1393_v20  ;;  %1654 = vst [vmem:[#allocation2 + $0x350] sm:$0xff] %v1399_v28  ;;  %v1057_v48 = vmin.f32 %v961_v59, 6.0  ;;  %v582_v34 = vadd.f32 %v581_v42, %v9572_v54 }
 0x10a   : > { %v962_v4 = vmax.f32 %v578_v1, 0.0  ;;  %v1383_v47 = vsel %vm1330_vm7, %v1376_v36, %v1382_v39  ;;  %v583_v5 = vpop.f32.mrf.mxu0  ;;  %v969_v53 = vmax.f32 %v833_v11, 0.0  ;;  %v4185_v18 = vmul.f32 %v9494_v62, %v9807_v46  ;;  %v5100_v28 = vld [vmem:[#allocation2 + $0x100] sm:$0xfc] }
 0x10b   : > { %v9815_v45 = vmin.f32 %v972_v63, 6.0  ;;  %1646 = vst [vmem:[#allocation2 + $0xb0] sm:$0xff] %v1383_v47  ;;  %v1385_v23 = vsel %vm1330_vm7, %v1378_v49, %v1384_v50  ;;  %v1388_v58 = vrot.slane %v1057_v48, 7  ;;  %v964_v38 = vmax.f32 %v582_v34, 0.0 }
 0x10c   : > { %v1058_v32 = vmin.f32 %v962_v4, 6.0  ;;  %1647 = vst [vmem:[#allocation2 + $0x168] sm:$0xff] %v1385_v23  ;;  %v584_v1 = vadd.f32 %v583_v5, %v9575_v56  ;;  %v1065_v36 = vmin.f32 %v969_v53, 6.0  ;;  %v4297_v20 = vmul.f32 %v9603_v8, %v4185_v18  ;;  %v6120_v23 = vld [vmem:[#allocation2 + $0x50] sm:$0xfe] }
 0x10d   : > { %19183 = vst [vmem:[#allocation50_spill] sm:$0xff] %v9815_v45  ;;  %v17859_v59 = vrot.slane %v9815_v45, 7  ;;  %v1389_v11 = vsel %vm1330_vm7, %v1382_v39, %v1388_v58  ;;  %v9824_v63 = vmin.f32 %v964_v38, 6.0  ;;  %v4513_v47 = vmul.f32 %v9613_v19, %v4491_v12 }
 0x10e   : > { %v1390_v42 = vrot.slane %v1058_v32, 7  ;;  %1649 = vst [vmem:[#allocation2 + $0x98] sm:$0xff] %v1389_v11  ;;  %v965_v49 = vmax.f32 %v584_v1, 0.0  ;;  %v1404_v48 = vrot.slane %v1065_v36, 7  ;;  %v4393_v4 = vadd.f32 %v4297_v20, %v9600_v14 }
 0x10f   : > { %v9830_v34 = vmul.f32 %v9613_v19, %v9727_v13  ;;  %v17863_v53 = vrot.slane %v9824_v63, 7  ;;  %v4713_v18 = vrot.slane %v4513_v47, 1  ;;  %v5106_v39 = vmul.f32 %v5100_v28, %v9471_v52  ;;  %v9861_v47 = vld [vmem:[#allocation2 + $0x108] sm:$0xff] }
 0x110   : > { %v1391_v5 = vsel %vm1330_vm7, %v1384_v50, %v1390_v42  ;;  %v9835_v32 = vmin.f32 %v965_v49, 6.0  ;;  %v1405_v12 = vsel %vm1330_vm7, %v1398_v17, %v1404_v48  ;;  %v1411_v14 = vsel %vm1330_vm7, %v1404_v48, %v17859_v59  ;;  %v6822_v17 = vld [vmem:[#allocation2 + $0x50] sm:$0xfc]  ;;  %19184 = vst [vmem:[#allocation51_spill] sm:$0xff] %v9861_v47 }
 0x111   : > { %1650 = vst [vmem:[#allocation2 + $0x318] sm:$0xff] %v1391_v5  ;;  %v17860_v38 = vrot.slane %v9830_v34, 1  ;;  %v1395_v50 = vsel %vm1330_vm7, %v1388_v58, %v17863_v53  ;;  %1657 = vst [vmem:[#allocation2 + $0x338] sm:$0xff] %v1405_v12  ;;  %v5109_v1 = vmul.f32 %v9491_v61, %v9727_v13  ;;  %v5221_v36 = vmul.f32 %v9625_v26, %v5106_v39  ;;  %v4492_v12 = vld [vmem:[#allocation2 + $0x108] sm:$0xfe] }
 0x112   : > { %1660 = vst [vmem:[#allocation2] sm:$0xff] %v1411_v14  ;;  %v5814_v55 = vmul.f32 %v9494_v62, %v9747_v43  ;;  %1652 = vst [vmem:[#allocation2 + $0x1f0] sm:$0xff] %v1395_v50  ;;  %v17861_v20 = vrot.slane %v9835_v32, 7  ;;  %v6235_v58 = vmul.f32 %v9637_v35, %v6120_v23  ;;  %v9859_v11 = vmul.f32 %v9637_v35, %v9759_v30  ;;  %v6121_v53 = vld [vmem:[#allocation2 + $0x2d0] sm:$0xfe] }
 0x113   : > { %v4715_v28 = vsel %vm2950_vm4, %v4713_v18, %v17860_v38  ;;  %v9864_v48 = vmul.f32 %v9625_v26, %v5109_v1  ;;  %v5421_v5 = vrot.slane %v5221_v36, 2  ;;  %v6828_v50 = vmul.f32 %v6822_v17, %v9471_v52 }
 0x114   : > { %v5002_v49 = vadd.f32 %v4715_v28, %v4393_v4  ;;  %v5926_v39 = vmul.f32 %v9634_v33, %v5814_v55  ;;  %v1397_v18 = vsel %vm1330_vm7, %v1390_v42, %v17861_v20  ;;  %v6435_v14 = vrot.slane %v6235_v58, 1  ;;  %v5101_v58 = vld [vmem:[#allocation2 + $0x108] sm:$0xfc] }
 0x115   : > { %19185 = vst [vmem:[#allocation52_spill] sm:$0xff] %v9864_v48  ;;  %v17862_v23 = vrot.slane %v9859_v11, 1  ;;  %1653 = vst [vmem:[#allocation2 + $0x2e8] sm:$0xff] %v1397_v18  ;;  %v17866_v59 = vrot.slane %v9864_v48, 2  ;;  %v6831_v4 = vmul.f32 %v9491_v61, %v9759_v30  ;;  %v9877_v1 = vmul.f32 %v9512_v10, %v9861_v47 }
 0x116   : > { %v3483_v36 = vmul.f32 %v9591_v3, %v9861_v47  ;;  %v6943_v55 = vmul.f32 %v9655_v0, %v6828_v50  ;;  %v4186_v17 = vmul.f32 %v9494_v62, %v9861_v47  ;;  %v4514_v28 = vmul.f32 %v9646_v40, %v4492_v12 }
 0x117   : > { %19186 = vst [vmem:[#allocation53_spill] sm:$0xff] %v9877_v1  ;;  %v6437_v42 = vsel %vm2950_vm4, %v6435_v14, %v17862_v23  ;;  %v5423_v30 = vsel %vm3788_vm5, %v5421_v5, %v17866_v59  ;;  %v9892_v18 = vmul.f32 %v9655_v0, %v6831_v4  ;;  %v9901_v12 = vmul.f32 %v9646_v40, %v9722_v27 }
 0x118   : > { %v9896_v20 = vmul.f32 %v9537_v25, %v3483_v36  ;;  %v5710_v14 = vadd.f32 %v5423_v30, %v5002_v49  ;;  %v7143_v50 = vrot.slane %v6943_v55, 2  ;;  %v4298_v23 = vmul.f32 %v9658_v7, %v4186_v17 }
 0x119   : > { %19187 = vst [vmem:[#allocation54_spill] sm:$0xff] %v9892_v18  ;;  %v17867_v10 = vrot.slane %v9892_v18, 2  ;;  %v4716_v4 = vrot.slane %v4514_v28, 1  ;;  %v5107_v59 = vmul.f32 %v5101_v58, %v9471_v52  ;;  %v17872_v49 = vrot.slane %v9901_v12, 1  ;;  %v6823_v58 = vld [vmem:[#allocation2 + $0x2d0] sm:$0xfc] }
 0x11a   : > { %19188 = vst [vmem:[#allocation55_spill] sm:$0xff] %v9896_v20  ;;  %v6022_v38 = vadd.f32 %v5926_v39, %v5710_v14  ;;  %v4394_v36 = vadd.f32 %v4298_v23, %v9667_v15  ;;  %v5110_v55 = vmul.f32 %v9491_v61, %v9722_v27  ;;  %v5815_v5 = vmul.f32 %v9494_v62, %v9739_v6  ;;  %v9936_v18 = vld [vmem:[#allocation2 + $0x88] sm:$0xff] }
 0x11b   : > { %v7145_v17 = vsel %vm3788_vm5, %v7143_v50, %v17867_v10  ;;  %v5222_v30 = vmul.f32 %v9661_v9, %v5107_v59  ;;  %v6236_v28 = vmul.f32 %v9670_v21, %v6121_v53  ;;  %v4718_v15 = vsel %vm2950_vm4, %v4716_v4, %v17872_v49  ;;  %v587_v50 = vpop.f32.mrf.mxu0  ;;  %v9927_v59 = vld [vmem:[#allocation2 + $0x40] sm:$0xff] }
 0x11c   : > { %v6724_v39 = vadd.f32 %v6437_v42, %v6022_v38  ;;  %v9921_v23 = vmul.f32 %v9661_v9, %v5110_v55  ;;  %v9925_v14 = vmul.f32 %v9670_v21, %v9742_v2  ;;  %v4490_v10 = vld [vmem:[#allocation2 + $0x40] sm:$0xfe]  ;;  %v5003_v25 = vadd.f32 %v4718_v15, %v4394_v36 }
 0x11d   : > { %v5424_v47 = vrot.slane %v5222_v30, 2  ;;  %v5927_v53 = vmul.f32 %v9679_v60, %v5815_v5  ;;  %v6438_v38 = vrot.slane %v6236_v28, 1  ;;  %v6829_v55 = vmul.f32 %v6823_v58, %v9471_v52 }
 0x11e   : > { %v7432_v42 = vadd.f32 %v7145_v17, %v6724_v39  ;;  %v17879_v45 = vrot.slane %v9921_v23, 2  ;;  %v17880_v4 = vrot.slane %v9925_v14, 1  ;;  %v6832_v49 = vmul.f32 %v9491_v61, %v9742_v2 }
 0x11f   : > { %v588_v57 = vadd.f32 %v587_v50, %v9572_v54  ;;  %v4184_v36 = vmul.f32 %v9494_v62, %v9927_v59  ;;  %v4512_v5 = vmul.f32 %v9610_v16, %v4490_v10  ;;  %v6944_v2 = vmul.f32 %v9684_v37, %v6829_v55  ;;  %v5099_v10 = vld [vmem:[#allocation2 + $0x40] sm:$0xfc] }
 0x120   : > { %v7545_v17 = vadd.f32 %v9676_v44, %v7432_v42  ;;  %v5426_v30 = vsel %vm3788_vm5, %v5424_v47, %v17879_v45  ;;  %v6440_v28 = vsel %vm2950_vm4, %v6438_v38, %v17880_v4  ;;  %v9950_v39 = vmul.f32 %v9684_v37, %v6832_v49  ;;  %v6119_v49 = vld [vmem:[#allocation2 + $0xf8] sm:$0xfe] }
 0x121   : > { %v5711_v58 = vadd.f32 %v5426_v30, %v5003_v25  ;;  %v967_v15 = vmax.f32 %v588_v57, 0.0  ;;  %v4296_v50 = vmul.f32 %v9619_v22, %v4184_v36  ;;  %v7146_v42 = vrot.slane %v6944_v2, 2 }
 0x122   : > { %v7641_v48 = vmax.f32 %v7545_v17, 0.0  ;;  %v9955_v44 = vmul.f32 %v9610_v16, %v9936_v18  ;;  %v4710_v47 = vrot.slane %v4512_v5, 1  ;;  %v17883_v38 = vrot.slane %v9950_v39, 2 }
 0x123   : > { %v6023_v45 = vadd.f32 %v5927_v53, %v5711_v58  ;;  %v9958_v4 = vmin.f32 %v967_v15, 6.0  ;;  %v4392_v25 = vadd.f32 %v4296_v50, %v9648_v41  ;;  %v5105_v36 = vmul.f32 %v5099_v10, %v9471_v52  ;;  %v9971_v41 = vld [vmem:[#allocation2 + $0x320] sm:$0xff]  ;;  %v6821_v15 = vld [vmem:[#allocation2 + $0xf8] sm:$0xfc] }
 0x124   : > { %v7737_v55 = vmin.f32 %v7641_v48, 6.0  ;;  %v17881_v57 = vrot.slane %v9955_v44, 1  ;;  %v5108_v17 = vmul.f32 %v9491_v61, %v9936_v18  ;;  %v7148_v53 = vsel %vm3788_vm5, %v7146_v42, %v17883_v38 }
 0x125   : > { %v6725_v30 = vadd.f32 %v6440_v28, %v6023_v45  ;;  %v17882_v5 = vrot.slane %v9958_v4, 7  ;;  %v5813_v2 = vmul.f32 %v9494_v62, %v9733_v29  ;;  %v5220_v58 = vmul.f32 %v9622_v24, %v5105_v36 }
 0x126   : > { %7951 = vmatprep.mubr.f32.mxu1 %v7737_v55  ;;  %v4712_v48 = vsel %vm2950_vm4, %v4710_v47, %v17881_v57  ;;  %v9978_v45 = vmul.f32 %v9622_v24, %v5108_v17  ;;  %v6234_v28 = vmul.f32 %v9652_v51, %v6119_v49  ;;  %v19189_v62 = vrot.slane %v9824_v63, 7  ;;  %v19190_v57 = vld [vmem:[#allocation43_spill] sm:$0xff]  ;;  %v19198_v24 = vld [vmem:[#allocation37_spill] sm:$0xff] }
 0x127   : > { %v7433_v50 = vadd.f32 %v7148_v53, %v6725_v30  ;;  %v5001_v42 = vadd.f32 %v4712_v48, %v4392_v25  ;;  %v5925_v55 = vmul.f32 %v9631_v31, %v5813_v2  ;;  %v5418_v47 = vrot.slane %v5220_v58, 2  ;;  %v19192_v48 = vld [vmem:[#allocation15_spill] sm:$0xff] }
 0x128   : > { %v1401_v10 = vsel %vm1330_vm7, %v19189_v62, %v17882_v5  ;;  %v17889_v36 = vrot.slane %v9978_v45, 2  ;;  %v9990_v17 = vmul.f32 %v9652_v51, %v9971_v41  ;;  %v6432_v49 = vrot.slane %v6234_v28, 1  ;;  %v19194_v28 = vld [vmem:[#allocation44_spill] sm:$0xff] }
 0x129   : > { %1655 = vst [vmem:[#allocation2 + $0x1b8] sm:$0xff] %v1401_v10  ;;  %v7546_v30 = vadd.f32 %v19190_v57, %v7433_v50  ;;  %v6827_v53 = vmul.f32 %v6821_v15, %v9471_v52  ;;  %v6830_v63 = vmul.f32 %v9971_v41, %v9491_v61  ;;  %v19191_v25 = vrot.slane %v9877_v1, 1  ;;  %v19196_v15 = vld [vmem:[#allocation19_spill] sm:$0xff] }
 0x12a   : > { %v19193_v2 = vrot.slane %v19192_v48, 1  ;;  %v5420_v62 = vsel %vm3788_vm5, %v5418_v47, %v17889_v36  ;;  %v17891_v10 = vrot.slane %v9990_v17, 1  ;;  %v19195_v50 = vrot.slane %v9896_v20, 2  ;;  %v10090_v20 = vld [vmem:[#allocation2 + $0x1a0] sm:$0xff] }
 0x12b   : > { %v19197_v38 = vrot.slane %v19196_v15, 2  ;;  %v7642_v52 = vmax.f32 %v7546_v30, 0.0  ;;  %v5709_v1 = vadd.f32 %v5420_v62, %v5001_v42  ;;  %v6942_v48 = vmul.f32 %v19198_v24, %v6827_v53  ;;  %v10026_v42 = vld [vmem:[#allocation2 + $0x150] sm:$0xff] }
 0x12c   : > { %v2965_v58 = vsel %vm2950_vm4, %v19193_v2, %v19191_v25  ;;  %v10013_v25 = vmul.f32 %v19198_v24, %v6830_v63  ;;  %v10015_v2 = vld [vmem:[#allocation2 + $0x2c8] sm:$0xff]  ;;  %v6434_v47 = vsel %vm2950_vm4, %v6432_v49, %v17891_v10  ;;  %19200 = vst [vmem:[#allocation44_spill] sm:$0xff] %v10026_v42 }
 0x12d   : > { %v3247_v5 = vadd.f32 %v2965_v58, %v19194_v28  ;;  %v3803_v61 = vsel %vm3788_vm5, %v19197_v38, %v19195_v50  ;;  %v4301_v28 = vmul.f32 %v9658_v7, %v9722_v27  ;;  %v10024_v38 = vmul.f32 %v9646_v40, %v9739_v6  ;;  %v589_v50 = vpop.f32.mrf.mxu0 }
 0x12e   : > { %v7738_v30 = vmin.f32 %v7642_v52, 6.0  ;;  %v6021_v53 = vadd.f32 %v5925_v55, %v5709_v1  ;;  %v7140_v63 = vrot.slane %v6942_v48, 2  ;;  %v17890_v62 = vrot.slane %v10013_v25, 2 }
 0x12f   : > { %v4085_v58 = vadd.f32 %v3803_v61, %v3247_v5  ;;  %19199 = vst [vmem:[#allocation15_spill] sm:$0xff] %v10024_v38  ;;  %v17894_v36 = vrot.slane %v10024_v38, 1  ;;  %v5113_v5 = vmul.f32 %v9591_v3, %v9739_v6  ;;  %v5930_v27 = vmul.f32 %v9679_v60, %v10015_v2 }
 0x130   : > { %8758 = vmatprep.mubr.f32.mxu0 %v7738_v30  ;;  %v6723_v49 = vadd.f32 %v6434_v47, %v6021_v53  ;;  %v7142_v52 = vsel %vm3788_vm5, %v7140_v63, %v17890_v62  ;;  %v10039_v1 = vmul.f32 %v9670_v21, %v10026_v42  ;;  %v6835_v55 = vmul.f32 %v10026_v42, %v9591_v3 }
 0x131   : > { %v4397_v15 = vadd.f32 %v4301_v28, %v4085_v58  ;;  %v19202_v61 = vrot.slane %v9901_v12, 1  ;;  %v10049_v58 = vmul.f32 %v9661_v9, %v5113_v5  ;;  %v590_v47 = vadd.f32 %v589_v50, %v9575_v56  ;;  %v19204_v28 = vld [vmem:[#allocation4_spill] sm:$0xff]  ;;  %v19206_v50 = vld [vmem:[#allocation39_spill] sm:$0xff] }
 0x132   : > { %19201 = vst [vmem:[#allocation19_spill] sm:$0xff] %v10039_v1  ;;  %v10054_v30 = vmul.f32 %v19204_v28, %v9807_v46  ;;  %v7431_v53 = vadd.f32 %v7142_v52, %v6723_v49  ;;  %v17898_v62 = vrot.slane %v10039_v1, 1  ;;  %v10058_v10 = vmul.f32 %v9684_v37, %v6835_v55 }
 0x133   : > { %v4724_v48 = vsel %vm2950_vm4, %v19202_v61, %v17894_v36  ;;  %19203 = vst [vmem:[#allocation56_spill] sm:$0xff] %v10049_v58  ;;  %v17903_v12 = vrot.slane %v10049_v58, 2  ;;  %v968_v60 = vmax.f32 %v590_v47, 0.0  ;;  %v3482_v5 = vmul.f32 %v9591_v3, %v9807_v46 }
 0x134   : > { %v5006_v63 = vadd.f32 %v4724_v48, %v4397_v15  ;;  %19205 = vst [vmem:[#allocation57_spill] sm:$0xff] %v10058_v10  ;;  %v7544_v36 = vadd.f32 %v19206_v50, %v7431_v53  ;;  %v19207_v49 = vrot.slane %v9925_v14, 1  ;;  %v4300_v55 = vmul.f32 %v9603_v8, %v9727_v13  ;;  %v10080_v53 = vld [vmem:[#allocation2 + $0x28] sm:$0xff]  ;;  %v19210_v14 = vld [vmem:[#allocation7_spill] sm:$0xff] }
 0x135   : > { %v19208_v48 = vrot.slane %v9921_v23, 2  ;;  %v10078_v61 = vmin.f32 %v968_v60, 6.0  ;;  %v19209_v37 = vrot.slane %v10054_v30, 1  ;;  %v19211_v1 = vrot.slane %v19210_v14, 1  ;;  %19213 = vst [vmem:[#allocation7_spill] sm:$0xff] %v10090_v20 }
 0x136   : > { %v6446_v15 = vsel %vm2950_vm4, %v19207_v49, %v17898_v62  ;;  %v19212_v62 = vld [vmem:[#allocation8_spill] sm:$0xff]  ;;  %v7640_v58 = vmax.f32 %v7544_v36, 0.0  ;;  %v19214_v23 = vrot.slane %v10058_v10, 2  ;;  %v19215_v60 = vrot.slane %v9950_v39, 2 }
 0x137   : > { %v5432_v47 = vsel %vm3788_vm5, %v19208_v48, %v17903_v12  ;;  %v2963_v49 = vsel %vm2950_vm4, %v19211_v1, %v19209_v37  ;;  %v10088_v52 = vmul.f32 %v19212_v62, %v3482_v5  ;;  %v19216_v12 = vld [vmem:[#allocation45_spill] sm:$0xff]  ;;  %v17914_v21 = vrot.slane %v10078_v61, 7 }
 0x138   : > { %v5714_v9 = vadd.f32 %v5432_v47, %v5006_v63  ;;  %v7154_v48 = vsel %vm3788_vm5, %v19215_v60, %v19214_v23  ;;  %v3246_v38 = vadd.f32 %v2963_v49, %v19216_v12  ;;  %v10102_v37 = vmul.f32 %v9613_v19, %v9747_v43  ;;  %v593_v12 = vpop.f32.mrf.mxu0  ;;  %v19218_v23 = vld [vmem:[#allocation11_spill] sm:$0xff] }
 0x139   : > { %v17913_v14 = vrot.slane %v10088_v52, 2  ;;  %v5112_v36 = vmul.f32 %v9591_v3, %v9747_v43  ;;  %v7736_v1 = vmin.f32 %v7640_v58, 6.0  ;;  %v5929_v39 = vmul.f32 %v9634_v33, %v10080_v53 }
 0x13a   : > { %v6026_v63 = vadd.f32 %v5930_v27, %v5714_v9  ;;  %v10110_v5 = vmul.f32 %v9637_v35, %v10090_v20  ;;  %v19217_v47 = vrot.slane %v9835_v32, 7  ;;  %v19219_v60 = vrot.slane %v19218_v23, 2 }
 0x13b   : > { %v17912_v27 = vrot.slane %v10102_v37, 1  ;;  %v10124_v58 = vmul.f32 %v9625_v26, %v5112_v36  ;;  %7952 = vmatmul.mubr.f32.vlgmr.msra.gmra.mxu1 %v7736_v1  ;;  %v6834_v32 = vmul.f32 %v10090_v20, %v9591_v3  ;;  %v594_v36 = vadd.f32 %v593_v12, %v9572_v54  ;;  %v19221_v1 = vld [vmem:[#allocation6_spill] sm:$0xff] }
 0x13c   : > { %v1403_v49 = vsel %vm1330_vm7, %v19217_v47, %v17914_v21  ;;  %v3801_v9 = vsel %vm3788_vm5, %v19219_v60, %v17913_v14  ;;  %v6728_v10 = vadd.f32 %v6446_v15, %v6026_v63  ;;  %v17916_v7 = vrot.slane %v10110_v5, 1 }
 0x13d   : > { %1656 = vst [vmem:[#allocation2 + $0x240] sm:$0xff] %v1403_v49  ;;  %v4084_v42 = vadd.f32 %v3801_v9, %v3246_v38  ;;  %v19220_v47 = vrot.slane %v9830_v34, 1  ;;  %v17915_v60 = vrot.slane %v10124_v58, 2  ;;  %v10138_v15 = vmul.f32 %v19221_v1, %v9927_v59 }
 0x13e   : > { %v7436_v38 = vadd.f32 %v7154_v48, %v6728_v10  ;;  %v19223_v49 = vrot.slane %v9859_v11, 1  ;;  %v10146_v34 = vmul.f32 %v9655_v0, %v6834_v32  ;;  %v970_v14 = vmax.f32 %v594_v36, 0.0  ;;  %v8701_v32 = vpop.f32.mrf.mxu1 }
 0x13f   : > { %v4722_v23 = vsel %vm2950_vm4, %v19220_v47, %v17912_v27  ;;  %19222 = vst [vmem:[#allocation45_spill] sm:$0xff] %v10138_v15  ;;  %v4396_v63 = vadd.f32 %v4300_v55, %v4084_v42  ;;  %v19224_v47 = vld [vmem:[#allocation52_spill] sm:$0xff]  ;;  %v17921_v21 = vrot.slane %v10138_v15, 1  ;;  %v3481_v10 = vmul.f32 %v9591_v3, %v9927_v59 }
 0x140   : > { %v6444_v9 = vsel %vm2950_vm4, %v19223_v49, %v17916_v7  ;;  %v19225_v27 = vrot.slane %v19224_v47, 2  ;;  %v7549_v42 = vadd.f32 %v19190_v57, %v7436_v38  ;;  %v4299_v48 = vmul.f32 %v9619_v22, %v9936_v18  ;;  %v10174_v38 = vld [vmem:[#allocation2 + $0x190] sm:$0xff] }
 0x141   : > { %v5005_v11 = vadd.f32 %v4722_v23, %v4396_v63  ;;  %v10160_v49 = vmin.f32 %v970_v14, 6.0  ;;  %v10172_v23 = vmul.f32 %v9610_v16, %v9733_v29  ;;  %19230 = vst [vmem:[#allocation52_spill] sm:$0xff] %v10174_v38  ;;  %v19231_v14 = vrot.slane %v10146_v34, 2  ;;  %v19232_v57 = vld [vmem:[#allocation54_spill] sm:$0xff] }
 0x142   : > { %v5430_v12 = vsel %vm3788_vm5, %v19225_v27, %v17915_v60  ;;  %v19227_v27 = vld [vmem:[#allocation13_spill] sm:$0xff]  ;;  %v19229_v60 = vld [vmem:[#allocation12_spill] sm:$0xff]  ;;  %v7645_v63 = vmax.f32 %v7549_v42, 0.0  ;;  %v19233_v22 = vrot.slane %v19232_v57, 2  ;;  %v5111_v16 = vmul.f32 %v9591_v3, %v9733_v29 }
 0x143   : > { %19226 = vst [vmem:[#allocation11_spill] sm:$0xff] %v10160_v49  ;;  %v19228_v36 = vrot.slane %v19227_v27, 1  ;;  %v10168_v7 = vmul.f32 %v19229_v60, %v3481_v10  ;;  %v5713_v55 = vadd.f32 %v5430_v12, %v5005_v11  ;;  %v19234_v27 = vld [vmem:[#allocation46_spill] sm:$0xff]  ;;  %v5928_v12 = vmul.f32 %v9971_v41, %v9631_v31  ;;  %v842_v11 = vpop.f32.mrf.mxu1  ;;  %v19236_v29 = vld [vmem:[#allocation17_spill] sm:$0xff]  ;;  %v19239_v31 = vld [vmem:[#allocation27_spill] sm:$0xff] }
 0x144   : > { %v7152_v15 = vsel %vm3788_vm5, %v19233_v22, %v19231_v14  ;;  %v7741_v60 = vmin.f32 %v7645_v63, 6.0  ;;  %v10191_v57 = vmul.f32 %v9652_v51, %v10174_v38  ;;  %v595_v22 = vpop.f32.mrf.mxu0  ;;  %v19237_v63 = vrot.slane %v19236_v29, 2 }
 0x145   : > { %v2961_v47 = vsel %vm2950_vm4, %v19228_v36, %v17921_v21  ;;  %v17930_v36 = vrot.slane %v10160_v49, 7  ;;  %v17929_v10 = vrot.slane %v10168_v7, 2  ;;  %v17931_v21 = vrot.slane %v10172_v23, 1 }
 0x146   : > { %v3245_v1 = vadd.f32 %v2961_v47, %v19234_v27  ;;  %v6025_v42 = vadd.f32 %v5929_v39, %v5713_v55  ;;  %v19235_v47 = vrot.slane %v9958_v4, 7  ;;  %v19238_v55 = vrot.slane %v9955_v44, 1  ;;  %8759 = vmatmul.mubr.f32.vlgmr.msra.gmra.mxu0 %v7741_v60 }
 0x147   : > { %v3799_v39 = vsel %vm3788_vm5, %v19237_v63, %v17929_v10  ;;  %v10209_v51 = vmul.f32 %v19239_v31, %v5111_v16  ;;  %v6833_v29 = vmul.f32 %v10174_v38, %v9591_v3  ;;  %v19240_v10 = vld [vmem:[#allocation22_spill] sm:$0xff]  ;;  %v596_v44 = vadd.f32 %v595_v22, %v9575_v56 }
 0x148   : > { %v1407_v14 = vsel %vm1330_vm7, %v19235_v47, %v17930_v36  ;;  %v4720_v27 = vsel %vm2950_vm4, %v19238_v55, %v17931_v21  ;;  %v6727_v49 = vadd.f32 %v6444_v9, %v6025_v42  ;;  %v4083_v4 = vadd.f32 %v3799_v39, %v3245_v1 }
 0x149   : > { %1658 = vst [vmem:[#allocation2 + $0x2a0] sm:$0xff] %v1407_v14  ;;  %v17932_v47 = vrot.slane %v10191_v57, 1  ;;  %v17934_v63 = vrot.slane %v10209_v51, 2  ;;  %v848_v36 = vadd.f32 %v8701_v32, %v19240_v10  ;;  %v843_v55 = vadd.f32 %v842_v11, %v19240_v10 }
 0x14a   : > { %v7435_v21 = vadd.f32 %v7152_v15, %v6727_v49  ;;  %v4395_v16 = vadd.f32 %v4299_v48, %v4083_v4  ;;  %v19241_v60 = vrot.slane %v9990_v17, 1  ;;  %v10224_v9 = vmul.f32 %v19198_v24, %v6833_v29  ;;  %v19243_v15 = vld [vmem:[#allocation40_spill] sm:$0xff]  ;;  %v19244_v17 = vld [vmem:[#allocation47_spill] sm:$0xff] }
 0x14b   : > { %v19242_v3 = vrot.slane %v9978_v45, 2  ;;  %v978_v42 = vmax.f32 %v848_v36, 0.0  ;;  %v971_v22 = vmax.f32 %v596_v44, 0.0  ;;  %v975_v11 = vmax.f32 %v843_v55, 0.0  ;;  %v19249_v55 = vld [vmem:[#allocation9_spill] sm:$0xff] }
 0x14c   : > { %v6442_v1 = vsel %vm2950_vm4, %v19241_v60, %v17932_v47  ;;  %v7548_v48 = vadd.f32 %v19243_v15, %v7435_v21  ;;  %v5004_v49 = vadd.f32 %v4720_v27, %v4395_v16  ;;  %v17933_v14 = vrot.slane %v10224_v9, 2 }
 0x14d   : > { %v5428_v32 = vsel %vm3788_vm5, %v19242_v3, %v17934_v63  ;;  %v2431_v39 = vmul.f32 %v19244_v17, %v9807_v46  ;;  %v10235_v4 = vmin.f32 %v978_v42, 6.0  ;;  %v10237_v29 = vmin.f32 %v971_v22, 6.0 }
 0x14e   : > { %v1071_v60 = vmin.f32 %v975_v11, 6.0  ;;  %v10241_v45 = vmul.f32 %v19204_v28, %v9727_v13  ;;  %v7644_v36 = vmax.f32 %v7548_v48, 0.0  ;;  %v5712_v44 = vadd.f32 %v5428_v32, %v5004_v49  ;;  %v19250_v48 = vld [vmem:[#allocation48_spill] sm:$0xff] }
 0x14f   : > { %19245 = vst [vmem:[#allocation13_spill] sm:$0xff] %v10235_v4  ;;  %19246 = vst [vmem:[#allocation54_spill] sm:$0xff] %v10237_v29  ;;  %v19248_v21 = vrot.slane %v10013_v25, 2  ;;  %v2543_v16 = vmul.f32 %v19249_v55, %v2431_v39  ;;  %v17935_v46 = vrot.slane %v10235_v4, 7  ;;  %v17936_v3 = vrot.slane %v10237_v29, 7  ;;  %v10256_v25 = vld [vmem:[#allocation2 + $0x270] sm:$0xff] }
 0x150   : > { %19247 = vst [vmem:[#allocation46_spill] sm:$0xff] %v10241_v45  ;;  %v1416_v42 = vrot.slane %v1071_v60, 7  ;;  %v17938_v22 = vrot.slane %v10241_v45, 1  ;;  %v7740_v11 = vmin.f32 %v7644_v36, 6.0  ;;  %v6024_v47 = vadd.f32 %v5928_v12, %v5712_v44  ;;  %19251 = vst [vmem:[#allocation17_spill] sm:$0xff] %v10256_v25  ;;  %v19270_v4 = vld [vmem:[#allocation16_spill] sm:$0xff] }
 0x151   : > { %v7150_v27 = vsel %vm3788_vm5, %v19248_v21, %v17933_v14  ;;  %v3485_v32 = vmul.f32 %v19250_v48, %v9727_v13  ;;  %v4191_v49 = vmul.f32 %v19244_v17, %v9747_v43  ;;  %v19252_v39 = vrot.slane %v10078_v61, 7  ;;  %v19253_v14 = vld [vmem:[#allocation50_spill] sm:$0xff] }
 0x152   : > { %v19254_v60 = vrot.slane %v19253_v14, 7  ;;  %v1423_v12 = vsel %vm1330_vm7, %v1416_v42, %v17935_v46  ;;  %v19255_v13 = vrot.slane %v10054_v30, 1  ;;  %7956 = vmatprep.mubr.f32.mxu1 %v7740_v11  ;;  %v6726_v36 = vadd.f32 %v6442_v1, %v6024_v47  ;;  %v19286_v45 = vld [vmem:[#allocation6_spill] sm:$0xff] }
 0x153   : > { %v1409_v21 = vsel %vm1330_vm7, %v19252_v39, %v17936_v3  ;;  %1666 = vst [vmem:[#allocation2 + $0x2f0] sm:$0xff] %v1423_v12  ;;  %v10275_v14 = vmul.f32 %v19212_v62, %v3485_v32  ;;  %v4303_v44 = vmul.f32 %v9603_v8, %v4191_v49  ;;  %v5115_v30 = vmul.f32 %v19250_v48, %v10080_v53  ;;  %v19259_v32 = vld [vmem:[#allocation51_spill] sm:$0xff] }
 0x154   : > { %v1417_v63 = vsel %vm1330_vm7, %v19254_v60, %v1416_v42  ;;  %v2969_v43 = vsel %vm2950_vm4, %v19255_v13, %v17938_v22  ;;  %1659 = vst [vmem:[#allocation2 + $0x308] sm:$0xff] %v1409_v21  ;;  %v10280_v42 = vmul.f32 %v9613_v19, %v10080_v53  ;;  %v5820_v11 = vmul.f32 %v19244_v17, %v10090_v20  ;;  %v10323_v22 = vld [vmem:[#allocation2 + $0x140] sm:$0xff] }
 0x155   : > { %1663 = vst [vmem:[#allocation2 + $0x1f8] sm:$0xff] %v1417_v63  ;;  %v3249_v61 = vadd.f32 %v2969_v43, %v2543_v16  ;;  %19256 = vst [vmem:[#allocation47_spill] sm:$0xff] %v10275_v14  ;;  %v10288_v47 = vmul.f32 %v9637_v35, %v10256_v25  ;;  %v7434_v63 = vadd.f32 %v7150_v27, %v6726_v36  ;;  %v17937_v1 = vrot.slane %v10275_v14, 2  ;;  %v19279_v14 = vld [vmem:[#allocation36_spill] sm:$0xff] }
 0x156   : > { %19257 = vst [vmem:[#allocation48_spill] sm:$0xff] %v10280_v42  ;;  %v6837_v16 = vmul.f32 %v10256_v25, %v19250_v48  ;;  %v2432_v49 = vmul.f32 %v19244_v17, %v19259_v32  ;;  %v17940_v39 = vrot.slane %v10280_v42, 1  ;;  %v10297_v21 = vmul.f32 %v9625_v26, %v5115_v30  ;;  %v19263_v32 = vld [vmem:[#allocation18_spill] sm:$0xff]  ;;  %v19277_v42 = vld [vmem:[#allocation15_spill] sm:$0xff] }
 0x157   : > { %19258 = vst [vmem:[#allocation50_spill] sm:$0xff] %v10288_v47  ;;  %v5932_v60 = vmul.f32 %v9634_v33, %v5820_v11  ;;  %v17939_v12 = vrot.slane %v10288_v47, 1  ;;  %v7547_v13 = vadd.f32 %v19206_v50, %v7434_v63  ;;  %v19261_v27 = vrot.slane %v10088_v52, 2  ;;  %v19282_v33 = vld [vmem:[#allocation41_spill] sm:$0xff] }
 0x158   : > { %19260 = vst [vmem:[#allocation51_spill] sm:$0xff] %v10297_v21  ;;  %v10308_v36 = vmul.f32 %v9655_v0, %v6837_v16  ;;  %v2544_v46 = vmul.f32 %v19263_v32, %v2432_v49  ;;  %v19264_v30 = vrot.slane %v10102_v37, 1  ;;  %v17942_v63 = vrot.slane %v10297_v21, 2 }
 0x159   : > { %v3807_v43 = vsel %vm3788_vm5, %v19261_v27, %v17937_v1  ;;  %v19265_v52 = vrot.slane %v10110_v5, 1  ;;  %v7643_v1 = vmax.f32 %v7547_v13, 0.0  ;;  %v3486_v37 = vmul.f32 %v10323_v22, %v19250_v48 }
 0x15a   : > { %19262 = vst [vmem:[#allocation58_spill] sm:$0xff] %v10308_v36  ;;  %v4087_v3 = vadd.f32 %v3807_v43, %v3249_v61  ;;  %v4728_v11 = vsel %vm2950_vm4, %v19264_v30, %v17940_v39  ;;  %v17947_v16 = vrot.slane %v10308_v36, 2  ;;  %v19266_v61 = vld [vmem:[#allocation10_spill] sm:$0xff]  ;;  %v19267_v30 = vrot.slane %v10124_v58, 2  ;;  %v19274_v36 = vld [vmem:[#allocation44_spill] sm:$0xff] }
 0x15b   : > { %v6450_v27 = vsel %vm2950_vm4, %v19265_v52, %v17939_v12  ;;  %v10327_v49 = vmul.f32 %v10323_v22, %v19266_v61  ;;  %v4192_v13 = vmul.f32 %v19244_v17, %v9739_v6  ;;  %v10340_v52 = vmul.f32 %v9646_v40, %v10015_v2  ;;  %v10342_v12 = vld [vmem:[#allocation2 + $0x348] sm:$0xff]  ;;  %v19271_v6 = vld [vmem:[#allocation35_spill] sm:$0xff] }
 0x15c   : > { %v4399_v43 = vadd.f32 %v4303_v44, %v4087_v3  ;;  %v5436_v5 = vsel %vm3788_vm5, %v19267_v30, %v17942_v63  ;;  %19268 = vst [vmem:[#allocation59_spill] sm:$0xff] %v10342_v12  ;;  %v7739_v39 = vmin.f32 %v7643_v1, 6.0  ;;  %v19269_v3 = vrot.slane %v10146_v34, 2  ;;  %v19272_v1 = vld [vmem:[#allocation53_spill] sm:$0xff] }
 0x15d   : > { %v17954_v58 = vrot.slane %v10327_v49, 1  ;;  %v10351_v30 = vmul.f32 %v19270_v4, %v3486_v37  ;;  %v4304_v10 = vmul.f32 %v19271_v6, %v4192_v13  ;;  %v5116_v47 = vmul.f32 %v19250_v48, %v10015_v2  ;;  %v599_v13 = vpop.f32.mrf.mxu0 }
 0x15e   : > { %v7158_v44 = vsel %vm3788_vm5, %v19269_v3, %v17947_v16  ;;  %v5008_v63 = vadd.f32 %v4728_v11, %v4399_v43  ;;  %7957 = vmatmul.mubr.f32.gmra.mxu1 %v7739_v39  ;;  %v19273_v34 = vrot.slane %v19272_v1, 1  ;;  %v5821_v37 = vmul.f32 %v19244_v17, %v19274_v36  ;;  %v19275_v11 = vld [vmem:[#allocation38_spill] sm:$0xff] }
 0x15f   : > { %v17962_v16 = vrot.slane %v10351_v30, 2  ;;  %v10367_v43 = vmul.f32 %v19275_v11, %v10342_v12  ;;  %v19276_v39 = vrot.slane %v10340_v52, 1  ;;  %v19278_v35 = vrot.slane %v19277_v42, 1 }
 0x160   : > { %v2971_v3 = vsel %vm2950_vm4, %v19273_v34, %v17954_v58  ;;  %v5716_v0 = vadd.f32 %v5436_v5, %v5008_v63  ;;  %v10375_v34 = vmul.f32 %v19279_v14, %v5116_v47  ;;  %v19280_v58 = vld [vmem:[#allocation55_spill] sm:$0xff]  ;;  %v5933_v26 = vmul.f32 %v19282_v33, %v5821_v37 }
 0x161   : > { %v3250_v21 = vadd.f32 %v2971_v3, %v2544_v46  ;;  %v4730_v1 = vsel %vm2950_vm4, %v19278_v35, %v19276_v39  ;;  %v19281_v29 = vrot.slane %v19280_v58, 2  ;;  %v17966_v63 = vrot.slane %v10367_v43, 1  ;;  %v19283_v3 = vld [vmem:[#allocation19_spill] sm:$0xff] }
 0x162   : > { %v6838_v46 = vmul.f32 %v10342_v12, %v19250_v48  ;;  %v6028_v5 = vadd.f32 %v5932_v60, %v5716_v0  ;;  %v17971_v35 = vrot.slane %v10375_v34, 2  ;;  %v600_v47 = vadd.f32 %v599_v13, %v9572_v54  ;;  %v19288_v60 = vld [vmem:[#allocation56_spill] sm:$0xff] }
 0x163   : > { %v3809_v25 = vsel %vm3788_vm5, %v19281_v29, %v17962_v16  ;;  %v19284_v39 = vrot.slane %v19283_v3, 1  ;;  %v19285_v29 = vld [vmem:[#allocation42_spill] sm:$0xff]  ;;  %v2430_v37 = vmul.f32 %v19244_v17, %v9927_v59  ;;  %v10400_v0 = vmul.f32 %v19286_v45, %v9936_v18 }
 0x164   : > { %v4088_v42 = vadd.f32 %v3809_v25, %v3250_v21  ;;  %v10394_v16 = vmul.f32 %v19285_v29, %v6838_v46  ;;  %v6730_v25 = vadd.f32 %v6450_v27, %v6028_v5  ;;  %v19289_v13 = vrot.slane %v19288_v60, 2  ;;  %v19290_v46 = vld [vmem:[#allocation14_spill] sm:$0xff]  ;;  %v19294_v60 = vld [vmem:[#allocation45_spill] sm:$0xff] }
 0x165   : > { %v6452_v58 = vsel %vm2950_vm4, %v19284_v39, %v17966_v63  ;;  %19287 = vst [vmem:[#allocation53_spill] sm:$0xff] %v10400_v0  ;;  %v973_v54 = vmax.f32 %v600_v47, 0.0  ;;  %v2542_v63 = vmul.f32 %v19290_v46, %v2430_v37  ;;  %v17976_v20 = vrot.slane %v10400_v0, 1 }
 0x166   : > { %v4400_v21 = vadd.f32 %v4304_v10, %v4088_v42  ;;  %v5438_v3 = vsel %vm3788_vm5, %v19289_v13, %v17971_v35  ;;  %v17974_v39 = vrot.slane %v10394_v16, 2  ;;  %v3484_v59 = vmul.f32 %v19250_v48, %v9936_v18  ;;  %v10414_v10 = vld [vmem:[#allocation2 + $0xf8] sm:$0xff]  ;;  %v19292_v42 = vld [vmem:[#allocation57_spill] sm:$0xff] }
 0x167   : > { %v7438_v45 = vadd.f32 %v7158_v44, %v6730_v25  ;;  %v10412_v27 = vmin.f32 %v973_v54, 6.0  ;;  %19291 = vst [vmem:[#allocation15_spill] sm:$0xff] %v10414_v10  ;;  %v4190_v5 = vmul.f32 %v10414_v10, %v19244_v17  ;;  %v19293_v47 = vrot.slane %v19292_v42, 2  ;;  %v19297_v25 = vld [vmem:[#allocation24_spill] sm:$0xff] }
 0x168   : > { %v5009_v19 = vadd.f32 %v4730_v1, %v4400_v21  ;;  %v19295_v13 = vrot.slane %v19294_v60, 1  ;;  %v19296_v1 = vld [vmem:[#allocation12_spill] sm:$0xff]  ;;  %v10433_v21 = vmul.f32 %v9971_v41, %v19297_v25  ;;  %v19299_v60 = vld [vmem:[#allocation26_spill] sm:$0xff] }
 0x169   : > { %v7160_v37 = vsel %vm3788_vm5, %v19293_v47, %v17974_v39  ;;  %v10429_v54 = vmul.f32 %v19296_v1, %v3484_v59  ;;  %v7551_v35 = vadd.f32 %v19243_v15, %v7438_v45  ;;  %v17977_v42 = vrot.slane %v10412_v27, 7  ;;  %v10437_v47 = vld [vmem:[#allocation2 + $0x2d8] sm:$0xff]  ;;  %v19305_v15 = vld [vmem:[#allocation29_spill] sm:$0xff] }
 0x16a   : > { %v2967_v44 = vsel %vm2950_vm4, %v19295_v13, %v17976_v20  ;;  %19298 = vst [vmem:[#allocation55_spill] sm:$0xff] %v10433_v21  ;;  %v5717_v10 = vadd.f32 %v5438_v3, %v5009_v19  ;;  %v4302_v0 = vmul.f32 %v19299_v60, %v4190_v5  ;;  %v17980_v13 = vrot.slane %v10433_v21, 1  ;;  %v19300_v45 = vld [vmem:[#allocation11_spill] sm:$0xff]  ;;  %v10475_v21 = vld [vmem:[#allocation2 + $0x2d0] sm:$0xff] }
 0x16b   : > { %v3248_v46 = vadd.f32 %v2967_v44, %v2542_v63  ;;  %v17979_v39 = vrot.slane %v10429_v54, 2  ;;  %v5114_v59 = vmul.f32 %v9971_v41, %v19250_v48  ;;  %v7647_v20 = vmax.f32 %v7551_v35, 0.0 }
 0x16c   : > { %v6029_v25 = vadd.f32 %v5933_v26, %v5717_v10  ;;  %v19301_v19 = vrot.slane %v19300_v45, 7  ;;  %v5819_v63 = vmul.f32 %v19244_v17, %v10174_v38  ;;  %v19302_v5 = vrot.slane %v10168_v7, 2  ;;  %v19304_v45 = vld [vmem:[#allocation33_spill] sm:$0xff] }
 0x16d   : > { %v19303_v26 = vrot.slane %v10172_v23, 1  ;;  %v10462_v10 = vmul.f32 %v19239_v31, %v5114_v59  ;;  %v7743_v17 = vmin.f32 %v7647_v20, 6.0  ;;  %v6836_v23 = vmul.f32 %v10437_v47, %v19250_v48 }
 0x16e   : > { %v1413_v3 = vsel %vm1330_vm7, %v19301_v19, %v17977_v42  ;;  %v3805_v44 = vsel %vm3788_vm5, %v19302_v5, %v17979_v39  ;;  %v10466_v19 = vmul.f32 %v19304_v45, %v10437_v47  ;;  %v5931_v7 = vmul.f32 %v19305_v15, %v5819_v63  ;;  %v19310_v63 = vld [vmem:[#allocation43_spill] sm:$0xff] }
 0x16f   : > { %1661 = vst [vmem:[#allocation2 + $0x220] sm:$0xff] %v1413_v3  ;;  %v4726_v35 = vsel %vm2950_vm4, %v19303_v26, %v17980_v13  ;;  %v6731_v3 = vadd.f32 %v6452_v58, %v6029_v25  ;;  %v4086_v42 = vadd.f32 %v3805_v44, %v3248_v46  ;;  %v17983_v5 = vrot.slane %v10462_v10, 2  ;;  %7961 = vmatprep.mubr.f32.mxu1 %v7743_v17  ;;  %v19307_v58 = vld [vmem:[#allocation49_spill] sm:$0xff] }
 0x170   : > { %v17982_v39 = vrot.slane %v10466_v19, 1  ;;  %v2547_v59 = vmul.f32 %v10323_v22, %v19263_v32  ;;  %v10479_v20 = vmul.f32 %v10475_v21, %v19266_v61  ;;  %v3489_v46 = vmul.f32 %v10475_v21, %v19307_v58 }
 0x171   : > { %v7439_v26 = vadd.f32 %v7160_v37, %v6731_v3  ;;  %v4398_v13 = vadd.f32 %v4302_v0, %v4086_v42  ;;  %v19308_v25 = vrot.slane %v10209_v51, 2  ;;  %v19309_v22 = vrot.slane %v10191_v57, 1 }
 0x172   : > { %19306 = vst [vmem:[#allocation19_spill] sm:$0xff] %v10479_v20  ;;  %v10494_v37 = vmul.f32 %v19198_v24, %v6836_v23  ;;  %v4307_v42 = vmul.f32 %v19271_v6, %v10015_v2  ;;  %v17994_v3 = vrot.slane %v10479_v20, 1  ;;  %v10501_v51 = vmul.f32 %v19270_v4, %v3489_v46 }
 0x173   : > { %v5434_v48 = vsel %vm3788_vm5, %v19308_v25, %v17983_v5  ;;  %v6448_v0 = vsel %vm2950_vm4, %v19309_v22, %v17982_v39  ;;  %v7552_v44 = vadd.f32 %v19310_v63, %v7439_v26  ;;  %v5007_v17 = vadd.f32 %v4726_v35, %v4398_v13  ;;  %v10512_v39 = vld [vmem:[#allocation2 + $0x258] sm:$0xff] }
 0x174   : > { %19311 = vst [vmem:[#allocation56_spill] sm:$0xff] %v10501_v51  ;;  %v17995_v25 = vrot.slane %v10494_v37, 2  ;;  %v10506_v57 = vmul.f32 %v19274_v36, %v9646_v40  ;;  %v5119_v23 = vmul.f32 %v19274_v36, %v19307_v58  ;;  %v5936_v22 = vmul.f32 %v10342_v12, %v19282_v33  ;;  %19313 = vst [vmem:[#allocation45_spill] sm:$0xff] %v10512_v39  ;;  %v19348_v36 = vld [vmem:[#allocation50_spill] sm:$0xff] }
 0x175   : > { %v7648_v13 = vmax.f32 %v7552_v44, 0.0  ;;  %v5715_v35 = vadd.f32 %v5434_v48, %v5007_v17  ;;  %v19314_v26 = vrot.slane %v10327_v49, 1  ;;  %v17991_v5 = vrot.slane %v10501_v51, 2  ;;  %v601_v48 = vpop.f32.mrf.mxu0 }
 0x176   : > { %19312 = vst [vmem:[#allocation57_spill] sm:$0xff] %v10506_v57  ;;  %v19315_v6 = vrot.slane %v10224_v9, 2  ;;  %v17990_v33 = vrot.slane %v10506_v57, 1  ;;  %v10527_v44 = vmul.f32 %v19279_v14, %v5119_v23  ;;  %v19317_v49 = vrot.slane %v10351_v30, 2  ;;  %v19333_v57 = vld [vmem:[#allocation54_spill] sm:$0xff] }
 0x177   : > { %v2977_v46 = vsel %vm2950_vm4, %v19314_v26, %v17994_v3  ;;  %v7744_v17 = vmin.f32 %v7648_v13, 6.0  ;;  %v6027_v20 = vadd.f32 %v5931_v7, %v5715_v35  ;;  %v10536_v9 = vmul.f32 %v19275_v11, %v10512_v39  ;;  %v19327_v3 = vld [vmem:[#allocation46_spill] sm:$0xff] }
 0x178   : > { %v7156_v40 = vsel %vm3788_vm5, %v19315_v6, %v17995_v25  ;;  %v3253_v4 = vadd.f32 %v2977_v46, %v2547_v59  ;;  %19316 = vst [vmem:[#allocation11_spill] sm:$0xff] %v10527_v44  ;;  %v3815_v26 = vsel %vm3788_vm5, %v19317_v49, %v17991_v5  ;;  %v19319_v59 = vrot.slane %v10340_v52, 1  ;;  %v8819_v49 = vld [vmem:[#allocation2 + $0x310] sm:$0xff]  ;;  %v10596_v25 = vld [vmem:[#allocation2 + $0x198] sm:$0xff] }
 0x179   : > { %19318 = vst [vmem:[#allocation49_spill] sm:$0xff] %v10536_v9  ;;  %v17992_v13 = vrot.slane %v10527_v44, 2  ;;  %v6841_v7 = vmul.f32 %v10512_v39, %v19307_v58  ;;  %8761 = vmatprep.mubr.f32.mxu0 %v7744_v17  ;;  %v6729_v30 = vadd.f32 %v6448_v0, %v6027_v20  ;;  %v17993_v35 = vrot.slane %v10536_v9, 1  ;;  %v10557_v5 = vld [vmem:[#allocation2 + $0x50] sm:$0xff]  ;;  %v19339_v39 = vld [vmem:[#allocation48_spill] sm:$0xff] }
 0x17a   : > { %v4091_v6 = vadd.f32 %v3815_v26, %v3253_v4  ;;  %v4736_v23 = vsel %vm2950_vm4, %v19319_v59, %v17990_v33  ;;  %v602_v46 = vadd.f32 %v601_v48, %v9575_v56  ;;  %v2546_v4 = vmul.f32 %v8819_v49, %v19249_v55 }
 0x17b   : > { %v19320_v52 = vrot.slane %v10375_v34, 2  ;;  %v10555_v33 = vmul.f32 %v19285_v29, %v6841_v7  ;;  %v10561_v20 = vmul.f32 %v10557_v5, %v19204_v28  ;;  %v7437_v0 = vadd.f32 %v7156_v40, %v6729_v30  ;;  %v19332_v29 = vld [vmem:[#allocation17_spill] sm:$0xff] }
 0x17c   : > { %v4403_v26 = vadd.f32 %v4307_v42, %v4091_v6  ;;  %v19322_v42 = vrot.slane %v10367_v43, 1  ;;  %v974_v17 = vmax.f32 %v602_v46, 0.0  ;;  %v3488_v34 = vmul.f32 %v10557_v5, %v19307_v58  ;;  %v19325_v46 = vld [vmem:[#allocation7_spill] sm:$0xff] }
 0x17d   : > { %v5444_v59 = vsel %vm3788_vm5, %v19320_v52, %v17992_v13  ;;  %19321 = vst [vmem:[#allocation60_spill] sm:$0xff] %v10555_v33  ;;  %v17998_v7 = vrot.slane %v10555_v33, 2  ;;  %v18001_v49 = vrot.slane %v10561_v20, 1  ;;  %v4306_v52 = vmul.f32 %v9603_v8, %v10080_v53  ;;  %19329 = vst [vmem:[#allocation7_spill] sm:$0xff] %v10596_v25 }
 0x17e   : > { %v6458_v48 = vsel %vm2950_vm4, %v19322_v42, %v17993_v35  ;;  %v5012_v6 = vadd.f32 %v4736_v23, %v4403_v26  ;;  %v7550_v40 = vadd.f32 %v19206_v50, %v7437_v0  ;;  %v10575_v30 = vmin.f32 %v974_v17, 6.0  ;;  %v19324_v42 = vld [vmem:[#allocation25_spill] sm:$0xff] }
 0x17f   : > { %v10578_v43 = vmul.f32 %v19212_v62, %v3488_v34  ;;  %v10582_v13 = vmul.f32 %v19325_v46, %v19324_v42  ;;  %v19326_v23 = vrot.slane %v10394_v16, 2  ;;  %v19328_v0 = vrot.slane %v19327_v3, 1  ;;  %v19331_v3 = vld [vmem:[#allocation30_spill] sm:$0xff] }
 0x180   : > { %v5720_v35 = vadd.f32 %v5444_v59, %v5012_v6  ;;  %v5118_v34 = vmul.f32 %v19325_v46, %v19307_v58  ;;  %v7646_v44 = vmax.f32 %v7550_v40, 0.0  ;;  %v18011_v59 = vrot.slane %v10575_v30, 7 }
 0x181   : > { %19323 = vst [vmem:[#allocation61_spill] sm:$0xff] %v10578_v43  ;;  %v7166_v26 = vsel %vm3788_vm5, %v19326_v23, %v17998_v7  ;;  %v2975_v17 = vsel %vm2950_vm4, %v19328_v0, %v18001_v49  ;;  %v18010_v33 = vrot.slane %v10578_v43, 2  ;;  %v19330_v7 = vld [vmem:[#allocation28_spill] sm:$0xff]  ;;  %v5935_v0 = vmul.f32 %v19332_v29, %v19331_v3  ;;  %v605_v49 = vpop.f32.mrf.mxu0 }
 0x182   : > { %v3252_v6 = vadd.f32 %v2975_v17, %v2546_v4  ;;  %v6032_v16 = vadd.f32 %v5936_v22, %v5720_v35  ;;  %v10602_v9 = vmul.f32 %v19330_v7, %v5118_v34  ;;  %v7742_v14 = vmin.f32 %v7646_v44, 6.0  ;;  %v19335_v4 = vld [vmem:[#allocation47_spill] sm:$0xff] }
 0x183   : > { %v19334_v40 = vrot.slane %v19333_v57, 7  ;;  %v19336_v22 = vrot.slane %v19335_v4, 2  ;;  %v19337_v17 = vld [vmem:[#allocation31_spill] sm:$0xff]  ;;  %v19338_v44 = vrot.slane %v10582_v13, 1  ;;  %v19340_v12 = vrot.slane %v19339_v39, 1 }
 0x184   : > { %v10618_v34 = vmul.f32 %v19337_v17, %v10596_v25  ;;  %v6734_v23 = vadd.f32 %v6458_v48, %v6032_v16  ;;  %7962 = vmatmul.mubr.f32.gmra.mxu1 %v7742_v14  ;;  %v19342_v48 = vld [vmem:[#allocation14_spill] sm:$0xff]  ;;  %v19343_v39 = vld [vmem:[#allocation51_spill] sm:$0xff]  ;;  %v19349_v32 = vrot.slane %v19348_v36, 1 }
 0x185   : > { %v1415_v51 = vsel %vm1330_vm7, %v19334_v40, %v18011_v59  ;;  %v3813_v35 = vsel %vm3788_vm5, %v19336_v22, %v18010_v33  ;;  %v4734_v57 = vsel %vm2950_vm4, %v19340_v12, %v19338_v44  ;;  %v18015_v40 = vrot.slane %v10602_v9, 2  ;;  %v19341_v33 = vld [vmem:[#allocation20_spill] sm:$0xff]  ;;  %v19345_v44 = vld [vmem:[#allocation6_spill] sm:$0xff]  ;;  %v19346_v14 = vld [vmem:[#allocation15_spill] sm:$0xff] }
 0x186   : > { %1662 = vst [vmem:[#allocation2 + $0x170] sm:$0xff] %v1415_v51  ;;  %v4090_v11 = vadd.f32 %v3813_v35, %v3252_v6  ;;  %v18016_v4 = vrot.slane %v10618_v34, 1  ;;  %v6840_v22 = vmul.f32 %v10596_v25, %v19307_v58  ;;  %v606_v59 = vadd.f32 %v605_v49, %v19341_v33  ;;  %v19350_v33 = vld [vmem:[#allocation34_spill] sm:$0xff] }
 0x187   : > { %v2545_v51 = vmul.f32 %v19342_v48, %v9936_v18  ;;  %v7442_v6 = vadd.f32 %v7166_v26, %v6734_v23  ;;  %v19344_v35 = vrot.slane %v19343_v39, 2  ;;  %v10639_v43 = vmul.f32 %v19346_v14, %v19345_v44 }
 0x188   : > { %v4402_v16 = vadd.f32 %v4306_v52, %v4090_v11  ;;  %v6456_v49 = vsel %vm2950_vm4, %v19349_v32, %v18016_v4  ;;  %v10647_v18 = vmul.f32 %v19350_v33, %v6840_v22  ;;  %v976_v11 = vmax.f32 %v606_v59, 0.0  ;;  %v19351_v22 = vld [vmem:[#allocation24_spill] sm:$0xff]  ;;  %v8704_v4 = vpop.f32.mrf.mxu1 }
 0x189   : > { %v5442_v12 = vsel %vm3788_vm5, %v19344_v35, %v18015_v40  ;;  %19347 = vst [vmem:[#allocation46_spill] sm:$0xff] %v10639_v43  ;;  %v3487_v52 = vmul.f32 %v19346_v14, %v19307_v58  ;;  %v7555_v26 = vadd.f32 %v19310_v63, %v7442_v6  ;;  %v18021_v39 = vrot.slane %v10639_v43, 1  ;;  %v10672_v40 = vld [vmem:[#allocation2 + $0x118] sm:$0xff]  ;;  %v19355_v63 = vld [vmem:[#allocation58_spill] sm:$0xff] }
 0x18a   : > { %v5011_v23 = vadd.f32 %v4734_v57, %v4402_v16  ;;  %v4305_v35 = vmul.f32 %v9971_v41, %v19299_v60  ;;  %v10656_v36 = vmin.f32 %v976_v11, 6.0  ;;  %v10663_v59 = vmul.f32 %v10174_v38, %v19351_v22  ;;  %v19352_v57 = vld [vmem:[#allocation53_spill] sm:$0xff]  ;;  %v607_v22 = vpop.f32.mrf.mxu0 }
 0x18b   : > { %v10659_v32 = vmul.f32 %v19296_v1, %v3487_v52  ;;  %v7651_v48 = vmax.f32 %v7555_v26, 0.0  ;;  %v19353_v16 = vrot.slane %v19352_v57, 1  ;;  %v5117_v11 = vmul.f32 %v10174_v38, %v19307_v58 }
 0x18c   : > { %v5719_v6 = vadd.f32 %v5442_v12, %v5011_v23  ;;  %v19354_v52 = vrot.slane %v10647_v18, 2  ;;  %v19356_v60 = vrot.slane %v19355_v63, 2  ;;  %v18024_v26 = vrot.slane %v10656_v36, 7 }
 0x18d   : > { %v2973_v41 = vsel %vm2950_vm4, %v19353_v16, %v18021_v39  ;;  %v18023_v23 = vrot.slane %v10659_v32, 2  ;;  %v7747_v43 = vmin.f32 %v7651_v48, 6.0  ;;  %v18026_v16 = vrot.slane %v10663_v59, 1 }
 0x18e   : > { %v7164_v1 = vsel %vm3788_vm5, %v19356_v60, %v19354_v52  ;;  %v3251_v12 = vadd.f32 %v2973_v41, %v2545_v51  ;;  %v6031_v57 = vadd.f32 %v5935_v0, %v5719_v6  ;;  %v10683_v39 = vmul.f32 %v19239_v31, %v5117_v11  ;;  %v852_v6 = vpop.f32.mrf.mxu1 }
 0x18f   : > { %v19357_v38 = vrot.slane %v10412_v27, 7  ;;  %v19358_v60 = vrot.slane %v10429_v54, 2  ;;  %v5934_v0 = vmul.f32 %v10437_v47, %v19305_v15  ;;  %v10699_v48 = vmul.f32 %v19304_v45, %v10672_v40  ;;  %8762 = vmatmul.mubr.f32.gmra.mxu0 %v7747_v43 }
 0x190   : > { %v6733_v41 = vadd.f32 %v6456_v49, %v6031_v57  ;;  %v18027_v52 = vrot.slane %v10683_v39, 2  ;;  %v608_v43 = vadd.f32 %v607_v22, %v9575_v56 }
 0x191   : > { %v1419_v63 = vsel %vm1330_vm7, %v19357_v38, %v18024_v26  ;;  %v3811_v51 = vsel %vm3788_vm5, %v19358_v60, %v18023_v23  ;;  %v19359_v38 = vld [vmem:[#allocation55_spill] sm:$0xff]  ;;  %v18028_v60 = vrot.slane %v10699_v48, 1  ;;  %v6839_v23 = vmul.f32 %v10672_v40, %v19307_v58  ;;  %v19361_v26 = vld [vmem:[#allocation22_spill] sm:$0xff] }
 0x192   : > { %1664 = vst [vmem:[#allocation2 + $0x2e0] sm:$0xff] %v1419_v63  ;;  %v4089_v27 = vadd.f32 %v3811_v51, %v3251_v12  ;;  %v19360_v11 = vrot.slane %v19359_v38, 1  ;;  %v858_v15 = vadd.f32 %v8704_v4, %v19361_v26  ;;  %v7441_v49 = vadd.f32 %v7164_v1, %v6733_v41 }
 0x193   : > { %v19362_v12 = vrot.slane %v10462_v10, 2  ;;  %v853_v51 = vadd.f32 %v852_v6, %v19361_v26  ;;  %v19363_v38 = vrot.slane %v10466_v19, 1  ;;  %v10724_v4 = vmul.f32 %v19198_v24, %v6839_v23  ;;  %v19365_v10 = vld [vmem:[#allocation3_spill] sm:$0xff] }
 0x194   : > { %v4732_v54 = vsel %vm2950_vm4, %v19360_v11, %v18026_v16  ;;  %v4401_v57 = vadd.f32 %v4305_v35, %v4089_v27  ;;  %v984_v22 = vmax.f32 %v858_v15, 0.0  ;;  %v977_v1 = vmax.f32 %v608_v43, 0.0  ;;  %v19364_v35 = vld [vmem:[#allocation40_spill] sm:$0xff] }
 0x195   : > { %v5440_v63 = vsel %vm3788_vm5, %v19362_v12, %v18027_v52  ;;  %v6454_v58 = vsel %vm2950_vm4, %v19363_v38, %v18028_v60  ;;  %v7554_v41 = vadd.f32 %v19364_v35, %v7441_v49  ;;  %v981_v11 = vmax.f32 %v853_v51, 0.0 }
 0x196   : > { %v5010_v27 = vadd.f32 %v4732_v54, %v4401_v57  ;;  %v1723_v16 = vadd.s32 32, %v19365_v10  ;;  %v18035_v12 = vrot.slane %v10724_v4, 2  ;;  %v10729_v6 = vmin.f32 %v984_v22, 6.0 }
 0x197   : > { %v10731_v52 = vmin.f32 %v977_v1, 6.0  ;;  %v1724_v19 = vadd.s32 40, %v19365_v10  ;;  %v7650_v38 = vmax.f32 %v7554_v41, 0.0  ;;  %v1077_v23 = vmin.f32 %v981_v11, 6.0  ;;  %v10746_v41 = vld [vmem:[#allocation2 + $0x2b0] sm:$0xff]  ;;  %v10755_v11 = vld [vmem:[#allocation2 + $0x128] sm:$0xff] }
 0x198   : > { %19366 = vst [vmem:[#allocation54_spill] sm:$0xff] %v10729_v6  ;;  %v5718_v60 = vadd.f32 %v5440_v63, %v5010_v27  ;;  %v1783_v26 = vand.u32 15, %v1723_v16  ;;  %v19368_v15 = vrot.slane %v10494_v37, 2  ;;  %v18030_v43 = vrot.slane %v10729_v6, 7  ;;  %19370 = vst [vmem:[#allocation48_spill] sm:$0xff] %v10746_v41  ;;  %v19389_v10 = vld [vmem:[#allocation16_spill] sm:$0xff] }
 0x199   : > { %19367 = vst [vmem:[#allocation47_spill] sm:$0xff] %v10731_v52  ;;  %v18031_v49 = vrot.slane %v10731_v52, 7  ;;  %v1790_v57 = vand.u32 15, %v1724_v19  ;;  %v7746_v51 = vmin.f32 %v7650_v38, 6.0  ;;  %v1428_v1 = vrot.slane %v1077_v23, 7  ;;  %19372 = vst [vmem:[#allocation15_spill] sm:$0xff] %v10755_v11 }
 0x19a   : > { %v7162_v54 = vsel %vm3788_vm5, %v19368_v15, %v18035_v12  ;;  %v6030_v22 = vadd.f32 %v5934_v0, %v5718_v60  ;;  %vm2139_vm9 = vcmp.gt.s32.totalorder %v1783_v26, 0  ;;  %v19369_v63 = vrot.slane %v10575_v30, 7  ;;  %v19373_v0 = vld [vmem:[#allocation13_spill] sm:$0xff]  ;;  %v19385_v12 = vld [vmem:[#allocation44_spill] sm:$0xff] }
 0x19b   : > { %v10749_v37 = vsel %vm2139_vm9, 1.0, %v10746_v41  ;;  %vm2236_vm10 = vcmp.lt.s32.totalorder %v1790_v57, 15  ;;  %v10753_v27 = vmul.f32 %v19204_v28, %v10080_v53  ;;  %7966 = vmatprep.mubr.f32.mxu1 %v7746_v51  ;;  %v19374_v60 = vrot.slane %v19373_v0, 7  ;;  %v19406_v52 = vld [vmem:[#allocation20_spill] sm:$0xff] }
 0x19c   : > { %v1421_v16 = vsel %vm1330_vm7, %v19369_v63, %v18031_v49  ;;  %v6732_v26 = vadd.f32 %v6454_v58, %v6030_v22  ;;  %v1435_v19 = vsel %vm1330_vm7, %v1428_v1, %v18030_v43  ;;  %v8547_v38 = vsel %vm2236_vm10, 1.0, %v10746_v41 }
 0x19d   : > { %19371 = vst [vmem:[#allocation51_spill] sm:$0xff] %v10753_v27  ;;  %1665 = vst [vmem:[#allocation2 + $0x200] sm:$0xff] %v1421_v16  ;;  %v1429_v30 = vsel %vm1330_vm7, %v19374_v60, %v1428_v1  ;;  %v2437_v23 = vmul.f32 %v10557_v5, %v10749_v37  ;;  %v18032_v15 = vrot.slane %v10753_v27, 1  ;;  %v10767_v57 = vrot.slane %v8547_v38, 6 }
 0x19e   : > { %1669 = vst [vmem:[#allocation2 + $0xf0] sm:$0xff] %v1429_v30  ;;  %1672 = vst [vmem:[#allocation2 + $0x130] sm:$0xff] %v1435_v19  ;;  %v4197_v58 = vmul.f32 %v10749_v37, %v19325_v46  ;;  %v7440_v51 = vadd.f32 %v7162_v54, %v6732_v26  ;;  %v10773_v22 = vmul.f32 %v19332_v29, %v19324_v42  ;;  %v19377_v16 = vrot.slane %v10561_v20, 1  ;;  %v19378_v54 = vld [vmem:[#allocation5_spill] sm:$0xff] }
 0x19f   : > { %v5826_v1 = vmul.f32 %v10749_v37, %v10596_v25  ;;  %v10779_v63 = vmul.f32 %v19337_v17, %v10755_v11  ;;  %v2549_v5 = vmul.f32 %v19249_v55, %v2437_v23  ;;  %v10790_v26 = vsel %vm3378_vm2, %v19378_v54, %v10767_v57 }
 0x1a0   : > { %19375 = vst [vmem:[#allocation50_spill] sm:$0xff] %v10773_v22  ;;  %v2981_v46 = vsel %vm2950_vm4, %v19377_v16, %v18032_v15  ;;  %v4309_v0 = vmul.f32 %v9603_v8, %v4197_v58  ;;  %v7553_v60 = vadd.f32 %v19206_v50, %v7440_v51  ;;  %v3491_v30 = vmul.f32 %v10790_v26, %v10080_v53 }
 0x1a1   : > { %19376 = vst [vmem:[#allocation53_spill] sm:$0xff] %v10779_v63  ;;  %v18034_v19 = vrot.slane %v10773_v22, 1  ;;  %v5121_v38 = vmul.f32 %v19332_v29, %v10790_v26  ;;  %v3255_v20 = vadd.f32 %v2981_v46, %v2549_v5  ;;  %v5938_v23 = vmul.f32 %v19331_v3, %v5826_v1  ;;  %v611_v22 = vpop.f32.mrf.mxu0  ;;  %v19405_v3 = vld [vmem:[#allocation36_spill] sm:$0xff] }
 0x1a2   : > { %v18033_v16 = vrot.slane %v10779_v63, 1  ;;  %v6843_v43 = vmul.f32 %v10755_v11, %v10790_v26  ;;  %v7649_v49 = vmax.f32 %v7553_v60, 0.0  ;;  %v10804_v58 = vmul.f32 %v19212_v62, %v3491_v30  ;;  %v19391_v63 = vld [vmem:[#allocation59_spill] sm:$0xff]  ;;  %v19407_v62 = vld [vmem:[#allocation41_spill] sm:$0xff] }
 0x1a3   : > { %v19380_v53 = vrot.slane %v10582_v13, 1  ;;  %v10812_v15 = vmul.f32 %v19330_v7, %v5121_v38  ;;  %v19382_v1 = vrot.slane %v10618_v34, 1  ;;  %v2438_v60 = vmul.f32 %v10475_v21, %v10749_v37 }
 0x1a4   : > { %19379 = vst [vmem:[#allocation58_spill] sm:$0xff] %v10804_v58  ;;  %v10820_v46 = vmul.f32 %v19350_v33, %v6843_v43  ;;  %v10826_v13 = vmul.f32 %v19266_v61, %v10015_v2  ;;  %v7745_v30 = vmin.f32 %v7649_v49, 6.0  ;;  %v18042_v38 = vrot.slane %v10804_v58, 2  ;;  %v19386_v49 = vld [vmem:[#allocation61_spill] sm:$0xff] }
 0x1a5   : > { %v4740_v51 = vsel %vm2950_vm4, %v19380_v53, %v18034_v19  ;;  %19381 = vst [vmem:[#allocation55_spill] sm:$0xff] %v10812_v15  ;;  %v6462_v5 = vsel %vm2950_vm4, %v19382_v1, %v18033_v16  ;;  %v18044_v53 = vrot.slane %v10812_v15, 2  ;;  %v3492_v34 = vmul.f32 %v10790_v26, %v10015_v2  ;;  %v19384_v16 = vld [vmem:[#allocation18_spill] sm:$0xff]  ;;  %v19390_v19 = vld [vmem:[#allocation32_spill] sm:$0xff]  ;;  %v19396_v15 = vld [vmem:[#allocation19_spill] sm:$0xff] }
 0x1a6   : > { %19383 = vst [vmem:[#allocation13_spill] sm:$0xff] %v10820_v46  ;;  %v2550_v43 = vmul.f32 %v19384_v16, %v2438_v60  ;;  %v4198_v21 = vmul.f32 %v10749_v37, %v19385_v12  ;;  %7967 = vmatmul.mubr.f32.gmra.mxu1 %v7745_v30  ;;  %v19387_v6 = vrot.slane %v19386_v49, 2  ;;  %v19388_v2 = vrot.slane %v10602_v9, 2  ;;  %v10854_v12 = vld [vmem:[#allocation2 + $0x1e0] sm:$0xff] }
 0x1a7   : > { %v10848_v60 = vmul.f32 %v19389_v10, %v3492_v34  ;;  %v10852_v33 = vmul.f32 %v19391_v63, %v19390_v19  ;;  %19392 = vst [vmem:[#allocation5_spill] sm:$0xff] %v10854_v12  ;;  %v19393_v49 = vrot.slane %v10820_v46, 2  ;;  %v19395_v9 = vrot.slane %v10826_v13, 1  ;;  %v19399_v46 = vld [vmem:[#allocation45_spill] sm:$0xff] }
 0x1a8   : > { %v3819_v41 = vsel %vm3788_vm5, %v19387_v6, %v18042_v38  ;;  %v5448_v1 = vsel %vm3788_vm5, %v19388_v2, %v18044_v53  ;;  %v19394_v6 = vrot.slane %v10647_v18, 2  ;;  %v19397_v2 = vrot.slane %v19396_v15, 1  ;;  %v19398_v53 = vld [vmem:[#allocation35_spill] sm:$0xff] }
 0x1a9   : > { %v4093_v30 = vadd.f32 %v3819_v41, %v3255_v20  ;;  %v4310_v17 = vmul.f32 %v19398_v53, %v4198_v21  ;;  %v18061_v11 = vrot.slane %v10848_v60, 2  ;;  %v18065_v41 = vrot.slane %v10852_v33, 1 }
 0x1aa   : > { %v7170_v38 = vsel %vm3788_vm5, %v19394_v6, %v19393_v49  ;;  %v2983_v34 = vsel %vm2950_vm4, %v19397_v2, %v19395_v9  ;;  %v5122_v20 = vmul.f32 %v19391_v63, %v10790_v26  ;;  %v5827_v49 = vmul.f32 %v10749_v37, %v19399_v46  ;;  %v19400_v6 = vld [vmem:[#allocation38_spill] sm:$0xff] }
 0x1ab   : > { %v3256_v58 = vadd.f32 %v2983_v34, %v2550_v43  ;;  %v4405_v18 = vadd.f32 %v4309_v0, %v4093_v30  ;;  %v10875_v15 = vmul.f32 %v19400_v6, %v10854_v12  ;;  %v6844_v21 = vmul.f32 %v10854_v12, %v10790_v26  ;;  %v19401_v43 = vld [vmem:[#allocation56_spill] sm:$0xff]  ;;  %v19403_v34 = vld [vmem:[#allocation57_spill] sm:$0xff] }
 0x1ac   : > { %v19402_v9 = vrot.slane %v19401_v43, 2  ;;  %v19404_v0 = vrot.slane %v19403_v34, 1  ;;  %v10890_v7 = vmul.f32 %v19405_v3, %v5122_v20  ;;  %v612_v27 = vadd.f32 %v611_v22, %v19406_v52  ;;  %v19409_v22 = vld [vmem:[#allocation49_spill] sm:$0xff]  ;;  %v19418_v52 = vld [vmem:[#allocation24_spill] sm:$0xff] }
 0x1ad   : > { %v5014_v25 = vadd.f32 %v4740_v51, %v4405_v18  ;;  %v5939_v50 = vmul.f32 %v19407_v62, %v5827_v49  ;;  %v18064_v29 = vrot.slane %v10875_v15, 1  ;;  %v2436_v34 = vmul.f32 %v19346_v14, %v10749_v37  ;;  %v10906_v18 = vld [vmem:[#allocation2 + $0x320] sm:$0xff] }
 0x1ae   : > { %v3821_v2 = vsel %vm3788_vm5, %v19402_v9, %v18061_v11  ;;  %v4742_v30 = vsel %vm2950_vm4, %v19404_v0, %v18065_v41  ;;  %v18067_v43 = vrot.slane %v10890_v7, 2  ;;  %v19408_v9 = vld [vmem:[#allocation42_spill] sm:$0xff]  ;;  %v979_v8 = vmax.f32 %v612_v27, 0.0  ;;  %19411 = vst [vmem:[#allocation44_spill] sm:$0xff] %v10906_v18  ;;  %v19412_v27 = vld [vmem:[#allocation11_spill] sm:$0xff]  ;;  %v19415_v41 = vld [vmem:[#allocation60_spill] sm:$0xff] }
 0x1af   : > { %v4094_v42 = vadd.f32 %v3821_v2, %v3256_v58  ;;  %v10897_v11 = vmul.f32 %v19408_v9, %v6844_v21  ;;  %v5722_v0 = vadd.f32 %v5448_v1, %v5014_v25  ;;  %v19410_v51 = vrot.slane %v19409_v22, 1 }
 0x1b0   : > { %v10910_v49 = vmul.f32 %v10906_v18, %v19345_v44  ;;  %v19413_v21 = vrot.slane %v19412_v27, 2  ;;  %v19416_v44 = vrot.slane %v19415_v41, 2  ;;  %v19421_v41 = vld [vmem:[#allocation12_spill] sm:$0xff] }
 0x1b1   : > { %v4406_v20 = vadd.f32 %v4310_v17, %v4094_v42  ;;  %v6464_v58 = vsel %vm2950_vm4, %v19410_v51, %v18064_v29  ;;  %v18069_v25 = vrot.slane %v10897_v11, 2  ;;  %v10918_v42 = vmin.f32 %v979_v8, 6.0  ;;  %v19414_v17 = vld [vmem:[#allocation14_spill] sm:$0xff] }
 0x1b2   : > { %v5450_v14 = vsel %vm3788_vm5, %v19413_v21, %v18067_v43  ;;  %v2548_v1 = vmul.f32 %v19414_v17, %v2436_v34  ;;  %v6034_v2 = vadd.f32 %v5938_v23, %v5722_v0  ;;  %v18070_v51 = vrot.slane %v10910_v49, 1  ;;  %v19417_v43 = vld [vmem:[#allocation52_spill] sm:$0xff]  ;;  %v19419_v0 = vld [vmem:[#allocation46_spill] sm:$0xff] }
 0x1b3   : > { %v5015_v22 = vadd.f32 %v4742_v30, %v4406_v20  ;;  %v3490_v29 = vmul.f32 %v10906_v18, %v10790_v26  ;;  %v7172_v27 = vsel %vm3788_vm5, %v19416_v44, %v18069_v25  ;;  %v18072_v21 = vrot.slane %v10918_v42, 7  ;;  %v10944_v44 = vld [vmem:[#allocation2 + $0xd8] sm:$0xff] }
 0x1b4   : > { %v4196_v8 = vmul.f32 %v10749_v37, %v19417_v43  ;;  %v10934_v23 = vmul.f32 %v10437_v47, %v19418_v52  ;;  %v6736_v30 = vadd.f32 %v6462_v5, %v6034_v2  ;;  %v19420_v20 = vrot.slane %v19419_v0, 1  ;;  %v19423_v5 = vld [vmem:[#allocation26_spill] sm:$0xff] }
 0x1b5   : > { %v5723_v34 = vadd.f32 %v5450_v14, %v5015_v22  ;;  %v10942_v17 = vmul.f32 %v19421_v41, %v3490_v29  ;;  %v19422_v43 = vrot.slane %v10656_v36, 7  ;;  %v5120_v29 = vmul.f32 %v10437_v47, %v10790_v26 }
 0x1b6   : > { %v2979_v18 = vsel %vm2950_vm4, %v19420_v20, %v18070_v51  ;;  %v4308_v14 = vmul.f32 %v19423_v5, %v4196_v8  ;;  %v18071_v2 = vrot.slane %v10934_v23, 1  ;;  %v7444_v22 = vadd.f32 %v7170_v38, %v6736_v30  ;;  %v19426_v30 = vld [vmem:[#allocation29_spill] sm:$0xff] }
 0x1b7   : > { %v1425_v25 = vsel %vm1330_vm7, %v19422_v43, %v18072_v21  ;;  %v3254_v52 = vadd.f32 %v2979_v18, %v2548_v1  ;;  %v6035_v0 = vadd.f32 %v5939_v50, %v5723_v34  ;;  %v18076_v20 = vrot.slane %v10942_v17, 2 }
 0x1b8   : > { %1667 = vst [vmem:[#allocation2 + $0x260] sm:$0xff] %v1425_v25  ;;  %v19424_v51 = vrot.slane %v10663_v59, 1  ;;  %v5825_v18 = vmul.f32 %v10749_v37, %v10672_v40  ;;  %v10965_v1 = vmul.f32 %v19304_v45, %v10944_v44  ;;  %v6842_v50 = vmul.f32 %v10944_v44, %v10790_v26 }
 0x1b9   : > { %v7557_v38 = vadd.f32 %v19364_v35, %v7444_v22  ;;  %v6737_v25 = vadd.f32 %v6464_v58, %v6035_v0  ;;  %v19425_v8 = vrot.slane %v10659_v32, 2  ;;  %v8823_v0 = vld [vmem:[#allocation2 + $0x2c8] sm:$0xff] }
 0x1ba   : > { %v4738_v36 = vsel %vm2950_vm4, %v19424_v51, %v18071_v2  ;;  %v10976_v51 = vmul.f32 %v19239_v31, %v5120_v29  ;;  %v5937_v34 = vmul.f32 %v19426_v30, %v5825_v18  ;;  %v18075_v43 = vrot.slane %v10965_v1, 1 }
 0x1bb   : > { %v3817_v59 = vsel %vm3788_vm5, %v19425_v8, %v18076_v20  ;;  %v10981_v2 = vmul.f32 %v19198_v24, %v6842_v50  ;;  %v7653_v26 = vmax.f32 %v7557_v38, 0.0  ;;  %v7445_v22 = vadd.f32 %v7172_v27, %v6737_v25  ;;  %v10991_v8 = vld [vmem:[#allocation2 + $0x150] sm:$0xff]  ;;  %v19430_v38 = vld [vmem:[#allocation43_spill] sm:$0xff] }
 0x1bc   : > { %v4092_v37 = vadd.f32 %v3817_v59, %v3254_v52  ;;  %v18074_v58 = vrot.slane %v10976_v51, 2  ;;  %v2553_v32 = vmul.f32 %v8823_v0, %v19384_v16  ;;  %v19427_v29 = vrot.slane %v10699_v48, 1  ;;  %19428 = vst [vmem:[#allocation61_spill] sm:$0xff] %v10991_v8 }
 0x1bd   : > { %v18073_v18 = vrot.slane %v10981_v2, 2  ;;  %v10995_v50 = vmul.f32 %v10991_v8, %v19266_v61  ;;  %v7749_v27 = vmin.f32 %v7653_v26, 6.0  ;;  %v7558_v25 = vadd.f32 %v19430_v38, %v7445_v22 }
 0x1be   : > { %v4404_v21 = vadd.f32 %v4308_v14, %v4092_v37  ;;  %v6460_v52 = vsel %vm2950_vm4, %v19427_v29, %v18075_v43  ;;  %v19431_v14 = vrot.slane %v10683_v39, 2  ;;  %v11006_v48 = vsel %vm3378_vm2, %v10767_v57, %v19378_v54 }
 0x1bf   : > { %19429 = vst [vmem:[#allocation59_spill] sm:$0xff] %v10995_v50  ;;  %v19432_v0 = vrot.slane %v10724_v4, 2  ;;  %v18078_v22 = vrot.slane %v10995_v50, 1  ;;  %v3495_v29 = vmul.f32 %v10991_v8, %v11006_v48  ;;  %7971 = vmatprep.mubr.f32.mxu1 %v7749_v27  ;;  %v7654_v39 = vmax.f32 %v7558_v25, 0.0  ;;  %v11024_v4 = vld [vmem:[#allocation2 + $0x290] sm:$0xff]  ;;  %v19460_v50 = vld [vmem:[#allocation15_spill] sm:$0xff] }
 0x1c0   : > { %v5446_v59 = vsel %vm3788_vm5, %v19431_v14, %v18074_v58  ;;  %v5013_v37 = vadd.f32 %v4738_v36, %v4404_v21  ;;  %v4313_v14 = vmul.f32 %v19391_v63, %v19398_v53  ;;  %v11020_v57 = vmul.f32 %v19399_v46, %v19390_v19  ;;  %19434 = vst [vmem:[#allocation56_spill] sm:$0xff] %v11024_v4 }
 0x1c1   : > { %v7168_v26 = vsel %vm3788_vm5, %v19432_v0, %v18073_v18  ;;  %v5125_v21 = vmul.f32 %v19399_v46, %v11006_v48  ;;  %v19435_v0 = vrot.slane %v10826_v13, 1  ;;  %v11032_v25 = vmul.f32 %v19389_v10, %v3495_v29  ;;  %v613_v18 = vpop.f32.mrf.mxu0 }
 0x1c2   : > { %19433 = vst [vmem:[#allocation19_spill] sm:$0xff] %v11020_v57  ;;  %v5721_v36 = vadd.f32 %v5446_v59, %v5013_v37  ;;  %v5942_v63 = vmul.f32 %v10854_v12, %v19407_v62  ;;  %v7750_v58 = vmin.f32 %v7654_v39, 6.0  ;;  %v18080_v20 = vrot.slane %v11020_v57, 1 }
 0x1c3   : > { %v2989_v27 = vsel %vm2950_vm4, %v19435_v0, %v18078_v22  ;;  %19436 = vst [vmem:[#allocation57_spill] sm:$0xff] %v11032_v25  ;;  %v11038_v53 = vmul.f32 %v19405_v3, %v5125_v21  ;;  %v18082_v37 = vrot.slane %v11032_v25, 2  ;;  %v11043_v13 = vmul.f32 %v19400_v6, %v11024_v4  ;;  %v19453_v3 = vld [vmem:[#allocation51_spill] sm:$0xff]  ;;  %v617_v19 = vpop.f32.mrf.mxu0 }
 0x1c4   : > { %v3259_v43 = vadd.f32 %v2989_v27, %v2553_v32  ;;  %v6033_v59 = vadd.f32 %v5937_v34, %v5721_v36  ;;  %v6847_v29 = vmul.f32 %v11024_v4, %v11006_v48  ;;  %8764 = vmatprep.mubr.f32.mxu0 %v7750_v58  ;;  %v19439_v32 = vrot.slane %v10852_v33, 1  ;;  %v8825_v36 = vld [vmem:[#allocation2 + $0x28] sm:$0xff]  ;;  %v19458_v4 = vld [vmem:[#allocation28_spill] sm:$0xff] }
 0x1c5   : > { %19437 = vst [vmem:[#allocation49_spill] sm:$0xff] %v11038_v53  ;;  %19438 = vst [vmem:[#allocation11_spill] sm:$0xff] %v11043_v13  ;;  %v18081_v21 = vrot.slane %v11038_v53, 2  ;;  %v614_v34 = vadd.f32 %v613_v18, %v9575_v56  ;;  %v2552_v0 = vmul.f32 %v8825_v36, %v19249_v55  ;;  %v19440_v22 = vrot.slane %v10848_v60, 2 }
 0x1c6   : > { %v4748_v39 = vsel %vm2950_vm4, %v19439_v32, %v18080_v20  ;;  %v6735_v27 = vadd.f32 %v6460_v52, %v6033_v59  ;;  %v18084_v62 = vrot.slane %v11043_v13, 1  ;;  %v11062_v33 = vmul.f32 %v19408_v9, %v6847_v29  ;;  %v11069_v52 = vld [vmem:[#allocation2 + $0x1a0] sm:$0xff]  ;;  %v19450_v9 = vld [vmem:[#allocation25_spill] sm:$0xff] }
 0x1c7   : > { %v3827_v58 = vsel %vm3788_vm5, %v19440_v22, %v18082_v37  ;;  %v19442_v18 = vrot.slane %v10890_v7, 2  ;;  %v980_v36 = vmax.f32 %v614_v34, 0.0  ;;  %v11073_v60 = vmul.f32 %v11069_v52, %v19204_v28  ;;  %v19445_v37 = vld [vmem:[#allocation17_spill] sm:$0xff] }
 0x1c8   : > { %19441 = vst [vmem:[#allocation60_spill] sm:$0xff] %v11062_v33  ;;  %v4097_v32 = vadd.f32 %v3827_v58, %v3259_v43  ;;  %v7443_v22 = vadd.f32 %v7168_v26, %v6735_v27  ;;  %v19443_v59 = vrot.slane %v10875_v15, 1  ;;  %v18089_v29 = vrot.slane %v11062_v33, 2  ;;  %v19446_v26 = vld [vmem:[#allocation39_spill] sm:$0xff] }
 0x1c9   : > { %v5456_v20 = vsel %vm3788_vm5, %v19442_v18, %v18081_v21  ;;  %v3494_v7 = vmul.f32 %v11069_v52, %v11006_v48  ;;  %v11083_v34 = vmin.f32 %v980_v36, 6.0  ;;  %v19444_v21 = vld [vmem:[#allocation23_spill] sm:$0xff]  ;;  %v19447_v15 = vrot.slane %v10897_v11, 2 }
 0x1ca   : > { %v6470_v43 = vsel %vm2950_vm4, %v19443_v59, %v18084_v62  ;;  %v4409_v58 = vadd.f32 %v4313_v14, %v4097_v32  ;;  %v4312_v53 = vmul.f32 %v19445_v37, %v19444_v21  ;;  %v7556_v27 = vadd.f32 %v19446_v26, %v7443_v22  ;;  %v19448_v62 = vld [vmem:[#allocation8_spill] sm:$0xff]  ;;  %v19451_v14 = vld [vmem:[#allocation7_spill] sm:$0xff] }
 0x1cb   : > { %v7178_v59 = vsel %vm3788_vm5, %v19447_v15, %v18089_v29  ;;  %v11095_v13 = vmul.f32 %v19448_v62, %v3494_v7  ;;  %v11099_v32 = vmul.f32 %v19451_v14, %v19450_v9  ;;  %v18099_v18 = vrot.slane %v11083_v34, 7  ;;  %v11109_v15 = vld [vmem:[#allocation2 + $0x8] sm:$0xff] }
 0x1cc   : > { %v5018_v36 = vadd.f32 %v4748_v39, %v4409_v58  ;;  %v19452_v37 = vrot.slane %v11073_v60, 1  ;;  %v19454_v22 = vrot.slane %v19453_v3, 1  ;;  %v5124_v11 = vmul.f32 %v19451_v14, %v11006_v48  ;;  %19455 = vst [vmem:[#allocation46_spill] sm:$0xff] %v11109_v15  ;;  %v19456_v58 = vld [vmem:[#allocation47_spill] sm:$0xff] }
 0x1cd   : > { %19449 = vst [vmem:[#allocation52_spill] sm:$0xff] %v11095_v13  ;;  %v7652_v7 = vmax.f32 %v7556_v27, 0.0  ;;  %v18102_v57 = vrot.slane %v11095_v13, 2  ;;  %v18105_v25 = vrot.slane %v11099_v32, 1  ;;  %v19457_v6 = vrot.slane %v19456_v58, 7  ;;  %v19467_v13 = vld [vmem:[#allocation14_spill] sm:$0xff] }
 0x1ce   : > { %v2987_v33 = vsel %vm2950_vm4, %v19454_v22, %v19452_v37  ;;  %v5726_v39 = vadd.f32 %v5456_v20, %v5018_v36  ;;  %v11119_v37 = vmul.f32 %v19458_v4, %v5124_v11  ;;  %v19459_v22 = vld [vmem:[#allocation30_spill] sm:$0xff]  ;;  %v19465_v11 = vld [vmem:[#allocation31_spill] sm:$0xff] }
 0x1cf   : > { %v3258_v29 = vadd.f32 %v2987_v33, %v2552_v0  ;;  %v1427_v3 = vsel %vm1330_vm7, %v19457_v6, %v18099_v18  ;;  %v5941_v12 = vmul.f32 %v19460_v50, %v19459_v22  ;;  %v7748_v27 = vmin.f32 %v7652_v7, 6.0  ;;  %v19461_v0 = vld [vmem:[#allocation58_spill] sm:$0xff] }
 0x1d0   : > { %1668 = vst [vmem:[#allocation2 + $0x268] sm:$0xff] %v1427_v3  ;;  %v19462_v33 = vrot.slane %v19461_v0, 2  ;;  %v19463_v36 = vld [vmem:[#allocation50_spill] sm:$0xff]  ;;  %v11135_v18 = vmul.f32 %v19465_v11, %v11109_v15  ;;  %v6038_v10 = vadd.f32 %v5942_v63, %v5726_v39  ;;  %v18109_v7 = vrot.slane %v11119_v37, 2  ;;  %v19471_v39 = vld [vmem:[#allocation55_spill] sm:$0xff] }
 0x1d1   : > { %v19464_v58 = vrot.slane %v19463_v36, 1  ;;  %v6846_v3 = vmul.f32 %v11109_v15, %v11006_v48  ;;  %7972 = vmatmul.mubr.f32.gmra.mxu1 %v7748_v27  ;;  %v19468_v36 = vld [vmem:[#allocation44_spill] sm:$0xff]  ;;  %v19473_v0 = vld [vmem:[#allocation34_spill] sm:$0xff] }
 0x1d2   : > { %v3825_v20 = vsel %vm3788_vm5, %v19462_v33, %v18102_v57  ;;  %v19466_v33 = vld [vmem:[#allocation20_spill] sm:$0xff]  ;;  %v2551_v16 = vmul.f32 %v19468_v36, %v19467_v13  ;;  %v6740_v63 = vadd.f32 %v6470_v43, %v6038_v10  ;;  %v19475_v36 = vld [vmem:[#allocation53_spill] sm:$0xff] }
 0x1d3   : > { %v4746_v6 = vsel %vm2950_vm4, %v19464_v58, %v18105_v25  ;;  %v4096_v46 = vadd.f32 %v3825_v20, %v3258_v29  ;;  %v618_v57 = vadd.f32 %v617_v19, %v19466_v33  ;;  %v11144_v58 = vld [vmem:[#allocation2 + $0x190] sm:$0xff]  ;;  %v19472_v20 = vrot.slane %v19471_v39, 2 }
 0x1d4   : > { %v19469_v25 = vld [vmem:[#allocation6_spill] sm:$0xff]  ;;  %v11156_v8 = vmul.f32 %v19473_v0, %v6846_v3  ;;  %v19474_v19 = vrot.slane %v11135_v18, 1  ;;  %v19476_v13 = vrot.slane %v19475_v36, 1  ;;  %v3493_v10 = vmul.f32 %v11144_v58, %v11006_v48 }
 0x1d5   : > { %v11148_v61 = vmul.f32 %v11144_v58, %v19469_v25  ;;  %v4408_v29 = vadd.f32 %v4312_v53, %v4096_v46  ;;  %v5454_v27 = vsel %vm3788_vm5, %v19472_v20, %v18109_v7  ;;  %v982_v4 = vmax.f32 %v618_v57, 0.0 }
 0x1d6   : > { %v6468_v33 = vsel %vm2950_vm4, %v19476_v13, %v19474_v19  ;;  %v7448_v46 = vadd.f32 %v7178_v59, %v6740_v63  ;;  %v18113_v43 = vrot.slane %v11156_v8, 2  ;;  %v4311_v3 = vmul.f32 %v10437_v47, %v19423_v5  ;;  %v19478_v19 = vld [vmem:[#allocation24_spill] sm:$0xff]  ;;  %v8707_v63 = vpop.f32.mrf.mxu1 }
 0x1d7   : > { %19470 = vst [vmem:[#allocation17_spill] sm:$0xff] %v11148_v61  ;;  %v18108_v25 = vrot.slane %v11148_v61, 1  ;;  %v5017_v53 = vadd.f32 %v4746_v6, %v4408_v29  ;;  %v11169_v39 = vmin.f32 %v982_v4, 6.0  ;;  %v19477_v20 = vrot.slane %v10910_v49, 1  ;;  %v11183_v6 = vld [vmem:[#allocation2 + $0x370] sm:$0xff]  ;;  %v19479_v29 = vld [vmem:[#allocation13_spill] sm:$0xff] }
 0x1d8   : > { %v11177_v13 = vmul.f32 %v19421_v41, %v3493_v10  ;;  %v11181_v59 = vmul.f32 %v10672_v40, %v19478_v19  ;;  %v7561_v47 = vadd.f32 %v19430_v38, %v7448_v46  ;;  %v19480_v36 = vrot.slane %v19479_v29, 2 }
 0x1d9   : > { %v2985_v57 = vsel %vm2950_vm4, %v19477_v20, %v18108_v25  ;;  %v5725_v4 = vadd.f32 %v5454_v27, %v5017_v53  ;;  %v18115_v10 = vrot.slane %v11169_v39, 7  ;;  %v5123_v5 = vmul.f32 %v10672_v40, %v11006_v48  ;;  %v619_v53 = vpop.f32.mrf.mxu0 }
 0x1da   : > { %v7176_v49 = vsel %vm3788_vm5, %v19480_v36, %v18113_v43  ;;  %v3257_v20 = vadd.f32 %v2985_v57, %v2551_v16  ;;  %v18116_v25 = vrot.slane %v11177_v13, 2  ;;  %v18125_v7 = vrot.slane %v11181_v59, 1  ;;  %v862_v43 = vpop.f32.mrf.mxu1 }
 0x1db   : > { %v7657_v41 = vmax.f32 %v7561_v47, 0.0  ;;  %v6037_v61 = vadd.f32 %v5941_v12, %v5725_v4  ;;  %v5940_v27 = vmul.f32 %v10944_v44, %v19426_v30  ;;  %v11200_v46 = vmul.f32 %v19304_v45, %v11183_v6 }
 0x1dc   : > { %v19481_v16 = vrot.slane %v10918_v42, 7  ;;  %v19482_v29 = vrot.slane %v10942_v17, 2  ;;  %v19483_v47 = vrot.slane %v10934_v23, 1  ;;  %v11218_v36 = vmul.f32 %v19239_v31, %v5123_v5 }
 0x1dd   : > { %v7753_v38 = vmin.f32 %v7657_v41, 6.0  ;;  %v6739_v42 = vadd.f32 %v6468_v33, %v6037_v61  ;;  %v620_v23 = vadd.f32 %v619_v53, %v9575_v56  ;;  %v19485_v61 = vrot.slane %v10965_v1, 1  ;;  %v19487_v1 = vld [vmem:[#allocation3_spill] sm:$0xff] }
 0x1de   : > { %v1431_v57 = vsel %vm1330_vm7, %v19481_v16, %v18115_v10  ;;  %v3823_v12 = vsel %vm3788_vm5, %v19482_v29, %v18116_v25  ;;  %v4744_v4 = vsel %vm2950_vm4, %v19483_v47, %v18125_v7  ;;  %v18123_v10 = vrot.slane %v11200_v46, 1  ;;  %v19484_v25 = vld [vmem:[#allocation22_spill] sm:$0xff] }
 0x1df   : > { %1670 = vst [vmem:[#allocation2 + $0x1c0] sm:$0xff] %v1431_v57  ;;  %v4095_v16 = vadd.f32 %v3823_v12, %v3257_v20  ;;  %v18118_v17 = vrot.slane %v11218_v36, 2  ;;  %v6845_v29 = vmul.f32 %v11183_v6, %v11006_v48  ;;  %v868_v30 = vadd.f32 %v8707_v63, %v19484_v25  ;;  %8765 = vmatmul.mubr.f32.gmra.mxu0 %v7753_v38 }
 0x1e0   : > { %v7447_v47 = vadd.f32 %v7176_v49, %v6739_v42  ;;  %v6466_v41 = vsel %vm2950_vm4, %v19485_v61, %v18123_v10  ;;  %v863_v33 = vadd.f32 %v862_v43, %v19484_v25  ;;  %v19486_v20 = vrot.slane %v10976_v51, 2  ;;  %v11338_v10 = vld [vmem:[#allocation2 + $0x348] sm:$0xff] }
 0x1e1   : > { %v4407_v5 = vadd.f32 %v4311_v3, %v4095_v16  ;;  %v11238_v63 = vmul.f32 %v19198_v24, %v6845_v29  ;;  %v990_v38 = vmax.f32 %v868_v30, 0.0  ;;  %v983_v49 = vmax.f32 %v620_v23, 0.0 }
 0x1e2   : > { %v5452_v48 = vsel %vm3788_vm5, %v19486_v20, %v18118_v17  ;;  %v7560_v3 = vadd.f32 %v19364_v35, %v7447_v47  ;;  %v987_v57 = vmax.f32 %v863_v33, 0.0  ;;  %v1725_v12 = vadd.s32 48, %v19487_v1 }
 0x1e3   : > { %v5016_v53 = vadd.f32 %v4744_v4, %v4407_v5  ;;  %v18122_v42 = vrot.slane %v11238_v63, 2  ;;  %v11243_v43 = vmin.f32 %v990_v38, 6.0  ;;  %v11245_v16 = vmin.f32 %v983_v49, 6.0 }
 0x1e4   : > { %v1726_v51 = vadd.s32 56, %v19487_v1  ;;  %v7656_v61 = vmax.f32 %v7560_v3, 0.0  ;;  %v1083_v29 = vmin.f32 %v987_v57, 6.0  ;;  %v1797_v17 = vand.u32 15, %v1725_v12 }
 0x1e5   : > { %19488 = vst [vmem:[#allocation7_spill] sm:$0xff] %v11243_v43  ;;  %19489 = vst [vmem:[#allocation51_spill] sm:$0xff] %v11245_v16  ;;  %v5724_v20 = vadd.f32 %v5452_v48, %v5016_v53  ;;  %v19490_v30 = vrot.slane %v10981_v2, 2  ;;  %v18119_v23 = vrot.slane %v11243_v43, 7  ;;  %v18120_v47 = vrot.slane %v11245_v16, 7  ;;  %v19492_v53 = vld [vmem:[#allocation48_spill] sm:$0xff] }
 0x1e6   : > { %v1804_v5 = vand.u32 15, %v1726_v51  ;;  %v7752_v33 = vmin.f32 %v7656_v61, 6.0  ;;  %v1440_v49 = vrot.slane %v1083_v29, 7  ;;  %vm2141_vm11 = vcmp.gt.s32.totalorder %v1797_v17, 0  ;;  %v11263_v2 = vld [vmem:[#allocation2 + $0x270] sm:$0xff]  ;;  %v11269_v51 = vld [vmem:[#allocation2 + $0x168] sm:$0xff] }
 0x1e7   : > { %v7174_v4 = vsel %vm3788_vm5, %v19490_v30, %v18122_v42  ;;  %v6036_v38 = vadd.f32 %v5940_v27, %v5724_v20  ;;  %v19491_v48 = vrot.slane %v11083_v34, 7  ;;  %v11261_v57 = vsel %vm2141_vm11, 1.0, %v19492_v53  ;;  %19493 = vst [vmem:[#allocation47_spill] sm:$0xff] %v11263_v2  ;;  %19495 = vst [vmem:[#allocation50_spill] sm:$0xff] %v11269_v51  ;;  %v19496_v17 = vld [vmem:[#allocation54_spill] sm:$0xff]  ;;  %v19510_v43 = vld [vmem:[#allocation45_spill] sm:$0xff] }
 0x1e8   : > { %vm2238_vm12 = vcmp.lt.s32.totalorder %v1804_v5, 15  ;;  %v11267_v12 = vmul.f32 %v11263_v2, %v19204_v28  ;;  %7976 = vmatprep.mubr.f32.mxu1 %v7752_v33  ;;  %v19497_v61 = vrot.slane %v19496_v17, 7  ;;  %v1447_v20 = vsel %vm1330_vm7, %v1440_v49, %v18119_v23 }
 0x1e9   : > { %v1433_v3 = vsel %vm1330_vm7, %v19491_v48, %v18120_v47  ;;  %v6738_v27 = vadd.f32 %v6466_v41, %v6036_v38  ;;  %v8548_v29 = vsel %vm2238_vm12, 1.0, %v19492_v53  ;;  %1678 = vst [vmem:[#allocation2 + $0xa0] sm:$0xff] %v1447_v20  ;;  %v2443_v30 = vmul.f32 %v11069_v52, %v11261_v57 }
 0x1ea   : > { %19494 = vst [vmem:[#allocation58_spill] sm:$0xff] %v11267_v12  ;;  %1671 = vst [vmem:[#allocation2 + $0xa8] sm:$0xff] %v1433_v3  ;;  %v1441_v34 = vsel %vm1330_vm7, %v19497_v61, %v1440_v49  ;;  %v18121_v5 = vrot.slane %v11267_v12, 1  ;;  %v11281_v33 = vrot.slane %v8548_v29, 6  ;;  %v4203_v41 = vmul.f32 %v11261_v57, %v19451_v14  ;;  %v19531_v12 = vld [vmem:[#allocation36_spill] sm:$0xff] }
 0x1eb   : > { %1675 = vst [vmem:[#allocation2 + $0x1d0] sm:$0xff] %v1441_v34  ;;  %v7446_v38 = vadd.f32 %v7174_v4, %v6738_v27  ;;  %v11287_v48 = vmul.f32 %v19460_v50, %v19450_v9  ;;  %v5832_v49 = vmul.f32 %v11261_v57, %v11109_v15  ;;  %v11293_v3 = vmul.f32 %v19465_v11, %v11269_v51  ;;  %v19514_v11 = vld [vmem:[#allocation16_spill] sm:$0xff] }
 0x1ec   : > { %v2555_v52 = vmul.f32 %v19249_v55, %v2443_v30  ;;  %v19500_v53 = vrot.slane %v11073_v60, 1  ;;  %v11304_v4 = vsel %vm3378_vm2, %v19378_v54, %v11281_v33  ;;  %v4315_v27 = vmul.f32 %v19444_v21, %v4203_v41  ;;  %v19532_v9 = vld [vmem:[#allocation20_spill] sm:$0xff]  ;;  %v19533_v21 = vld [vmem:[#allocation41_spill] sm:$0xff] }
 0x1ed   : > { %19498 = vst [vmem:[#allocation44_spill] sm:$0xff] %v11287_v48  ;;  %19499 = vst [vmem:[#allocation55_spill] sm:$0xff] %v11293_v3  ;;  %v7559_v17 = vadd.f32 %v19446_v26, %v7446_v38  ;;  %v3497_v61 = vmul.f32 %v11263_v2, %v11304_v4  ;;  %v18124_v34 = vrot.slane %v11287_v48, 1  ;;  %v5127_v20 = vmul.f32 %v19460_v50, %v11304_v4  ;;  %v19517_v48 = vld [vmem:[#allocation5_spill] sm:$0xff] }
 0x1ee   : > { %v2993_v14 = vsel %vm2950_vm4, %v19500_v53, %v18121_v5  ;;  %v5944_v29 = vmul.f32 %v19459_v22, %v5832_v49  ;;  %v18126_v30 = vrot.slane %v11293_v3, 1  ;;  %v6849_v53 = vmul.f32 %v11269_v51, %v11304_v4  ;;  %v19503_v5 = vld [vmem:[#allocation28_spill] sm:$0xff]  ;;  %v623_v22 = vpop.f32.mrf.mxu0 }
 0x1ef   : > { %v3261_v60 = vadd.f32 %v2993_v14, %v2555_v52  ;;  %v7655_v23 = vmax.f32 %v7559_v17, 0.0  ;;  %v11318_v41 = vmul.f32 %v19448_v62, %v3497_v61  ;;  %v19502_v38 = vrot.slane %v11099_v32, 1  ;;  %v19507_v17 = vld [vmem:[#allocation61_spill] sm:$0xff]  ;;  %v19508_v32 = vld [vmem:[#allocation10_spill] sm:$0xff] }
 0x1f0   : > { %v11326_v42 = vmul.f32 %v19503_v5, %v5127_v20  ;;  %v19505_v49 = vrot.slane %v11135_v18, 1  ;;  %v11334_v14 = vmul.f32 %v19473_v0, %v6849_v53  ;;  %v2444_v61 = vmul.f32 %v19507_v17, %v11261_v57  ;;  %v19516_v17 = vld [vmem:[#allocation32_spill] sm:$0xff] }
 0x1f1   : > { %19501 = vst [vmem:[#allocation53_spill] sm:$0xff] %v11318_v41  ;;  %v4752_v47 = vsel %vm2950_vm4, %v19502_v38, %v18124_v34  ;;  %v11342_v38 = vmul.f32 %v11338_v10, %v19508_v32  ;;  %v7751_v20 = vmin.f32 %v7655_v23, 6.0  ;;  %v18136_v34 = vrot.slane %v11318_v41, 2  ;;  %v19511_v23 = vld [vmem:[#allocation52_spill] sm:$0xff] }
 0x1f2   : > { %19504 = vst [vmem:[#allocation13_spill] sm:$0xff] %v11326_v42  ;;  %v6474_v52 = vsel %vm2950_vm4, %v19505_v49, %v18126_v30  ;;  %19506 = vst [vmem:[#allocation48_spill] sm:$0xff] %v11334_v14  ;;  %v18138_v7 = vrot.slane %v11326_v42, 2  ;;  %v3498_v18 = vmul.f32 %v11338_v10, %v11304_v4  ;;  %v19509_v49 = vld [vmem:[#allocation18_spill] sm:$0xff]  ;;  %v4204_v1 = vmul.f32 %v11261_v57, %v19510_v43  ;;  %v19522_v42 = vld [vmem:[#allocation59_spill] sm:$0xff] }
 0x1f3   : > { %v2556_v30 = vmul.f32 %v19509_v49, %v2444_v61  ;;  %7977 = vmatmul.mubr.f32.gmra.mxu1 %v7751_v20  ;;  %v19512_v25 = vrot.slane %v19511_v23, 2  ;;  %v19513_v0 = vrot.slane %v11119_v37, 2  ;;  %v11368_v51 = vmul.f32 %v19517_v48, %v19516_v17  ;;  %v11370_v43 = vld [vmem:[#allocation2 + $0x90] sm:$0xff] }
 0x1f4   : > { %v11364_v61 = vmul.f32 %v19514_v11, %v3498_v18  ;;  %19518 = vst [vmem:[#allocation61_spill] sm:$0xff] %v11370_v43  ;;  %v19519_v23 = vrot.slane %v11334_v14, 2  ;;  %v19521_v37 = vrot.slane %v11342_v38, 1  ;;  %v19525_v14 = vld [vmem:[#allocation56_spill] sm:$0xff]  ;;  %v624_v62 = vadd.f32 %v623_v22, %v19532_v9  ;;  %v19535_v22 = vld [vmem:[#allocation11_spill] sm:$0xff] }
 0x1f5   : > { %v3831_v3 = vsel %vm3788_vm5, %v19512_v25, %v18136_v34  ;;  %v5460_v53 = vsel %vm3788_vm5, %v19513_v0, %v18138_v7  ;;  %v19520_v25 = vrot.slane %v11156_v8, 2  ;;  %v19523_v0 = vrot.slane %v19522_v42, 1  ;;  %v19524_v7 = vld [vmem:[#allocation35_spill] sm:$0xff] }
 0x1f6   : > { %19515 = vst [vmem:[#allocation54_spill] sm:$0xff] %v11364_v61  ;;  %v4099_v20 = vadd.f32 %v3831_v3, %v3261_v60  ;;  %v4316_v41 = vmul.f32 %v19524_v7, %v4204_v1  ;;  %v18153_v16 = vrot.slane %v11364_v61, 2  ;;  %v18156_v3 = vrot.slane %v11368_v51, 1 }
 0x1f7   : > { %v7182_v34 = vsel %vm3788_vm5, %v19520_v25, %v19519_v23  ;;  %v2995_v18 = vsel %vm2950_vm4, %v19523_v0, %v19521_v37  ;;  %v5128_v60 = vmul.f32 %v19517_v48, %v11304_v4  ;;  %v5833_v23 = vmul.f32 %v11261_v57, %v19525_v14  ;;  %v19526_v25 = vld [vmem:[#allocation38_spill] sm:$0xff] }
 0x1f8   : > { %v3262_v5 = vadd.f32 %v2995_v18, %v2556_v30  ;;  %v4411_v8 = vadd.f32 %v4315_v27, %v4099_v20  ;;  %v11391_v42 = vmul.f32 %v19526_v25, %v11370_v43  ;;  %v6850_v1 = vmul.f32 %v11370_v43, %v11304_v4  ;;  %v19527_v30 = vld [vmem:[#allocation57_spill] sm:$0xff]  ;;  %v19529_v18 = vld [vmem:[#allocation19_spill] sm:$0xff] }
 0x1f9   : > { %v19528_v37 = vrot.slane %v19527_v30, 2  ;;  %v19530_v27 = vrot.slane %v19529_v18, 1  ;;  %v11406_v15 = vmul.f32 %v19531_v12, %v5128_v60  ;;  %v5945_v28 = vmul.f32 %v19533_v21, %v5833_v23  ;;  %v19538_v23 = vld [vmem:[#allocation6_spill] sm:$0xff] }
 0x1fa   : > { %v5020_v26 = vadd.f32 %v4752_v47, %v4411_v8  ;;  %v18155_v61 = vrot.slane %v11391_v42, 1  ;;  %v985_v2 = vmax.f32 %v624_v62, 0.0  ;;  %v2442_v18 = vmul.f32 %v11144_v58, %v11261_v57  ;;  %v11422_v8 = vld [vmem:[#allocation2 + $0x2d8] sm:$0xff]  ;;  %v19539_v62 = vld [vmem:[#allocation49_spill] sm:$0xff] }
 0x1fb   : > { %v3833_v0 = vsel %vm3788_vm5, %v19528_v37, %v18153_v16  ;;  %v4754_v20 = vsel %vm2950_vm4, %v19530_v27, %v18156_v3  ;;  %v18157_v30 = vrot.slane %v11406_v15, 2  ;;  %v19534_v37 = vld [vmem:[#allocation42_spill] sm:$0xff]  ;;  %v19536_v47 = vrot.slane %v19535_v22, 1  ;;  %19537 = vst [vmem:[#allocation45_spill] sm:$0xff] %v11422_v8 }
 0x1fc   : > { %v4100_v50 = vadd.f32 %v3833_v0, %v3262_v5  ;;  %v11413_v16 = vmul.f32 %v19534_v37, %v6850_v1  ;;  %v5728_v27 = vadd.f32 %v5460_v53, %v5020_v26  ;;  %v11426_v0 = vmul.f32 %v11422_v8, %v19538_v23  ;;  %v19542_v23 = vld [vmem:[#allocation60_spill] sm:$0xff] }
 0x1fd   : > { %v6476_v5 = vsel %vm2950_vm4, %v19536_v47, %v18155_v61  ;;  %v19540_v1 = vrot.slane %v19539_v62, 2  ;;  %v11434_v26 = vmin.f32 %v985_v2, 6.0  ;;  %v3496_v3 = vmul.f32 %v11422_v8, %v11304_v4 }
 0x1fe   : > { %v4412_v60 = vadd.f32 %v4316_v41, %v4100_v50  ;;  %v18159_v50 = vrot.slane %v11413_v16, 2  ;;  %v19541_v41 = vld [vmem:[#allocation14_spill] sm:$0xff]  ;;  %v6040_v22 = vadd.f32 %v5944_v29, %v5728_v27  ;;  %v18161_v61 = vrot.slane %v11426_v0, 1  ;;  %v19544_v27 = vld [vmem:[#allocation17_spill] sm:$0xff] }
 0x1ff   : > { %v5462_v58 = vsel %vm3788_vm5, %v19540_v1, %v18157_v30  ;;  %v2554_v53 = vmul.f32 %v19541_v41, %v2442_v18  ;;  %v19543_v9 = vrot.slane %v19542_v23, 2  ;;  %v18167_v1 = vrot.slane %v11434_v26, 7  ;;  %v19546_v23 = vld [vmem:[#allocation12_spill] sm:$0xff] }
 0x200   : > { %v5021_v47 = vadd.f32 %v4754_v20, %v4412_v60  ;;  %v4202_v2 = vmul.f32 %v11261_v57, %v10672_v40  ;;  %v11450_v29 = vmul.f32 %v10944_v44, %v19478_v19  ;;  %v6742_v20 = vadd.f32 %v6474_v52, %v6040_v22  ;;  %v19548_v52 = vld [vmem:[#allocation26_spill] sm:$0xff] }
 0x201   : > { %v7184_v62 = vsel %vm3788_vm5, %v19543_v9, %v18159_v50  ;;  %v19545_v60 = vrot.slane %v19544_v27, 1  ;;  %v11458_v8 = vmul.f32 %v19546_v23, %v3496_v3  ;;  %v11460_v9 = vld [vmem:[#allocation2 + $0xb0] sm:$0xff]  ;;  %v19547_v40 = vrot.slane %v11169_v39, 7 }
 0x202   : > { %v5729_v18 = vadd.f32 %v5462_v58, %v5021_v47  ;;  %v4314_v58 = vmul.f32 %v19548_v52, %v4202_v2  ;;  %v18162_v22 = vrot.slane %v11450_v29, 1  ;;  %v7450_v47 = vadd.f32 %v7182_v34, %v6742_v20  ;;  %v19551_v20 = vld [vmem:[#allocation29_spill] sm:$0xff] }
 0x203   : > { %v2991_v30 = vsel %vm2950_vm4, %v19545_v60, %v18161_v61  ;;  %v1437_v50 = vsel %vm1330_vm7, %v19547_v40, %v18167_v1  ;;  %v18166_v60 = vrot.slane %v11458_v8, 2  ;;  %v5126_v3 = vmul.f32 %v10944_v44, %v11304_v4 }
 0x204   : > { %v3260_v19 = vadd.f32 %v2991_v30, %v2554_v53  ;;  %v6041_v27 = vadd.f32 %v5945_v28, %v5729_v18  ;;  %1673 = vst [vmem:[#allocation2 + $0x2b8] sm:$0xff] %v1437_v50  ;;  %v19549_v61 = vrot.slane %v11181_v59, 1  ;;  %v5831_v30 = vmul.f32 %v11261_v57, %v11183_v6 }
 0x205   : > { %v11481_v53 = vmul.f32 %v19304_v45, %v11460_v9  ;;  %v6848_v28 = vmul.f32 %v11460_v9, %v11304_v4  ;;  %v7563_v34 = vadd.f32 %v19364_v35, %v7450_v47  ;;  %v19550_v2 = vrot.slane %v11177_v13, 2 }
 0x206   : > { %v4750_v39 = vsel %vm2950_vm4, %v19549_v61, %v18162_v22  ;;  %v6743_v50 = vadd.f32 %v6476_v5, %v6041_v27  ;;  %v11492_v61 = vmul.f32 %v19239_v31, %v5126_v3  ;;  %v5943_v18 = vmul.f32 %v19551_v20, %v5831_v30 }
 0x207   : > { %v3829_v59 = vsel %vm3788_vm5, %v19550_v2, %v18166_v60  ;;  %v18165_v40 = vrot.slane %v11481_v53, 1  ;;  %v11497_v22 = vmul.f32 %v19198_v24, %v6848_v28  ;;  %v7659_v4 = vmax.f32 %v7563_v34, 0.0  ;;  %v11508_v2 = vld [vmem:[#allocation2 + $0x258] sm:$0xff] }
 0x208   : > { %v4098_v57 = vadd.f32 %v3829_v59, %v3260_v19  ;;  %v7451_v47 = vadd.f32 %v7184_v62, %v6743_v50  ;;  %v18164_v5 = vrot.slane %v11492_v61, 2  ;;  %v2559_v13 = vmul.f32 %v11338_v10, %v19509_v49  ;;  %19553 = vst [vmem:[#allocation52_spill] sm:$0xff] %v11508_v2  ;;  %v19555_v34 = vld [vmem:[#allocation43_spill] sm:$0xff] }
 0x209   : > { %v19552_v3 = vrot.slane %v11200_v46, 1  ;;  %v18163_v30 = vrot.slane %v11497_v22, 2  ;;  %v11512_v28 = vmul.f32 %v11508_v2, %v19508_v32  ;;  %v7755_v62 = vmin.f32 %v7659_v4, 6.0 }
 0x20a   : > { %v4410_v27 = vadd.f32 %v4314_v58, %v4098_v57  ;;  %v7564_v50 = vadd.f32 %v19555_v34, %v7451_v47  ;;  %v19556_v10 = vrot.slane %v11218_v36, 2  ;;  %v11523_v46 = vsel %vm3378_vm2, %v11281_v33, %v19378_v54 }
 0x20b   : > { %v6472_v19 = vsel %vm2950_vm4, %v19552_v3, %v18165_v40  ;;  %19554 = vst [vmem:[#allocation5_spill] sm:$0xff] %v11512_v28  ;;  %v19557_v57 = vrot.slane %v11238_v63, 2  ;;  %v18168_v47 = vrot.slane %v11512_v28, 1  ;;  %v3501_v3 = vmul.f32 %v11508_v2, %v11523_v46  ;;  %7981 = vmatprep.mubr.f32.mxu1 %v7755_v62  ;;  %v11541_v63 = vld [vmem:[#allocation2 + $0xe8] sm:$0xff]  ;;  %v19586_v28 = vld [vmem:[#allocation28_spill] sm:$0xff] }
 0x20c   : > { %v5458_v58 = vsel %vm3788_vm5, %v19556_v10, %v18164_v5  ;;  %v5019_v59 = vadd.f32 %v4750_v39, %v4410_v27  ;;  %v7660_v36 = vmax.f32 %v7564_v50, 0.0  ;;  %v4319_v10 = vmul.f32 %v19517_v48, %v19524_v7  ;;  %19559 = vst [vmem:[#allocation57_spill] sm:$0xff] %v11541_v63 }
 0x20d   : > { %v7180_v4 = vsel %vm3788_vm5, %v19557_v57, %v18163_v30  ;;  %v11537_v33 = vmul.f32 %v19525_v14, %v19516_v17  ;;  %v5131_v39 = vmul.f32 %v19525_v14, %v11523_v46  ;;  %v19560_v57 = vrot.slane %v11342_v38, 1  ;;  %v625_v30 = vpop.f32.mrf.mxu0 }
 0x20e   : > { %v5727_v27 = vadd.f32 %v5458_v58, %v5019_v59  ;;  %v11549_v50 = vmul.f32 %v19514_v11, %v3501_v3  ;;  %v5948_v48 = vmul.f32 %v11370_v43, %v19533_v21  ;;  %v7756_v5 = vmin.f32 %v7660_v36, 6.0  ;;  %v19588_v43 = vld [vmem:[#allocation50_spill] sm:$0xff] }
 0x20f   : > { %19558 = vst [vmem:[#allocation59_spill] sm:$0xff] %v11537_v33  ;;  %v3001_v62 = vsel %vm2950_vm4, %v19560_v57, %v18168_v47  ;;  %v18171_v60 = vrot.slane %v11537_v33, 1  ;;  %v11555_v1 = vmul.f32 %v19531_v12, %v5131_v39  ;;  %v11560_v38 = vmul.f32 %v19526_v25, %v11541_v63  ;;  %v19566_v47 = vld [vmem:[#allocation54_spill] sm:$0xff]  ;;  %v19578_v33 = vld [vmem:[#allocation25_spill] sm:$0xff]  ;;  %v629_v11 = vpop.f32.mrf.mxu0 }
 0x210   : > { %19561 = vst [vmem:[#allocation19_spill] sm:$0xff] %v11549_v50  ;;  %v3265_v40 = vadd.f32 %v3001_v62, %v2559_v13  ;;  %v6039_v58 = vadd.f32 %v5943_v18, %v5727_v27  ;;  %v18173_v59 = vrot.slane %v11549_v50, 2  ;;  %v6853_v3 = vmul.f32 %v11541_v63, %v11523_v46  ;;  %8767 = vmatprep.mubr.f32.mxu0 %v7756_v5  ;;  %v19565_v27 = vld [vmem:[#allocation47_spill] sm:$0xff]  ;;  %v19581_v50 = vld [vmem:[#allocation58_spill] sm:$0xff] }
 0x211   : > { %19562 = vst [vmem:[#allocation11_spill] sm:$0xff] %v11555_v1  ;;  %19563 = vst [vmem:[#allocation49_spill] sm:$0xff] %v11560_v38  ;;  %v19564_v13 = vrot.slane %v11368_v51, 1  ;;  %v18172_v39 = vrot.slane %v11555_v1, 2  ;;  %v626_v18 = vadd.f32 %v625_v30, %v9575_v56  ;;  %v2558_v57 = vmul.f32 %v19565_v27, %v19249_v55  ;;  %v19573_v1 = vld [vmem:[#allocation15_spill] sm:$0xff] }
 0x212   : > { %v6741_v62 = vadd.f32 %v6472_v19, %v6039_v58  ;;  %v19567_v21 = vrot.slane %v19566_v47, 2  ;;  %v18176_v12 = vrot.slane %v11560_v38, 1  ;;  %v11580_v51 = vmul.f32 %v19534_v37, %v6853_v3  ;;  %v11587_v19 = vld [vmem:[#allocation2 + $0x198] sm:$0xff]  ;;  %v19570_v58 = vld [vmem:[#allocation4_spill] sm:$0xff] }
 0x213   : > { %v4760_v36 = vsel %vm2950_vm4, %v19564_v13, %v18171_v60  ;;  %v19569_v30 = vrot.slane %v11406_v15, 2  ;;  %v986_v27 = vmax.f32 %v626_v18, 0.0  ;;  %v11591_v47 = vmul.f32 %v11587_v19, %v19570_v58 }
 0x214   : > { %v3839_v5 = vsel %vm3788_vm5, %v19567_v21, %v18173_v59  ;;  %19568 = vst [vmem:[#allocation60_spill] sm:$0xff] %v11580_v51  ;;  %v7449_v21 = vadd.f32 %v7180_v4, %v6741_v62  ;;  %v19571_v3 = vrot.slane %v11391_v42, 1  ;;  %v3500_v15 = vmul.f32 %v11587_v19, %v11523_v46  ;;  %v19572_v59 = vld [vmem:[#allocation23_spill] sm:$0xff] }
 0x215   : > { %v4103_v13 = vadd.f32 %v3839_v5, %v3265_v40  ;;  %v5468_v60 = vsel %vm3788_vm5, %v19569_v30, %v18172_v39  ;;  %v18181_v5 = vrot.slane %v11580_v51, 2  ;;  %v11601_v18 = vmin.f32 %v986_v27, 6.0  ;;  %v19574_v4 = vld [vmem:[#allocation39_spill] sm:$0xff] }
 0x216   : > { %v6482_v40 = vsel %vm2950_vm4, %v19571_v3, %v18176_v12  ;;  %v4318_v37 = vmul.f32 %v19573_v1, %v19572_v59  ;;  %v7562_v62 = vadd.f32 %v19574_v4, %v7449_v21  ;;  %v19575_v42 = vrot.slane %v11413_v16, 2  ;;  %v19576_v12 = vld [vmem:[#allocation8_spill] sm:$0xff] }
 0x217   : > { %v4415_v30 = vadd.f32 %v4319_v10, %v4103_v13  ;;  %v11613_v38 = vmul.f32 %v19576_v12, %v3500_v15  ;;  %v19579_v10 = vld [vmem:[#allocation46_spill] sm:$0xff]  ;;  %v18191_v39 = vrot.slane %v11601_v18, 7  ;;  %v19580_v1 = vrot.slane %v11591_v47, 1 }
 0x218   : > { %v7190_v3 = vsel %vm3788_vm5, %v19575_v42, %v18181_v5  ;;  %v11617_v13 = vmul.f32 %v19579_v10, %v19578_v33  ;;  %v19582_v21 = vrot.slane %v19581_v50, 1  ;;  %v5130_v16 = vmul.f32 %v19579_v10, %v11523_v46  ;;  %v11627_v42 = vld [vmem:[#allocation2 + $0x318] sm:$0xff] }
 0x219   : > { %19577 = vst [vmem:[#allocation17_spill] sm:$0xff] %v11613_v38  ;;  %v5024_v27 = vadd.f32 %v4760_v36, %v4415_v30  ;;  %19583 = vst [vmem:[#allocation47_spill] sm:$0xff] %v11627_v42  ;;  %v7658_v15 = vmax.f32 %v7562_v62, 0.0  ;;  %v18194_v25 = vrot.slane %v11613_v38, 2  ;;  %v19584_v30 = vld [vmem:[#allocation51_spill] sm:$0xff] }
 0x21a   : > { %v2999_v51 = vsel %vm2950_vm4, %v19582_v21, %v19580_v1  ;;  %v18196_v63 = vrot.slane %v11617_v13, 1  ;;  %v19585_v7 = vrot.slane %v19584_v30, 7  ;;  %v11637_v1 = vmul.f32 %v19586_v28, %v5130_v16  ;;  %v19587_v21 = vld [vmem:[#allocation30_spill] sm:$0xff]  ;;  %v19593_v16 = vld [vmem:[#allocation31_spill] sm:$0xff] }
 0x21b   : > { %v3264_v5 = vadd.f32 %v2999_v51, %v2558_v57  ;;  %v5732_v36 = vadd.f32 %v5468_v60, %v5024_v27  ;;  %v5947_v17 = vmul.f32 %v19588_v43, %v19587_v21  ;;  %v7754_v62 = vmin.f32 %v7658_v15, 6.0  ;;  %v19589_v57 = vld [vmem:[#allocation53_spill] sm:$0xff]  ;;  %v19591_v27 = vld [vmem:[#allocation44_spill] sm:$0xff] }
 0x21c   : > { %v1439_v50 = vsel %vm1330_vm7, %v19585_v7, %v18191_v39  ;;  %v19590_v51 = vrot.slane %v19589_v57, 2  ;;  %v19592_v30 = vrot.slane %v19591_v27, 1  ;;  %v11653_v39 = vmul.f32 %v19593_v16, %v11627_v42  ;;  %v19595_v27 = vld [vmem:[#allocation45_spill] sm:$0xff]  ;;  %v19600_v57 = vld [vmem:[#allocation34_spill] sm:$0xff] }
 0x21d   : > { %1674 = vst [vmem:[#allocation2 + $0xe0] sm:$0xff] %v1439_v50  ;;  %v6044_v14 = vadd.f32 %v5948_v48, %v5732_v36  ;;  %v18201_v15 = vrot.slane %v11637_v1, 2  ;;  %v6852_v50 = vmul.f32 %v11627_v42, %v11523_v46  ;;  %7982 = vmatmul.mubr.f32.gmra.mxu1 %v7754_v62  ;;  %v2557_v38 = vmul.f32 %v19595_v27, %v19541_v41  ;;  %v19598_v36 = vld [vmem:[#allocation13_spill] sm:$0xff]  ;;  %v19602_v27 = vld [vmem:[#allocation55_spill] sm:$0xff] }
 0x21e   : > { %v3837_v60 = vsel %vm3788_vm5, %v19590_v51, %v18194_v25  ;;  %v4758_v7 = vsel %vm2950_vm4, %v19592_v30, %v18196_v63  ;;  %v19594_v51 = vld [vmem:[#allocation20_spill] sm:$0xff]  ;;  %v11662_v30 = vld [vmem:[#allocation2 + $0x118] sm:$0xff]  ;;  %v19596_v63 = vld [vmem:[#allocation6_spill] sm:$0xff]  ;;  %v19603_v41 = vrot.slane %v19602_v27, 1 }
 0x21f   : > { %v4102_v49 = vadd.f32 %v3837_v60, %v3264_v5  ;;  %v630_v25 = vadd.f32 %v629_v11, %v19594_v51  ;;  %v11666_v32 = vmul.f32 %v11662_v30, %v19596_v63  ;;  %v6746_v48 = vadd.f32 %v6482_v40, %v6044_v14 }
 0x220   : > { %v19599_v60 = vrot.slane %v19598_v36, 2  ;;  %v11674_v2 = vmul.f32 %v19600_v57, %v6852_v50  ;;  %v19601_v11 = vrot.slane %v11653_v39, 1  ;;  %v3499_v14 = vmul.f32 %v11662_v30, %v11523_v46 }
 0x221   : > { %19597 = vst [vmem:[#allocation54_spill] sm:$0xff] %v11666_v32  ;;  %v4414_v5 = vadd.f32 %v4318_v37, %v4102_v49  ;;  %v988_v28 = vmax.f32 %v630_v25, 0.0  ;;  %v18200_v63 = vrot.slane %v11666_v32, 1  ;;  %v7454_v49 = vadd.f32 %v7190_v3, %v6746_v48  ;;  %v8710_v48 = vpop.f32.mrf.mxu1 }
 0x222   : > { %v5466_v62 = vsel %vm3788_vm5, %v19599_v60, %v18201_v15  ;;  %v6480_v51 = vsel %vm2950_vm4, %v19603_v41, %v19601_v11  ;;  %v18205_v40 = vrot.slane %v11674_v2, 2  ;;  %v4317_v50 = vmul.f32 %v10944_v44, %v19548_v52  ;;  %v19605_v11 = vld [vmem:[#allocation24_spill] sm:$0xff] }
 0x223   : > { %v5023_v37 = vadd.f32 %v4758_v7, %v4414_v5  ;;  %v11687_v36 = vmin.f32 %v988_v28, 6.0  ;;  %v19604_v60 = vrot.slane %v11426_v0, 1  ;;  %v11695_v41 = vmul.f32 %v19546_v23, %v3499_v14  ;;  %v11701_v7 = vld [vmem:[#allocation2 + $0x98] sm:$0xff]  ;;  %v19606_v5 = vld [vmem:[#allocation48_spill] sm:$0xff] }
 0x224   : > { %v11699_v3 = vmul.f32 %v11183_v6, %v19605_v11  ;;  %v7567_v44 = vadd.f32 %v19555_v34, %v7454_v49  ;;  %v19607_v27 = vrot.slane %v19606_v5, 2  ;;  %v5129_v52 = vmul.f32 %v11183_v6, %v11523_v46 }
 0x225   : > { %v2997_v25 = vsel %vm2950_vm4, %v19604_v60, %v18200_v63  ;;  %v5731_v28 = vadd.f32 %v5466_v62, %v5023_v37  ;;  %v18207_v14 = vrot.slane %v11687_v36, 7  ;;  %v18208_v63 = vrot.slane %v11695_v41, 2  ;;  %v631_v37 = vpop.f32.mrf.mxu0 }
 0x226   : > { %v7188_v0 = vsel %vm3788_vm5, %v19607_v27, %v18205_v40  ;;  %v3263_v60 = vadd.f32 %v2997_v25, %v2557_v38  ;;  %v18216_v15 = vrot.slane %v11699_v3, 1  ;;  %v7663_v23 = vmax.f32 %v7567_v44, 0.0  ;;  %v872_v40 = vpop.f32.mrf.mxu1 }
 0x227   : > { %v6043_v32 = vadd.f32 %v5947_v17, %v5731_v28  ;;  %v5946_v62 = vmul.f32 %v11460_v9, %v19551_v20  ;;  %v11718_v49 = vmul.f32 %v19304_v45, %v11701_v7  ;;  %v19608_v38 = vrot.slane %v11434_v26, 7 }
 0x228   : > { %v19609_v5 = vrot.slane %v11458_v8, 2  ;;  %v19610_v44 = vrot.slane %v11450_v29, 1  ;;  %v11736_v27 = vmul.f32 %v19239_v31, %v5129_v52  ;;  %v7759_v34 = vmin.f32 %v7663_v23, 6.0 }
 0x229   : > { %v1443_v25 = vsel %vm1330_vm7, %v19608_v38, %v18207_v14  ;;  %v6745_v26 = vadd.f32 %v6480_v51, %v6043_v32  ;;  %v18215_v14 = vrot.slane %v11718_v49, 1  ;;  %v632_v29 = vadd.f32 %v631_v37, %v9575_v56 }
 0x22a   : > { %v3835_v17 = vsel %vm3788_vm5, %v19609_v5, %v18208_v63  ;;  %v4756_v28 = vsel %vm2950_vm4, %v19610_v44, %v18216_v15  ;;  %1676 = vst [vmem:[#allocation2 + $0x210] sm:$0xff] %v1443_v25  ;;  %v18210_v8 = vrot.slane %v11736_v27, 2  ;;  %v6851_v5 = vmul.f32 %v11701_v7, %v11523_v46  ;;  %v19611_v63 = vld [vmem:[#allocation22_spill] sm:$0xff]  ;;  %8768 = vmatmul.mubr.f32.gmra.mxu0 %v7759_v34  ;;  %v11858_v15 = vld [vmem:[#allocation2 + $0x1e0] sm:$0xff] }
 0x22b   : > { %v4101_v38 = vadd.f32 %v3835_v17, %v3263_v60  ;;  %v878_v20 = vadd.f32 %v8710_v48, %v19611_v63  ;;  %v7453_v44 = vadd.f32 %v7188_v0, %v6745_v26  ;;  %v19612_v32 = vrot.slane %v11481_v53, 1  ;;  %v19614_v53 = vld [vmem:[#allocation3_spill] sm:$0xff] }
 0x22c   : > { %v873_v51 = vadd.f32 %v872_v40, %v19611_v63  ;;  %v19613_v60 = vrot.slane %v11492_v61, 2  ;;  %v11756_v48 = vmul.f32 %v19198_v24, %v6851_v5  ;;  %v989_v0 = vmax.f32 %v632_v29, 0.0 }
 0x22d   : > { %v4413_v52 = vadd.f32 %v4317_v50, %v4101_v38  ;;  %v6478_v23 = vsel %vm2950_vm4, %v19612_v32, %v18215_v14  ;;  %v996_v34 = vmax.f32 %v878_v20, 0.0  ;;  %v7566_v50 = vadd.f32 %v19364_v35, %v7453_v44 }
 0x22e   : > { %v5464_v46 = vsel %vm3788_vm5, %v19613_v60, %v18210_v8  ;;  %v993_v25 = vmax.f32 %v873_v51, 0.0  ;;  %v1727_v17 = vadd.s32 64, %v19614_v53  ;;  %v18214_v26 = vrot.slane %v11756_v48, 2 }
 0x22f   : > { %v5022_v37 = vadd.f32 %v4756_v28, %v4413_v52  ;;  %v11761_v40 = vmin.f32 %v996_v34, 6.0  ;;  %v11763_v38 = vmin.f32 %v989_v0, 6.0  ;;  %v1728_v61 = vadd.s32 72, %v19614_v53 }
 0x230   : > { %v7662_v32 = vmax.f32 %v7566_v50, 0.0  ;;  %v1089_v5 = vmin.f32 %v993_v25, 6.0  ;;  %v1811_v8 = vand.u32 15, %v1727_v17  ;;  %v19617_v20 = vrot.slane %v11497_v22, 2  ;;  %v11783_v25 = vld [vmem:[#allocation2 + $0x128] sm:$0xff] }
 0x231   : > { %19615 = vst [vmem:[#allocation15_spill] sm:$0xff] %v11761_v40  ;;  %19616 = vst [vmem:[#allocation46_spill] sm:$0xff] %v11763_v38  ;;  %v5730_v60 = vadd.f32 %v5464_v46, %v5022_v37  ;;  %v18211_v29 = vrot.slane %v11761_v40, 7  ;;  %v18212_v44 = vrot.slane %v11763_v38, 7  ;;  %v1818_v52 = vand.u32 15, %v1728_v61  ;;  %v11778_v37 = vld [vmem:[#allocation2 + $0x2b0] sm:$0xff] }
 0x232   : > { %v7186_v28 = vsel %vm3788_vm5, %v19617_v20, %v18214_v26  ;;  %v7758_v51 = vmin.f32 %v7662_v32, 6.0  ;;  %v1452_v0 = vrot.slane %v1089_v5, 7  ;;  %vm2143_vm13 = vcmp.gt.s32.totalorder %v1811_v8, 0  ;;  %19619 = vst [vmem:[#allocation58_spill] sm:$0xff] %v11778_v37  ;;  %19620 = vst [vmem:[#allocation51_spill] sm:$0xff] %v11783_v25  ;;  %v19630_v26 = vld [vmem:[#allocation28_spill] sm:$0xff] }
 0x233   : > { %v6042_v34 = vadd.f32 %v5946_v62, %v5730_v60  ;;  %v19618_v46 = vrot.slane %v11601_v18, 7  ;;  %v11781_v22 = vsel %vm2143_vm13, 1.0, %v11778_v37  ;;  %vm2240_vm14 = vcmp.lt.s32.totalorder %v1818_v52, 15  ;;  %v11789_v62 = vld [vmem:[#allocation2 + $0x2e8] sm:$0xff]  ;;  %v19623_v18 = vld [vmem:[#allocation7_spill] sm:$0xff] }
 0x234   : > { %v11787_v17 = vmul.f32 %v11783_v25, %v19570_v58  ;;  %19622 = vst [vmem:[#allocation44_spill] sm:$0xff] %v11789_v62  ;;  %7986 = vmatprep.mubr.f32.mxu1 %v7758_v51  ;;  %v19624_v61 = vrot.slane %v19623_v18, 7  ;;  %v1459_v60 = vsel %vm1330_vm7, %v1452_v0, %v18211_v29  ;;  %v8549_v5 = vsel %vm2240_vm14, 1.0, %v11778_v37  ;;  %v19637_v37 = vld [vmem:[#allocation56_spill] sm:$0xff] }
 0x235   : > { %v1445_v50 = vsel %vm1330_vm7, %v19618_v46, %v18212_v44  ;;  %v6744_v8 = vadd.f32 %v6478_v23, %v6042_v34  ;;  %1684 = vst [vmem:[#allocation2 + $0x38] sm:$0xff] %v1459_v60  ;;  %v2449_v20 = vmul.f32 %v11587_v19, %v11781_v22  ;;  %v11801_v51 = vrot.slane %v8549_v5, 6 }
 0x236   : > { %19621 = vst [vmem:[#allocation53_spill] sm:$0xff] %v11787_v17  ;;  %1677 = vst [vmem:[#allocation2 + $0x368] sm:$0xff] %v1445_v50  ;;  %v1453_v32 = vsel %vm1330_vm7, %v19624_v61, %v1452_v0  ;;  %v18213_v52 = vrot.slane %v11787_v17, 1  ;;  %v4209_v23 = vmul.f32 %v11781_v22, %v19579_v10  ;;  %v11807_v46 = vmul.f32 %v19588_v43, %v19578_v33  ;;  %v19658_v17 = vld [vmem:[#allocation36_spill] sm:$0xff] }
 0x237   : > { %1681 = vst [vmem:[#allocation2 + $0x228] sm:$0xff] %v1453_v32  ;;  %v7452_v34 = vadd.f32 %v7186_v28, %v6744_v8  ;;  %v5838_v0 = vmul.f32 %v11781_v22, %v11627_v42  ;;  %v11813_v50 = vmul.f32 %v19593_v16, %v11789_v62  ;;  %v2561_v19 = vmul.f32 %v19249_v55, %v2449_v20  ;;  %v19641_v16 = vld [vmem:[#allocation16_spill] sm:$0xff] }
 0x238   : > { %19625 = vst [vmem:[#allocation45_spill] sm:$0xff] %v11807_v46  ;;  %v19627_v18 = vrot.slane %v11591_v47, 1  ;;  %v11824_v28 = vsel %vm3378_vm2, %v19378_v54, %v11801_v51  ;;  %v4321_v8 = vmul.f32 %v19572_v59, %v4209_v23  ;;  %v18217_v60 = vrot.slane %v11807_v46, 1  ;;  %v19644_v46 = vld [vmem:[#allocation61_spill] sm:$0xff]  ;;  %v19659_v33 = vld [vmem:[#allocation20_spill] sm:$0xff] }
 0x239   : > { %19626 = vst [vmem:[#allocation13_spill] sm:$0xff] %v11813_v50  ;;  %v7565_v61 = vadd.f32 %v19574_v4, %v7452_v34  ;;  %v3503_v32 = vmul.f32 %v11783_v25, %v11824_v28  ;;  %v5133_v5 = vmul.f32 %v19588_v43, %v11824_v28  ;;  %v5950_v20 = vmul.f32 %v19587_v21, %v5838_v0  ;;  %v635_v21 = vpop.f32.mrf.mxu0  ;;  %v19660_v59 = vld [vmem:[#allocation41_spill] sm:$0xff] }
 0x23a   : > { %v3005_v10 = vsel %vm2950_vm4, %v19627_v18, %v18213_v52  ;;  %v18219_v18 = vrot.slane %v11813_v50, 1  ;;  %v6855_v29 = vmul.f32 %v11789_v62, %v11824_v28  ;;  %v19629_v34 = vrot.slane %v11617_v13, 1  ;;  %v19635_v13 = vld [vmem:[#allocation10_spill] sm:$0xff] }
 0x23b   : > { %v3267_v47 = vadd.f32 %v3005_v10, %v2561_v19  ;;  %v7661_v44 = vmax.f32 %v7565_v61, 0.0  ;;  %v11838_v23 = vmul.f32 %v19576_v12, %v3503_v32  ;;  %v11846_v14 = vmul.f32 %v19630_v26, %v5133_v5  ;;  %v19634_v61 = vld [vmem:[#allocation52_spill] sm:$0xff] }
 0x23c   : > { %v4764_v52 = vsel %vm2950_vm4, %v19629_v34, %v18217_v60  ;;  %v19632_v0 = vrot.slane %v11653_v39, 1  ;;  %v11854_v10 = vmul.f32 %v19600_v57, %v6855_v29  ;;  %v2450_v32 = vmul.f32 %v19634_v61, %v11781_v22  ;;  %v19643_v61 = vld [vmem:[#allocation32_spill] sm:$0xff] }
 0x23d   : > { %19628 = vst [vmem:[#allocation55_spill] sm:$0xff] %v11838_v23  ;;  %19631 = vst [vmem:[#allocation48_spill] sm:$0xff] %v11846_v14  ;;  %v11862_v34 = vmul.f32 %v11858_v15, %v19635_v13  ;;  %v7757_v5 = vmin.f32 %v7661_v44, 6.0  ;;  %v18230_v60 = vrot.slane %v11838_v23, 2  ;;  %v18232_v40 = vrot.slane %v11846_v14, 2  ;;  %v19638_v44 = vld [vmem:[#allocation17_spill] sm:$0xff] }
 0x23e   : > { %v6486_v19 = vsel %vm2950_vm4, %v19632_v0, %v18219_v18  ;;  %19633 = vst [vmem:[#allocation7_spill] sm:$0xff] %v11854_v10  ;;  %v3504_v39 = vmul.f32 %v11858_v15, %v11824_v28  ;;  %v19636_v0 = vld [vmem:[#allocation18_spill] sm:$0xff]  ;;  %v4210_v53 = vmul.f32 %v11781_v22, %v19637_v37  ;;  %v19639_v63 = vrot.slane %v19638_v44, 2  ;;  %v19649_v14 = vld [vmem:[#allocation5_spill] sm:$0xff] }
 0x23f   : > { %v2562_v18 = vmul.f32 %v19636_v0, %v2450_v32  ;;  %7987 = vmatmul.mubr.f32.gmra.mxu1 %v7757_v5  ;;  %v19640_v57 = vrot.slane %v11637_v1, 2  ;;  %v11888_v62 = vmul.f32 %v19644_v46, %v19643_v61  ;;  %v11890_v37 = vld [vmem:[#allocation2 + $0x350] sm:$0xff]  ;;  %v19646_v44 = vrot.slane %v11854_v10, 2  ;;  %v19652_v10 = vld [vmem:[#allocation57_spill] sm:$0xff] }
 0x240   : > { %v3843_v50 = vsel %vm3788_vm5, %v19639_v63, %v18230_v60  ;;  %v11884_v32 = vmul.f32 %v19641_v16, %v3504_v39  ;;  %19645 = vst [vmem:[#allocation56_spill] sm:$0xff] %v11890_v37  ;;  %v19647_v63 = vrot.slane %v11674_v2, 2  ;;  %v19648_v1 = vrot.slane %v11862_v34, 1 }
 0x241   : > { %v5472_v29 = vsel %vm3788_vm5, %v19640_v57, %v18232_v40  ;;  %v4105_v5 = vadd.f32 %v3843_v50, %v3267_v47  ;;  %v19650_v57 = vrot.slane %v19649_v14, 1  ;;  %v19651_v40 = vld [vmem:[#allocation35_spill] sm:$0xff]  ;;  %v18250_v50 = vrot.slane %v11888_v62, 1 }
 0x242   : > { %19642 = vst [vmem:[#allocation52_spill] sm:$0xff] %v11884_v32  ;;  %v7194_v60 = vsel %vm3788_vm5, %v19647_v63, %v19646_v44  ;;  %v4322_v23 = vmul.f32 %v19651_v40, %v4210_v53  ;;  %v18247_v38 = vrot.slane %v11884_v32, 2  ;;  %v5134_v47 = vmul.f32 %v19644_v46, %v11824_v28  ;;  %v19653_v63 = vld [vmem:[#allocation38_spill] sm:$0xff] }
 0x243   : > { %v3007_v39 = vsel %vm2950_vm4, %v19650_v57, %v19648_v1  ;;  %v4417_v2 = vadd.f32 %v4321_v8, %v4105_v5  ;;  %v5839_v44 = vmul.f32 %v11781_v22, %v19652_v10  ;;  %v11911_v14 = vmul.f32 %v19653_v63, %v11890_v37 }
 0x244   : > { %v3268_v26 = vadd.f32 %v3007_v39, %v2562_v18  ;;  %v6856_v53 = vmul.f32 %v11890_v37, %v11824_v28  ;;  %v19654_v18 = vld [vmem:[#allocation19_spill] sm:$0xff]  ;;  %v11926_v42 = vmul.f32 %v19658_v17, %v5134_v47  ;;  %v636_v12 = vadd.f32 %v635_v21, %v19659_v33  ;;  %v19662_v21 = vld [vmem:[#allocation49_spill] sm:$0xff] }
 0x245   : > { %v19655_v1 = vrot.slane %v19654_v18, 2  ;;  %v19656_v39 = vld [vmem:[#allocation59_spill] sm:$0xff]  ;;  %v5026_v4 = vadd.f32 %v4764_v52, %v4417_v2  ;;  %v5951_v58 = vmul.f32 %v19660_v59, %v5839_v44  ;;  %v18249_v32 = vrot.slane %v11911_v14, 1  ;;  %v19665_v44 = vld [vmem:[#allocation6_spill] sm:$0xff] }
 0x246   : > { %v19657_v8 = vrot.slane %v19656_v39, 1  ;;  %v18251_v18 = vrot.slane %v11926_v42, 2  ;;  %v991_v25 = vmax.f32 %v636_v12, 0.0  ;;  %v2448_v39 = vmul.f32 %v11662_v30, %v11781_v22  ;;  %v11942_v2 = vld [vmem:[#allocation2 + $0xd8] sm:$0xff] }
 0x247   : > { %v3845_v57 = vsel %vm3788_vm5, %v19655_v1, %v18247_v38  ;;  %v19661_v1 = vld [vmem:[#allocation42_spill] sm:$0xff]  ;;  %v19663_v52 = vrot.slane %v19662_v21, 1  ;;  %19664 = vst [vmem:[#allocation17_spill] sm:$0xff] %v11942_v2  ;;  %v19666_v12 = vld [vmem:[#allocation11_spill] sm:$0xff] }
 0x248   : > { %v4766_v5 = vsel %vm2950_vm4, %v19657_v8, %v18250_v50  ;;  %v4106_v43 = vadd.f32 %v3845_v57, %v3268_v26  ;;  %v11933_v38 = vmul.f32 %v19661_v1, %v6856_v53  ;;  %v5734_v8 = vadd.f32 %v5472_v29, %v5026_v4 }
 0x249   : > { %v6488_v26 = vsel %vm2950_vm4, %v19663_v52, %v18249_v32  ;;  %v11946_v57 = vmul.f32 %v11942_v2, %v19665_v44  ;;  %v19667_v53 = vrot.slane %v19666_v12, 2  ;;  %v11954_v4 = vmin.f32 %v991_v25, 6.0  ;;  %v19669_v44 = vld [vmem:[#allocation60_spill] sm:$0xff] }
 0x24a   : > { %v4418_v47 = vadd.f32 %v4322_v23, %v4106_v43  ;;  %v18253_v43 = vrot.slane %v11933_v38, 2  ;;  %v19668_v23 = vld [vmem:[#allocation14_spill] sm:$0xff]  ;;  %v6046_v21 = vadd.f32 %v5950_v20, %v5734_v8  ;;  %v3502_v50 = vmul.f32 %v11942_v2, %v11824_v28 }
 0x24b   : > { %v5474_v30 = vsel %vm3788_vm5, %v19667_v53, %v18251_v18  ;;  %v2560_v29 = vmul.f32 %v19668_v23, %v2448_v39  ;;  %v18255_v32 = vrot.slane %v11946_v57, 1  ;;  %v19670_v33 = vrot.slane %v19669_v44, 2  ;;  %v19671_v8 = vld [vmem:[#allocation54_spill] sm:$0xff]  ;;  %v19673_v44 = vld [vmem:[#allocation12_spill] sm:$0xff] }
 0x24c   : > { %v5027_v52 = vadd.f32 %v4766_v5, %v4418_v47  ;;  %v18261_v53 = vrot.slane %v11954_v4, 7  ;;  %v4208_v25 = vmul.f32 %v11781_v22, %v11183_v6  ;;  %v11970_v20 = vmul.f32 %v11460_v9, %v19605_v11 }
 0x24d   : > { %v7196_v12 = vsel %vm3788_vm5, %v19670_v33, %v18253_v43  ;;  %v6748_v5 = vadd.f32 %v6486_v19, %v6046_v21  ;;  %v19672_v47 = vrot.slane %v19671_v8, 1  ;;  %v11978_v2 = vmul.f32 %v19673_v44, %v3502_v50  ;;  %v11980_v33 = vld [vmem:[#allocation2 + $0x1f0] sm:$0xff] }
 0x24e   : > { %v5735_v39 = vadd.f32 %v5474_v30, %v5027_v52  ;;  %v19674_v6 = vrot.slane %v11687_v36, 7  ;;  %v19675_v19 = vld [vmem:[#allocation26_spill] sm:$0xff]  ;;  %v18256_v21 = vrot.slane %v11970_v20, 1  ;;  %v5132_v50 = vmul.f32 %v11460_v9, %v11824_v28 }
 0x24f   : > { %v3003_v18 = vsel %vm2950_vm4, %v19672_v47, %v18255_v32  ;;  %v4320_v30 = vmul.f32 %v19675_v19, %v4208_v25  ;;  %v7456_v52 = vadd.f32 %v7194_v60, %v6748_v5  ;;  %v18260_v47 = vrot.slane %v11978_v2, 2  ;;  %v19678_v5 = vld [vmem:[#allocation29_spill] sm:$0xff] }
 0x250   : > { %v1449_v43 = vsel %vm1330_vm7, %v19674_v6, %v18261_v53  ;;  %v3266_v11 = vadd.f32 %v3003_v18, %v2560_v29  ;;  %v6047_v8 = vadd.f32 %v5951_v58, %v5735_v39  ;;  %v19676_v32 = vrot.slane %v11699_v3, 1 }
 0x251   : > { %1679 = vst [vmem:[#allocation2 + $0xc0] sm:$0xff] %v1449_v43  ;;  %v5837_v18 = vmul.f32 %v11781_v22, %v11701_v7  ;;  %v12001_v29 = vmul.f32 %v19304_v45, %v11980_v33  ;;  %v6854_v58 = vmul.f32 %v11980_v33, %v11824_v28  ;;  %v7569_v60 = vadd.f32 %v19364_v35, %v7456_v52 }
 0x252   : > { %v4762_v36 = vsel %vm2950_vm4, %v19676_v32, %v18256_v21  ;;  %v6749_v43 = vadd.f32 %v6488_v26, %v6047_v8  ;;  %v19677_v25 = vrot.slane %v11695_v41, 2  ;;  %v12012_v32 = vmul.f32 %v19239_v31, %v5132_v50 }
 0x253   : > { %v5949_v39 = vmul.f32 %v19678_v5, %v5837_v18  ;;  %v18259_v6 = vrot.slane %v12001_v29, 1  ;;  %v12017_v21 = vmul.f32 %v19198_v24, %v6854_v58  ;;  %v7665_v28 = vmax.f32 %v7569_v60, 0.0  ;;  %v19682_v60 = vld [vmem:[#allocation43_spill] sm:$0xff] }
 0x254   : > { %v3841_v3 = vsel %vm3788_vm5, %v19677_v25, %v18260_v47  ;;  %v7457_v52 = vadd.f32 %v7196_v12, %v6749_v43  ;;  %v18258_v26 = vrot.slane %v12012_v32, 2  ;;  %v2565_v41 = vmul.f32 %v11858_v15, %v19636_v0  ;;  %v12028_v25 = vld [vmem:[#allocation2 + $0x290] sm:$0xff] }
 0x255   : > { %v4104_v22 = vadd.f32 %v3841_v3, %v3266_v11  ;;  %v19679_v50 = vrot.slane %v11718_v49, 1  ;;  %v18257_v18 = vrot.slane %v12017_v21, 2  ;;  %19680 = vst [vmem:[#allocation61_spill] sm:$0xff] %v12028_v25  ;;  %v12032_v58 = vmul.f32 %v12028_v25, %v19635_v13 }
 0x256   : > { %v7761_v12 = vmin.f32 %v7665_v28, 6.0  ;;  %v7570_v43 = vadd.f32 %v19682_v60, %v7457_v52  ;;  %v19683_v15 = vrot.slane %v11736_v27, 2  ;;  %v12043_v49 = vsel %vm3378_vm2, %v11801_v51, %v19378_v54 }
 0x257   : > { %v4416_v8 = vadd.f32 %v4320_v30, %v4104_v22  ;;  %v6484_v11 = vsel %vm2950_vm4, %v19679_v50, %v18259_v6  ;;  %19681 = vst [vmem:[#allocation5_spill] sm:$0xff] %v12032_v58  ;;  %v19684_v22 = vrot.slane %v11756_v48, 2  ;;  %v18262_v52 = vrot.slane %v12032_v58, 1  ;;  %v12061_v48 = vld [vmem:[#allocation2 + $0x338] sm:$0xff]  ;;  %v19713_v58 = vld [vmem:[#allocation28_spill] sm:$0xff] }
 0x258   : > { %v5470_v30 = vsel %vm3788_vm5, %v19683_v15, %v18258_v26  ;;  %v3507_v50 = vmul.f32 %v12028_v25, %v12043_v49  ;;  %7991 = vmatprep.mubr.f32.mxu1 %v7761_v12  ;;  %v7666_v27 = vmax.f32 %v7570_v43, 0.0  ;;  %v4325_v15 = vmul.f32 %v19644_v46, %v19651_v40  ;;  %19686 = vst [vmem:[#allocation59_spill] sm:$0xff] %v12061_v48 }
 0x259   : > { %v5025_v3 = vadd.f32 %v4762_v36, %v4416_v8  ;;  %v7192_v28 = vsel %vm3788_vm5, %v19684_v22, %v18257_v18  ;;  %v12057_v51 = vmul.f32 %v19652_v10, %v19643_v61  ;;  %v5137_v36 = vmul.f32 %v19652_v10, %v12043_v49  ;;  %v637_v18 = vpop.f32.mrf.mxu0 }
 0x25a   : > { %v19687_v22 = vrot.slane %v11862_v34, 1  ;;  %v12069_v43 = vmul.f32 %v19641_v16, %v3507_v50  ;;  %v5954_v46 = vmul.f32 %v11890_v37, %v19660_v59  ;;  %v7762_v26 = vmin.f32 %v7666_v27, 6.0  ;;  %v19715_v37 = vld [vmem:[#allocation44_spill] sm:$0xff] }
 0x25b   : > { %19685 = vst [vmem:[#allocation19_spill] sm:$0xff] %v12057_v51  ;;  %v5733_v8 = vadd.f32 %v5470_v30, %v5025_v3  ;;  %v18265_v47 = vrot.slane %v12057_v51, 1  ;;  %v12075_v53 = vmul.f32 %v19658_v17, %v5137_v36  ;;  %v12080_v34 = vmul.f32 %v19653_v63, %v12061_v48  ;;  %v19705_v51 = vld [vmem:[#allocation25_spill] sm:$0xff]  ;;  %v641_v16 = vpop.f32.mrf.mxu0 }
 0x25c   : > { %v3013_v12 = vsel %vm2950_vm4, %v19687_v22, %v18262_v52  ;;  %19688 = vst [vmem:[#allocation49_spill] sm:$0xff] %v12069_v43  ;;  %v18267_v3 = vrot.slane %v12069_v43, 2  ;;  %v6859_v50 = vmul.f32 %v12061_v48, %v12043_v49  ;;  %8770 = vmatprep.mubr.f32.mxu0 %v7762_v26  ;;  %v19693_v52 = vld [vmem:[#allocation52_spill] sm:$0xff]  ;;  %v19708_v43 = vld [vmem:[#allocation53_spill] sm:$0xff] }
 0x25d   : > { %v3271_v6 = vadd.f32 %v3013_v12, %v2565_v41  ;;  %19689 = vst [vmem:[#allocation11_spill] sm:$0xff] %v12075_v53  ;;  %v6045_v30 = vadd.f32 %v5949_v39, %v5733_v8  ;;  %19690 = vst [vmem:[#allocation60_spill] sm:$0xff] %v12080_v34  ;;  %v19691_v41 = vrot.slane %v11888_v62, 1  ;;  %v18266_v36 = vrot.slane %v12075_v53, 2  ;;  %v19692_v8 = vld [vmem:[#allocation51_spill] sm:$0xff]  ;;  %v19700_v53 = vld [vmem:[#allocation50_spill] sm:$0xff] }
 0x25e   : > { %v638_v39 = vadd.f32 %v637_v18, %v9575_v56  ;;  %v2564_v22 = vmul.f32 %v19692_v8, %v19249_v55  ;;  %v19694_v59 = vrot.slane %v19693_v52, 2  ;;  %v18270_v17 = vrot.slane %v12080_v34, 1 }
 0x25f   : > { %v4772_v27 = vsel %vm2950_vm4, %v19691_v41, %v18265_v47  ;;  %v6747_v12 = vadd.f32 %v6484_v11, %v6045_v30  ;;  %v12100_v62 = vmul.f32 %v19661_v1, %v6859_v50  ;;  %v19696_v18 = vrot.slane %v11926_v42, 2  ;;  %v12107_v11 = vld [vmem:[#allocation2 + $0x8] sm:$0xff]  ;;  %v19697_v30 = vld [vmem:[#allocation4_spill] sm:$0xff] }
 0x260   : > { %v3851_v26 = vsel %vm3788_vm5, %v19694_v59, %v18267_v3  ;;  %v992_v8 = vmax.f32 %v638_v39, 0.0  ;;  %v12111_v52 = vmul.f32 %v12107_v11, %v19697_v30  ;;  %v19698_v50 = vrot.slane %v11911_v14, 1  ;;  %v19699_v3 = vld [vmem:[#allocation23_spill] sm:$0xff] }
 0x261   : > { %19695 = vst [vmem:[#allocation54_spill] sm:$0xff] %v12100_v62  ;;  %v4109_v41 = vadd.f32 %v3851_v26, %v3271_v6  ;;  %v5480_v47 = vsel %vm3788_vm5, %v19696_v18, %v18266_v36  ;;  %v7455_v59 = vadd.f32 %v7192_v28, %v6747_v12  ;;  %v18275_v26 = vrot.slane %v12100_v62, 2  ;;  %v19701_v28 = vld [vmem:[#allocation39_spill] sm:$0xff] }
 0x262   : > { %v6494_v6 = vsel %vm2950_vm4, %v19698_v50, %v18270_v17  ;;  %v3506_v42 = vmul.f32 %v12107_v11, %v12043_v49  ;;  %v12121_v39 = vmin.f32 %v992_v8, 6.0  ;;  %v4324_v1 = vmul.f32 %v19700_v53, %v19699_v3  ;;  %v19703_v17 = vld [vmem:[#allocation8_spill] sm:$0xff] }
 0x263   : > { %v4421_v18 = vadd.f32 %v4325_v15, %v4109_v41  ;;  %v7568_v12 = vadd.f32 %v19701_v28, %v7455_v59  ;;  %v19702_v14 = vrot.slane %v11933_v38, 2  ;;  %v19706_v15 = vld [vmem:[#allocation47_spill] sm:$0xff]  ;;  %v19707_v53 = vrot.slane %v12111_v52, 1 }
 0x264   : > { %v12133_v34 = vmul.f32 %v19703_v17, %v3506_v42  ;;  %v12137_v41 = vmul.f32 %v19706_v15, %v19705_v51  ;;  %v18285_v36 = vrot.slane %v12121_v39, 7  ;;  %v19709_v59 = vrot.slane %v19708_v43, 1 }
 0x265   : > { %v7202_v50 = vsel %vm3788_vm5, %v19702_v14, %v18275_v26  ;;  %v5030_v8 = vadd.f32 %v4772_v27, %v4421_v18  ;;  %v5136_v38 = vmul.f32 %v19706_v15, %v12043_v49  ;;  %v12147_v14 = vld [vmem:[#allocation2 + $0x240] sm:$0xff]  ;;  %v7664_v42 = vmax.f32 %v7568_v12, 0.0  ;;  %v19711_v18 = vld [vmem:[#allocation46_spill] sm:$0xff] }
 0x266   : > { %19704 = vst [vmem:[#allocation51_spill] sm:$0xff] %v12133_v34  ;;  %v3011_v62 = vsel %vm2950_vm4, %v19709_v59, %v19707_v53  ;;  %19710 = vst [vmem:[#allocation52_spill] sm:$0xff] %v12147_v14  ;;  %v18288_v63 = vrot.slane %v12133_v34, 2  ;;  %v18290_v48 = vrot.slane %v12137_v41, 1  ;;  %v19712_v40 = vrot.slane %v19711_v18, 7  ;;  %v19714_v59 = vld [vmem:[#allocation30_spill] sm:$0xff] }
 0x267   : > { %v3270_v26 = vadd.f32 %v3011_v62, %v2564_v22  ;;  %v5738_v27 = vadd.f32 %v5480_v47, %v5030_v8  ;;  %v12157_v53 = vmul.f32 %v19713_v58, %v5136_v38  ;;  %v5953_v61 = vmul.f32 %v19715_v37, %v19714_v59  ;;  %v19716_v22 = vld [vmem:[#allocation55_spill] sm:$0xff]  ;;  %v19718_v8 = vld [vmem:[#allocation45_spill] sm:$0xff] }
 0x268   : > { %v1451_v43 = vsel %vm1330_vm7, %v19712_v40, %v18285_v36  ;;  %v7760_v12 = vmin.f32 %v7664_v42, 6.0  ;;  %v19717_v62 = vrot.slane %v19716_v22, 2  ;;  %v19719_v18 = vrot.slane %v19718_v8, 1  ;;  %v19720_v38 = vld [vmem:[#allocation31_spill] sm:$0xff]  ;;  %v19722_v8 = vld [vmem:[#allocation17_spill] sm:$0xff]  ;;  %v19727_v22 = vld [vmem:[#allocation34_spill] sm:$0xff] }
 0x269   : > { %1680 = vst [vmem:[#allocation2 + $0x330] sm:$0xff] %v1451_v43  ;;  %v12173_v36 = vmul.f32 %v19720_v38, %v12147_v14  ;;  %v6050_v10 = vadd.f32 %v5954_v46, %v5738_v27  ;;  %v18295_v42 = vrot.slane %v12157_v53, 2  ;;  %v6858_v43 = vmul.f32 %v12147_v14, %v12043_v49  ;;  %v19725_v27 = vld [vmem:[#allocation48_spill] sm:$0xff] }
 0x26a   : > { %v3849_v47 = vsel %vm3788_vm5, %v19717_v62, %v18288_v63  ;;  %v4770_v40 = vsel %vm2950_vm4, %v19719_v18, %v18290_v48  ;;  %7992 = vmatmul.mubr.f32.gmra.mxu1 %v7760_v12  ;;  %v19721_v62 = vld [vmem:[#allocation20_spill] sm:$0xff]  ;;  %v2563_v34 = vmul.f32 %v19722_v8, %v19668_v23  ;;  %v12182_v18 = vld [vmem:[#allocation2 + $0x370] sm:$0xff]  ;;  %v19729_v8 = vld [vmem:[#allocation13_spill] sm:$0xff] }
 0x26b   : > { %v4108_v0 = vadd.f32 %v3849_v47, %v3270_v26  ;;  %v642_v63 = vadd.f32 %v641_v16, %v19721_v62  ;;  %v19723_v48 = vld [vmem:[#allocation6_spill] sm:$0xff]  ;;  %v6752_v46 = vadd.f32 %v6494_v6, %v6050_v10  ;;  %v19726_v47 = vrot.slane %v19725_v27, 2 }
 0x26c   : > { %v12186_v13 = vmul.f32 %v12182_v18, %v19723_v48  ;;  %v12194_v25 = vmul.f32 %v19727_v22, %v6858_v43  ;;  %v19728_v16 = vrot.slane %v12173_v36, 1  ;;  %v19730_v23 = vrot.slane %v19729_v8, 1 }
 0x26d   : > { %v4420_v26 = vadd.f32 %v4324_v1, %v4108_v0  ;;  %v5478_v12 = vsel %vm3788_vm5, %v19726_v47, %v18295_v42  ;;  %v994_v58 = vmax.f32 %v642_v63, 0.0  ;;  %v3505_v10 = vmul.f32 %v12182_v18, %v12043_v49 }
 0x26e   : > { %19724 = vst [vmem:[#allocation50_spill] sm:$0xff] %v12186_v13  ;;  %v6492_v62 = vsel %vm2950_vm4, %v19730_v23, %v19728_v16  ;;  %v18294_v48 = vrot.slane %v12186_v13, 1  ;;  %v7460_v0 = vadd.f32 %v7202_v50, %v6752_v46  ;;  %v18299_v6 = vrot.slane %v12194_v25, 2  ;;  %v19732_v16 = vld [vmem:[#allocation24_spill] sm:$0xff]  ;;  %v8713_v46 = vpop.f32.mrf.mxu1 }
 0x26f   : > { %v5029_v1 = vadd.f32 %v4770_v40, %v4420_v26  ;;  %v4323_v43 = vmul.f32 %v11460_v9, %v19675_v19  ;;  %v12207_v27 = vmin.f32 %v994_v58, 6.0  ;;  %v19731_v47 = vrot.slane %v11946_v57, 1  ;;  %v12221_v40 = vld [vmem:[#allocation2 + $0x1b8] sm:$0xff] }
 0x270   : > { %v12215_v23 = vmul.f32 %v19673_v44, %v3505_v10  ;;  %v12219_v50 = vmul.f32 %v11701_v7, %v19732_v16  ;;  %v7573_v9 = vadd.f32 %v19682_v60, %v7460_v0  ;;  %v19733_v26 = vld [vmem:[#allocation7_spill] sm:$0xff]  ;;  %v5135_v19 = vmul.f32 %v11701_v7, %v12043_v49 }
 0x271   : > { %v3009_v63 = vsel %vm2950_vm4, %v19731_v47, %v18294_v48  ;;  %v5737_v58 = vadd.f32 %v5478_v12, %v5029_v1  ;;  %v19734_v8 = vrot.slane %v19733_v26, 2  ;;  %v18301_v10 = vrot.slane %v12207_v27, 7  ;;  %v643_v1 = vpop.f32.mrf.mxu0 }
 0x272   : > { %v3269_v47 = vadd.f32 %v3009_v63, %v2563_v34  ;;  %v18302_v48 = vrot.slane %v12215_v23, 2  ;;  %v18311_v42 = vrot.slane %v12219_v50, 1  ;;  %v7669_v44 = vmax.f32 %v7573_v9, 0.0 }
 0x273   : > { %v7200_v57 = vsel %vm3788_vm5, %v19734_v8, %v18299_v6  ;;  %v6049_v13 = vadd.f32 %v5953_v61, %v5737_v58  ;;  %v5952_v12 = vmul.f32 %v11980_v33, %v19678_v5  ;;  %v12238_v0 = vmul.f32 %v19304_v45, %v12221_v40  ;;  %v882_v6 = vpop.f32.mrf.mxu1 }
 0x274   : > { %v19735_v34 = vrot.slane %v11954_v4, 7  ;;  %v19736_v26 = vrot.slane %v11978_v2, 2  ;;  %v19737_v9 = vrot.slane %v11970_v20, 1  ;;  %v12256_v8 = vmul.f32 %v19239_v31, %v5135_v19 }
 0x275   : > { %v7765_v60 = vmin.f32 %v7669_v44, 6.0  ;;  %v6751_v4 = vadd.f32 %v6492_v62, %v6049_v13  ;;  %v644_v20 = vadd.f32 %v643_v1, %v9575_v56  ;;  %v19739_v13 = vrot.slane %v12001_v29, 1  ;;  %v19741_v29 = vld [vmem:[#allocation3_spill] sm:$0xff] }
 0x276   : > { %v1455_v63 = vsel %vm1330_vm7, %v19735_v34, %v18301_v10  ;;  %v3847_v61 = vsel %vm3788_vm5, %v19736_v26, %v18302_v48  ;;  %v4768_v58 = vsel %vm2950_vm4, %v19737_v9, %v18311_v42  ;;  %v18309_v10 = vrot.slane %v12238_v0, 1  ;;  %v19738_v48 = vld [vmem:[#allocation22_spill] sm:$0xff] }
 0x277   : > { %1682 = vst [vmem:[#allocation2 + $0xb8] sm:$0xff] %v1455_v63  ;;  %v4107_v34 = vadd.f32 %v3847_v61, %v3269_v47  ;;  %v18304_v2 = vrot.slane %v12256_v8, 2  ;;  %v6857_v26 = vmul.f32 %v12221_v40, %v12043_v49  ;;  %v888_v5 = vadd.f32 %v8713_v46, %v19738_v48  ;;  %8771 = vmatmul.mubr.f32.gmra.mxu0 %v7765_v60 }
 0x278   : > { %v7459_v9 = vadd.f32 %v7200_v57, %v6751_v4  ;;  %v6490_v44 = vsel %vm2950_vm4, %v19739_v13, %v18309_v10  ;;  %v883_v62 = vadd.f32 %v882_v6, %v19738_v48  ;;  %v19740_v47 = vrot.slane %v12012_v32, 2  ;;  %v12376_v10 = vld [vmem:[#allocation2 + $0x90] sm:$0xff] }
 0x279   : > { %v4419_v19 = vadd.f32 %v4323_v43, %v4107_v34  ;;  %v12276_v46 = vmul.f32 %v19198_v24, %v6857_v26  ;;  %v1002_v60 = vmax.f32 %v888_v5, 0.0  ;;  %v995_v57 = vmax.f32 %v644_v20, 0.0 }
 0x27a   : > { %v5476_v49 = vsel %vm3788_vm5, %v19740_v47, %v18304_v2  ;;  %v7572_v43 = vadd.f32 %v19364_v35, %v7459_v9  ;;  %v999_v63 = vmax.f32 %v883_v62, 0.0  ;;  %v1729_v61 = vadd.s32 80, %v19741_v29 }
 0x27b   : > { %v5028_v1 = vadd.f32 %v4768_v58, %v4419_v19  ;;  %v18308_v4 = vrot.slane %v12276_v46, 2  ;;  %v12281_v6 = vmin.f32 %v1002_v60, 6.0  ;;  %v12283_v34 = vmin.f32 %v995_v57, 6.0 }
 0x27c   : > { %v1730_v32 = vadd.s32 88, %v19741_v29  ;;  %v7668_v13 = vmax.f32 %v7572_v43, 0.0  ;;  %v1095_v26 = vmin.f32 %v999_v63, 6.0  ;;  %v1825_v2 = vand.u32 15, %v1729_v61 }
 0x27d   : > { %19742 = vst [vmem:[#allocation47_spill] sm:$0xff] %v12281_v6  ;;  %19743 = vst [vmem:[#allocation53_spill] sm:$0xff] %v12283_v34  ;;  %v5736_v47 = vadd.f32 %v5476_v49, %v5028_v1  ;;  %v19744_v5 = vrot.slane %v12017_v21, 2  ;;  %v18305_v20 = vrot.slane %v12281_v6, 7  ;;  %v18306_v9 = vrot.slane %v12283_v34, 7  ;;  %v19746_v1 = vld [vmem:[#allocation58_spill] sm:$0xff] }
 0x27e   : > { %v1832_v19 = vand.u32 15, %v1730_v32  ;;  %v7764_v62 = vmin.f32 %v7668_v13, 6.0  ;;  %v1464_v57 = vrot.slane %v1095_v26, 7  ;;  %vm2145_vm15 = vcmp.gt.s32.totalorder %v1825_v2, 0  ;;  %v12301_v21 = vld [vmem:[#allocation2 + $0x168] sm:$0xff]  ;;  %v19750_v2 = vld [vmem:[#allocation15_spill] sm:$0xff] }
 0x27f   : > { %v7198_v58 = vsel %vm3788_vm5, %v19744_v5, %v18308_v4  ;;  %v6048_v60 = vadd.f32 %v5952_v12, %v5736_v47  ;;  %v19745_v49 = vrot.slane %v12121_v39, 7  ;;  %v12299_v63 = vsel %vm2145_vm15, 1.0, %v19746_v1  ;;  %19747 = vst [vmem:[#allocation46_spill] sm:$0xff] %v12301_v21  ;;  %v12307_v32 = vld [vmem:[#allocation2 + $0x308] sm:$0xff] }
 0x280   : > { %vm2242_vm1 = vcmp.lt.s32.totalorder %v1832_v19, 15  ;;  %v12305_v61 = vmul.f32 %v12301_v21, %v19697_v30  ;;  %19749 = vst [vmem:[#allocation45_spill] sm:$0xff] %v12307_v32  ;;  %7996 = vmatprep.mubr.f32.mxu1 %v7764_v62  ;;  %v19751_v13 = vrot.slane %v19750_v2, 7  ;;  %v1471_v47 = vsel %vm1330_vm7, %v1464_v57, %v18305_v20  ;;  %v19764_v6 = vld [vmem:[#allocation57_spill] sm:$0xff] }
 0x281   : > { %v1457_v43 = vsel %vm1330_vm7, %v19745_v49, %v18306_v9  ;;  %v6750_v12 = vadd.f32 %v6490_v44, %v6048_v60  ;;  %v8550_v26 = vsel %vm2242_vm1, 1.0, %v19746_v1  ;;  %1690 = vst [vmem:[#allocation2 + $0x158] sm:$0xff] %v1471_v47  ;;  %v2455_v5 = vmul.f32 %v12107_v11, %v12299_v63 }
 0x282   : > { %19748 = vst [vmem:[#allocation55_spill] sm:$0xff] %v12305_v61  ;;  %1683 = vst [vmem:[#allocation2 + $0x120] sm:$0xff] %v1457_v43  ;;  %v1465_v39 = vsel %vm1330_vm7, %v19751_v13, %v1464_v57  ;;  %v18307_v19 = vrot.slane %v12305_v61, 1  ;;  %v12319_v62 = vrot.slane %v8550_v26, 6  ;;  %v4215_v44 = vmul.f32 %v12299_v63, %v19706_v15  ;;  %v19785_v61 = vld [vmem:[#allocation36_spill] sm:$0xff] }
 0x283   : > { %1687 = vst [vmem:[#allocation2 + $0x18] sm:$0xff] %v1465_v39  ;;  %v7458_v60 = vadd.f32 %v7198_v58, %v6750_v12  ;;  %v12325_v49 = vmul.f32 %v19715_v37, %v19705_v51  ;;  %v5844_v57 = vmul.f32 %v12299_v63, %v12147_v14  ;;  %v12331_v43 = vmul.f32 %v19720_v38, %v12307_v32  ;;  %v19768_v38 = vld [vmem:[#allocation16_spill] sm:$0xff] }
 0x284   : > { %v2567_v11 = vmul.f32 %v19249_v55, %v2455_v5  ;;  %v19754_v1 = vrot.slane %v12111_v52, 1  ;;  %v12342_v58 = vsel %vm3378_vm2, %v19378_v54, %v12319_v62  ;;  %v4327_v12 = vmul.f32 %v19699_v3, %v4215_v44  ;;  %v19786_v51 = vld [vmem:[#allocation20_spill] sm:$0xff]  ;;  %v19787_v3 = vld [vmem:[#allocation41_spill] sm:$0xff] }
 0x285   : > { %19752 = vst [vmem:[#allocation17_spill] sm:$0xff] %v12325_v49  ;;  %19753 = vst [vmem:[#allocation48_spill] sm:$0xff] %v12331_v43  ;;  %v7571_v2 = vadd.f32 %v19701_v28, %v7458_v60  ;;  %v3509_v13 = vmul.f32 %v12301_v21, %v12342_v58  ;;  %v18310_v39 = vrot.slane %v12325_v49, 1  ;;  %v5139_v47 = vmul.f32 %v19715_v37, %v12342_v58  ;;  %v19771_v49 = vld [vmem:[#allocation56_spill] sm:$0xff] }
 0x286   : > { %v3017_v15 = vsel %vm2950_vm4, %v19754_v1, %v18307_v19  ;;  %v5956_v26 = vmul.f32 %v19714_v59, %v5844_v57  ;;  %v18312_v5 = vrot.slane %v12331_v43, 1  ;;  %v6861_v1 = vmul.f32 %v12307_v32, %v12342_v58  ;;  %v19757_v19 = vld [vmem:[#allocation28_spill] sm:$0xff]  ;;  %v647_v59 = vpop.f32.mrf.mxu0 }
 0x287   : > { %v3273_v52 = vadd.f32 %v3017_v15, %v2567_v11  ;;  %v7667_v20 = vmax.f32 %v7571_v2, 0.0  ;;  %v12356_v44 = vmul.f32 %v19703_v17, %v3509_v13  ;;  %v19756_v60 = vrot.slane %v12137_v41, 1  ;;  %v19761_v2 = vld [vmem:[#allocation61_spill] sm:$0xff]  ;;  %v19762_v41 = vld [vmem:[#allocation10_spill] sm:$0xff] }
 0x288   : > { %v12364_v4 = vmul.f32 %v19757_v19, %v5139_v47  ;;  %v19759_v57 = vrot.slane %v12173_v36, 1  ;;  %v12372_v15 = vmul.f32 %v19727_v22, %v6861_v1  ;;  %v2456_v13 = vmul.f32 %v19761_v2, %v12299_v63  ;;  %v19770_v2 = vld [vmem:[#allocation32_spill] sm:$0xff] }
 0x289   : > { %19755 = vst [vmem:[#allocation13_spill] sm:$0xff] %v12356_v44  ;;  %v4776_v9 = vsel %vm2950_vm4, %v19756_v60, %v18310_v39  ;;  %v12380_v60 = vmul.f32 %v12376_v10, %v19762_v41  ;;  %v7763_v47 = vmin.f32 %v7667_v20, 6.0  ;;  %v18322_v39 = vrot.slane %v12356_v44, 2  ;;  %v19765_v20 = vld [vmem:[#allocation51_spill] sm:$0xff] }
 0x28a   : > { %19758 = vst [vmem:[#allocation7_spill] sm:$0xff] %v12364_v4  ;;  %v6498_v11 = vsel %vm2950_vm4, %v19759_v57, %v18312_v5  ;;  %19760 = vst [vmem:[#allocation58_spill] sm:$0xff] %v12372_v15  ;;  %v18324_v42 = vrot.slane %v12364_v4, 2  ;;  %v3510_v36 = vmul.f32 %v12376_v10, %v12342_v58  ;;  %v19763_v57 = vld [vmem:[#allocation18_spill] sm:$0xff]  ;;  %v4216_v29 = vmul.f32 %v12299_v63, %v19764_v6  ;;  %v12408_v6 = vld [vmem:[#allocation2] sm:$0xff] }
 0x28b   : > { %v2568_v5 = vmul.f32 %v19763_v57, %v2456_v13  ;;  %7997 = vmatmul.mubr.f32.gmra.mxu1 %v7763_v47  ;;  %v19766_v48 = vrot.slane %v19765_v20, 2  ;;  %v19767_v22 = vrot.slane %v12157_v53, 2  ;;  %v12406_v32 = vmul.f32 %v19771_v49, %v19770_v2  ;;  %19772 = vst [vmem:[#allocation61_spill] sm:$0xff] %v12408_v6  ;;  %v19776_v4 = vld [vmem:[#allocation5_spill] sm:$0xff] }
 0x28c   : > { %v12402_v13 = vmul.f32 %v19768_v38, %v3510_v36  ;;  %v19773_v20 = vrot.slane %v12372_v15, 2  ;;  %v19775_v53 = vrot.slane %v12380_v60, 1  ;;  %v19779_v15 = vld [vmem:[#allocation59_spill] sm:$0xff]  ;;  %v648_v17 = vadd.f32 %v647_v59, %v19786_v51  ;;  %v19789_v59 = vld [vmem:[#allocation60_spill] sm:$0xff] }
 0x28d   : > { %v3855_v43 = vsel %vm3788_vm5, %v19766_v48, %v18322_v39  ;;  %v5484_v1 = vsel %vm3788_vm5, %v19767_v22, %v18324_v42  ;;  %v19774_v48 = vrot.slane %v12194_v25, 2  ;;  %v19777_v22 = vrot.slane %v19776_v4, 1  ;;  %v19778_v42 = vld [vmem:[#allocation35_spill] sm:$0xff] }
 0x28e   : > { %19769 = vst [vmem:[#allocation15_spill] sm:$0xff] %v12402_v13  ;;  %v4111_v47 = vadd.f32 %v3855_v43, %v3273_v52  ;;  %v4328_v44 = vmul.f32 %v19778_v42, %v4216_v29  ;;  %v18339_v34 = vrot.slane %v12402_v13, 2  ;;  %v18342_v43 = vrot.slane %v12406_v32, 1 }
 0x28f   : > { %v7206_v39 = vsel %vm3788_vm5, %v19774_v48, %v19773_v20  ;;  %v3019_v36 = vsel %vm2950_vm4, %v19777_v22, %v19775_v53  ;;  %v5140_v52 = vmul.f32 %v19771_v49, %v12342_v58  ;;  %v5845_v20 = vmul.f32 %v12299_v63, %v19779_v15  ;;  %v19780_v48 = vld [vmem:[#allocation38_spill] sm:$0xff] }
 0x290   : > { %v3274_v19 = vadd.f32 %v3019_v36, %v2568_v5  ;;  %v4423_v25 = vadd.f32 %v4327_v12, %v4111_v47  ;;  %v12429_v4 = vmul.f32 %v19780_v48, %v12408_v6  ;;  %v6862_v29 = vmul.f32 %v12408_v6, %v12342_v58  ;;  %v19781_v5 = vld [vmem:[#allocation49_spill] sm:$0xff]  ;;  %v19783_v36 = vld [vmem:[#allocation19_spill] sm:$0xff] }
 0x291   : > { %v19782_v53 = vrot.slane %v19781_v5, 2  ;;  %v19784_v12 = vrot.slane %v19783_v36, 1  ;;  %v12444_v14 = vmul.f32 %v19785_v61, %v5140_v52  ;;  %v5957_v30 = vmul.f32 %v19787_v3, %v5845_v20  ;;  %v19792_v20 = vld [vmem:[#allocation6_spill] sm:$0xff] }
 0x292   : > { %v5032_v28 = vadd.f32 %v4776_v9, %v4423_v25  ;;  %v18341_v13 = vrot.slane %v12429_v4, 1  ;;  %v997_v21 = vmax.f32 %v648_v17, 0.0  ;;  %v2454_v36 = vmul.f32 %v12182_v18, %v12299_v63  ;;  %v12460_v25 = vld [vmem:[#allocation2 + $0xb0] sm:$0xff]  ;;  %v19793_v17 = vld [vmem:[#allocation11_spill] sm:$0xff] }
 0x293   : > { %v3857_v22 = vsel %vm3788_vm5, %v19782_v53, %v18339_v34  ;;  %v4778_v47 = vsel %vm2950_vm4, %v19784_v12, %v18342_v43  ;;  %v18343_v5 = vrot.slane %v12444_v14, 2  ;;  %v19788_v53 = vld [vmem:[#allocation42_spill] sm:$0xff]  ;;  %v19790_v9 = vrot.slane %v19789_v59, 1  ;;  %19791 = vst [vmem:[#allocation57_spill] sm:$0xff] %v12460_v25 }
 0x294   : > { %v4112_v37 = vadd.f32 %v3857_v22, %v3274_v19  ;;  %v12451_v34 = vmul.f32 %v19788_v53, %v6862_v29  ;;  %v5740_v12 = vadd.f32 %v5484_v1, %v5032_v28  ;;  %v12464_v22 = vmul.f32 %v12460_v25, %v19792_v20  ;;  %v19796_v20 = vld [vmem:[#allocation54_spill] sm:$0xff] }
 0x295   : > { %v6500_v19 = vsel %vm2950_vm4, %v19790_v9, %v18341_v13  ;;  %v19794_v29 = vrot.slane %v19793_v17, 2  ;;  %v12472_v28 = vmin.f32 %v997_v21, 6.0  ;;  %v3508_v43 = vmul.f32 %v12460_v25, %v12342_v58 }
 0x296   : > { %v4424_v52 = vadd.f32 %v4328_v44, %v4112_v37  ;;  %v18345_v37 = vrot.slane %v12451_v34, 2  ;;  %v19795_v44 = vld [vmem:[#allocation14_spill] sm:$0xff]  ;;  %v6052_v59 = vadd.f32 %v5956_v26, %v5740_v12  ;;  %v18347_v13 = vrot.slane %v12464_v22, 1 }
 0x297   : > { %v5486_v18 = vsel %vm3788_vm5, %v19794_v29, %v18343_v5  ;;  %v2566_v1 = vmul.f32 %v19795_v44, %v2454_v36  ;;  %v19797_v51 = vrot.slane %v19796_v20, 2  ;;  %v18353_v29 = vrot.slane %v12472_v28, 7  ;;  %v19798_v12 = vld [vmem:[#allocation50_spill] sm:$0xff]  ;;  %v19800_v20 = vld [vmem:[#allocation12_spill] sm:$0xff] }
 0x298   : > { %v5033_v9 = vadd.f32 %v4778_v47, %v4424_v52  ;;  %v4214_v21 = vmul.f32 %v12299_v63, %v11701_v7  ;;  %v12488_v26 = vmul.f32 %v11980_v33, %v19732_v16  ;;  %v6754_v47 = vadd.f32 %v6498_v11, %v6052_v59  ;;  %v19802_v11 = vld [vmem:[#allocation26_spill] sm:$0xff] }
 0x299   : > { %v7208_v17 = vsel %vm3788_vm5, %v19797_v51, %v18345_v37  ;;  %v19799_v52 = vrot.slane %v19798_v12, 1  ;;  %v12496_v25 = vmul.f32 %v19800_v20, %v3508_v43  ;;  %v12498_v51 = vld [vmem:[#allocation2 + $0x2a0] sm:$0xff]  ;;  %v19801_v7 = vrot.slane %v12207_v27, 7 }
 0x29a   : > { %v5741_v36 = vadd.f32 %v5486_v18, %v5033_v9  ;;  %v4326_v18 = vmul.f32 %v19802_v11, %v4214_v21  ;;  %v18348_v59 = vrot.slane %v12488_v26, 1  ;;  %v7462_v9 = vadd.f32 %v7206_v39, %v6754_v47  ;;  %v19805_v47 = vld [vmem:[#allocation29_spill] sm:$0xff] }
 0x29b   : > { %v3015_v5 = vsel %vm2950_vm4, %v19799_v52, %v18347_v13  ;;  %v1461_v37 = vsel %vm1330_vm7, %v19801_v7, %v18353_v29  ;;  %v18352_v52 = vrot.slane %v12496_v25, 2  ;;  %v5138_v43 = vmul.f32 %v11980_v33, %v12342_v58 }
 0x29c   : > { %v3272_v16 = vadd.f32 %v3015_v5, %v2566_v1  ;;  %v6053_v12 = vadd.f32 %v5957_v30, %v5741_v36  ;;  %1685 = vst [vmem:[#allocation2 + $0x208] sm:$0xff] %v1461_v37  ;;  %v19803_v13 = vrot.slane %v12219_v50, 1  ;;  %v5843_v5 = vmul.f32 %v12299_v63, %v12221_v40 }
 0x29d   : > { %v12519_v1 = vmul.f32 %v19304_v45, %v12498_v51  ;;  %v6860_v30 = vmul.f32 %v12498_v51, %v12342_v58  ;;  %v7575_v39 = vadd.f32 %v19364_v35, %v7462_v9  ;;  %v19804_v21 = vrot.slane %v12215_v23, 2 }
 0x29e   : > { %v4774_v27 = vsel %vm2950_vm4, %v19803_v13, %v18348_v59  ;;  %v6755_v37 = vadd.f32 %v6500_v19, %v6053_v12  ;;  %v12530_v13 = vmul.f32 %v19239_v31, %v5138_v43  ;;  %v5955_v36 = vmul.f32 %v19805_v47, %v5843_v5 }
 0x29f   : > { %v3853_v50 = vsel %vm3788_vm5, %v19804_v21, %v18352_v52  ;;  %v18351_v7 = vrot.slane %v12519_v1, 1  ;;  %v12535_v59 = vmul.f32 %v19198_v24, %v6860_v30  ;;  %v7671_v58 = vmax.f32 %v7575_v39, 0.0  ;;  %v12546_v21 = vld [vmem:[#allocation2 + $0xe8] sm:$0xff]  ;;  %v19809_v39 = vld [vmem:[#allocation43_spill] sm:$0xff] }
 0x2a0   : > { %v4110_v63 = vadd.f32 %v3853_v50, %v3272_v16  ;;  %v7463_v9 = vadd.f32 %v7208_v17, %v6755_v37  ;;  %v18350_v19 = vrot.slane %v12530_v13, 2  ;;  %v2571_v23 = vmul.f32 %v12376_v10, %v19763_v57  ;;  %19807 = vst [vmem:[#allocation51_spill] sm:$0xff] %v12546_v21 }
 0x2a1   : > { %v19806_v43 = vrot.slane %v12238_v0, 1  ;;  %v18349_v5 = vrot.slane %v12535_v59, 2  ;;  %v12550_v30 = vmul.f32 %v12546_v21, %v19762_v41  ;;  %v7767_v17 = vmin.f32 %v7671_v58, 6.0 }
 0x2a2   : > { %v4422_v12 = vadd.f32 %v4326_v18, %v4110_v63  ;;  %v7576_v37 = vadd.f32 %v19809_v39, %v7463_v9  ;;  %v19810_v10 = vrot.slane %v12256_v8, 2  ;;  %v12561_v0 = vsel %vm3378_vm2, %v12319_v62, %v19378_v54 }
 0x2a3   : > { %v6496_v16 = vsel %vm2950_vm4, %v19806_v43, %v18351_v7  ;;  %19808 = vst [vmem:[#allocation56_spill] sm:$0xff] %v12550_v30  ;;  %v19811_v63 = vrot.slane %v12276_v46, 2  ;;  %v18354_v9 = vrot.slane %v12550_v30, 1  ;;  %v3513_v43 = vmul.f32 %v12546_v21, %v12561_v0  ;;  %8001 = vmatprep.mubr.f32.mxu1 %v7767_v17  ;;  %v12579_v46 = vld [vmem:[#allocation2 + $0x1f8] sm:$0xff]  ;;  %v19840_v30 = vld [vmem:[#allocation28_spill] sm:$0xff] }
 0x2a4   : > { %v5482_v18 = vsel %vm3788_vm5, %v19810_v10, %v18350_v19  ;;  %v5031_v50 = vadd.f32 %v4774_v27, %v4422_v12  ;;  %v7672_v8 = vmax.f32 %v7576_v37, 0.0  ;;  %v4331_v10 = vmul.f32 %v19771_v49, %v19778_v42  ;;  %19813 = vst [vmem:[#allocation49_spill] sm:$0xff] %v12579_v46 }
 0x2a5   : > { %v7204_v58 = vsel %vm3788_vm5, %v19811_v63, %v18349_v5  ;;  %v12575_v62 = vmul.f32 %v19779_v15, %v19770_v2  ;;  %v5143_v27 = vmul.f32 %v19779_v15, %v12561_v0  ;;  %v19814_v63 = vrot.slane %v12380_v60, 1  ;;  %v649_v5 = vpop.f32.mrf.mxu0 }
 0x2a6   : > { %v5739_v12 = vadd.f32 %v5482_v18, %v5031_v50  ;;  %v12587_v37 = vmul.f32 %v19768_v38, %v3513_v43  ;;  %v5960_v49 = vmul.f32 %v12408_v6, %v19787_v3  ;;  %v7768_v19 = vmin.f32 %v7672_v8, 6.0  ;;  %v19842_v6 = vld [vmem:[#allocation45_spill] sm:$0xff] }
 0x2a7   : > { %19812 = vst [vmem:[#allocation5_spill] sm:$0xff] %v12575_v62  ;;  %v3025_v17 = vsel %vm2950_vm4, %v19814_v63, %v18354_v9  ;;  %v18357_v52 = vrot.slane %v12575_v62, 1  ;;  %v12593_v29 = vmul.f32 %v19785_v61, %v5143_v27  ;;  %v12598_v60 = vmul.f32 %v19780_v48, %v12579_v46  ;;  %v19820_v9 = vld [vmem:[#allocation15_spill] sm:$0xff]  ;;  %v19832_v62 = vld [vmem:[#allocation25_spill] sm:$0xff]  ;;  %v653_v38 = vpop.f32.mrf.mxu0 }
 0x2a8   : > { %19815 = vst [vmem:[#allocation19_spill] sm:$0xff] %v12587_v37  ;;  %v3277_v7 = vadd.f32 %v3025_v17, %v2571_v23  ;;  %v6051_v18 = vadd.f32 %v5955_v36, %v5739_v12  ;;  %v18359_v50 = vrot.slane %v12587_v37, 2  ;;  %v6865_v43 = vmul.f32 %v12579_v46, %v12561_v0  ;;  %8773 = vmatprep.mubr.f32.mxu0 %v7768_v19  ;;  %v19819_v12 = vld [vmem:[#allocation46_spill] sm:$0xff]  ;;  %v19835_v37 = vld [vmem:[#allocation55_spill] sm:$0xff] }
 0x2a9   : > { %19816 = vst [vmem:[#allocation60_spill] sm:$0xff] %v12593_v29  ;;  %19817 = vst [vmem:[#allocation11_spill] sm:$0xff] %v12598_v60  ;;  %v19818_v23 = vrot.slane %v12406_v32, 1  ;;  %v18358_v27 = vrot.slane %v12593_v29, 2  ;;  %v650_v36 = vadd.f32 %v649_v5, %v9575_v56  ;;  %v2570_v63 = vmul.f32 %v19819_v12, %v19249_v55  ;;  %v19827_v29 = vld [vmem:[#allocation44_spill] sm:$0xff] }
 0x2aa   : > { %v6753_v17 = vadd.f32 %v6496_v16, %v6051_v18  ;;  %v19821_v3 = vrot.slane %v19820_v9, 2  ;;  %v18362_v61 = vrot.slane %v12598_v60, 1  ;;  %v12618_v32 = vmul.f32 %v19788_v53, %v6865_v43  ;;  %v12625_v16 = vld [vmem:[#allocation2 + $0x318] sm:$0xff]  ;;  %v19824_v18 = vld [vmem:[#allocation4_spill] sm:$0xff] }
 0x2ab   : > { %v4784_v8 = vsel %vm2950_vm4, %v19818_v23, %v18357_v52  ;;  %v19823_v5 = vrot.slane %v12444_v14, 2  ;;  %v998_v12 = vmax.f32 %v650_v36, 0.0  ;;  %v12629_v9 = vmul.f32 %v12625_v16, %v19824_v18 }
 0x2ac   : > { %v3863_v19 = vsel %vm3788_vm5, %v19821_v3, %v18359_v50  ;;  %19822 = vst [vmem:[#allocation54_spill] sm:$0xff] %v12618_v32  ;;  %v7461_v3 = vadd.f32 %v7204_v58, %v6753_v17  ;;  %v19825_v43 = vrot.slane %v12429_v4, 1  ;;  %v3512_v14 = vmul.f32 %v12625_v16, %v12561_v0  ;;  %v19826_v50 = vld [vmem:[#allocation23_spill] sm:$0xff] }
 0x2ad   : > { %v4115_v23 = vadd.f32 %v3863_v19, %v3277_v7  ;;  %v5492_v52 = vsel %vm3788_vm5, %v19823_v5, %v18358_v27  ;;  %v18367_v19 = vrot.slane %v12618_v32, 2  ;;  %v12639_v36 = vmin.f32 %v998_v12, 6.0  ;;  %v19828_v58 = vld [vmem:[#allocation39_spill] sm:$0xff] }
 0x2ae   : > { %v6506_v7 = vsel %vm2950_vm4, %v19825_v43, %v18362_v61  ;;  %v4330_v53 = vmul.f32 %v19827_v29, %v19826_v50  ;;  %v7574_v17 = vadd.f32 %v19828_v58, %v7461_v3  ;;  %v19829_v4 = vrot.slane %v12451_v34, 2  ;;  %v19830_v61 = vld [vmem:[#allocation8_spill] sm:$0xff] }
 0x2af   : > { %v4427_v5 = vadd.f32 %v4331_v10, %v4115_v23  ;;  %v12651_v60 = vmul.f32 %v19830_v61, %v3512_v14  ;;  %v19833_v10 = vld [vmem:[#allocation52_spill] sm:$0xff]  ;;  %v18377_v27 = vrot.slane %v12639_v36, 7  ;;  %v19834_v29 = vrot.slane %v12629_v9, 1 }
 0x2b0   : > { %v7214_v43 = vsel %vm3788_vm5, %v19829_v4, %v18367_v19  ;;  %v12655_v23 = vmul.f32 %v19833_v10, %v19832_v62  ;;  %v19836_v3 = vrot.slane %v19835_v37, 1  ;;  %v5142_v34 = vmul.f32 %v19833_v10, %v12561_v0  ;;  %v12665_v4 = vld [vmem:[#allocation2 + $0x170] sm:$0xff] }
 0x2b1   : > { %19831 = vst [vmem:[#allocation50_spill] sm:$0xff] %v12651_v60  ;;  %v5036_v12 = vadd.f32 %v4784_v8, %v4427_v5  ;;  %19837 = vst [vmem:[#allocation46_spill] sm:$0xff] %v12665_v4  ;;  %v7670_v14 = vmax.f32 %v7574_v17, 0.0  ;;  %v18380_v48 = vrot.slane %v12651_v60, 2  ;;  %v19838_v5 = vld [vmem:[#allocation53_spill] sm:$0xff] }
 0x2b2   : > { %v3023_v32 = vsel %vm2950_vm4, %v19836_v3, %v19834_v29  ;;  %v18382_v46 = vrot.slane %v12655_v23, 1  ;;  %v19839_v42 = vrot.slane %v19838_v5, 7  ;;  %v12675_v29 = vmul.f32 %v19840_v30, %v5142_v34  ;;  %v19841_v3 = vld [vmem:[#allocation30_spill] sm:$0xff]  ;;  %v19847_v34 = vld [vmem:[#allocation31_spill] sm:$0xff] }
 0x2b3   : > { %v3276_v19 = vadd.f32 %v3023_v32, %v2570_v63  ;;  %v5744_v8 = vadd.f32 %v5492_v52, %v5036_v12  ;;  %v5959_v2 = vmul.f32 %v19842_v6, %v19841_v3  ;;  %v7766_v17 = vmin.f32 %v7670_v14, 6.0  ;;  %v19843_v63 = vld [vmem:[#allocation13_spill] sm:$0xff] }
 0x2b4   : > { %v1463_v37 = vsel %vm1330_vm7, %v19839_v42, %v18377_v27  ;;  %v19844_v32 = vrot.slane %v19843_v63, 2  ;;  %v19845_v12 = vld [vmem:[#allocation17_spill] sm:$0xff]  ;;  %v12691_v27 = vmul.f32 %v19847_v34, %v12665_v4  ;;  %v18387_v14 = vrot.slane %v12675_v29, 2  ;;  %v19854_v63 = vld [vmem:[#allocation34_spill] sm:$0xff] }
 0x2b5   : > { %1686 = vst [vmem:[#allocation2 + $0x1d8] sm:$0xff] %v1463_v37  ;;  %v19846_v5 = vrot.slane %v19845_v12, 1  ;;  %v6056_v15 = vadd.f32 %v5960_v49, %v5744_v8  ;;  %v6864_v37 = vmul.f32 %v12665_v4, %v12561_v0  ;;  %8002 = vmatmul.mubr.f32.gmra.mxu1 %v7766_v17  ;;  %v19849_v12 = vld [vmem:[#allocation57_spill] sm:$0xff]  ;;  %v19852_v8 = vld [vmem:[#allocation7_spill] sm:$0xff] }
 0x2b6   : > { %v3861_v52 = vsel %vm3788_vm5, %v19844_v32, %v18380_v48  ;;  %v19848_v32 = vld [vmem:[#allocation20_spill] sm:$0xff]  ;;  %v2569_v60 = vmul.f32 %v19849_v12, %v19795_v44 }
 0x2b7   : > { %v4782_v42 = vsel %vm2950_vm4, %v19846_v5, %v18382_v46  ;;  %v4114_v57 = vadd.f32 %v3861_v52, %v3276_v19  ;;  %v654_v48 = vadd.f32 %v653_v38, %v19848_v32  ;;  %v12700_v5 = vld [vmem:[#allocation2 + $0x98] sm:$0xff]  ;;  %v19850_v46 = vld [vmem:[#allocation6_spill] sm:$0xff]  ;;  %v6758_v49 = vadd.f32 %v6506_v7, %v6056_v15  ;;  %v19856_v12 = vld [vmem:[#allocation48_spill] sm:$0xff] }
 0x2b8   : > { %v12704_v41 = vmul.f32 %v12700_v5, %v19850_v46  ;;  %v19853_v52 = vrot.slane %v19852_v8, 2  ;;  %v12712_v21 = vmul.f32 %v19854_v63, %v6864_v37  ;;  %v19855_v38 = vrot.slane %v12691_v27, 1 }
 0x2b9   : > { %v4426_v19 = vadd.f32 %v4330_v53, %v4114_v57  ;;  %v19857_v44 = vrot.slane %v19856_v12, 1  ;;  %v1000_v30 = vmax.f32 %v654_v48, 0.0  ;;  %v3511_v15 = vmul.f32 %v12700_v5, %v12561_v0 }
 0x2ba   : > { %19851 = vst [vmem:[#allocation15_spill] sm:$0xff] %v12704_v41  ;;  %v5490_v17 = vsel %vm3788_vm5, %v19853_v52, %v18387_v14  ;;  %v18386_v46 = vrot.slane %v12704_v41, 1  ;;  %v7466_v57 = vadd.f32 %v7214_v43, %v6758_v49  ;;  %v18391_v7 = vrot.slane %v12712_v21, 2  ;;  %v8716_v49 = vpop.f32.mrf.mxu1 }
 0x2bb   : > { %v6504_v32 = vsel %vm2950_vm4, %v19857_v44, %v19855_v38  ;;  %v5035_v53 = vadd.f32 %v4782_v42, %v4426_v19  ;;  %v4329_v37 = vmul.f32 %v11980_v33, %v19802_v11  ;;  %v12725_v8 = vmin.f32 %v1000_v30, 6.0  ;;  %v19859_v38 = vld [vmem:[#allocation24_spill] sm:$0xff]  ;;  %v19860_v19 = vld [vmem:[#allocation58_spill] sm:$0xff] }
 0x2bc   : > { %v19858_v52 = vrot.slane %v12464_v22, 1  ;;  %v12733_v44 = vmul.f32 %v19800_v20, %v3511_v15  ;;  %v12737_v43 = vmul.f32 %v12221_v40, %v19859_v38  ;;  %v12739_v42 = vld [vmem:[#allocation2 + $0x220] sm:$0xff]  ;;  %v7579_v33 = vadd.f32 %v19809_v39, %v7466_v57 }
 0x2bd   : > { %v5743_v30 = vadd.f32 %v5490_v17, %v5035_v53  ;;  %v19861_v12 = vrot.slane %v19860_v19, 2  ;;  %v18393_v15 = vrot.slane %v12725_v8, 7  ;;  %v5141_v11 = vmul.f32 %v12221_v40, %v12561_v0  ;;  %v655_v53 = vpop.f32.mrf.mxu0 }
 0x2be   : > { %v3021_v48 = vsel %vm2950_vm4, %v19858_v52, %v18386_v46  ;;  %v18394_v46 = vrot.slane %v12733_v44, 2  ;;  %v18402_v14 = vrot.slane %v12737_v43, 1  ;;  %v7675_v20 = vmax.f32 %v7579_v33, 0.0 }
 0x2bf   : > { %v7212_v22 = vsel %vm3788_vm5, %v19861_v12, %v18391_v7  ;;  %v3275_v52 = vadd.f32 %v3021_v48, %v2569_v60  ;;  %v6055_v41 = vadd.f32 %v5959_v2, %v5743_v30  ;;  %v5958_v17 = vmul.f32 %v12498_v51, %v19805_v47  ;;  %v892_v7 = vpop.f32.mrf.mxu1 }
 0x2c0   : > { %v12756_v57 = vmul.f32 %v19304_v45, %v12739_v42  ;;  %v19862_v60 = vrot.slane %v12472_v28, 7  ;;  %v19863_v19 = vrot.slane %v12496_v25, 2  ;;  %v19864_v33 = vrot.slane %v12488_v26, 1 }
 0x2c1   : > { %v12774_v12 = vmul.f32 %v19239_v31, %v5141_v11  ;;  %v7771_v39 = vmin.f32 %v7675_v20, 6.0  ;;  %v6757_v28 = vadd.f32 %v6504_v32, %v6055_v41  ;;  %v656_v26 = vadd.f32 %v655_v53, %v9575_v56 }
 0x2c2   : > { %v1467_v48 = vsel %vm1330_vm7, %v19862_v60, %v18393_v15  ;;  %v3859_v2 = vsel %vm3788_vm5, %v19863_v19, %v18394_v46  ;;  %v4780_v30 = vsel %vm2950_vm4, %v19864_v33, %v18402_v14  ;;  %v18401_v15 = vrot.slane %v12756_v57, 1  ;;  %v19865_v46 = vld [vmem:[#allocation22_spill] sm:$0xff] }
 0x2c3   : > { %1688 = vst [vmem:[#allocation2 + $0x78] sm:$0xff] %v1467_v48  ;;  %v4113_v60 = vadd.f32 %v3859_v2, %v3275_v52  ;;  %v18396_v25 = vrot.slane %v12774_v12, 2  ;;  %v6863_v19 = vmul.f32 %v12739_v42, %v12561_v0  ;;  %v898_v47 = vadd.f32 %v8716_v49, %v19865_v46  ;;  %8774 = vmatmul.mubr.f32.gmra.mxu0 %v7771_v39  ;;  %v12896_v14 = vld [vmem:[#allocation2 + $0x350] sm:$0xff] }
 0x2c4   : > { %v7465_v33 = vadd.f32 %v7212_v22, %v6757_v28  ;;  %v19866_v41 = vrot.slane %v12519_v1, 1  ;;  %v893_v32 = vadd.f32 %v892_v7, %v19865_v46  ;;  %v19867_v52 = vrot.slane %v12530_v13, 2  ;;  %v19868_v1 = vld [vmem:[#allocation3_spill] sm:$0xff] }
 0x2c5   : > { %v4425_v11 = vadd.f32 %v4329_v37, %v4113_v60  ;;  %v12794_v49 = vmul.f32 %v19198_v24, %v6863_v19  ;;  %v1008_v39 = vmax.f32 %v898_v47, 0.0  ;;  %v1001_v22 = vmax.f32 %v656_v26, 0.0 }
 0x2c6   : > { %v6502_v20 = vsel %vm2950_vm4, %v19866_v41, %v18401_v15  ;;  %v5488_v0 = vsel %vm3788_vm5, %v19867_v52, %v18396_v25  ;;  %v7578_v37 = vadd.f32 %v19364_v35, %v7465_v33  ;;  %v1005_v48 = vmax.f32 %v893_v32, 0.0 }
 0x2c7   : > { %v5034_v53 = vadd.f32 %v4780_v30, %v4425_v11  ;;  %v1731_v2 = vadd.s32 96, %v19868_v1  ;;  %v18400_v28 = vrot.slane %v12794_v49, 2  ;;  %v12799_v7 = vmin.f32 %v1008_v39, 6.0 }
 0x2c8   : > { %v12801_v60 = vmin.f32 %v1001_v22, 6.0  ;;  %v1732_v13 = vadd.s32 104, %v19868_v1  ;;  %v7674_v41 = vmax.f32 %v7578_v37, 0.0  ;;  %v1101_v19 = vmin.f32 %v1005_v48, 6.0  ;;  %v12821_v48 = vld [vmem:[#allocation2 + $0x2e8] sm:$0xff] }
 0x2c9   : > { %19869 = vst [vmem:[#allocation44_spill] sm:$0xff] %v12799_v7  ;;  %v5742_v52 = vadd.f32 %v5488_v0, %v5034_v53  ;;  %v1839_v25 = vand.u32 15, %v1731_v2  ;;  %v19871_v47 = vrot.slane %v12535_v59, 2  ;;  %v18397_v26 = vrot.slane %v12799_v7, 7  ;;  %v12816_v53 = vld [vmem:[#allocation2 + $0x2b0] sm:$0xff]  ;;  %19874 = vst [vmem:[#allocation53_spill] sm:$0xff] %v12821_v48 }
 0x2ca   : > { %19870 = vst [vmem:[#allocation52_spill] sm:$0xff] %v12801_v60  ;;  %v18398_v33 = vrot.slane %v12801_v60, 7  ;;  %v1846_v11 = vand.u32 15, %v1732_v13  ;;  %v7770_v32 = vmin.f32 %v7674_v41, 6.0  ;;  %v1476_v22 = vrot.slane %v1101_v19, 7  ;;  %19873 = vst [vmem:[#allocation55_spill] sm:$0xff] %v12816_v53 }
 0x2cb   : > { %v7210_v30 = vsel %vm3788_vm5, %v19871_v47, %v18400_v28  ;;  %v6054_v39 = vadd.f32 %v5958_v17, %v5742_v52  ;;  %vm2147_vm3 = vcmp.gt.s32.totalorder %v1839_v25, 0  ;;  %v19872_v0 = vrot.slane %v12639_v36, 7  ;;  %v12827_v17 = vld [vmem:[#allocation2 + $0x200] sm:$0xff]  ;;  %v19877_v36 = vld [vmem:[#allocation47_spill] sm:$0xff] }
 0x2cc   : > { %v12819_v59 = vsel %vm2147_vm3, 1.0, %v12816_v53  ;;  %vm2244_vm6 = vcmp.lt.s32.totalorder %v1846_v11, 15  ;;  %v12825_v2 = vmul.f32 %v12821_v48, %v19824_v18  ;;  %19876 = vst [vmem:[#allocation17_spill] sm:$0xff] %v12827_v17  ;;  %8006 = vmatprep.mubr.f32.mxu1 %v7770_v32  ;;  %v19878_v13 = vrot.slane %v19877_v36, 7  ;;  %v19884_v28 = vld [vmem:[#allocation28_spill] sm:$0xff] }
 0x2cd   : > { %v1469_v37 = vsel %vm1330_vm7, %v19872_v0, %v18398_v33  ;;  %v6756_v25 = vadd.f32 %v6502_v20, %v6054_v39  ;;  %v1483_v52 = vsel %vm1330_vm7, %v1476_v22, %v18397_v26  ;;  %v8551_v19 = vsel %vm2244_vm6, 1.0, %v12816_v53  ;;  %v19891_v53 = vld [vmem:[#allocation59_spill] sm:$0xff] }
 0x2ce   : > { %19875 = vst [vmem:[#allocation13_spill] sm:$0xff] %v12825_v2  ;;  %1689 = vst [vmem:[#allocation2 + $0x1e8] sm:$0xff] %v1469_v37  ;;  %v1477_v41 = vsel %vm1330_vm7, %v19878_v13, %v1476_v22  ;;  %v2461_v47 = vmul.f32 %v12625_v16, %v12819_v59  ;;  %v18399_v11 = vrot.slane %v12825_v2, 1  ;;  %v12839_v32 = vrot.slane %v8551_v19, 6  ;;  %v19912_v2 = vld [vmem:[#allocation36_spill] sm:$0xff] }
 0x2cf   : > { %1693 = vst [vmem:[#allocation2 + $0x358] sm:$0xff] %v1477_v41  ;;  %1696 = vst [vmem:[#allocation2 + $0x180] sm:$0xff] %v1483_v52  ;;  %v4221_v20 = vmul.f32 %v12819_v59, %v19833_v10  ;;  %v7464_v39 = vadd.f32 %v7210_v30, %v6756_v25  ;;  %v12845_v0 = vmul.f32 %v19842_v6, %v19832_v62  ;;  %v19881_v36 = vrot.slane %v12629_v9, 1  ;;  %v19913_v62 = vld [vmem:[#allocation20_spill] sm:$0xff] }
 0x2d0   : > { %v5850_v22 = vmul.f32 %v12819_v59, %v12665_v4  ;;  %v12851_v37 = vmul.f32 %v19847_v34, %v12827_v17  ;;  %v2573_v16 = vmul.f32 %v19249_v55, %v2461_v47  ;;  %v12862_v30 = vsel %vm3378_vm2, %v19378_v54, %v12839_v32  ;;  %v19895_v34 = vld [vmem:[#allocation16_spill] sm:$0xff] }
 0x2d1   : > { %19879 = vst [vmem:[#allocation57_spill] sm:$0xff] %v12845_v0  ;;  %v3029_v10 = vsel %vm2950_vm4, %v19881_v36, %v18399_v11  ;;  %v4333_v25 = vmul.f32 %v19826_v50, %v4221_v20  ;;  %v7577_v13 = vadd.f32 %v19828_v58, %v7464_v39  ;;  %v3515_v41 = vmul.f32 %v12821_v48, %v12862_v30  ;;  %v19914_v50 = vld [vmem:[#allocation41_spill] sm:$0xff] }
 0x2d2   : > { %19880 = vst [vmem:[#allocation7_spill] sm:$0xff] %v12851_v37  ;;  %v18403_v52 = vrot.slane %v12845_v0, 1  ;;  %v5145_v19 = vmul.f32 %v19842_v6, %v12862_v30  ;;  %v3279_v9 = vadd.f32 %v3029_v10, %v2573_v16  ;;  %v5962_v47 = vmul.f32 %v19841_v3, %v5850_v22  ;;  %v19898_v0 = vld [vmem:[#allocation61_spill] sm:$0xff]  ;;  %v659_v3 = vpop.f32.mrf.mxu0 }
 0x2d3   : > { %v18405_v36 = vrot.slane %v12851_v37, 1  ;;  %v6867_v26 = vmul.f32 %v12827_v17, %v12862_v30  ;;  %v7673_v33 = vmax.f32 %v7577_v13, 0.0  ;;  %v12876_v20 = vmul.f32 %v19830_v61, %v3515_v41  ;;  %v19888_v13 = vld [vmem:[#allocation51_spill] sm:$0xff] }
 0x2d4   : > { %v19883_v39 = vrot.slane %v12655_v23, 1  ;;  %v12884_v15 = vmul.f32 %v19884_v28, %v5145_v19  ;;  %v19886_v22 = vrot.slane %v12691_v27, 1  ;;  %v2462_v41 = vmul.f32 %v19888_v13, %v12819_v59  ;;  %v19889_v23 = vld [vmem:[#allocation10_spill] sm:$0xff]  ;;  %v19897_v13 = vld [vmem:[#allocation32_spill] sm:$0xff] }
 0x2d5   : > { %19882 = vst [vmem:[#allocation48_spill] sm:$0xff] %v12876_v20  ;;  %v12892_v10 = vmul.f32 %v19854_v63, %v6867_v26  ;;  %v7769_v19 = vmin.f32 %v7673_v33, 6.0  ;;  %v3516_v27 = vmul.f32 %v12896_v14, %v12862_v30  ;;  %v4222_v1 = vmul.f32 %v12819_v59, %v19891_v53  ;;  %v19892_v33 = vld [vmem:[#allocation50_spill] sm:$0xff] }
 0x2d6   : > { %v4788_v11 = vsel %vm2950_vm4, %v19883_v39, %v18403_v52  ;;  %19885 = vst [vmem:[#allocation58_spill] sm:$0xff] %v12884_v15  ;;  %v6510_v16 = vsel %vm2950_vm4, %v19886_v22, %v18405_v36  ;;  %v12900_v39 = vmul.f32 %v12896_v14, %v19889_v23  ;;  %v18416_v52 = vrot.slane %v12876_v20, 2  ;;  %v19890_v22 = vld [vmem:[#allocation18_spill] sm:$0xff] }
 0x2d7   : > { %19887 = vst [vmem:[#allocation47_spill] sm:$0xff] %v12892_v10  ;;  %v18418_v7 = vrot.slane %v12884_v15, 2  ;;  %v2574_v36 = vmul.f32 %v19890_v22, %v2462_v41  ;;  %8007 = vmatmul.mubr.f32.gmra.mxu1 %v7769_v19  ;;  %v19893_v46 = vrot.slane %v19892_v33, 2  ;;  %v19894_v63 = vrot.slane %v12675_v29, 2  ;;  %v12928_v53 = vld [vmem:[#allocation2 + $0x2f0] sm:$0xff]  ;;  %v19903_v15 = vld [vmem:[#allocation56_spill] sm:$0xff] }
 0x2d8   : > { %v12922_v41 = vmul.f32 %v19895_v34, %v3516_v27  ;;  %v12926_v17 = vmul.f32 %v19898_v0, %v19897_v13  ;;  %19899 = vst [vmem:[#allocation59_spill] sm:$0xff] %v12928_v53  ;;  %v19900_v33 = vrot.slane %v12892_v10, 2  ;;  %v19902_v29 = vrot.slane %v12900_v39, 1  ;;  %v19906_v10 = vld [vmem:[#allocation49_spill] sm:$0xff] }
 0x2d9   : > { %v3867_v37 = vsel %vm3788_vm5, %v19893_v46, %v18416_v52  ;;  %v5496_v26 = vsel %vm3788_vm5, %v19894_v63, %v18418_v7  ;;  %v19901_v46 = vrot.slane %v12712_v21, 2  ;;  %v19904_v63 = vrot.slane %v19903_v15, 1  ;;  %v19905_v7 = vld [vmem:[#allocation35_spill] sm:$0xff] }
 0x2da   : > { %19896 = vst [vmem:[#allocation51_spill] sm:$0xff] %v12922_v41  ;;  %v4117_v19 = vadd.f32 %v3867_v37, %v3279_v9  ;;  %v4334_v20 = vmul.f32 %v19905_v7, %v4222_v1  ;;  %v18433_v60 = vrot.slane %v12922_v41, 2  ;;  %v18436_v37 = vrot.slane %v12926_v17, 1 }
 0x2db   : > { %v7218_v52 = vsel %vm3788_vm5, %v19901_v46, %v19900_v33  ;;  %v3031_v27 = vsel %vm2950_vm4, %v19904_v63, %v19902_v29  ;;  %v5146_v9 = vmul.f32 %v19898_v0, %v12862_v30  ;;  %v5851_v33 = vmul.f32 %v12819_v59, %v19906_v10  ;;  %v19907_v46 = vld [vmem:[#allocation38_spill] sm:$0xff] }
 0x2dc   : > { %v3280_v28 = vadd.f32 %v3031_v27, %v2574_v36  ;;  %v4429_v21 = vadd.f32 %v4333_v25, %v4117_v19  ;;  %v12949_v15 = vmul.f32 %v19907_v46, %v12928_v53  ;;  %v6868_v1 = vmul.f32 %v12928_v53, %v12862_v30  ;;  %v19908_v36 = vld [vmem:[#allocation19_spill] sm:$0xff]  ;;  %v19910_v27 = vld [vmem:[#allocation5_spill] sm:$0xff] }
 0x2dd   : > { %v19909_v29 = vrot.slane %v19908_v36, 2  ;;  %v19911_v25 = vrot.slane %v19910_v27, 1  ;;  %v12964_v4 = vmul.f32 %v19912_v2, %v5146_v9  ;;  %v660_v61 = vadd.f32 %v659_v3, %v19913_v62  ;;  %v19916_v3 = vld [vmem:[#allocation11_spill] sm:$0xff] }
 0x2de   : > { %v5038_v58 = vadd.f32 %v4788_v11, %v4429_v21  ;;  %v5963_v18 = vmul.f32 %v19914_v50, %v5851_v33  ;;  %v18435_v41 = vrot.slane %v12949_v15, 1  ;;  %v2460_v27 = vmul.f32 %v12700_v5, %v12819_v59  ;;  %v12980_v21 = vld [vmem:[#allocation2 + $0x1f0] sm:$0xff] }
 0x2df   : > { %v3869_v63 = vsel %vm3788_vm5, %v19909_v29, %v18433_v60  ;;  %v4790_v19 = vsel %vm2950_vm4, %v19911_v25, %v18436_v37  ;;  %v18437_v36 = vrot.slane %v12964_v4, 2  ;;  %v19915_v29 = vld [vmem:[#allocation42_spill] sm:$0xff]  ;;  %v1003_v48 = vmax.f32 %v660_v61, 0.0  ;;  %19918 = vst [vmem:[#allocation50_spill] sm:$0xff] %v12980_v21  ;;  %v19920_v61 = vld [vmem:[#allocation60_spill] sm:$0xff] }
 0x2e0   : > { %v4118_v6 = vadd.f32 %v3869_v63, %v3280_v28  ;;  %v12971_v60 = vmul.f32 %v19915_v29, %v6868_v1  ;;  %v5746_v25 = vadd.f32 %v5496_v26, %v5038_v58  ;;  %v19917_v11 = vrot.slane %v19916_v3, 1  ;;  %v19919_v33 = vld [vmem:[#allocation6_spill] sm:$0xff] }
 0x2e1   : > { %v12984_v63 = vmul.f32 %v12980_v21, %v19919_v33  ;;  %v19921_v1 = vrot.slane %v19920_v61, 2  ;;  %v12992_v58 = vmin.f32 %v1003_v48, 6.0  ;;  %v3514_v37 = vmul.f32 %v12980_v21, %v12862_v30  ;;  %v19923_v33 = vld [vmem:[#allocation54_spill] sm:$0xff] }
 0x2e2   : > { %v4430_v9 = vadd.f32 %v4334_v20, %v4118_v6  ;;  %v6512_v28 = vsel %vm2950_vm4, %v19917_v11, %v18435_v41  ;;  %v18439_v6 = vrot.slane %v12971_v60, 2  ;;  %v19922_v20 = vld [vmem:[#allocation14_spill] sm:$0xff]  ;;  %v6058_v3 = vadd.f32 %v5962_v47, %v5746_v25  ;;  %v19925_v25 = vld [vmem:[#allocation15_spill] sm:$0xff] }
 0x2e3   : > { %v5498_v5 = vsel %vm3788_vm5, %v19921_v1, %v18437_v36  ;;  %v2572_v26 = vmul.f32 %v19922_v20, %v2460_v27  ;;  %v18441_v41 = vrot.slane %v12984_v63, 1  ;;  %v19924_v62 = vrot.slane %v19923_v33, 2  ;;  %v19927_v33 = vld [vmem:[#allocation12_spill] sm:$0xff] }
 0x2e4   : > { %v5039_v11 = vadd.f32 %v4790_v19, %v4430_v9  ;;  %v18447_v1 = vrot.slane %v12992_v58, 7  ;;  %v4220_v48 = vmul.f32 %v12819_v59, %v12221_v40  ;;  %v13008_v47 = vmul.f32 %v12498_v51, %v19859_v38 }
 0x2e5   : > { %v7220_v61 = vsel %vm3788_vm5, %v19924_v62, %v18439_v6  ;;  %v6760_v19 = vadd.f32 %v6510_v16, %v6058_v3  ;;  %v19926_v9 = vrot.slane %v19925_v25, 1  ;;  %v13016_v21 = vmul.f32 %v19927_v33, %v3514_v37  ;;  %v13018_v62 = vld [vmem:[#allocation2 + $0x2e0] sm:$0xff]  ;;  %v19929_v16 = vld [vmem:[#allocation26_spill] sm:$0xff] }
 0x2e6   : > { %v5747_v27 = vadd.f32 %v5498_v5, %v5039_v11  ;;  %v19928_v40 = vrot.slane %v12725_v8, 7  ;;  %v4332_v5 = vmul.f32 %v19929_v16, %v4220_v48  ;;  %v18442_v3 = vrot.slane %v13008_v47, 1 }
 0x2e7   : > { %v3027_v36 = vsel %vm2950_vm4, %v19926_v9, %v18441_v41  ;;  %v7468_v11 = vadd.f32 %v7218_v52, %v6760_v19  ;;  %v18446_v9 = vrot.slane %v13016_v21, 2  ;;  %v5144_v37 = vmul.f32 %v12498_v51, %v12862_v30  ;;  %v19932_v19 = vld [vmem:[#allocation29_spill] sm:$0xff] }
 0x2e8   : > { %v1473_v6 = vsel %vm1330_vm7, %v19928_v40, %v18447_v1  ;;  %v3278_v38 = vadd.f32 %v3027_v36, %v2572_v26  ;;  %v6059_v25 = vadd.f32 %v5963_v18, %v5747_v27  ;;  %v19930_v41 = vrot.slane %v12737_v43, 1 }
 0x2e9   : > { %1691 = vst [vmem:[#allocation2 + $0x58] sm:$0xff] %v1473_v6  ;;  %v5849_v36 = vmul.f32 %v12819_v59, %v12739_v42  ;;  %v13039_v26 = vmul.f32 %v19304_v45, %v13018_v62  ;;  %v6866_v18 = vmul.f32 %v13018_v62, %v12862_v30  ;;  %v7581_v52 = vadd.f32 %v19364_v35, %v7468_v11 }
 0x2ea   : > { %v4786_v8 = vsel %vm2950_vm4, %v19930_v41, %v18442_v3  ;;  %v6761_v6 = vadd.f32 %v6512_v28, %v6059_v25  ;;  %v19931_v48 = vrot.slane %v12733_v44, 2  ;;  %v13050_v41 = vmul.f32 %v19239_v31, %v5144_v37 }
 0x2eb   : > { %v5961_v27 = vmul.f32 %v19932_v19, %v5849_v36  ;;  %v18445_v40 = vrot.slane %v13039_v26, 1  ;;  %v13055_v3 = vmul.f32 %v19198_v24, %v6866_v18  ;;  %v7677_v30 = vmax.f32 %v7581_v52, 0.0  ;;  %v19936_v52 = vld [vmem:[#allocation43_spill] sm:$0xff] }
 0x2ec   : > { %v3865_v43 = vsel %vm3788_vm5, %v19931_v48, %v18446_v9  ;;  %v7469_v11 = vadd.f32 %v7220_v61, %v6761_v6  ;;  %v18444_v28 = vrot.slane %v13050_v41, 2  ;;  %v2577_v44 = vmul.f32 %v12896_v14, %v19890_v22  ;;  %v13066_v48 = vld [vmem:[#allocation2 + $0x338] sm:$0xff] }
 0x2ed   : > { %v4116_v59 = vadd.f32 %v3865_v43, %v3278_v38  ;;  %v19933_v37 = vrot.slane %v12756_v57, 1  ;;  %v18443_v36 = vrot.slane %v13055_v3, 2  ;;  %19934 = vst [vmem:[#allocation61_spill] sm:$0xff] %v13066_v48  ;;  %v13070_v18 = vmul.f32 %v13066_v48, %v19889_v23 }
 0x2ee   : > { %v7773_v61 = vmin.f32 %v7677_v30, 6.0  ;;  %v7582_v6 = vadd.f32 %v19936_v52, %v7469_v11  ;;  %v19937_v14 = vrot.slane %v12774_v12, 2  ;;  %v13081_v57 = vsel %vm3378_vm2, %v12839_v32, %v19378_v54 }
 0x2ef   : > { %v4428_v25 = vadd.f32 %v4332_v5, %v4116_v59  ;;  %v6508_v38 = vsel %vm2950_vm4, %v19933_v37, %v18445_v40  ;;  %19935 = vst [vmem:[#allocation56_spill] sm:$0xff] %v13070_v18  ;;  %v19938_v59 = vrot.slane %v12794_v49, 2  ;;  %v18448_v11 = vrot.slane %v13070_v18, 1  ;;  %v13099_v49 = vld [vmem:[#allocation2 + $0xf0] sm:$0xff]  ;;  %v19967_v18 = vld [vmem:[#allocation28_spill] sm:$0xff] }
 0x2f0   : > { %v5494_v5 = vsel %vm3788_vm5, %v19937_v14, %v18444_v28  ;;  %v3519_v37 = vmul.f32 %v13066_v48, %v13081_v57  ;;  %8011 = vmatprep.mubr.f32.mxu1 %v7773_v61  ;;  %v7678_v12 = vmax.f32 %v7582_v6, 0.0  ;;  %v4337_v14 = vmul.f32 %v19898_v0, %v19905_v7  ;;  %19940 = vst [vmem:[#allocation5_spill] sm:$0xff] %v13099_v49 }
 0x2f1   : > { %v5037_v43 = vadd.f32 %v4786_v8, %v4428_v25  ;;  %v7216_v30 = vsel %vm3788_vm5, %v19938_v59, %v18443_v36  ;;  %v13095_v32 = vmul.f32 %v19906_v10, %v19897_v13  ;;  %v5149_v8 = vmul.f32 %v19906_v10, %v13081_v57  ;;  %v661_v36 = vpop.f32.mrf.mxu0 }
 0x2f2   : > { %v19941_v59 = vrot.slane %v12900_v39, 1  ;;  %v13107_v6 = vmul.f32 %v19895_v34, %v3519_v37  ;;  %v5966_v0 = vmul.f32 %v12928_v53, %v19914_v50  ;;  %v7774_v28 = vmin.f32 %v7678_v12, 6.0  ;;  %v19969_v53 = vld [vmem:[#allocation17_spill] sm:$0xff] }
 0x2f3   : > { %19939 = vst [vmem:[#allocation19_spill] sm:$0xff] %v13095_v32  ;;  %v5745_v25 = vadd.f32 %v5494_v5, %v5037_v43  ;;  %v18451_v9 = vrot.slane %v13095_v32, 1  ;;  %v13113_v1 = vmul.f32 %v19912_v2, %v5149_v8  ;;  %v13118_v39 = vmul.f32 %v19907_v46, %v13099_v49  ;;  %v19959_v32 = vld [vmem:[#allocation25_spill] sm:$0xff]  ;;  %v665_v34 = vpop.f32.mrf.mxu0 }
 0x2f4   : > { %v3037_v61 = vsel %vm2950_vm4, %v19941_v59, %v18448_v11  ;;  %19942 = vst [vmem:[#allocation11_spill] sm:$0xff] %v13107_v6  ;;  %v18453_v43 = vrot.slane %v13107_v6, 2  ;;  %v6871_v37 = vmul.f32 %v13099_v49, %v13081_v57  ;;  %8776 = vmatprep.mubr.f32.mxu0 %v7774_v28  ;;  %v19947_v11 = vld [vmem:[#allocation51_spill] sm:$0xff]  ;;  %v19962_v6 = vld [vmem:[#allocation13_spill] sm:$0xff] }
 0x2f5   : > { %v3283_v40 = vadd.f32 %v3037_v61, %v2577_v44  ;;  %19943 = vst [vmem:[#allocation60_spill] sm:$0xff] %v13113_v1  ;;  %v6057_v5 = vadd.f32 %v5961_v27, %v5745_v25  ;;  %19944 = vst [vmem:[#allocation54_spill] sm:$0xff] %v13118_v39  ;;  %v19945_v44 = vrot.slane %v12926_v17, 1  ;;  %v18452_v8 = vrot.slane %v13113_v1, 2  ;;  %v19946_v25 = vld [vmem:[#allocation53_spill] sm:$0xff] }
 0x2f6   : > { %v662_v27 = vadd.f32 %v661_v36, %v9575_v56  ;;  %v2576_v59 = vmul.f32 %v19946_v25, %v19249_v55  ;;  %v19948_v50 = vrot.slane %v19947_v11, 2  ;;  %v18456_v2 = vrot.slane %v13118_v39, 1  ;;  %v19954_v1 = vld [vmem:[#allocation45_spill] sm:$0xff] }
 0x2f7   : > { %v4796_v12 = vsel %vm2950_vm4, %v19945_v44, %v18451_v9  ;;  %v6759_v61 = vadd.f32 %v6508_v38, %v6057_v5  ;;  %v13138_v17 = vmul.f32 %v19915_v29, %v6871_v37  ;;  %v19950_v36 = vrot.slane %v12964_v4, 2  ;;  %v13145_v38 = vld [vmem:[#allocation2 + $0x240] sm:$0xff] }
 0x2f8   : > { %v3875_v28 = vsel %vm3788_vm5, %v19948_v50, %v18453_v43  ;;  %v1004_v25 = vmax.f32 %v662_v27, 0.0  ;;  %v19951_v5 = vld [vmem:[#allocation4_spill] sm:$0xff]  ;;  %v19952_v37 = vrot.slane %v12949_v15, 1  ;;  %v3518_v4 = vmul.f32 %v13145_v38, %v13081_v57  ;;  %v19953_v43 = vld [vmem:[#allocation23_spill] sm:$0xff] }
 0x2f9   : > { %19949 = vst [vmem:[#allocation15_spill] sm:$0xff] %v13138_v17  ;;  %v4121_v44 = vadd.f32 %v3875_v28, %v3283_v40  ;;  %v5504_v9 = vsel %vm3788_vm5, %v19950_v36, %v18452_v8  ;;  %v13149_v11 = vmul.f32 %v13145_v38, %v19951_v5  ;;  %v7467_v50 = vadd.f32 %v7216_v30, %v6759_v61  ;;  %v19955_v30 = vld [vmem:[#allocation39_spill] sm:$0xff] }
 0x2fa   : > { %v6518_v40 = vsel %vm2950_vm4, %v19952_v37, %v18456_v2  ;;  %v18461_v28 = vrot.slane %v13138_v17, 2  ;;  %v13159_v27 = vmin.f32 %v1004_v25, 6.0  ;;  %v4336_v29 = vmul.f32 %v19954_v1, %v19953_v43  ;;  %v19957_v2 = vld [vmem:[#allocation8_spill] sm:$0xff] }
 0x2fb   : > { %v4433_v36 = vadd.f32 %v4337_v14, %v4121_v44  ;;  %v7580_v61 = vadd.f32 %v19955_v30, %v7467_v50  ;;  %v19956_v15 = vrot.slane %v12971_v60, 2  ;;  %v13171_v39 = vmul.f32 %v19957_v2, %v3518_v4  ;;  %v19960_v14 = vld [vmem:[#allocation46_spill] sm:$0xff] }
 0x2fc   : > { %v13175_v44 = vmul.f32 %v19960_v14, %v19959_v32  ;;  %v18471_v8 = vrot.slane %v13159_v27, 7  ;;  %v19961_v1 = vrot.slane %v13149_v11, 1  ;;  %v19963_v50 = vrot.slane %v19962_v6, 1 }
 0x2fd   : > { %v7226_v37 = vsel %vm3788_vm5, %v19956_v15, %v18461_v28  ;;  %19958 = vst [vmem:[#allocation53_spill] sm:$0xff] %v13171_v39  ;;  %v5042_v25 = vadd.f32 %v4796_v12, %v4433_v36  ;;  %v5148_v60 = vmul.f32 %v19960_v14, %v13081_v57  ;;  %v13185_v15 = vld [vmem:[#allocation2 + $0x268] sm:$0xff]  ;;  %v7676_v4 = vmax.f32 %v7580_v61, 0.0  ;;  %v19965_v36 = vld [vmem:[#allocation52_spill] sm:$0xff] }
 0x2fe   : > { %v3035_v17 = vsel %vm2950_vm4, %v19963_v50, %v19961_v1  ;;  %19964 = vst [vmem:[#allocation51_spill] sm:$0xff] %v13185_v15  ;;  %v18474_v46 = vrot.slane %v13171_v39, 2  ;;  %v18476_v49 = vrot.slane %v13175_v44, 1  ;;  %v19966_v7 = vrot.slane %v19965_v36, 7  ;;  %v19968_v50 = vld [vmem:[#allocation30_spill] sm:$0xff] }
 0x2ff   : > { %v3282_v28 = vadd.f32 %v3035_v17, %v2576_v59  ;;  %v5750_v12 = vadd.f32 %v5504_v9, %v5042_v25  ;;  %v13195_v1 = vmul.f32 %v19967_v18, %v5148_v60  ;;  %v5965_v13 = vmul.f32 %v19969_v53, %v19968_v50  ;;  %v19970_v59 = vld [vmem:[#allocation48_spill] sm:$0xff]  ;;  %v19972_v25 = vld [vmem:[#allocation57_spill] sm:$0xff]  ;;  %v19974_v60 = vld [vmem:[#allocation31_spill] sm:$0xff] }
 0x300   : > { %v1475_v6 = vsel %vm1330_vm7, %v19966_v7, %v18471_v8  ;;  %v7772_v61 = vmin.f32 %v7676_v4, 6.0  ;;  %v19971_v17 = vrot.slane %v19970_v59, 2  ;;  %v19973_v36 = vrot.slane %v19972_v25, 1  ;;  %v19976_v25 = vld [vmem:[#allocation50_spill] sm:$0xff] }
 0x301   : > { %1692 = vst [vmem:[#allocation2 + $0x138] sm:$0xff] %v1475_v6  ;;  %v13211_v8 = vmul.f32 %v19974_v60, %v13185_v15  ;;  %v6062_v10 = vadd.f32 %v5966_v0, %v5750_v12  ;;  %v18481_v4 = vrot.slane %v13195_v1, 2  ;;  %v6870_v6 = vmul.f32 %v13185_v15, %v13081_v57  ;;  %v19979_v12 = vld [vmem:[#allocation58_spill] sm:$0xff] }
 0x302   : > { %v3873_v9 = vsel %vm3788_vm5, %v19971_v17, %v18474_v46  ;;  %v4794_v7 = vsel %vm2950_vm4, %v19973_v36, %v18476_v49  ;;  %8012 = vmatmul.mubr.f32.gmra.mxu1 %v7772_v61  ;;  %v19975_v17 = vld [vmem:[#allocation20_spill] sm:$0xff]  ;;  %v2575_v39 = vmul.f32 %v19976_v25, %v19922_v20  ;;  %v13220_v36 = vld [vmem:[#allocation2 + $0x1b8] sm:$0xff]  ;;  %v19977_v49 = vld [vmem:[#allocation6_spill] sm:$0xff] }
 0x303   : > { %v4120_v22 = vadd.f32 %v3873_v9, %v3282_v28  ;;  %v666_v46 = vadd.f32 %v665_v34, %v19975_v17  ;;  %v13224_v23 = vmul.f32 %v13220_v36, %v19977_v49  ;;  %v6764_v0 = vadd.f32 %v6518_v40, %v6062_v10  ;;  %v19981_v59 = vld [vmem:[#allocation34_spill] sm:$0xff]  ;;  %v19983_v25 = vld [vmem:[#allocation7_spill] sm:$0xff] }
 0x304   : > { %v19980_v9 = vrot.slane %v19979_v12, 2  ;;  %v13232_v48 = vmul.f32 %v19981_v59, %v6870_v6  ;;  %v19982_v34 = vrot.slane %v13211_v8, 1  ;;  %v19984_v20 = vrot.slane %v19983_v25, 1 }
 0x305   : > { %19978 = vst [vmem:[#allocation45_spill] sm:$0xff] %v13224_v23  ;;  %v4432_v28 = vadd.f32 %v4336_v29, %v4120_v22  ;;  %v1006_v18 = vmax.f32 %v666_v46, 0.0  ;;  %v18480_v49 = vrot.slane %v13224_v23, 1  ;;  %v3517_v10 = vmul.f32 %v13220_v36, %v13081_v57 }
 0x306   : > { %v5502_v61 = vsel %vm3788_vm5, %v19980_v9, %v18481_v4  ;;  %v6516_v17 = vsel %vm2950_vm4, %v19984_v20, %v19982_v34  ;;  %v7472_v22 = vadd.f32 %v7226_v37, %v6764_v0  ;;  %v18485_v40 = vrot.slane %v13232_v48, 2  ;;  %v19986_v34 = vld [vmem:[#allocation24_spill] sm:$0xff]  ;;  %v8719_v0 = vpop.f32.mrf.mxu1 }
 0x307   : > { %v5041_v29 = vadd.f32 %v4794_v7, %v4432_v28  ;;  %v4335_v6 = vmul.f32 %v12498_v51, %v19929_v16  ;;  %v13245_v12 = vmin.f32 %v1006_v18, 6.0  ;;  %v19985_v9 = vrot.slane %v12984_v63, 1  ;;  %v13259_v7 = vld [vmem:[#allocation2 + $0x260] sm:$0xff]  ;;  %v19987_v28 = vld [vmem:[#allocation47_spill] sm:$0xff] }
 0x308   : > { %v13253_v20 = vmul.f32 %v19927_v33, %v3517_v10  ;;  %v13257_v37 = vmul.f32 %v12739_v42, %v19986_v34  ;;  %v7585_v51 = vadd.f32 %v19936_v52, %v7472_v22  ;;  %v19988_v25 = vrot.slane %v19987_v28, 2 }
 0x309   : > { %v3033_v46 = vsel %vm2950_vm4, %v19985_v9, %v18480_v49  ;;  %v5749_v18 = vadd.f32 %v5502_v61, %v5041_v29  ;;  %v18487_v10 = vrot.slane %v13245_v12, 7  ;;  %v5147_v16 = vmul.f32 %v12739_v42, %v13081_v57  ;;  %v667_v29 = vpop.f32.mrf.mxu0 }
 0x30a   : > { %v7224_v63 = vsel %vm3788_vm5, %v19988_v25, %v18485_v40  ;;  %v3281_v9 = vadd.f32 %v3033_v46, %v2575_v39  ;;  %v18488_v49 = vrot.slane %v13253_v20, 2  ;;  %v18497_v4 = vrot.slane %v13257_v37, 1  ;;  %v902_v40 = vpop.f32.mrf.mxu1 }
 0x30b   : > { %v7681_v33 = vmax.f32 %v7585_v51, 0.0  ;;  %v6061_v23 = vadd.f32 %v5965_v13, %v5749_v18  ;;  %v5964_v61 = vmul.f32 %v13018_v62, %v19932_v19  ;;  %v13276_v22 = vmul.f32 %v19304_v45, %v13259_v7 }
 0x30c   : > { %v19989_v39 = vrot.slane %v12992_v58, 7  ;;  %v19990_v28 = vrot.slane %v13016_v21, 2  ;;  %v19991_v51 = vrot.slane %v13008_v47, 1  ;;  %v13294_v25 = vmul.f32 %v19239_v31, %v5147_v16 }
 0x30d   : > { %v7777_v52 = vmin.f32 %v7681_v33, 6.0  ;;  %v6763_v58 = vadd.f32 %v6516_v17, %v6061_v23  ;;  %v668_v47 = vadd.f32 %v667_v29, %v9575_v56  ;;  %v19993_v23 = vrot.slane %v13039_v26, 1  ;;  %v19995_v26 = vld [vmem:[#allocation3_spill] sm:$0xff] }
 0x30e   : > { %v1479_v46 = vsel %vm1330_vm7, %v19989_v39, %v18487_v10  ;;  %v3871_v13 = vsel %vm3788_vm5, %v19990_v28, %v18488_v49  ;;  %v4792_v18 = vsel %vm2950_vm4, %v19991_v51, %v18497_v4  ;;  %v18495_v10 = vrot.slane %v13276_v22, 1  ;;  %v19992_v49 = vld [vmem:[#allocation22_spill] sm:$0xff] }
 0x30f   : > { %1694 = vst [vmem:[#allocation2 + $0x60] sm:$0xff] %v1479_v46  ;;  %v4119_v39 = vadd.f32 %v3871_v13, %v3281_v9  ;;  %v18490_v21 = vrot.slane %v13294_v25, 2  ;;  %v6869_v28 = vmul.f32 %v13259_v7, %v13081_v57  ;;  %v908_v19 = vadd.f32 %v8719_v0, %v19992_v49  ;;  %8777 = vmatmul.mubr.f32.gmra.mxu0 %v7777_v52 }
 0x310   : > { %v7471_v51 = vadd.f32 %v7224_v63, %v6763_v58  ;;  %v6514_v33 = vsel %vm2950_vm4, %v19993_v23, %v18495_v10  ;;  %v903_v17 = vadd.f32 %v902_v40, %v19992_v49  ;;  %v19994_v9 = vrot.slane %v13050_v41, 2  ;;  %v13414_v10 = vld [vmem:[#allocation2] sm:$0xff] }
 0x311   : > { %v4431_v16 = vadd.f32 %v4335_v6, %v4119_v39  ;;  %v13314_v0 = vmul.f32 %v19198_v24, %v6869_v28  ;;  %v1014_v52 = vmax.f32 %v908_v19, 0.0  ;;  %v1007_v63 = vmax.f32 %v668_v47, 0.0 }
 0x312   : > { %v5500_v57 = vsel %vm3788_vm5, %v19994_v9, %v18490_v21  ;;  %v7584_v6 = vadd.f32 %v19364_v35, %v7471_v51  ;;  %v1011_v46 = vmax.f32 %v903_v17, 0.0  ;;  %v1733_v13 = vadd.s32 112, %v19995_v26 }
 0x313   : > { %v5040_v29 = vadd.f32 %v4792_v18, %v4431_v16  ;;  %v18494_v58 = vrot.slane %v13314_v0, 2  ;;  %v13319_v40 = vmin.f32 %v1014_v52, 6.0  ;;  %v13321_v39 = vmin.f32 %v1007_v63, 6.0 }
 0x314   : > { %v1734_v41 = vadd.s32 120, %v19995_v26  ;;  %v7680_v23 = vmax.f32 %v7584_v6, 0.0  ;;  %v1107_v28 = vmin.f32 %v1011_v46, 6.0  ;;  %v1853_v21 = vand.u32 15, %v1733_v13 }
 0x315   : > { %19996 = vst [vmem:[#allocation46_spill] sm:$0xff] %v13319_v40  ;;  %19997 = vst [vmem:[#allocation13_spill] sm:$0xff] %v13321_v39  ;;  %v5748_v9 = vadd.f32 %v5500_v57, %v5040_v29  ;;  %v19998_v19 = vrot.slane %v13055_v3, 2  ;;  %v18491_v47 = vrot.slane %v13319_v40, 7  ;;  %v18492_v51 = vrot.slane %v13321_v39, 7  ;;  %v20000_v29 = vld [vmem:[#allocation55_spill] sm:$0xff] }
 0x316   : > { %v1860_v16 = vand.u32 15, %v1734_v41  ;;  %v7776_v17 = vmin.f32 %v7680_v23, 6.0  ;;  %v1488_v63 = vrot.slane %v1107_v28, 7  ;;  %vm2149_vm8 = vcmp.gt.s32.totalorder %v1853_v21, 0  ;;  %v13339_v3 = vld [vmem:[#allocation2 + $0x308] sm:$0xff]  ;;  %v20004_v21 = vld [vmem:[#allocation44_spill] sm:$0xff] }
 0x317   : > { %v7222_v18 = vsel %vm3788_vm5, %v19998_v19, %v18494_v58  ;;  %v6060_v52 = vadd.f32 %v5964_v61, %v5748_v9  ;;  %v19999_v57 = vrot.slane %v13159_v27, 7  ;;  %v13337_v46 = vsel %vm2149_vm8, 1.0, %v20000_v29  ;;  %20001 = vst [vmem:[#allocation52_spill] sm:$0xff] %v13339_v3  ;;  %v13345_v41 = vld [vmem:[#allocation2 + $0xa8] sm:$0xff] }
 0x318   : > { %vm2246_vm9 = vcmp.lt.s32.totalorder %v1860_v16, 15  ;;  %v13343_v13 = vmul.f32 %v13339_v3, %v19951_v5  ;;  %20003 = vst [vmem:[#allocation57_spill] sm:$0xff] %v13345_v41  ;;  %8016 = vmatprep.mubr.f32.mxu1 %v7776_v17  ;;  %v20005_v23 = vrot.slane %v20004_v21, 7  ;;  %v1495_v9 = vsel %vm1330_vm7, %v1488_v63, %v18491_v47  ;;  %v20018_v40 = vld [vmem:[#allocation49_spill] sm:$0xff] }
 0x319   : > { %v1481_v6 = vsel %vm1330_vm7, %v19999_v57, %v18492_v51  ;;  %v6762_v61 = vadd.f32 %v6514_v33, %v6060_v52  ;;  %v8552_v28 = vsel %vm2246_vm9, 1.0, %v20000_v29  ;;  %1702 = vst [vmem:[#allocation2 + $0x280] sm:$0xff] %v1495_v9  ;;  %v2467_v19 = vmul.f32 %v13145_v38, %v13337_v46 }
 0x31a   : > { %20002 = vst [vmem:[#allocation48_spill] sm:$0xff] %v13343_v13  ;;  %1695 = vst [vmem:[#allocation2 + $0x70] sm:$0xff] %v1481_v6  ;;  %v1489_v27 = vsel %vm1330_vm7, %v20005_v23, %v1488_v63  ;;  %v18493_v16 = vrot.slane %v13343_v13, 1  ;;  %v13357_v17 = vrot.slane %v8552_v28, 6  ;;  %v4227_v33 = vmul.f32 %v13337_v46, %v19960_v14  ;;  %v20039_v13 = vld [vmem:[#allocation36_spill] sm:$0xff] }
 0x31b   : > { %1699 = vst [vmem:[#allocation2 + $0x68] sm:$0xff] %v1489_v27  ;;  %v7470_v52 = vadd.f32 %v7222_v18, %v6762_v61  ;;  %v13363_v57 = vmul.f32 %v19969_v53, %v19959_v32  ;;  %v5856_v63 = vmul.f32 %v13337_v46, %v13185_v15  ;;  %v13369_v6 = vmul.f32 %v19974_v60, %v13345_v41  ;;  %v20022_v60 = vld [vmem:[#allocation16_spill] sm:$0xff] }
 0x31c   : > { %v2579_v38 = vmul.f32 %v19249_v55, %v2467_v19  ;;  %v20008_v29 = vrot.slane %v13149_v11, 1  ;;  %v13380_v18 = vsel %vm3378_vm2, %v19378_v54, %v13357_v17  ;;  %v4339_v61 = vmul.f32 %v19953_v43, %v4227_v33  ;;  %v20040_v32 = vld [vmem:[#allocation20_spill] sm:$0xff]  ;;  %v20041_v43 = vld [vmem:[#allocation41_spill] sm:$0xff] }
 0x31d   : > { %20006 = vst [vmem:[#allocation50_spill] sm:$0xff] %v13363_v57  ;;  %20007 = vst [vmem:[#allocation58_spill] sm:$0xff] %v13369_v6  ;;  %v7583_v21 = vadd.f32 %v19955_v30, %v7470_v52  ;;  %v3521_v23 = vmul.f32 %v13339_v3, %v13380_v18  ;;  %v18496_v27 = vrot.slane %v13363_v57, 1  ;;  %v5151_v9 = vmul.f32 %v19969_v53, %v13380_v18  ;;  %v20025_v57 = vld [vmem:[#allocation59_spill] sm:$0xff] }
 0x31e   : > { %v3041_v14 = vsel %vm2950_vm4, %v20008_v29, %v18493_v16  ;;  %v5968_v28 = vmul.f32 %v19968_v50, %v5856_v63  ;;  %v18498_v19 = vrot.slane %v13369_v6, 1  ;;  %v6873_v29 = vmul.f32 %v13345_v41, %v13380_v18  ;;  %v20011_v16 = vld [vmem:[#allocation28_spill] sm:$0xff]  ;;  %v671_v50 = vpop.f32.mrf.mxu0 }
 0x31f   : > { %v3285_v11 = vadd.f32 %v3041_v14, %v2579_v38  ;;  %v7679_v47 = vmax.f32 %v7583_v21, 0.0  ;;  %v13394_v33 = vmul.f32 %v19957_v2, %v3521_v23  ;;  %v20010_v52 = vrot.slane %v13175_v44, 1  ;;  %v20015_v21 = vld [vmem:[#allocation61_spill] sm:$0xff]  ;;  %v20016_v44 = vld [vmem:[#allocation10_spill] sm:$0xff] }
 0x320   : > { %v13402_v58 = vmul.f32 %v20011_v16, %v5151_v9  ;;  %v20013_v63 = vrot.slane %v13211_v8, 1  ;;  %v13410_v14 = vmul.f32 %v19981_v59, %v6873_v29  ;;  %v2468_v23 = vmul.f32 %v20015_v21, %v13337_v46  ;;  %v20024_v21 = vld [vmem:[#allocation32_spill] sm:$0xff] }
 0x321   : > { %20009 = vst [vmem:[#allocation7_spill] sm:$0xff] %v13394_v33  ;;  %v4800_v51 = vsel %vm2950_vm4, %v20010_v52, %v18496_v27  ;;  %v13418_v52 = vmul.f32 %v13414_v10, %v20016_v44  ;;  %v7775_v9 = vmin.f32 %v7679_v47, 6.0  ;;  %v18508_v27 = vrot.slane %v13394_v33, 2  ;;  %v20019_v47 = vld [vmem:[#allocation53_spill] sm:$0xff] }
 0x322   : > { %20012 = vst [vmem:[#allocation47_spill] sm:$0xff] %v13402_v58  ;;  %v6522_v38 = vsel %vm2950_vm4, %v20013_v63, %v18498_v19  ;;  %20014 = vst [vmem:[#allocation55_spill] sm:$0xff] %v13410_v14  ;;  %v18510_v4 = vrot.slane %v13402_v58, 2  ;;  %v3522_v8 = vmul.f32 %v13414_v10, %v13380_v18  ;;  %v20017_v63 = vld [vmem:[#allocation18_spill] sm:$0xff]  ;;  %v4228_v26 = vmul.f32 %v13337_v46, %v20018_v40  ;;  %v20030_v58 = vld [vmem:[#allocation56_spill] sm:$0xff] }
 0x323   : > { %v2580_v19 = vmul.f32 %v20017_v63, %v2468_v23  ;;  %8017 = vmatmul.mubr.f32.gmra.mxu1 %v7775_v9  ;;  %v20020_v6 = vrot.slane %v20019_v47, 2  ;;  %v20021_v49 = vrot.slane %v13195_v1, 2  ;;  %v13444_v41 = vmul.f32 %v20025_v57, %v20024_v21  ;;  %v13446_v40 = vld [vmem:[#allocation2 + $0x130] sm:$0xff] }
 0x324   : > { %v13440_v23 = vmul.f32 %v20022_v60, %v3522_v8  ;;  %20026 = vst [vmem:[#allocation61_spill] sm:$0xff] %v13446_v40  ;;  %v20027_v47 = vrot.slane %v13410_v14, 2  ;;  %v20029_v1 = vrot.slane %v13418_v52, 1  ;;  %v20033_v14 = vld [vmem:[#allocation5_spill] sm:$0xff]  ;;  %v672_v2 = vadd.f32 %v671_v50, %v20040_v32  ;;  %v20043_v50 = vld [vmem:[#allocation54_spill] sm:$0xff] }
 0x325   : > { %v3879_v59 = vsel %vm3788_vm5, %v20020_v6, %v18508_v27  ;;  %v5508_v29 = vsel %vm3788_vm5, %v20021_v49, %v18510_v4  ;;  %v20028_v6 = vrot.slane %v13232_v48, 2  ;;  %v20031_v49 = vrot.slane %v20030_v58, 1  ;;  %v20032_v4 = vld [vmem:[#allocation35_spill] sm:$0xff] }
 0x326   : > { %20023 = vst [vmem:[#allocation44_spill] sm:$0xff] %v13440_v23  ;;  %v4123_v9 = vadd.f32 %v3879_v59, %v3285_v11  ;;  %v4340_v33 = vmul.f32 %v20032_v4, %v4228_v26  ;;  %v18525_v39 = vrot.slane %v13440_v23, 2  ;;  %v18528_v59 = vrot.slane %v13444_v41, 1 }
 0x327   : > { %v7230_v27 = vsel %vm3788_vm5, %v20028_v6, %v20027_v47  ;;  %v3043_v8 = vsel %vm2950_vm4, %v20031_v49, %v20029_v1  ;;  %v5152_v11 = vmul.f32 %v20025_v57, %v13380_v18  ;;  %v5857_v47 = vmul.f32 %v13337_v46, %v20033_v14  ;;  %v20034_v6 = vld [vmem:[#allocation38_spill] sm:$0xff] }
 0x328   : > { %v3286_v16 = vadd.f32 %v3043_v8, %v2580_v19  ;;  %v4435_v48 = vadd.f32 %v4339_v61, %v4123_v9  ;;  %v13467_v58 = vmul.f32 %v20034_v6, %v13446_v40  ;;  %v6874_v26 = vmul.f32 %v13446_v40, %v13380_v18  ;;  %v20035_v19 = vld [vmem:[#allocation11_spill] sm:$0xff] }
 0x329   : > { %v20036_v1 = vrot.slane %v20035_v19, 2  ;;  %v20037_v8 = vld [vmem:[#allocation19_spill] sm:$0xff]  ;;  %v13482_v15 = vmul.f32 %v20039_v13, %v5152_v11  ;;  %v5969_v5 = vmul.f32 %v20041_v43, %v5857_v47  ;;  %v1009_v3 = vmax.f32 %v672_v2, 0.0  ;;  %v20046_v47 = vld [vmem:[#allocation6_spill] sm:$0xff]  ;;  %v20047_v2 = vld [vmem:[#allocation60_spill] sm:$0xff] }
 0x32a   : > { %v20038_v61 = vrot.slane %v20037_v8, 1  ;;  %v5044_v30 = vadd.f32 %v4800_v51, %v4435_v48  ;;  %v18527_v23 = vrot.slane %v13467_v58, 1  ;;  %v2466_v8 = vmul.f32 %v13220_v36, %v13337_v46  ;;  %v13498_v48 = vld [vmem:[#allocation2 + $0x2a0] sm:$0xff] }
 0x32b   : > { %v3881_v49 = vsel %vm3788_vm5, %v20036_v1, %v18525_v39  ;;  %v18529_v19 = vrot.slane %v13482_v15, 2  ;;  %v20042_v1 = vld [vmem:[#allocation42_spill] sm:$0xff]  ;;  %v20044_v51 = vrot.slane %v20043_v50, 1  ;;  %20045 = vst [vmem:[#allocation49_spill] sm:$0xff] %v13498_v48 }
 0x32c   : > { %v4802_v9 = vsel %vm2950_vm4, %v20038_v61, %v18528_v59  ;;  %v4124_v53 = vadd.f32 %v3881_v49, %v3286_v16  ;;  %v13489_v39 = vmul.f32 %v20042_v1, %v6874_v26  ;;  %v5752_v61 = vadd.f32 %v5508_v29, %v5044_v30 }
 0x32d   : > { %v6524_v16 = vsel %vm2950_vm4, %v20044_v51, %v18527_v23  ;;  %v13502_v49 = vmul.f32 %v13498_v48, %v20046_v47  ;;  %v20048_v26 = vrot.slane %v20047_v2, 2  ;;  %v13510_v30 = vmin.f32 %v1009_v3, 6.0  ;;  %v20050_v47 = vld [vmem:[#allocation15_spill] sm:$0xff] }
 0x32e   : > { %v4436_v11 = vadd.f32 %v4340_v33, %v4124_v53  ;;  %v18531_v53 = vrot.slane %v13489_v39, 2  ;;  %v20049_v33 = vld [vmem:[#allocation14_spill] sm:$0xff]  ;;  %v6064_v50 = vadd.f32 %v5968_v28, %v5752_v61  ;;  %v3520_v59 = vmul.f32 %v13498_v48, %v13380_v18  ;;  %v20052_v61 = vld [vmem:[#allocation45_spill] sm:$0xff] }
 0x32f   : > { %v5510_v36 = vsel %vm3788_vm5, %v20048_v26, %v18529_v19  ;;  %v2578_v29 = vmul.f32 %v20049_v33, %v2466_v8  ;;  %v18533_v23 = vrot.slane %v13502_v49, 1  ;;  %v20051_v32 = vrot.slane %v20050_v47, 2  ;;  %v20054_v47 = vld [vmem:[#allocation12_spill] sm:$0xff] }
 0x330   : > { %v5045_v51 = vadd.f32 %v4802_v9, %v4436_v11  ;;  %v18539_v26 = vrot.slane %v13510_v30, 7  ;;  %v4226_v3 = vmul.f32 %v13337_v46, %v12739_v42  ;;  %v13526_v28 = vmul.f32 %v13018_v62, %v19986_v34 }
 0x331   : > { %v7232_v2 = vsel %vm3788_vm5, %v20051_v32, %v18531_v53  ;;  %v6766_v9 = vadd.f32 %v6522_v38, %v6064_v50  ;;  %v20053_v11 = vrot.slane %v20052_v61, 1  ;;  %v13534_v48 = vmul.f32 %v20054_v47, %v3520_v59  ;;  %v13536_v32 = vld [vmem:[#allocation2 + $0x1c0] sm:$0xff]  ;;  %v20056_v38 = vld [vmem:[#allocation26_spill] sm:$0xff] }
 0x332   : > { %v5753_v8 = vadd.f32 %v5510_v36, %v5045_v51  ;;  %v20055_v42 = vrot.slane %v13245_v12, 7  ;;  %v4338_v36 = vmul.f32 %v20056_v38, %v4226_v3  ;;  %v18534_v50 = vrot.slane %v13526_v28, 1 }
 0x333   : > { %v3039_v19 = vsel %vm2950_vm4, %v20053_v11, %v18533_v23  ;;  %v7474_v51 = vadd.f32 %v7230_v27, %v6766_v9  ;;  %v18538_v11 = vrot.slane %v13534_v48, 2  ;;  %v5150_v59 = vmul.f32 %v13018_v62, %v13380_v18  ;;  %v20059_v9 = vld [vmem:[#allocation29_spill] sm:$0xff] }
 0x334   : > { %v1485_v53 = vsel %vm1330_vm7, %v20055_v42, %v18539_v26  ;;  %v3284_v34 = vadd.f32 %v3039_v19, %v2578_v29  ;;  %v6065_v61 = vadd.f32 %v5969_v5, %v5753_v8  ;;  %v20057_v23 = vrot.slane %v13257_v37, 1 }
 0x335   : > { %1697 = vst [vmem:[#allocation2 + $0x230] sm:$0xff] %v1485_v53  ;;  %v5855_v19 = vmul.f32 %v13337_v46, %v13259_v7  ;;  %v13557_v29 = vmul.f32 %v19304_v45, %v13536_v32  ;;  %v6872_v5 = vmul.f32 %v13536_v32, %v13380_v18  ;;  %v7587_v27 = vadd.f32 %v19364_v35, %v7474_v51 }
 0x336   : > { %v4798_v12 = vsel %vm2950_vm4, %v20057_v23, %v18534_v50  ;;  %v6767_v53 = vadd.f32 %v6524_v16, %v6065_v61  ;;  %v20058_v3 = vrot.slane %v13253_v20, 2  ;;  %v13568_v23 = vmul.f32 %v19239_v31, %v5150_v59 }
 0x337   : > { %v5967_v8 = vmul.f32 %v20059_v9, %v5855_v19  ;;  %v18537_v42 = vrot.slane %v13557_v29, 1  ;;  %v13573_v50 = vmul.f32 %v19198_v24, %v6872_v5  ;;  %v7683_v18 = vmax.f32 %v7587_v27, 0.0  ;;  %v20062_v27 = vld [vmem:[#allocation43_spill] sm:$0xff] }
 0x338   : > { %v3877_v37 = vsel %vm3788_vm5, %v20058_v3, %v18538_v11  ;;  %v7475_v51 = vadd.f32 %v7232_v2, %v6767_v53  ;;  %v18536_v16 = vrot.slane %v13568_v23, 2  ;;  %v2583_v20 = vmul.f32 %v13414_v10, %v20017_v63  ;;  %v13584_v3 = vld [vmem:[#allocation2 + $0x1f8] sm:$0xff] }
 0x339   : > { %v4122_v46 = vadd.f32 %v3877_v37, %v3284_v34  ;;  %v20060_v59 = vrot.slane %v13276_v22, 1  ;;  %v18535_v19 = vrot.slane %v13573_v50, 2  ;;  %v13588_v5 = vmul.f32 %v13584_v3, %v20016_v44 }
 0x33a   : > { %v7779_v2 = vmin.f32 %v7683_v18, 6.0  ;;  %v7588_v53 = vadd.f32 %v20062_v27, %v7475_v51  ;;  %v20063_v10 = vrot.slane %v13294_v25, 2  ;;  %v13599_v22 = vsel %vm3378_vm2, %v13357_v17, %v19378_v54 }
 0x33b   : > { %v4434_v61 = vadd.f32 %v4338_v36, %v4122_v46  ;;  %v6520_v34 = vsel %vm2950_vm4, %v20060_v59, %v18537_v42  ;;  %20061 = vst [vmem:[#allocation53_spill] sm:$0xff] %v13588_v5  ;;  %v20064_v46 = vrot.slane %v13314_v0, 2  ;;  %v18540_v51 = vrot.slane %v13588_v5, 1  ;;  %v13617_v0 = vld [vmem:[#allocation2 + $0x1d0] sm:$0xff]  ;;  %v20094_v5 = vld [vmem:[#allocation28_spill] sm:$0xff] }
 0x33c   : > { %v5506_v36 = vsel %vm3788_vm5, %v20063_v10, %v18536_v16  ;;  %v3525_v59 = vmul.f32 %v13584_v3, %v13599_v22  ;;  %8021 = vmatprep.mubr.f32.mxu1 %v7779_v2  ;;  %v7684_v25 = vmax.f32 %v7588_v53, 0.0  ;;  %v4343_v10 = vmul.f32 %v20025_v57, %v20032_v4  ;;  %20066 = vst [vmem:[#allocation56_spill] sm:$0xff] %v13617_v0 }
 0x33d   : > { %v5043_v37 = vadd.f32 %v4798_v12, %v4434_v61  ;;  %v7228_v18 = vsel %vm3788_vm5, %v20064_v46, %v18535_v19  ;;  %v13613_v17 = vmul.f32 %v20033_v14, %v20024_v21  ;;  %v5155_v12 = vmul.f32 %v20033_v14, %v13599_v22  ;;  %v673_v19 = vpop.f32.mrf.mxu0 }
 0x33e   : > { %v20067_v46 = vrot.slane %v13418_v52, 1  ;;  %v13625_v53 = vmul.f32 %v20022_v60, %v3525_v59  ;;  %v5972_v57 = vmul.f32 %v13446_v40, %v20041_v43  ;;  %v7780_v16 = vmin.f32 %v7684_v25, 6.0  ;;  %v20096_v60 = vld [vmem:[#allocation57_spill] sm:$0xff] }
 0x33f   : > { %20065 = vst [vmem:[#allocation59_spill] sm:$0xff] %v13613_v17  ;;  %v5751_v61 = vadd.f32 %v5506_v36, %v5043_v37  ;;  %v18543_v11 = vrot.slane %v13613_v17, 1  ;;  %v13631_v26 = vmul.f32 %v20039_v13, %v5155_v12  ;;  %v13636_v52 = vmul.f32 %v20034_v6, %v13617_v0  ;;  %v20089_v6 = vld [vmem:[#allocation48_spill] sm:$0xff]  ;;  %v677_v21 = vpop.f32.mrf.mxu0 }
 0x340   : > { %v3049_v2 = vsel %vm2950_vm4, %v20067_v46, %v18540_v51  ;;  %20068 = vst [vmem:[#allocation11_spill] sm:$0xff] %v13625_v53  ;;  %v18545_v37 = vrot.slane %v13625_v53, 2  ;;  %v6877_v59 = vmul.f32 %v13617_v0, %v13599_v22  ;;  %8779 = vmatprep.mubr.f32.mxu0 %v7780_v16  ;;  %v20073_v51 = vld [vmem:[#allocation44_spill] sm:$0xff]  ;;  %v20085_v53 = vld [vmem:[#allocation25_spill] sm:$0xff] }
 0x341   : > { %v3289_v42 = vadd.f32 %v3049_v2, %v2583_v20  ;;  %20069 = vst [vmem:[#allocation19_spill] sm:$0xff] %v13631_v26  ;;  %v6063_v36 = vadd.f32 %v5967_v8, %v5751_v61  ;;  %20070 = vst [vmem:[#allocation54_spill] sm:$0xff] %v13636_v52  ;;  %v20071_v20 = vrot.slane %v13444_v41, 1  ;;  %v18544_v12 = vrot.slane %v13631_v26, 2  ;;  %v20072_v61 = vld [vmem:[#allocation52_spill] sm:$0xff]  ;;  %v20080_v26 = vld [vmem:[#allocation17_spill] sm:$0xff] }
 0x342   : > { %v674_v8 = vadd.f32 %v673_v19, %v9575_v56  ;;  %v2582_v46 = vmul.f32 %v20072_v61, %v19249_v55  ;;  %v20074_v43 = vrot.slane %v20073_v51, 2  ;;  %v18548_v13 = vrot.slane %v13636_v52, 1 }
 0x343   : > { %v4808_v25 = vsel %vm2950_vm4, %v20071_v20, %v18543_v11  ;;  %v6765_v2 = vadd.f32 %v6520_v34, %v6063_v36  ;;  %v13656_v41 = vmul.f32 %v20042_v1, %v6877_v59  ;;  %v20076_v19 = vrot.slane %v13482_v15, 2  ;;  %v13663_v34 = vld [vmem:[#allocation2 + $0x170] sm:$0xff]  ;;  %v20077_v36 = vld [vmem:[#allocation4_spill] sm:$0xff] }
 0x344   : > { %v3887_v16 = vsel %vm3788_vm5, %v20074_v43, %v18545_v37  ;;  %v1010_v61 = vmax.f32 %v674_v8, 0.0  ;;  %v13667_v51 = vmul.f32 %v13663_v34, %v20077_v36  ;;  %v20078_v59 = vrot.slane %v13467_v58, 1  ;;  %v20079_v37 = vld [vmem:[#allocation23_spill] sm:$0xff] }
 0x345   : > { %20075 = vst [vmem:[#allocation60_spill] sm:$0xff] %v13656_v41  ;;  %v4127_v20 = vadd.f32 %v3887_v16, %v3289_v42  ;;  %v5516_v11 = vsel %vm3788_vm5, %v20076_v19, %v18544_v12  ;;  %v7473_v43 = vadd.f32 %v7228_v18, %v6765_v2  ;;  %v18553_v16 = vrot.slane %v13656_v41, 2  ;;  %v20081_v18 = vld [vmem:[#allocation39_spill] sm:$0xff] }
 0x346   : > { %v6530_v42 = vsel %vm2950_vm4, %v20078_v59, %v18548_v13  ;;  %v3524_v15 = vmul.f32 %v13663_v34, %v13599_v22  ;;  %v13677_v8 = vmin.f32 %v1010_v61, 6.0  ;;  %v4342_v1 = vmul.f32 %v20080_v26, %v20079_v37  ;;  %v20083_v13 = vld [vmem:[#allocation8_spill] sm:$0xff] }
 0x347   : > { %v4439_v19 = vadd.f32 %v4343_v10, %v4127_v20  ;;  %v7586_v2 = vadd.f32 %v20081_v18, %v7473_v43  ;;  %v20082_v58 = vrot.slane %v13489_v39, 2  ;;  %v20086_v10 = vld [vmem:[#allocation51_spill] sm:$0xff]  ;;  %v20088_v26 = vrot.slane %v13667_v51, 1 }
 0x348   : > { %v13689_v52 = vmul.f32 %v20083_v13, %v3524_v15  ;;  %v13693_v20 = vmul.f32 %v20086_v10, %v20085_v53  ;;  %v18563_v12 = vrot.slane %v13677_v8, 7  ;;  %v20090_v43 = vrot.slane %v20089_v6, 1 }
 0x349   : > { %v7238_v59 = vsel %vm3788_vm5, %v20082_v58, %v18553_v16  ;;  %v5048_v61 = vadd.f32 %v4808_v25, %v4439_v19  ;;  %v5154_v39 = vmul.f32 %v20086_v10, %v13599_v22  ;;  %v13703_v58 = vld [vmem:[#allocation2 + $0xe0] sm:$0xff]  ;;  %v7682_v15 = vmax.f32 %v7586_v2, 0.0  ;;  %v20092_v19 = vld [vmem:[#allocation13_spill] sm:$0xff] }
 0x34a   : > { %20084 = vst [vmem:[#allocation15_spill] sm:$0xff] %v13689_v52  ;;  %20087 = vst [vmem:[#allocation45_spill] sm:$0xff] %v13693_v20  ;;  %v3047_v41 = vsel %vm2950_vm4, %v20090_v43, %v20088_v26  ;;  %v18566_v0 = vrot.slane %v13689_v52, 2  ;;  %v18569_v17 = vrot.slane %v13693_v20, 1  ;;  %v20093_v4 = vrot.slane %v20092_v19, 7  ;;  %v20095_v43 = vld [vmem:[#allocation30_spill] sm:$0xff] }
 0x34b   : > { %20091 = vst [vmem:[#allocation52_spill] sm:$0xff] %v13703_v58  ;;  %v3288_v16 = vadd.f32 %v3047_v41, %v2582_v46  ;;  %v5756_v25 = vadd.f32 %v5516_v11, %v5048_v61  ;;  %v13713_v26 = vmul.f32 %v20094_v5, %v5154_v39  ;;  %v5971_v40 = vmul.f32 %v20096_v60, %v20095_v43  ;;  %v20097_v46 = vld [vmem:[#allocation7_spill] sm:$0xff]  ;;  %v20099_v61 = vld [vmem:[#allocation50_spill] sm:$0xff] }
 0x34c   : > { %v1487_v6 = vsel %vm1330_vm7, %v20093_v4, %v18563_v12  ;;  %v7778_v2 = vmin.f32 %v7682_v15, 6.0  ;;  %v20098_v41 = vrot.slane %v20097_v46, 2  ;;  %v20100_v19 = vrot.slane %v20099_v61, 1  ;;  %v20101_v39 = vld [vmem:[#allocation31_spill] sm:$0xff]  ;;  %v8722_v46 = vpop.f32.mrf.mxu1  ;;  %v20103_v61 = vld [vmem:[#allocation22_spill] sm:$0xff] }
 0x34d   : > { %1698 = vst [vmem:[#allocation2 + $0x2c0] sm:$0xff] %v1487_v6  ;;  %v13729_v12 = vmul.f32 %v20101_v39, %v13703_v58  ;;  %v6068_v14 = vadd.f32 %v5972_v57, %v5756_v25  ;;  %v18571_v15 = vrot.slane %v13713_v26, 2  ;;  %v6876_v6 = vmul.f32 %v13703_v58, %v13599_v22  ;;  %v20105_v57 = vld [vmem:[#allocation47_spill] sm:$0xff] }
 0x34e   : > { %v3885_v11 = vsel %vm3788_vm5, %v20098_v41, %v18566_v0  ;;  %v4806_v4 = vsel %vm2950_vm4, %v20100_v19, %v18569_v17  ;;  %8022 = vmatmul.mubr.f32.gmra.mxu1 %v7778_v2  ;;  %v20102_v0 = vld [vmem:[#allocation20_spill] sm:$0xff]  ;;  %v918_v63 = vadd.f32 %v8722_v46, %v20103_v61  ;;  %v20104_v19 = vld [vmem:[#allocation49_spill] sm:$0xff]  ;;  %v20108_v2 = vld [vmem:[#allocation58_spill] sm:$0xff] }
 0x34f   : > { %v4126_v44 = vadd.f32 %v3885_v11, %v3288_v16  ;;  %v18573_v41 = vrot.slane %v13729_v12, 1  ;;  %v678_v52 = vadd.f32 %v677_v21, %v20102_v0  ;;  %v2581_v17 = vmul.f32 %v20104_v19, %v20049_v33  ;;  %v20107_v11 = vld [vmem:[#allocation34_spill] sm:$0xff]  ;;  %v13752_v19 = vld [vmem:[#allocation2 + $0x220] sm:$0xff] }
 0x350   : > { %v6770_v5 = vadd.f32 %v6530_v42, %v6068_v14  ;;  %v20106_v16 = vrot.slane %v20105_v57, 2  ;;  %v13745_v13 = vmul.f32 %v20107_v11, %v6876_v6  ;;  %v20109_v21 = vrot.slane %v20108_v2, 1  ;;  %v20110_v14 = vld [vmem:[#allocation6_spill] sm:$0xff] }
 0x351   : > { %v4438_v20 = vadd.f32 %v4342_v1, %v4126_v44  ;;  %v1012_v0 = vmax.f32 %v678_v52, 0.0  ;;  %v1020_v43 = vmax.f32 %v918_v63, 0.0  ;;  %v13756_v44 = vmul.f32 %v13752_v19, %v20110_v14 }
 0x352   : > { %v5514_v25 = vsel %vm3788_vm5, %v20106_v16, %v18571_v15  ;;  %v6528_v46 = vsel %vm2950_vm4, %v20109_v21, %v18573_v41  ;;  %v7478_v1 = vadd.f32 %v7238_v59, %v6770_v5  ;;  %v18572_v57 = vrot.slane %v13745_v13, 2  ;;  %v20112_v5 = vld [vmem:[#allocation55_spill] sm:$0xff] }
 0x353   : > { %v5047_v42 = vadd.f32 %v4806_v4, %v4438_v20  ;;  %v3523_v6 = vmul.f32 %v13752_v19, %v13599_v22  ;;  %v13761_v16 = vmin.f32 %v1012_v0, 6.0  ;;  %v13763_v2 = vmin.f32 %v1020_v43, 6.0 }
 0x354   : > { %v18575_v52 = vrot.slane %v13756_v44, 1  ;;  %v4341_v63 = vmul.f32 %v13018_v62, %v20056_v38  ;;  %v7591_v21 = vadd.f32 %v20062_v27, %v7478_v1  ;;  %v20113_v59 = vrot.slane %v20112_v5, 2  ;;  %v13788_v5 = vld [vmem:[#allocation2 + $0x2b8] sm:$0xff]  ;;  %v679_v38 = vpop.f32.mrf.mxu0 }
 0x355   : > { %20111 = vst [vmem:[#allocation44_spill] sm:$0xff] %v13763_v2  ;;  %v5755_v15 = vadd.f32 %v5514_v25, %v5047_v42  ;;  %v13775_v4 = vmul.f32 %v20054_v47, %v3523_v6  ;;  %v18577_v0 = vrot.slane %v13761_v16, 7  ;;  %v20114_v62 = vrot.slane %v13502_v49, 1  ;;  %v20115_v25 = vld [vmem:[#allocation24_spill] sm:$0xff] }
 0x356   : > { %v7236_v20 = vsel %vm3788_vm5, %v20113_v59, %v18572_v57  ;;  %v13786_v42 = vmul.f32 %v13259_v7, %v20115_v25  ;;  %v7687_v59 = vmax.f32 %v7591_v21, 0.0  ;;  %v20116_v43 = vrot.slane %v13510_v30, 7  ;;  %v912_v21 = vpop.f32.mrf.mxu1 }
 0x357   : > { %v3045_v1 = vsel %vm2950_vm4, %v20114_v62, %v18575_v52  ;;  %v6067_v57 = vadd.f32 %v5971_v40, %v5755_v15  ;;  %v18579_v41 = vrot.slane %v13775_v4, 2  ;;  %v5153_v62 = vmul.f32 %v13259_v7, %v13599_v22 }
 0x358   : > { %v3287_v6 = vadd.f32 %v3045_v1, %v2581_v17  ;;  %v1491_v27 = vsel %vm1330_vm7, %v20116_v43, %v18577_v0  ;;  %v18580_v49 = vrot.slane %v13786_v42, 1  ;;  %v5970_v52 = vmul.f32 %v13536_v32, %v20059_v9 }
 0x359   : > { %v7783_v40 = vmin.f32 %v7687_v59, 6.0  ;;  %v6769_v17 = vadd.f32 %v6528_v46, %v6067_v57  ;;  %1700 = vst [vmem:[#allocation2 + $0x340] sm:$0xff] %v1491_v27  ;;  %v20117_v15 = vrot.slane %v13534_v48, 2  ;;  %v13808_v43 = vmul.f32 %v19304_v45, %v13788_v5 }
 0x35a   : > { %v20118_v0 = vrot.slane %v13526_v28, 1  ;;  %v13816_v46 = vmul.f32 %v19239_v31, %v5153_v62  ;;  %v6875_v27 = vmul.f32 %v13788_v5, %v13599_v22  ;;  %v680_v59 = vadd.f32 %v679_v38, %v9575_v56 }
 0x35b   : > { %v3883_v30 = vsel %vm3788_vm5, %v20117_v15, %v18579_v41  ;;  %8780 = vmatmul.mubr.f32.gmra.mxu0 %v7783_v40  ;;  %v7477_v48 = vadd.f32 %v7236_v20, %v6769_v17  ;;  %v18588_v57 = vrot.slane %v13808_v43, 1  ;;  %v20120_v22 = vrot.slane %v13557_v29, 1 }
 0x35c   : > { %v4125_v1 = vadd.f32 %v3883_v30, %v3287_v6  ;;  %v4804_v9 = vsel %vm2950_vm4, %v20118_v0, %v18580_v49  ;;  %v913_v6 = vadd.f32 %v912_v21, %v20103_v61  ;;  %v18587_v30 = vrot.slane %v13816_v46, 2  ;;  %v20119_v0 = vld [vmem:[#allocation3_spill] sm:$0xff] }
 0x35d   : > { %v13825_v28 = vmul.f32 %v19198_v24, %v6875_v27  ;;  %v1735_v62 = vadd.s32 128, %v20119_v0  ;;  %v7590_v41 = vadd.f32 %v19364_v35, %v7477_v48  ;;  %v6526_v20 = vsel %vm2950_vm4, %v20120_v22, %v18588_v57  ;;  %v20140_v57 = vld [vmem:[#allocation28_spill] sm:$0xff] }
 0x35e   : > { %v4437_v15 = vadd.f32 %v4341_v63, %v4125_v1  ;;  %v1013_v40 = vmax.f32 %v680_v59, 0.0  ;;  %v1017_v38 = vmax.f32 %v913_v6, 0.0  ;;  %v20121_v63 = vrot.slane %v13568_v23, 2  ;;  %v13848_v23 = vld [vmem:[#allocation2 + $0x200] sm:$0xff] }
 0x35f   : > { %v18586_v1 = vrot.slane %v13825_v28, 2  ;;  %v1736_v27 = vadd.s32 136, %v20119_v0  ;;  %v7686_v48 = vmax.f32 %v7590_v41, 0.0  ;;  %v1867_v29 = vand.u32 15, %v1735_v62  ;;  %20124 = vst [vmem:[#allocation51_spill] sm:$0xff] %v13848_v23 }
 0x360   : > { %v5046_v17 = vadd.f32 %v4804_v9, %v4437_v15  ;;  %v5512_v21 = vsel %vm3788_vm5, %v20121_v63, %v18587_v30  ;;  %v13841_v49 = vmin.f32 %v1013_v40, 6.0  ;;  %v1113_v61 = vmin.f32 %v1017_v38, 6.0  ;;  %v13855_v38 = vld [vmem:[#allocation2 + $0x2b0] sm:$0xff]  ;;  %v13861_v63 = vld [vmem:[#allocation2 + $0x368] sm:$0xff] }
 0x361   : > { %v20123_v9 = vrot.slane %v13573_v50, 2  ;;  %v1874_v6 = vand.u32 15, %v1736_v27  ;;  %v13852_v15 = vmul.f32 %v13848_v23, %v20077_v36  ;;  %v7782_v22 = vmin.f32 %v7686_v48, 6.0  ;;  %20126 = vst [vmem:[#allocation13_spill] sm:$0xff] %v13855_v38  ;;  %20127 = vst [vmem:[#allocation7_spill] sm:$0xff] %v13861_v63 }
 0x362   : > { %20122 = vst [vmem:[#allocation17_spill] sm:$0xff] %v13841_v49  ;;  %v5754_v56 = vadd.f32 %v5512_v21, %v5046_v17  ;;  %v18585_v41 = vrot.slane %v13841_v49, 7  ;;  %v1500_v40 = vrot.slane %v1113_v61, 7  ;;  %vm2151_vm10 = vcmp.gt.s32.totalorder %v1867_v29, 0  ;;  %v20129_v61 = vld [vmem:[#allocation46_spill] sm:$0xff]  ;;  %v13966_v49 = vld [vmem:[#allocation2 + $0xa0] sm:$0xff] }
 0x363   : > { %v7234_v59 = vsel %vm3788_vm5, %v20123_v9, %v18586_v1  ;;  %20125 = vst [vmem:[#allocation48_spill] sm:$0xff] %v13852_v15  ;;  %v13858_v17 = vsel %vm2151_vm10, 1.0, %v13855_v38  ;;  %vm2248_vm11 = vcmp.lt.s32.totalorder %v1874_v6, 15  ;;  %v18584_v50 = vrot.slane %v13852_v15, 1  ;;  %8026 = vmatprep.mubr.f32.mxu1 %v7782_v22  ;;  %v20154_v15 = vld [vmem:[#allocation16_spill] sm:$0xff] }
 0x364   : > { %v6066_v62 = vadd.f32 %v5970_v52, %v5754_v56  ;;  %v20128_v21 = vrot.slane %v13677_v8, 7  ;;  %v20130_v48 = vrot.slane %v20129_v61, 7  ;;  %v20131_v52 = vrot.slane %v13763_v2, 7  ;;  %v13932_v2 = vld [vmem:[#allocation2 + $0x2f0] sm:$0xff] }
 0x365   : > { %v8553_v9 = vsel %vm2248_vm11, 1.0, %v13855_v38  ;;  %v2473_v22 = vmul.f32 %v13663_v34, %v13858_v17  ;;  %v20132_v8 = vrot.slane %v13667_v51, 1  ;;  %v13894_v34 = vmul.f32 %v20101_v39, %v13861_v63  ;;  %v20148_v39 = vld [vmem:[#allocation61_spill] sm:$0xff] }
 0x366   : > { %v1493_v27 = vsel %vm1330_vm7, %v20128_v21, %v18585_v41  ;;  %v1501_v56 = vsel %vm1330_vm7, %v20130_v48, %v1500_v40  ;;  %v1507_v29 = vsel %vm1330_vm7, %v1500_v40, %v20131_v52  ;;  %v6768_v6 = vadd.f32 %v6526_v20, %v6066_v62  ;;  %v20136_v41 = vld [vmem:[#allocation8_spill] sm:$0xff] }
 0x367   : > { %1701 = vst [vmem:[#allocation2 + $0x160] sm:$0xff] %v1493_v27  ;;  %1705 = vst [vmem:[#allocation2 + $0x2f8] sm:$0xff] %v1501_v56  ;;  %v3053_v21 = vsel %vm2950_vm4, %v20132_v8, %v18584_v50  ;;  %v13882_v61 = vrot.slane %v8553_v9, 6  ;;  %v4233_v40 = vmul.f32 %v13858_v17, %v20086_v10  ;;  %v13888_v20 = vmul.f32 %v20096_v60, %v20085_v53 }
 0x368   : > { %1708 = vst [vmem:[#allocation2 + $0x238] sm:$0xff] %v1507_v29  ;;  %v5862_v62 = vmul.f32 %v13858_v17, %v13703_v58  ;;  %20134 = vst [vmem:[#allocation49_spill] sm:$0xff] %v13894_v34  ;;  %v7476_v27 = vadd.f32 %v7234_v59, %v6768_v6  ;;  %v2585_v51 = vmul.f32 %v19249_v55, %v2473_v22  ;;  %v20135_v22 = vld [vmem:[#allocation30_spill] sm:$0xff]  ;;  %v18595_v50 = vrot.slane %v13894_v34, 1 }
 0x369   : > { %20133 = vst [vmem:[#allocation50_spill] sm:$0xff] %v13888_v20  ;;  %v13900_v48 = vsel %vm3378_vm2, %v19378_v54, %v13882_v61  ;;  %v2474_v10 = vmul.f32 %v13584_v3, %v13858_v17  ;;  %v4345_v52 = vmul.f32 %v20079_v37, %v4233_v40  ;;  %v18593_v29 = vrot.slane %v13888_v20, 1  ;;  %v20138_v3 = vld [vmem:[#allocation45_spill] sm:$0xff]  ;;  %v20147_v20 = vld [vmem:[#allocation32_spill] sm:$0xff] }
 0x36a   : > { %v3527_v56 = vmul.f32 %v13848_v23, %v13900_v48  ;;  %v5157_v59 = vmul.f32 %v20096_v60, %v13900_v48  ;;  %v7589_v9 = vadd.f32 %v20081_v18, %v7476_v27  ;;  %v3291_v6 = vadd.f32 %v3053_v21, %v2585_v51  ;;  %v20170_v18 = vld [vmem:[#allocation41_spill] sm:$0xff] }
 0x36b   : > { %v5974_v8 = vmul.f32 %v20135_v22, %v5862_v62  ;;  %v20139_v30 = vrot.slane %v20138_v3, 1  ;;  %v6879_v27 = vmul.f32 %v13861_v63, %v13900_v48  ;;  %v20142_v62 = vrot.slane %v13729_v12, 1  ;;  %v20144_v3 = vld [vmem:[#allocation10_spill] sm:$0xff]  ;;  %v20150_v63 = vld [vmem:[#allocation15_spill] sm:$0xff] }
 0x36c   : > { %v13914_v1 = vmul.f32 %v20136_v41, %v3527_v56  ;;  %v13922_v38 = vmul.f32 %v20140_v57, %v5157_v59  ;;  %v7685_v21 = vmax.f32 %v7589_v9, 0.0  ;;  %v20143_v56 = vld [vmem:[#allocation18_spill] sm:$0xff]  ;;  %v3528_v12 = vmul.f32 %v13932_v2, %v13900_v48 }
 0x36d   : > { %v4812_v40 = vsel %vm2950_vm4, %v20139_v30, %v18593_v29  ;;  %v6534_v51 = vsel %vm2950_vm4, %v20142_v62, %v18595_v50  ;;  %v2586_v0 = vmul.f32 %v20143_v56, %v2474_v10  ;;  %v13936_v30 = vmul.f32 %v13932_v2, %v20144_v3  ;;  %v20146_v10 = vld [vmem:[#allocation5_spill] sm:$0xff] }
 0x36e   : > { %20137 = vst [vmem:[#allocation47_spill] sm:$0xff] %v13914_v1  ;;  %20141 = vst [vmem:[#allocation58_spill] sm:$0xff] %v13922_v38  ;;  %v18607_v59 = vrot.slane %v13914_v1, 2  ;;  %v13941_v9 = vmul.f32 %v20107_v11, %v6879_v27  ;;  %v7781_v34 = vmin.f32 %v7685_v21, 6.0  ;;  %v4234_v50 = vmul.f32 %v13858_v17, %v20146_v10 }
 0x36f   : > { %v13950_v57 = vmul.f32 %v20148_v39, %v20147_v20  ;;  %v20151_v29 = vrot.slane %v20150_v63, 2  ;;  %v20152_v11 = vrot.slane %v13922_v38, 2  ;;  %v20153_v22 = vrot.slane %v13713_v26, 2  ;;  %20156 = vst [vmem:[#allocation5_spill] sm:$0xff] %v13966_v49  ;;  %v20158_v63 = vld [vmem:[#allocation53_spill] sm:$0xff] }
 0x370   : > { %20145 = vst [vmem:[#allocation55_spill] sm:$0xff] %v13941_v9  ;;  %v18611_v62 = vrot.slane %v13941_v9, 2  ;;  %v13964_v10 = vmul.f32 %v20154_v15, %v3528_v12  ;;  %8027 = vmatmul.mubr.f32.gmra.mxu1 %v7781_v34  ;;  %v20157_v1 = vrot.slane %v13936_v30, 1  ;;  %v20159_v53 = vrot.slane %v20158_v63, 1  ;;  %v20164_v63 = vld [vmem:[#allocation56_spill] sm:$0xff] }
 0x371   : > { %20149 = vst [vmem:[#allocation46_spill] sm:$0xff] %v13950_v57  ;;  %v3891_v27 = vsel %vm3788_vm5, %v20151_v29, %v18607_v59  ;;  %v5520_v21 = vsel %vm3788_vm5, %v20153_v22, %v20152_v11  ;;  %v20160_v59 = vld [vmem:[#allocation35_spill] sm:$0xff]  ;;  %v18612_v26 = vrot.slane %v13950_v57, 1  ;;  %v683_v11 = vpop.f32.mrf.mxu0  ;;  %v20161_v22 = vrot.slane %v13745_v13, 2  ;;  %v20165_v13 = vld [vmem:[#allocation38_spill] sm:$0xff] }
 0x372   : > { %20155 = vst [vmem:[#allocation45_spill] sm:$0xff] %v13964_v10  ;;  %v4129_v58 = vadd.f32 %v3891_v27, %v3291_v6  ;;  %v3055_v29 = vsel %vm2950_vm4, %v20159_v53, %v20157_v1  ;;  %v4346_v38 = vmul.f32 %v20160_v59, %v4234_v50  ;;  %v18619_v34 = vrot.slane %v13964_v10, 2  ;;  %v20162_v53 = vld [vmem:[#allocation59_spill] sm:$0xff]  ;;  %v20171_v10 = vld [vmem:[#allocation42_spill] sm:$0xff] }
 0x373   : > { %v7242_v12 = vsel %vm3788_vm5, %v20161_v22, %v18611_v62  ;;  %v3292_v41 = vadd.f32 %v3055_v29, %v2586_v0  ;;  %v5158_v6 = vmul.f32 %v20148_v39, %v13900_v48  ;;  %v20163_v1 = vrot.slane %v20162_v53, 1  ;;  %v20166_v0 = vld [vmem:[#allocation11_spill] sm:$0xff] }
 0x374   : > { %v4441_v27 = vadd.f32 %v4345_v52, %v4129_v58  ;;  %v5863_v9 = vmul.f32 %v13858_v17, %v20164_v63  ;;  %v13992_v60 = vmul.f32 %v20165_v13, %v13966_v49  ;;  %v20167_v29 = vrot.slane %v20166_v0, 2  ;;  %v20168_v58 = vld [vmem:[#allocation36_spill] sm:$0xff] }
 0x375   : > { %v4814_v50 = vsel %vm2950_vm4, %v20163_v1, %v18612_v26  ;;  %v14000_v52 = vmul.f32 %v20168_v58, %v5158_v6  ;;  %v6880_v53 = vmul.f32 %v13966_v49, %v13900_v48  ;;  %v20169_v1 = vld [vmem:[#allocation20_spill] sm:$0xff]  ;;  %v2472_v6 = vmul.f32 %v13752_v19, %v13858_v17 }
 0x376   : > { %v3893_v22 = vsel %vm3788_vm5, %v20167_v29, %v18619_v34  ;;  %v684_v62 = vadd.f32 %v683_v11, %v20169_v1  ;;  %v5050_v26 = vadd.f32 %v4812_v40, %v4441_v27  ;;  %v5975_v36 = vmul.f32 %v20170_v18, %v5863_v9  ;;  %v20172_v11 = vld [vmem:[#allocation54_spill] sm:$0xff]  ;;  %v14018_v9 = vld [vmem:[#allocation2 + $0x2e0] sm:$0xff] }
 0x377   : > { %v4130_v37 = vadd.f32 %v3893_v22, %v3292_v41  ;;  %v18621_v23 = vrot.slane %v13992_v60, 1  ;;  %v18624_v55 = vrot.slane %v14000_v52, 2  ;;  %v14009_v0 = vmul.f32 %v20171_v10, %v6880_v53 }
 0x378   : > { %v1015_v29 = vmax.f32 %v684_v62, 0.0  ;;  %v5758_v34 = vadd.f32 %v5520_v21, %v5050_v26  ;;  %v20173_v40 = vrot.slane %v20172_v11, 1  ;;  %v14022_v27 = vmul.f32 %v14018_v9, %v20110_v14  ;;  %v20174_v62 = vld [vmem:[#allocation19_spill] sm:$0xff] }
 0x379   : > { %v4442_v57 = vadd.f32 %v4346_v38, %v4130_v37  ;;  %v20175_v22 = vrot.slane %v20174_v62, 2  ;;  %v18623_v37 = vrot.slane %v14009_v0, 2  ;;  %v2584_v21 = vmul.f32 %v20049_v33, %v2472_v6 }
 0x37a   : > { %v6536_v41 = vsel %vm2950_vm4, %v20173_v40, %v18621_v23  ;;  %v14030_v38 = vmin.f32 %v1015_v29, 6.0  ;;  %v6070_v26 = vadd.f32 %v5974_v8, %v5758_v34  ;;  %v18625_v11 = vrot.slane %v14022_v27, 1  ;;  %v20176_v23 = vld [vmem:[#allocation60_spill] sm:$0xff] }
 0x37b   : > { %v5522_v19 = vsel %vm3788_vm5, %v20175_v22, %v18624_v55  ;;  %v5051_v53 = vadd.f32 %v4814_v50, %v4442_v57  ;;  %v3526_v40 = vmul.f32 %v14018_v9, %v13900_v48  ;;  %v20177_v14 = vrot.slane %v20176_v23, 2 }
 0x37c   : > { %v18631_v22 = vrot.slane %v14030_v38, 7  ;;  %v4232_v29 = vmul.f32 %v13858_v17, %v13259_v7  ;;  %v14046_v8 = vmul.f32 %v13536_v32, %v20115_v25  ;;  %v6772_v57 = vadd.f32 %v6534_v51, %v6070_v26  ;;  %v20180_v51 = vld [vmem:[#allocation26_spill] sm:$0xff] }
 0x37d   : > { %v7244_v62 = vsel %vm3788_vm5, %v20177_v14, %v18623_v37  ;;  %v5759_v34 = vadd.f32 %v5522_v19, %v5051_v53  ;;  %v20178_v50 = vrot.slane %v13756_v44, 1  ;;  %v14054_v23 = vmul.f32 %v20054_v47, %v3526_v40  ;;  %v14056_v14 = vld [vmem:[#allocation2 + $0x210] sm:$0xff] }
 0x37e   : > { %v20179_v7 = vrot.slane %v13761_v16, 7  ;;  %v4344_v19 = vmul.f32 %v20180_v51, %v4232_v29  ;;  %v18626_v26 = vrot.slane %v14046_v8, 1  ;;  %v7480_v53 = vadd.f32 %v7242_v12, %v6772_v57 }
 0x37f   : > { %v3051_v6 = vsel %vm2950_vm4, %v20178_v50, %v18625_v11  ;;  %v6071_v44 = vadd.f32 %v5975_v36, %v5759_v34  ;;  %v18630_v50 = vrot.slane %v14054_v23, 2  ;;  %v5156_v40 = vmul.f32 %v13536_v32, %v13900_v48  ;;  %v20183_v34 = vld [vmem:[#allocation29_spill] sm:$0xff] }
 0x380   : > { %v1497_v37 = vsel %vm1330_vm7, %v20179_v7, %v18631_v22  ;;  %v3290_v55 = vadd.f32 %v3051_v6, %v2584_v21  ;;  %v20181_v11 = vrot.slane %v13786_v42, 1  ;;  %v5861_v21 = vmul.f32 %v13858_v17, %v13788_v5 }
 0x381   : > { %1703 = vst [vmem:[#allocation2 + $0x1c8] sm:$0xff] %v1497_v37  ;;  %v14077_v29 = vmul.f32 %v19304_v45, %v14056_v14  ;;  %v6878_v36 = vmul.f32 %v14056_v14, %v13900_v48  ;;  %v7593_v12 = vadd.f32 %v19364_v35, %v7480_v53  ;;  %v6773_v37 = vadd.f32 %v6536_v41, %v6071_v44 }
 0x382   : > { %v4810_v16 = vsel %vm2950_vm4, %v20181_v11, %v18626_v26  ;;  %v20182_v57 = vrot.slane %v13775_v4, 2  ;;  %v14088_v11 = vmul.f32 %v19239_v31, %v5156_v40  ;;  %v5973_v6 = vmul.f32 %v20183_v34, %v5861_v21 }
 0x383   : > { %v18629_v7 = vrot.slane %v14077_v29, 1  ;;  %v14093_v26 = vmul.f32 %v19198_v24, %v6878_v36  ;;  %v7689_v48 = vmax.f32 %v7593_v12, 0.0  ;;  %v7481_v53 = vadd.f32 %v7244_v62, %v6773_v37  ;;  %v20187_v12 = vld [vmem:[#allocation43_spill] sm:$0xff] }
 0x384   : > { %v3889_v42 = vsel %vm3788_vm5, %v20182_v57, %v18630_v50  ;;  %v18628_v41 = vrot.slane %v14088_v11, 2  ;;  %v2589_v4 = vmul.f32 %v13932_v2, %v20143_v56  ;;  %v20184_v40 = vrot.slane %v13808_v43, 1  ;;  %v14104_v57 = vld [vmem:[#allocation2 + $0xf0] sm:$0xff] }
 0x385   : > { %v4128_v17 = vadd.f32 %v3889_v42, %v3290_v55  ;;  %v18627_v21 = vrot.slane %v14093_v26, 2  ;;  %20185 = vst [vmem:[#allocation61_spill] sm:$0xff] %v14104_v57  ;;  %v14108_v36 = vmul.f32 %v14104_v57, %v20144_v3  ;;  %v7785_v62 = vmin.f32 %v7689_v48, 6.0 }
 0x386   : > { %v6532_v55 = vsel %vm2950_vm4, %v20184_v40, %v18629_v7  ;;  %v7594_v37 = vadd.f32 %v20187_v12, %v7481_v53  ;;  %v20188_v2 = vrot.slane %v13816_v46, 2  ;;  %v14119_v43 = vsel %vm3378_vm2, %v13882_v61, %v19378_v54 }
 0x387   : > { %v4440_v44 = vadd.f32 %v4344_v19, %v4128_v17  ;;  %20186 = vst [vmem:[#allocation15_spill] sm:$0xff] %v14108_v36  ;;  %v20189_v17 = vrot.slane %v13825_v28, 2  ;;  %v18632_v53 = vrot.slane %v14108_v36, 1  ;;  %v3531_v40 = vmul.f32 %v14104_v57, %v14119_v43  ;;  %8031 = vmatprep.mubr.f32.mxu1 %v7785_v62  ;;  %v14137_v28 = vld [vmem:[#allocation2 + $0x228] sm:$0xff] }
 0x388   : > { %v5518_v19 = vsel %vm3788_vm5, %v20188_v2, %v18628_v41  ;;  %v7690_v46 = vmax.f32 %v7594_v37, 0.0  ;;  %v4349_v2 = vmul.f32 %v20148_v39, %v20160_v59  ;;  %v14133_v61 = vmul.f32 %v20164_v63, %v20147_v20  ;;  %20191 = vst [vmem:[#allocation59_spill] sm:$0xff] %v14137_v28  ;;  %v14222_v59 = vld [vmem:[#allocation2 + $0x330] sm:$0xff]  ;;  %v20224_v20 = vld [vmem:[#allocation7_spill] sm:$0xff] }
 0x389   : > { %v5049_v42 = vadd.f32 %v4810_v16, %v4440_v44  ;;  %v7240_v48 = vsel %vm3788_vm5, %v20189_v17, %v18627_v21  ;;  %v5161_v16 = vmul.f32 %v20164_v63, %v14119_v43  ;;  %v20192_v17 = vrot.slane %v13936_v30, 1  ;;  %v685_v21 = vpop.f32.mrf.mxu0 }
 0x38a   : > { %20190 = vst [vmem:[#allocation53_spill] sm:$0xff] %v14133_v61  ;;  %v14145_v37 = vmul.f32 %v20154_v15, %v3531_v40  ;;  %v5978_v39 = vmul.f32 %v13966_v49, %v20170_v18  ;;  %v7786_v41 = vmin.f32 %v7690_v46, 6.0  ;;  %v18640_v50 = vrot.slane %v14133_v61, 1  ;;  %v20223_v49 = vld [vmem:[#allocation30_spill] sm:$0xff] }
 0x38b   : > { %v5757_v44 = vadd.f32 %v5518_v19, %v5049_v42  ;;  %v3061_v62 = vsel %vm2950_vm4, %v20192_v17, %v18632_v53  ;;  %v14151_v22 = vmul.f32 %v20168_v58, %v5161_v16  ;;  %v14156_v30 = vmul.f32 %v20165_v13, %v14137_v28  ;;  %v8725_v17 = vpop.f32.mrf.mxu1  ;;  %v20199_v53 = vld [vmem:[#allocation22_spill] sm:$0xff]  ;;  %v20201_v13 = vld [vmem:[#allocation45_spill] sm:$0xff]  ;;  %v689_v3 = vpop.f32.mrf.mxu0 }
 0x38c   : > { %20193 = vst [vmem:[#allocation11_spill] sm:$0xff] %v14145_v37  ;;  %v3295_v7 = vadd.f32 %v3061_v62, %v2589_v4  ;;  %v6883_v40 = vmul.f32 %v14137_v28, %v14119_v43  ;;  %8782 = vmatprep.mubr.f32.mxu0 %v7786_v41  ;;  %v20196_v4 = vld [vmem:[#allocation46_spill] sm:$0xff]  ;;  %v928_v42 = vadd.f32 %v8725_v17, %v20199_v53  ;;  %v20200_v58 = vrot.slane %v14145_v37, 2  ;;  %v20216_v37 = vld [vmem:[#allocation52_spill] sm:$0xff] }
 0x38d   : > { %20194 = vst [vmem:[#allocation20_spill] sm:$0xff] %v14151_v22  ;;  %v6069_v19 = vadd.f32 %v5973_v6, %v5757_v44  ;;  %20195 = vst [vmem:[#allocation54_spill] sm:$0xff] %v14156_v30  ;;  %v20197_v46 = vrot.slane %v20196_v4, 1  ;;  %v18642_v16 = vrot.slane %v14151_v22, 2  ;;  %v20198_v6 = vld [vmem:[#allocation21_spill] sm:$0xff]  ;;  %v20202_v36 = vrot.slane %v20201_v13, 2 }
 0x38e   : > { %v686_v44 = vadd.f32 %v685_v21, %v20198_v6  ;;  %v18643_v41 = vrot.slane %v14156_v30, 1  ;;  %v14175_v61 = vmul.f32 %v20171_v10, %v6883_v40  ;;  %v20205_v13 = vrot.slane %v13992_v60, 1  ;;  %v20206_v40 = vld [vmem:[#allocation9_spill] sm:$0xff]  ;;  %v20213_v10 = vld [vmem:[#allocation8_spill] sm:$0xff]  ;;  %20218 = vst [vmem:[#allocation22_spill] sm:$0xff] %v14222_v59 }
 0x38f   : > { %v4820_v62 = vsel %vm2950_vm4, %v20197_v46, %v18640_v50  ;;  %v6771_v18 = vadd.f32 %v6532_v55, %v6069_v19  ;;  %v3899_v28 = vsel %vm3788_vm5, %v20202_v36, %v20200_v58  ;;  %v20204_v46 = vrot.slane %v14000_v52, 2  ;;  %v20207_v50 = vld [vmem:[#allocation51_spill] sm:$0xff] }
 0x390   : > { %20203 = vst [vmem:[#allocation19_spill] sm:$0xff] %v14175_v61  ;;  %v4133_v4 = vadd.f32 %v3899_v28, %v3295_v7  ;;  %v1016_v17 = vmax.f32 %v686_v44, 0.0  ;;  %v1026_v55 = vmax.f32 %v928_v42, 0.0  ;;  %v6542_v58 = vsel %vm2950_vm4, %v20205_v13, %v18643_v41  ;;  %v20208_v42 = vld [vmem:[#allocation4_spill] sm:$0xff] }
 0x391   : > { %v5528_v21 = vsel %vm3788_vm5, %v20204_v46, %v18642_v16  ;;  %v7479_v19 = vadd.f32 %v7240_v48, %v6771_v18  ;;  %v18648_v36 = vrot.slane %v14175_v61, 2  ;;  %v2588_v7 = vmul.f32 %v20207_v50, %v20206_v40  ;;  %v14194_v46 = vld [vmem:[#allocation2 + $0x268] sm:$0xff]  ;;  %v20209_v48 = vld [vmem:[#allocation39_spill] sm:$0xff] }
 0x392   : > { %v4445_v28 = vadd.f32 %v4349_v2, %v4133_v4  ;;  %v14190_v22 = vmin.f32 %v1016_v17, 6.0  ;;  %v14192_v52 = vmin.f32 %v1026_v55, 6.0  ;;  %v14198_v18 = vmul.f32 %v14194_v46, %v20208_v42  ;;  %v20211_v2 = vld [vmem:[#allocation23_spill] sm:$0xff]  ;;  %v20212_v4 = vld [vmem:[#allocation57_spill] sm:$0xff] }
 0x393   : > { %v7592_v60 = vadd.f32 %v20209_v48, %v7479_v19  ;;  %v20210_v44 = vrot.slane %v14009_v0, 2  ;;  %v3530_v50 = vmul.f32 %v14194_v46, %v14119_v43  ;;  %v4348_v17 = vmul.f32 %v20212_v4, %v20211_v2  ;;  %v20215_v0 = vld [vmem:[#allocation25_spill] sm:$0xff]  ;;  %v922_v48 = vpop.f32.mrf.mxu1  ;;  %v20231_v2 = vld [vmem:[#allocation34_spill] sm:$0xff] }
 0x394   : > { %v5054_v55 = vadd.f32 %v4820_v62, %v4445_v28  ;;  %v18657_v16 = vrot.slane %v14190_v22, 7  ;;  %v1518_v41 = vrot.slane %v14192_v52, 7  ;;  %v18659_v30 = vrot.slane %v14198_v18, 1  ;;  %v20219_v28 = vld [vmem:[#allocation17_spill] sm:$0xff] }
 0x395   : > { %v7250_v13 = vsel %vm3788_vm5, %v20210_v44, %v18648_v36  ;;  %v7688_v19 = vmax.f32 %v7592_v60, 0.0  ;;  %v14214_v61 = vmul.f32 %v20213_v10, %v3530_v50  ;;  %v14218_v44 = vmul.f32 %v20216_v37, %v20215_v0  ;;  %v20221_v60 = vld [vmem:[#allocation48_spill] sm:$0xff] }
 0x396   : > { %v5160_v36 = vmul.f32 %v20216_v37, %v14119_v43  ;;  %v5762_v62 = vadd.f32 %v5528_v21, %v5054_v55  ;;  %v20220_v52 = vrot.slane %v20219_v28, 7  ;;  %1717 = vst [vmem:[#allocation2 + $0x218] sm:$0x1] %v1518_v41  ;;  %v20222_v50 = vrot.slane %v20221_v60, 1  ;;  %v20226_v60 = vld [vmem:[#allocation31_spill] sm:$0xff] }
 0x397   : > { %20214 = vst [vmem:[#allocation60_spill] sm:$0xff] %v14214_v61  ;;  %20217 = vst [vmem:[#allocation46_spill] sm:$0xff] %v14218_v44  ;;  %v5977_v63 = vmul.f32 %v20224_v20, %v20223_v49  ;;  %v7784_v56 = vmin.f32 %v7688_v19, 6.0  ;;  %v18661_v55 = vrot.slane %v14214_v61, 2  ;;  %v18666_v28 = vrot.slane %v14218_v44, 1  ;;  %v20227_v19 = vld [vmem:[#allocation47_spill] sm:$0xff] }
 0x398   : > { %v1499_v4 = vsel %vm1330_vm7, %v20220_v52, %v18657_v16  ;;  %v3059_v15 = vsel %vm2950_vm4, %v20222_v50, %v18659_v30  ;;  %v6074_v52 = vadd.f32 %v5978_v39, %v5762_v62  ;;  %v20225_v16 = vld [vmem:[#allocation28_spill] sm:$0xff]  ;;  %v14243_v57 = vmul.f32 %v20226_v60, %v14222_v59  ;;  %v20229_v39 = vld [vmem:[#allocation50_spill] sm:$0xff] }
 0x399   : > { %1704 = vst [vmem:[#allocation2 + $0x278] sm:$0xff] %v1499_v4  ;;  %v3294_v21 = vadd.f32 %v3059_v15, %v2588_v7  ;;  %v14239_v10 = vmul.f32 %v20225_v16, %v5160_v36  ;;  %v6882_v50 = vmul.f32 %v14222_v59, %v14119_v43  ;;  %8032 = vmatmul.mubr.f32.gmra.mxu1 %v7784_v56  ;;  %v20228_v15 = vrot.slane %v20227_v19, 2 }
 0x39a   : > { %v20230_v62 = vrot.slane %v20229_v39, 1  ;;  %v690_v4 = vadd.f32 %v689_v3, %v20169_v1  ;;  %v923_v30 = vadd.f32 %v922_v48, %v20199_v53  ;;  %v6776_v16 = vadd.f32 %v6542_v58, %v6074_v52  ;;  %v20232_v3 = vld [vmem:[#allocation58_spill] sm:$0xff]  ;;  %v20234_v48 = vld [vmem:[#allocation49_spill] sm:$0xff] }
 0x39b   : > { %v3897_v7 = vsel %vm3788_vm5, %v20228_v15, %v18661_v55  ;;  %v18663_v56 = vrot.slane %v14239_v10, 2  ;;  %v18664_v61 = vrot.slane %v14243_v57, 1  ;;  %v14262_v19 = vmul.f32 %v20231_v2, %v6882_v50 }
 0x39c   : > { %v4818_v36 = vsel %vm2950_vm4, %v20230_v62, %v18666_v28  ;;  %v4132_v49 = vadd.f32 %v3897_v7, %v3294_v21  ;;  %v1018_v15 = vmax.f32 %v690_v4, 0.0  ;;  %v1023_v55 = vmax.f32 %v923_v30, 0.0  ;;  %v691_v28 = vpop.f32.mrf.mxu0 }
 0x39d   : > { %v2587_v39 = vmul.f32 %v14018_v9, %v20049_v33  ;;  %v7484_v44 = vadd.f32 %v7250_v13, %v6776_v16  ;;  %v20233_v53 = vrot.slane %v20232_v3, 2  ;;  %v20235_v21 = vrot.slane %v20234_v48, 1  ;;  %v14279_v9 = vld [vmem:[#allocation2 + $0x260] sm:$0xff] }
 0x39e   : > { %v4444_v62 = vadd.f32 %v4348_v17, %v4132_v49  ;;  %v18665_v50 = vrot.slane %v14262_v19, 2  ;;  %v14277_v30 = vmin.f32 %v1018_v15, 6.0  ;;  %v1119_v7 = vmin.f32 %v1023_v55, 6.0  ;;  %v20236_v49 = vld [vmem:[#allocation6_spill] sm:$0xff]  ;;  %v20237_v15 = vld [vmem:[#allocation55_spill] sm:$0xff] }
 0x39f   : > { %v5526_v58 = vsel %vm3788_vm5, %v20233_v53, %v18663_v56  ;;  %v6540_v52 = vsel %vm2950_vm4, %v20235_v21, %v18664_v61  ;;  %v14283_v16 = vmul.f32 %v14279_v9, %v20236_v49  ;;  %v7597_v13 = vadd.f32 %v20187_v12, %v7484_v44 }
 0x3a0   : > { %v5053_v17 = vadd.f32 %v4818_v36, %v4444_v62  ;;  %v3529_v4 = vmul.f32 %v14279_v9, %v14119_v43  ;;  %v4347_v3 = vmul.f32 %v13536_v32, %v20180_v51  ;;  %v20238_v53 = vrot.slane %v20237_v15, 2  ;;  %v14304_v32 = vld [vmem:[#allocation2 + $0xc0] sm:$0xff] }
 0x3a1   : > { %v18676_v48 = vrot.slane %v14277_v30, 7  ;;  %v1512_v21 = vrot.slane %v1119_v7, 7  ;;  %v18677_v56 = vrot.slane %v14283_v16, 1  ;;  %v7693_v61 = vmax.f32 %v7597_v13, 0.0  ;;  %v20240_v7 = vld [vmem:[#allocation44_spill] sm:$0xff] }
 0x3a2   : > { %v7248_v55 = vsel %vm3788_vm5, %v20238_v53, %v18665_v50  ;;  %v5761_v44 = vadd.f32 %v5526_v58, %v5053_v17  ;;  %v14298_v36 = vmul.f32 %v20054_v47, %v3529_v4  ;;  %v14302_v62 = vmul.f32 %v13788_v5, %v20115_v25 }
 0x3a3   : > { %v20239_v15 = vrot.slane %v14030_v38, 7  ;;  %v20241_v50 = vrot.slane %v20240_v7, 7  ;;  %v1519_v58 = vsel %vm1330_vm7, %v1512_v21, %v1518_v41  ;;  %v20242_v17 = vrot.slane %v14022_v27, 1 }
 0x3a4   : > { %v7789_v12 = vmin.f32 %v7693_v61, 6.0  ;;  %v6073_v51 = vadd.f32 %v5977_v63, %v5761_v44  ;;  %1714 = vst [vmem:[#allocation2 + $0x178] sm:$0xff] %v1519_v58  ;;  %v18675_v7 = vrot.slane %v14302_v62, 1  ;;  %v5159_v41 = vmul.f32 %v13788_v5, %v14119_v43 }
 0x3a5   : > { %v1503_v53 = vsel %vm1330_vm7, %v20239_v15, %v18676_v48  ;;  %v1513_v13 = vsel %vm1330_vm7, %v20241_v50, %v1512_v21  ;;  %v3057_v4 = vsel %vm2950_vm4, %v20242_v17, %v18677_v56  ;;  %v18674_v15 = vrot.slane %v14298_v36, 2  ;;  %v20265_v56 = vld [vmem:[#allocation28_spill] sm:$0xff] }
 0x3a6   : > { %1706 = vst [vmem:[#allocation2 + $0x300] sm:$0xff] %v1503_v53  ;;  %1711 = vst [vmem:[#allocation2 + $0x110] sm:$0xff] %v1513_v13  ;;  %v3293_v38 = vadd.f32 %v3057_v4, %v2587_v39  ;;  %v5976_v50 = vmul.f32 %v14056_v14, %v20183_v34  ;;  %v14328_v27 = vmul.f32 %v19304_v45, %v14304_v32  ;;  %8783 = vmatmul.mubr.f32.gmra.mxu0 %v7789_v12 }
 0x3a7   : > { %v6775_v63 = vadd.f32 %v6540_v52, %v6073_v51  ;;  %v20243_v61 = vrot.slane %v14054_v23, 2  ;;  %v6881_v21 = vmul.f32 %v14304_v32, %v14119_v43  ;;  %v692_v44 = vadd.f32 %v691_v28, %v20198_v6  ;;  %v20245_v43 = vld [vmem:[#allocation3_spill] sm:$0xff] }
 0x3a8   : > { %v20244_v13 = vrot.slane %v14046_v8, 1  ;;  %v14344_v51 = vmul.f32 %v19239_v31, %v5159_v41  ;;  %v18670_v12 = vrot.slane %v14328_v27, 1  ;;  %v1737_v4 = vadd.s32 144, %v20245_v43 }
 0x3a9   : > { %v3895_v39 = vsel %vm3788_vm5, %v20243_v61, %v18674_v15  ;;  %v7483_v23 = vadd.f32 %v7248_v55, %v6775_v63  ;;  %v14348_v52 = vmul.f32 %v19198_v24, %v6881_v21  ;;  %v1019_v17 = vmax.f32 %v692_v44, 0.0 }
 0x3aa   : > { %v4131_v53 = vadd.f32 %v3895_v39, %v3293_v38  ;;  %v4816_v58 = vsel %vm2950_vm4, %v20244_v13, %v18675_v7  ;;  %v18669_v38 = vrot.slane %v14344_v51, 2  ;;  %v20246_v8 = vrot.slane %v14077_v29, 1  ;;  %v14367_v29 = vld [vmem:[#allocation2 + $0xa8] sm:$0xff]  ;;  %v20261_v7 = vld [vmem:[#allocation8_spill] sm:$0xff] }
 0x3ab   : > { %v1738_v41 = vadd.s32 152, %v20245_v43  ;;  %v7596_v39 = vadd.f32 %v19364_v35, %v7483_v23  ;;  %v18673_v55 = vrot.slane %v14348_v52, 2  ;;  %v14360_v63 = vmin.f32 %v1019_v17, 6.0  ;;  %20249 = vst [vmem:[#allocation51_spill] sm:$0xff] %v14367_v29 }
 0x3ac   : > { %v4443_v28 = vadd.f32 %v4347_v3, %v4131_v53  ;;  %v6538_v61 = vsel %vm2950_vm4, %v20246_v8, %v18670_v12  ;;  %v1881_v21 = vand.u32 15, %v1737_v4  ;;  %v20248_v3 = vrot.slane %v14088_v11, 2 }
 0x3ad   : > { %20247 = vst [vmem:[#allocation45_spill] sm:$0xff] %v14360_v63  ;;  %v1888_v13 = vand.u32 15, %v1738_v41  ;;  %v14371_v8 = vmul.f32 %v14367_v29, %v20208_v42  ;;  %v7692_v23 = vmax.f32 %v7596_v39, 0.0  ;;  %v20251_v17 = vrot.slane %v14093_v26, 2 }
 0x3ae   : > { %v5052_v44 = vadd.f32 %v4816_v58, %v4443_v28  ;;  %v5524_v53 = vsel %vm3788_vm5, %v20248_v3, %v18669_v38  ;;  %v18671_v4 = vrot.slane %v14360_v63, 7  ;;  %vm2153_vm12 = vcmp.gt.s32.totalorder %v1881_v21, 0  ;;  %v20252_v28 = vld [vmem:[#allocation13_spill] sm:$0xff]  ;;  %v14383_v38 = vld [vmem:[#allocation2 + $0x120] sm:$0xff] }
 0x3af   : > { %20250 = vst [vmem:[#allocation57_spill] sm:$0xff] %v14371_v8  ;;  %v7246_v58 = vsel %vm3788_vm5, %v20251_v17, %v18673_v55  ;;  %v14380_v3 = vsel %vm2153_vm12, 1.0, %v20252_v28  ;;  %vm2250_vm13 = vcmp.lt.s32.totalorder %v1888_v13, 15  ;;  %v18672_v41 = vrot.slane %v14371_v8, 1  ;;  %20253 = vst [vmem:[#allocation52_spill] sm:$0xff] %v14383_v38  ;;  %v20276_v63 = vld [vmem:[#allocation60_spill] sm:$0xff] }
 0x3b0   : > { %v5760_v11 = vadd.f32 %v5524_v53, %v5052_v44  ;;  %v7788_v12 = vmin.f32 %v7692_v23, 6.0  ;;  %v20254_v39 = vrot.slane %v14190_v22, 7  ;;  %v8554_v17 = vsel %vm2250_vm13, 1.0, %v20252_v28 }
 0x3b1   : > { %v2479_v21 = vmul.f32 %v14194_v46, %v14380_v3  ;;  %v20255_v53 = vrot.slane %v14198_v18, 1  ;;  %v14398_v23 = vrot.slane %v8554_v17, 6  ;;  %v4239_v22 = vmul.f32 %v14380_v3, %v20216_v37  ;;  %v20258_v37 = vld [vmem:[#allocation23_spill] sm:$0xff] }
 0x3b2   : > { %v1505_v26 = vsel %vm1330_vm7, %v20254_v39, %v18671_v4  ;;  %v6072_v44 = vadd.f32 %v5976_v50, %v5760_v11  ;;  %8036 = vmatprep.mubr.f32.mxu1 %v7788_v12  ;;  %v14405_v28 = vmul.f32 %v20224_v20, %v20215_v0  ;;  %v5868_v46 = vmul.f32 %v14380_v3, %v14222_v59 }
 0x3b3   : > { %1707 = vst [vmem:[#allocation2 + $0x288] sm:$0xff] %v1505_v26  ;;  %v3065_v13 = vsel %vm2950_vm4, %v20255_v53, %v18672_v41  ;;  %v2591_v39 = vmul.f32 %v20206_v40, %v2479_v21  ;;  %v14411_v18 = vmul.f32 %v20226_v60, %v14383_v38  ;;  %v14416_v11 = vsel %vm3378_vm2, %v19378_v54, %v14398_v23  ;;  %v20259_v26 = vld [vmem:[#allocation61_spill] sm:$0xff] }
 0x3b4   : > { %20256 = vst [vmem:[#allocation17_spill] sm:$0xff] %v14405_v28  ;;  %v6774_v50 = vadd.f32 %v6538_v61, %v6072_v44  ;;  %v4351_v12 = vmul.f32 %v20258_v37, %v4239_v22  ;;  %v2480_v17 = vmul.f32 %v20259_v26, %v14380_v3  ;;  %v3533_v53 = vmul.f32 %v14367_v29, %v14416_v11  ;;  %v20260_v44 = vld [vmem:[#allocation30_spill] sm:$0xff] }
 0x3b5   : > { %20257 = vst [vmem:[#allocation48_spill] sm:$0xff] %v14411_v18  ;;  %v3297_v21 = vadd.f32 %v3065_v13, %v2591_v39  ;;  %v18683_v4 = vrot.slane %v14405_v28, 1  ;;  %v5163_v41 = vmul.f32 %v20224_v20, %v14416_v11  ;;  %v5980_v55 = vmul.f32 %v20260_v44, %v5868_v46  ;;  %v20263_v13 = vld [vmem:[#allocation46_spill] sm:$0xff]  ;;  %v20268_v46 = vld [vmem:[#allocation39_spill] sm:$0xff] }
 0x3b6   : > { %v7482_v61 = vadd.f32 %v7246_v58, %v6774_v50  ;;  %v18684_v15 = vrot.slane %v14411_v18, 1  ;;  %v6885_v22 = vmul.f32 %v14383_v38, %v14416_v11  ;;  %v14431_v48 = vmul.f32 %v20261_v7, %v3533_v53  ;;  %v20267_v58 = vld [vmem:[#allocation18_spill] sm:$0xff]  ;;  %v20273_v18 = vld [vmem:[#allocation32_spill] sm:$0xff] }
 0x3b7   : > { %v20264_v39 = vrot.slane %v20263_v13, 1  ;;  %v14439_v43 = vmul.f32 %v20265_v56, %v5163_v41  ;;  %v2592_v50 = vmul.f32 %v20267_v58, %v2480_v17  ;;  %v20269_v38 = vrot.slane %v14243_v57, 1  ;;  %v14451_v28 = vld [vmem:[#allocation2 + $0x130] sm:$0xff] }
 0x3b8   : > { %20262 = vst [vmem:[#allocation47_spill] sm:$0xff] %v14431_v48  ;;  %v7595_v60 = vadd.f32 %v20268_v46, %v7482_v61  ;;  %v14449_v44 = vmul.f32 %v20231_v2, %v6885_v22  ;;  %v20271_v13 = vld [vmem:[#allocation10_spill] sm:$0xff]  ;;  %v18694_v41 = vrot.slane %v14431_v48, 2  ;;  %v3534_v61 = vmul.f32 %v14451_v28, %v14416_v11  ;;  %v20274_v2 = vld [vmem:[#allocation5_spill] sm:$0xff]  ;;  %v14483_v46 = vld [vmem:[#allocation2 + $0x38] sm:$0xff] }
 0x3b9   : > { %v4824_v26 = vsel %vm2950_vm4, %v20264_v39, %v18683_v4  ;;  %20266 = vst [vmem:[#allocation50_spill] sm:$0xff] %v14439_v43  ;;  %v6546_v53 = vsel %vm2950_vm4, %v20269_v38, %v18684_v15  ;;  %v14455_v39 = vmul.f32 %v14451_v28, %v20271_v13  ;;  %v20272_v4 = vld [vmem:[#allocation56_spill] sm:$0xff]  ;;  %v14467_v56 = vmul.f32 %v20274_v2, %v20273_v18  ;;  %v20282_v15 = vld [vmem:[#allocation35_spill] sm:$0xff] }
 0x3ba   : > { %20270 = vst [vmem:[#allocation58_spill] sm:$0xff] %v14449_v44  ;;  %v4240_v57 = vmul.f32 %v14380_v3, %v20272_v4  ;;  %v7691_v38 = vmax.f32 %v7595_v60, 0.0  ;;  %v20277_v8 = vrot.slane %v20276_v63, 2  ;;  %v20278_v59 = vrot.slane %v14439_v43, 2  ;;  %v20280_v4 = vld [vmem:[#allocation16_spill] sm:$0xff]  ;;  %20283 = vst [vmem:[#allocation44_spill] sm:$0xff] %v14483_v46 }
 0x3bb   : > { %20275 = vst [vmem:[#allocation49_spill] sm:$0xff] %v14467_v56  ;;  %v20279_v0 = vrot.slane %v14239_v10, 2  ;;  %v14480_v22 = vmul.f32 %v20280_v4, %v3534_v61  ;;  %v20284_v48 = vrot.slane %v14449_v44, 2  ;;  %v20285_v63 = vrot.slane %v14262_v19, 2  ;;  %v20287_v10 = vld [vmem:[#allocation15_spill] sm:$0xff] }
 0x3bc   : > { %v3903_v17 = vsel %vm3788_vm5, %v20277_v8, %v18694_v41  ;;  %v4352_v7 = vmul.f32 %v20282_v15, %v4240_v57  ;;  %v7787_v20 = vmin.f32 %v7691_v38, 6.0  ;;  %v20286_v41 = vrot.slane %v14455_v39, 1  ;;  %v20289_v19 = vld [vmem:[#allocation59_spill] sm:$0xff]  ;;  %v20290_v38 = vld [vmem:[#allocation38_spill] sm:$0xff] }
 0x3bd   : > { %v5532_v60 = vsel %vm3788_vm5, %v20279_v0, %v20278_v59  ;;  %20281 = vst [vmem:[#allocation55_spill] sm:$0xff] %v14480_v22  ;;  %v4135_v37 = vadd.f32 %v3903_v17, %v3297_v21  ;;  %v7254_v8 = vsel %vm3788_vm5, %v20285_v63, %v20284_v48  ;;  %v20288_v43 = vrot.slane %v20287_v10, 1  ;;  %v695_v0 = vpop.f32.mrf.mxu0 }
 0x3be   : > { %v18704_v57 = vrot.slane %v14480_v22, 2  ;;  %v18707_v42 = vrot.slane %v14467_v56, 1  ;;  %v5164_v21 = vmul.f32 %v20274_v2, %v14416_v11  ;;  %8037 = vmatmul.mubr.f32.gmra.mxu1 %v7787_v20  ;;  %v5869_v48 = vmul.f32 %v14380_v3, %v20289_v19  ;;  %v20293_v20 = vld [vmem:[#allocation53_spill] sm:$0xff] }
 0x3bf   : > { %v3067_v59 = vsel %vm2950_vm4, %v20288_v43, %v20286_v41  ;;  %v4447_v17 = vadd.f32 %v4351_v12, %v4135_v37  ;;  %v14503_v63 = vmul.f32 %v20290_v38, %v14483_v46  ;;  %v6886_v43 = vmul.f32 %v14483_v46, %v14416_v11  ;;  %v20296_v38 = vld [vmem:[#allocation41_spill] sm:$0xff] }
 0x3c0   : > { %v3298_v61 = vadd.f32 %v3067_v59, %v2592_v50  ;;  %v20291_v50 = vld [vmem:[#allocation11_spill] sm:$0xff]  ;;  %v20294_v37 = vrot.slane %v20293_v20, 1  ;;  %v20295_v59 = vld [vmem:[#allocation36_spill] sm:$0xff]  ;;  %v696_v29 = vadd.f32 %v695_v0, %v20169_v1  ;;  %v5981_v46 = vmul.f32 %v20296_v38, %v5869_v48  ;;  %v20298_v0 = vld [vmem:[#allocation54_spill] sm:$0xff] }
 0x3c1   : > { %v20292_v41 = vrot.slane %v20291_v50, 2  ;;  %v14518_v44 = vmul.f32 %v20295_v59, %v5164_v21  ;;  %v5056_v40 = vadd.f32 %v4824_v26, %v4447_v17  ;;  %v18706_v22 = vrot.slane %v14503_v63, 1  ;;  %v14534_v17 = vld [vmem:[#allocation2 + $0x1c0] sm:$0xff] }
 0x3c2   : > { %v4826_v12 = vsel %vm2950_vm4, %v20294_v37, %v18707_v42  ;;  %v1021_v56 = vmax.f32 %v696_v29, 0.0  ;;  %v2478_v20 = vmul.f32 %v14279_v9, %v14380_v3  ;;  %v20299_v26 = vrot.slane %v20298_v0, 1  ;;  %v20300_v29 = vld [vmem:[#allocation20_spill] sm:$0xff] }
 0x3c3   : > { %v3905_v10 = vsel %vm3788_vm5, %v20292_v41, %v18704_v57  ;;  %v18709_v50 = vrot.slane %v14518_v44, 2  ;;  %v20297_v41 = vld [vmem:[#allocation42_spill] sm:$0xff]  ;;  %v5764_v37 = vadd.f32 %v5532_v60, %v5056_v40  ;;  %v14538_v48 = vmul.f32 %v14534_v17, %v20236_v49 }
 0x3c4   : > { %v4136_v6 = vadd.f32 %v3905_v10, %v3298_v61  ;;  %v14525_v57 = vmul.f32 %v20297_v41, %v6886_v43  ;;  %v6548_v61 = vsel %vm2950_vm4, %v20299_v26, %v18706_v22  ;;  %v20301_v43 = vrot.slane %v20300_v29, 2  ;;  %v20302_v22 = vld [vmem:[#allocation19_spill] sm:$0xff] }
 0x3c5   : > { %v14546_v40 = vmin.f32 %v1021_v56, 6.0  ;;  %v6076_v60 = vadd.f32 %v5980_v55, %v5764_v37  ;;  %v18710_v0 = vrot.slane %v14538_v48, 1  ;;  %v3532_v26 = vmul.f32 %v14534_v17, %v14416_v11 }
 0x3c6   : > { %v4448_v21 = vadd.f32 %v4352_v7, %v4136_v6  ;;  %v5534_v9 = vsel %vm3788_vm5, %v20301_v43, %v18709_v50  ;;  %v18708_v6 = vrot.slane %v14525_v57, 2  ;;  %v2590_v7 = vmul.f32 %v20049_v33, %v2478_v20 }
 0x3c7   : > { %v20303_v42 = vrot.slane %v20302_v22, 2  ;;  %v18716_v43 = vrot.slane %v14546_v40, 7  ;;  %v4238_v56 = vmul.f32 %v14380_v3, %v13788_v5  ;;  %v14562_v55 = vmul.f32 %v14056_v14, %v20115_v25 }
 0x3c8   : > { %v5057_v10 = vadd.f32 %v4826_v12, %v4448_v21  ;;  %v6778_v12 = vadd.f32 %v6546_v53, %v6076_v60  ;;  %v20304_v37 = vrot.slane %v14283_v16, 1  ;;  %v14570_v22 = vmul.f32 %v20054_v47, %v3532_v26  ;;  %v20307_v53 = vld [vmem:[#allocation26_spill] sm:$0xff] }
 0x3c9   : > { %v7256_v29 = vsel %vm3788_vm5, %v20303_v42, %v18708_v6  ;;  %v14572_v42 = vld [vmem:[#allocation2 + $0xb8] sm:$0xff]  ;;  %v20306_v5 = vrot.slane %v14277_v30, 7  ;;  %v18714_v60 = vrot.slane %v14562_v55, 1  ;;  %v5162_v26 = vmul.f32 %v14056_v14, %v14416_v11 }
 0x3ca   : > { %v5765_v20 = vadd.f32 %v5534_v9, %v5057_v10  ;;  %v3063_v21 = vsel %vm2950_vm4, %v20304_v37, %v18710_v0  ;;  %20305 = vst [vmem:[#allocation13_spill] sm:$0xff] %v14572_v42  ;;  %v4350_v9 = vmul.f32 %v20307_v53, %v4238_v56  ;;  %v7486_v10 = vadd.f32 %v7254_v8, %v6778_v12 }
 0x3cb   : > { %v1509_v6 = vsel %vm1330_vm7, %v20306_v5, %v18716_v43  ;;  %v3296_v50 = vadd.f32 %v3063_v21, %v2590_v7  ;;  %v18715_v37 = vrot.slane %v14570_v22, 2  ;;  %v20308_v0 = vrot.slane %v14302_v62, 1 }
 0x3cc   : > { %v6077_v16 = vadd.f32 %v5981_v46, %v5765_v20  ;;  %1709 = vst [vmem:[#allocation2 + $0x250] sm:$0xff] %v1509_v6  ;;  %v5867_v7 = vmul.f32 %v14380_v3, %v14304_v32  ;;  %v14593_v56 = vmul.f32 %v19304_v45, %v14572_v42  ;;  %v6884_v46 = vmul.f32 %v14572_v42, %v14416_v11 }
 0x3cd   : > { %v4822_v30 = vsel %vm2950_vm4, %v20308_v0, %v18714_v60  ;;  %v7599_v8 = vadd.f32 %v19364_v35, %v7486_v10  ;;  %v20309_v12 = vrot.slane %v14298_v36, 2  ;;  %v14604_v0 = vmul.f32 %v19239_v31, %v5162_v26 }
 0x3ce   : > { %v6779_v6 = vadd.f32 %v6548_v61, %v6077_v16  ;;  %v5979_v20 = vmul.f32 %v20183_v34, %v5867_v7  ;;  %v18713_v21 = vrot.slane %v14593_v56, 1  ;;  %v14609_v5 = vmul.f32 %v19198_v24, %v6884_v46 }
 0x3cf   : > { %v3901_v62 = vsel %vm3788_vm5, %v20309_v12, %v18715_v37  ;;  %v7695_v11 = vmax.f32 %v7599_v8, 0.0  ;;  %v18712_v61 = vrot.slane %v14604_v0, 2  ;;  %v2595_v36 = vmul.f32 %v14451_v28, %v20267_v58  ;;  %v14620_v12 = vld [vmem:[#allocation2 + $0x1d0] sm:$0xff]  ;;  %v20313_v8 = vld [vmem:[#allocation43_spill] sm:$0xff]  ;;  %v20352_v58 = vld [vmem:[#allocation52_spill] sm:$0xff] }
 0x3d0   : > { %v4134_v3 = vadd.f32 %v3901_v62, %v3296_v50  ;;  %v7487_v10 = vadd.f32 %v7256_v29, %v6779_v6  ;;  %v20310_v26 = vrot.slane %v14328_v27, 1  ;;  %v18711_v7 = vrot.slane %v14609_v5, 2  ;;  %20311 = vst [vmem:[#allocation61_spill] sm:$0xff] %v14620_v12 }
 0x3d1   : > { %v14624_v46 = vmul.f32 %v14620_v12, %v20271_v13  ;;  %v7791_v29 = vmin.f32 %v7695_v11, 6.0  ;;  %v20314_v28 = vrot.slane %v14344_v51, 2  ;;  %v14635_v27 = vsel %vm3378_vm2, %v14398_v23, %v19378_v54 }
 0x3d2   : > { %v4446_v16 = vadd.f32 %v4350_v9, %v4134_v3  ;;  %v6544_v50 = vsel %vm2950_vm4, %v20310_v26, %v18713_v21  ;;  %v7600_v6 = vadd.f32 %v20313_v8, %v7487_v10  ;;  %v20315_v3 = vrot.slane %v14348_v52, 2  ;;  %v14653_v52 = vld [vmem:[#allocation2 + $0x18] sm:$0xff] }
 0x3d3   : > { %20312 = vst [vmem:[#allocation46_spill] sm:$0xff] %v14624_v46  ;;  %v5530_v9 = vsel %vm3788_vm5, %v20314_v28, %v18712_v61  ;;  %v18717_v10 = vrot.slane %v14624_v46, 1  ;;  %v3537_v26 = vmul.f32 %v14620_v12, %v14635_v27  ;;  %8041 = vmatprep.mubr.f32.mxu1 %v7791_v29  ;;  %v4355_v28 = vmul.f32 %v20274_v2, %v20282_v15  ;;  %v20320_v2 = vld [vmem:[#allocation44_spill] sm:$0xff]  ;;  %v697_v61 = vpop.f32.mrf.mxu0 }
 0x3d4   : > { %v5055_v62 = vadd.f32 %v4822_v30, %v4446_v16  ;;  %v7252_v11 = vsel %vm3788_vm5, %v20315_v3, %v18711_v7  ;;  %v7696_v51 = vmax.f32 %v7600_v6, 0.0  ;;  %v14649_v23 = vmul.f32 %v20289_v19, %v20273_v18  ;;  %20317 = vst [vmem:[#allocation5_spill] sm:$0xff] %v14653_v52 }
 0x3d5   : > { %v5167_v30 = vmul.f32 %v20289_v19, %v14635_v27  ;;  %v20318_v3 = vrot.slane %v14455_v39, 1  ;;  %v14661_v6 = vmul.f32 %v20280_v4, %v3537_v26  ;;  %v5984_v7 = vmul.f32 %v20320_v2, %v20296_v38  ;;  %v20322_v39 = vld [vmem:[#allocation38_spill] sm:$0xff]  ;;  %v20330_v2 = vld [vmem:[#allocation55_spill] sm:$0xff]  ;;  %v20350_v4 = vld [vmem:[#allocation28_spill] sm:$0xff]  ;;  %v701_v13 = vpop.f32.mrf.mxu0 }
 0x3d6   : > { %20316 = vst [vmem:[#allocation56_spill] sm:$0xff] %v14649_v23  ;;  %v5763_v16 = vadd.f32 %v5530_v9, %v5055_v62  ;;  %v7792_v21 = vmin.f32 %v7696_v51, 6.0  ;;  %v18722_v37 = vrot.slane %v14649_v23, 1  ;;  %v6889_v26 = vmul.f32 %v14653_v52, %v14635_v27  ;;  %v20324_v51 = vld [vmem:[#allocation49_spill] sm:$0xff]  ;;  %v20328_v62 = vld [vmem:[#allocation51_spill] sm:$0xff] }
 0x3d7   : > { %v3073_v29 = vsel %vm2950_vm4, %v20318_v3, %v18717_v10  ;;  %20319 = vst [vmem:[#allocation60_spill] sm:$0xff] %v14661_v6  ;;  %v14667_v43 = vmul.f32 %v20295_v59, %v5167_v30  ;;  %v14672_v3 = vmul.f32 %v20322_v39, %v14653_v52  ;;  %v20326_v10 = vld [vmem:[#allocation21_spill] sm:$0xff]  ;;  %v20329_v39 = vrot.slane %v14661_v6, 2 }
 0x3d8   : > { %v3301_v60 = vadd.f32 %v3073_v29, %v2595_v36  ;;  %v6075_v9 = vadd.f32 %v5979_v20, %v5763_v16  ;;  %8785 = vmatprep.mubr.f32.mxu0 %v7792_v21  ;;  %v20325_v36 = vrot.slane %v20324_v51, 1  ;;  %v698_v20 = vadd.f32 %v697_v61, %v20326_v10  ;;  %v20327_v16 = vld [vmem:[#allocation9_spill] sm:$0xff] }
 0x3d9   : > { %20321 = vst [vmem:[#allocation15_spill] sm:$0xff] %v14667_v43  ;;  %20323 = vst [vmem:[#allocation11_spill] sm:$0xff] %v14672_v3  ;;  %v18723_v30 = vrot.slane %v14667_v43, 2  ;;  %v2594_v38 = vmul.f32 %v20328_v62, %v20327_v16  ;;  %v20331_v18 = vrot.slane %v20330_v2, 2  ;;  %v18726_v23 = vrot.slane %v14672_v3, 1  ;;  %v20337_v43 = vld [vmem:[#allocation7_spill] sm:$0xff] }
 0x3da   : > { %v4832_v29 = vsel %vm2950_vm4, %v20325_v36, %v18722_v37  ;;  %v6777_v59 = vadd.f32 %v6544_v50, %v6075_v9  ;;  %v14692_v51 = vmul.f32 %v20297_v41, %v6889_v26  ;;  %v20333_v61 = vrot.slane %v14518_v44, 2  ;;  %v14699_v50 = vld [vmem:[#allocation2 + $0xe0] sm:$0xff]  ;;  %v20342_v6 = vld [vmem:[#allocation25_spill] sm:$0xff] }
 0x3db   : > { %v3911_v21 = vsel %vm3788_vm5, %v20331_v18, %v20329_v39  ;;  %v1022_v62 = vmax.f32 %v698_v20, 0.0  ;;  %v20334_v9 = vld [vmem:[#allocation4_spill] sm:$0xff]  ;;  %v20335_v39 = vrot.slane %v14503_v63, 1  ;;  %v3536_v44 = vmul.f32 %v14699_v50, %v14635_v27  ;;  %v20345_v52 = vld [vmem:[#allocation57_spill] sm:$0xff] }
 0x3dc   : > { %20332 = vst [vmem:[#allocation53_spill] sm:$0xff] %v14692_v51  ;;  %v4139_v36 = vadd.f32 %v3911_v21, %v3301_v60  ;;  %v5540_v37 = vsel %vm3788_vm5, %v20333_v61, %v18723_v30  ;;  %v14703_v2 = vmul.f32 %v14699_v50, %v20334_v9  ;;  %v7485_v18 = vadd.f32 %v7252_v11, %v6777_v59  ;;  %v20336_v30 = vld [vmem:[#allocation23_spill] sm:$0xff] }
 0x3dd   : > { %v6554_v60 = vsel %vm2950_vm4, %v20335_v39, %v18726_v23  ;;  %v18732_v26 = vrot.slane %v14692_v51, 2  ;;  %v14713_v20 = vmin.f32 %v1022_v62, 6.0  ;;  %v4354_v41 = vmul.f32 %v20337_v43, %v20336_v30  ;;  %v20338_v59 = vld [vmem:[#allocation39_spill] sm:$0xff]  ;;  %v20340_v23 = vld [vmem:[#allocation8_spill] sm:$0xff] }
 0x3de   : > { %v4451_v21 = vadd.f32 %v4355_v28, %v4139_v36  ;;  %v7598_v11 = vadd.f32 %v20338_v59, %v7485_v18  ;;  %v20339_v63 = vrot.slane %v14525_v57, 2  ;;  %v14725_v3 = vmul.f32 %v20340_v23, %v3536_v44  ;;  %v20343_v28 = vld [vmem:[#allocation22_spill] sm:$0xff] }
 0x3df   : > { %v14729_v36 = vmul.f32 %v20343_v28, %v20342_v6  ;;  %v18739_v61 = vrot.slane %v14713_v20, 7  ;;  %v20344_v43 = vrot.slane %v14703_v2, 1  ;;  %v20346_v18 = vrot.slane %v20345_v52, 1 }
 0x3e0   : > { %v7262_v39 = vsel %vm3788_vm5, %v20339_v63, %v18732_v26  ;;  %20341 = vst [vmem:[#allocation54_spill] sm:$0xff] %v14725_v3  ;;  %v5060_v62 = vadd.f32 %v4832_v29, %v4451_v21  ;;  %v5166_v57 = vmul.f32 %v20343_v28, %v14635_v27  ;;  %v14739_v63 = vld [vmem:[#allocation2 + $0x1d8] sm:$0xff]  ;;  %v7694_v44 = vmax.f32 %v7598_v11, 0.0  ;;  %v20348_v21 = vld [vmem:[#allocation45_spill] sm:$0xff] }
 0x3e1   : > { %v3071_v51 = vsel %vm2950_vm4, %v20346_v18, %v20344_v43  ;;  %20347 = vst [vmem:[#allocation20_spill] sm:$0xff] %v14739_v63  ;;  %v18741_v15 = vrot.slane %v14725_v3, 2  ;;  %v18742_v19 = vrot.slane %v14729_v36, 1  ;;  %v20349_v46 = vrot.slane %v20348_v21, 7  ;;  %v20351_v18 = vld [vmem:[#allocation30_spill] sm:$0xff] }
 0x3e2   : > { %v3300_v26 = vadd.f32 %v3071_v51, %v2594_v38  ;;  %v5768_v29 = vadd.f32 %v5540_v37, %v5060_v62  ;;  %v14749_v43 = vmul.f32 %v20350_v4, %v5166_v57  ;;  %v5983_v59 = vmul.f32 %v20352_v58, %v20351_v18  ;;  %v20353_v38 = vld [vmem:[#allocation47_spill] sm:$0xff]  ;;  %v20355_v62 = vld [vmem:[#allocation17_spill] sm:$0xff] }
 0x3e3   : > { %v1511_v52 = vsel %vm1330_vm7, %v20349_v46, %v18739_v61  ;;  %v7790_v11 = vmin.f32 %v7694_v44, 6.0  ;;  %v20354_v51 = vrot.slane %v20353_v38, 2  ;;  %v20356_v21 = vrot.slane %v20355_v62, 1  ;;  %v20357_v57 = vld [vmem:[#allocation31_spill] sm:$0xff] }
 0x3e4   : > { %1710 = vst [vmem:[#allocation2 + $0x1b0] sm:$0xff] %v1511_v52  ;;  %v14765_v61 = vmul.f32 %v20357_v57, %v14739_v63  ;;  %v6080_v4 = vadd.f32 %v5984_v7, %v5768_v29  ;;  %v18747_v44 = vrot.slane %v14749_v43, 2  ;;  %v6888_v52 = vmul.f32 %v14739_v63, %v14635_v27  ;;  %v20359_v29 = vld [vmem:[#allocation50_spill] sm:$0xff] }
 0x3e5   : > { %v3909_v37 = vsel %vm3788_vm5, %v20354_v51, %v18741_v15  ;;  %v4830_v46 = vsel %vm2950_vm4, %v20356_v21, %v18742_v19  ;;  %8042 = vmatmul.mubr.f32.gmra.mxu1 %v7790_v11  ;;  %v702_v51 = vadd.f32 %v701_v13, %v20169_v1  ;;  %v2593_v62 = vmul.f32 %v14534_v17, %v20049_v33  ;;  %v14774_v21 = vld [vmem:[#allocation2 + $0x2b8] sm:$0xff]  ;;  %v20361_v19 = vld [vmem:[#allocation34_spill] sm:$0xff]  ;;  %v20363_v13 = vld [vmem:[#allocation48_spill] sm:$0xff] }
 0x3e6   : > { %v4138_v12 = vadd.f32 %v3909_v37, %v3300_v26  ;;  %v14778_v15 = vmul.f32 %v14774_v21, %v20236_v49  ;;  %v6782_v7 = vadd.f32 %v6554_v60, %v6080_v4  ;;  %v20360_v37 = vrot.slane %v20359_v29, 2 }
 0x3e7   : > { %v14786_v38 = vmul.f32 %v20361_v19, %v6888_v52  ;;  %v20362_v1 = vrot.slane %v14765_v61, 1  ;;  %v20364_v17 = vrot.slane %v20363_v13, 1  ;;  %v1024_v3 = vmax.f32 %v702_v51, 0.0 }
 0x3e8   : > { %20358 = vst [vmem:[#allocation19_spill] sm:$0xff] %v14778_v15  ;;  %v4450_v26 = vadd.f32 %v4354_v41, %v4138_v12  ;;  %v5538_v11 = vsel %vm3788_vm5, %v20360_v37, %v18747_v44  ;;  %v18746_v49 = vrot.slane %v14778_v15, 1  ;;  %v3535_v4 = vmul.f32 %v14774_v21, %v14635_v27 }
 0x3e9   : > { %v6552_v33 = vsel %vm2950_vm4, %v20364_v17, %v20362_v1  ;;  %v7490_v41 = vadd.f32 %v7262_v39, %v6782_v7  ;;  %v18749_v60 = vrot.slane %v14786_v38, 2  ;;  %v4353_v52 = vmul.f32 %v14056_v14, %v20307_v53  ;;  %v14811_v39 = vld [vmem:[#allocation2 + $0x208] sm:$0xff]  ;;  %v20367_v14 = vld [vmem:[#allocation58_spill] sm:$0xff] }
 0x3ea   : > { %v5059_v12 = vadd.f32 %v4830_v46, %v4450_v26  ;;  %v1120_v29 = vmin.f32 %v1024_v3, 6.0  ;;  %v20365_v37 = vrot.slane %v14538_v48, 1  ;;  %v14805_v51 = vmul.f32 %v20054_v47, %v3535_v4  ;;  %20366 = vst [vmem:[#allocation49_spill] sm:$0xff] %v14811_v39 }
 0x3eb   : > { %v14809_v13 = vmul.f32 %v14304_v32, %v20115_v25  ;;  %v7603_v46 = vadd.f32 %v20313_v8, %v7490_v41  ;;  %v20368_v3 = vrot.slane %v20367_v14, 2  ;;  %v14827_v41 = vmul.f32 %v19304_v45, %v14811_v39 }
 0x3ec   : > { %v3069_v1 = vsel %vm2950_vm4, %v20365_v37, %v18746_v49  ;;  %v5767_v7 = vadd.f32 %v5538_v11, %v5059_v12  ;;  %v1514_v17 = vrot.slane %v1120_v29, 7  ;;  %v18750_v4 = vrot.slane %v14805_v51, 2  ;;  %v703_v12 = vpop.f32.mrf.mxu0 }
 0x3ed   : > { %v7260_v48 = vsel %vm3788_vm5, %v20368_v3, %v18749_v60  ;;  %v3299_v26 = vadd.f32 %v3069_v1, %v2593_v62  ;;  %v18751_v37 = vrot.slane %v14809_v13, 1  ;;  %v5165_v49 = vmul.f32 %v14304_v32, %v14635_v27 }
 0x3ee   : > { %v7699_v44 = vmax.f32 %v7603_v46, 0.0  ;;  %v6079_v15 = vadd.f32 %v5983_v59, %v5767_v7  ;;  %v5982_v11 = vmul.f32 %v14572_v42, %v20183_v34  ;;  %v20369_v62 = vrot.slane %v14546_v40, 7  ;;  %1715 = vst [vmem:[#allocation2 + $0x248] sm:$0x1] %v1514_v17 }
 0x3ef   : > { %v20370_v1 = vrot.slane %v14570_v22, 2  ;;  %v20371_v59 = vrot.slane %v14562_v55, 1  ;;  %v14843_v14 = vmul.f32 %v19239_v31, %v5165_v49  ;;  %v6887_v22 = vmul.f32 %v14811_v39, %v14635_v27 }
 0x3f0   : > { %v1515_v29 = vsel %vm1330_vm7, %v20369_v62, %v1514_v17  ;;  %v7795_v3 = vmin.f32 %v7699_v44, 6.0  ;;  %v6781_v40 = vadd.f32 %v6552_v33, %v6079_v15  ;;  %v18755_v17 = vrot.slane %v14827_v41, 1 }
 0x3f1   : > { %v3907_v46 = vsel %vm3788_vm5, %v20370_v1, %v18750_v4  ;;  %v4828_v7 = vsel %vm2950_vm4, %v20371_v59, %v18751_v37  ;;  %1712 = vst [vmem:[#allocation2 + $0x80] sm:$0xff] %v1515_v29  ;;  %v18756_v60 = vrot.slane %v14843_v14, 2  ;;  %v704_v1 = vadd.f32 %v703_v12, %v20326_v10  ;;  %v20372_v4 = vld [vmem:[#allocation3_spill] sm:$0xff] }
 0x3f2   : > { %v4137_v62 = vadd.f32 %v3907_v46, %v3299_v26  ;;  %v1739_v55 = vadd.s32 160, %v20372_v4  ;;  %8786 = vmatmul.mubr.f32.gmra.mxu0 %v7795_v3  ;;  %v7489_v59 = vadd.f32 %v7260_v48, %v6781_v40  ;;  %v20373_v33 = vrot.slane %v14593_v56, 1  ;;  %v14866_v56 = vld [vmem:[#allocation2 + $0x368] sm:$0xff] }
 0x3f3   : > { %v1740_v15 = vadd.s32 168, %v20372_v4  ;;  %v20374_v44 = vrot.slane %v14604_v0, 2  ;;  %v14863_v10 = vmul.f32 %v19198_v24, %v6887_v22  ;;  %v1025_v26 = vmax.f32 %v704_v1, 0.0  ;;  %v14877_v1 = vld [vmem:[#allocation2 + $0x2b0] sm:$0xff] }
 0x3f4   : > { %v4449_v37 = vadd.f32 %v4353_v52, %v4137_v62  ;;  %v6550_v49 = vsel %vm2950_vm4, %v20373_v33, %v18755_v17  ;;  %v1895_v48 = vand.u32 15, %v1739_v55  ;;  %v7602_v52 = vadd.f32 %v19364_v35, %v7489_v59  ;;  %20377 = vst [vmem:[#allocation55_spill] sm:$0xff] %v14877_v1  ;;  %v20391_v17 = vld [vmem:[#allocation18_spill] sm:$0xff] }
 0x3f5   : > { %v5536_v27 = vsel %vm3788_vm5, %v20374_v44, %v18756_v60  ;;  %v1902_v29 = vand.u32 15, %v1740_v15  ;;  %v14870_v46 = vmul.f32 %v14866_v56, %v20334_v9  ;;  %v18754_v3 = vrot.slane %v14863_v10, 2 }
 0x3f6   : > { %v5058_v12 = vadd.f32 %v4828_v7, %v4449_v37  ;;  %v1121_v0 = vmin.f32 %v1025_v26, 6.0  ;;  %vm2155_vm14 = vcmp.gt.s32.totalorder %v1895_v48, 0  ;;  %v14875_v40 = vmul.f32 %v20352_v58, %v20342_v6  ;;  %v20414_v6 = vld [vmem:[#allocation41_spill] sm:$0xff] }
 0x3f7   : > { %20375 = vst [vmem:[#allocation21_spill] sm:$0xff] %v14870_v46  ;;  %v7698_v62 = vmax.f32 %v7602_v52, 0.0  ;;  %v14880_v37 = vsel %vm2155_vm14, 1.0, %v14877_v1  ;;  %vm2252_vm15 = vcmp.lt.s32.totalorder %v1902_v29, 15  ;;  %v20378_v7 = vrot.slane %v14609_v5, 2 }
 0x3f8   : > { %20376 = vst [vmem:[#allocation51_spill] sm:$0xff] %v14875_v40  ;;  %v5766_v22 = vadd.f32 %v5536_v27, %v5058_v12  ;;  %v1516_v59 = vrot.slane %v1121_v0, 7  ;;  %v8555_v33 = vsel %vm2252_vm15, 1.0, %v14877_v1  ;;  %v2485_v15 = vmul.f32 %v14699_v50, %v14880_v37 }
 0x3f9   : > { %v7258_v55 = vsel %vm3788_vm5, %v20378_v7, %v18754_v3  ;;  %v7794_v44 = vmin.f32 %v7698_v62, 6.0  ;;  %v18753_v26 = vrot.slane %v14870_v46, 1  ;;  %v14891_v48 = vrot.slane %v8555_v33, 6  ;;  %v14900_v7 = vld [vmem:[#allocation2 + $0x1e8] sm:$0xff] }
 0x3fa   : > { %v6078_v27 = vadd.f32 %v5982_v11, %v5766_v22  ;;  %v20379_v52 = vrot.slane %v14713_v20, 7  ;;  %1716 = vst [vmem:[#allocation2 + $0x188] sm:$0x1] %v1516_v59  ;;  %v2597_v5 = vmul.f32 %v20327_v16, %v2485_v15  ;;  %v4245_v29 = vmul.f32 %v14880_v37, %v20343_v28  ;;  %20380 = vst [vmem:[#allocation7_spill] sm:$0xff] %v14900_v7 }
 0x3fb   : > { %v18752_v0 = vrot.slane %v14875_v40, 1  ;;  %8046 = vmatprep.mubr.f32.mxu1 %v7794_v44  ;;  %v20381_v11 = vrot.slane %v14703_v2, 1  ;;  %v14910_v62 = vsel %vm3378_vm2, %v19378_v54, %v14891_v48  ;;  %v5874_v28 = vmul.f32 %v14880_v37, %v14739_v63 }
 0x3fc   : > { %v1517_v12 = vsel %vm1330_vm7, %v20379_v52, %v1516_v59  ;;  %v6780_v50 = vadd.f32 %v6550_v49, %v6078_v27  ;;  %v3539_v59 = vmul.f32 %v14866_v56, %v14910_v62  ;;  %v4357_v49 = vmul.f32 %v20336_v30, %v4245_v29  ;;  %v20417_v30 = vld [vmem:[#allocation42_spill] sm:$0xff] }
 0x3fd   : > { %1713 = vst [vmem:[#allocation2 + $0x20] sm:$0xff] %v1517_v12  ;;  %v3077_v20 = vsel %vm2950_vm4, %v20381_v11, %v18753_v26  ;;  %v20382_v2 = vrot.slane %v14729_v36, 1  ;;  %v5169_v44 = vmul.f32 %v20352_v58, %v14910_v62  ;;  %v5986_v27 = vmul.f32 %v20351_v18, %v5874_v28  ;;  %v20385_v36 = vld [vmem:[#allocation61_spill] sm:$0xff]  ;;  %v14936_v11 = vld [vmem:[#allocation2 + $0xa0] sm:$0xff] }
 0x3fe   : > { %v3303_v22 = vadd.f32 %v3077_v20, %v2597_v5  ;;  %v7488_v15 = vadd.f32 %v7258_v55, %v6780_v50  ;;  %v14927_v52 = vmul.f32 %v20357_v57, %v14900_v7  ;;  %v14930_v12 = vmul.f32 %v20340_v23, %v3539_v59  ;;  %v20386_v55 = vld [vmem:[#allocation10_spill] sm:$0xff]  ;;  %v20387_v20 = vld [vmem:[#allocation39_spill] sm:$0xff]  ;;  %v20393_v57 = vld [vmem:[#allocation16_spill] sm:$0xff] }
 0x3ff   : > { %v4836_v33 = vsel %vm2950_vm4, %v20382_v2, %v18752_v0  ;;  %v6891_v5 = vmul.f32 %v14900_v7, %v14910_v62  ;;  %v2486_v29 = vmul.f32 %v20385_v36, %v14880_v37  ;;  %v14940_v50 = vmul.f32 %v14936_v11, %v20386_v55  ;;  %v20388_v2 = vld [vmem:[#allocation28_spill] sm:$0xff] }
 0x400   : > { %20383 = vst [vmem:[#allocation22_spill] sm:$0xff] %v14927_v52  ;;  %20384 = vst [vmem:[#allocation57_spill] sm:$0xff] %v14930_v12  ;;  %v7601_v28 = vadd.f32 %v20387_v20, %v7488_v15  ;;  %v14944_v0 = vmul.f32 %v20388_v2, %v5169_v44  ;;  %v18767_v59 = vrot.slane %v14927_v52, 1  ;;  %v3540_v26 = vmul.f32 %v14936_v11, %v14910_v62  ;;  %v20398_v15 = vld [vmem:[#allocation46_spill] sm:$0xff]  ;;  %v20406_v20 = vld [vmem:[#allocation32_spill] sm:$0xff] }
 0x401   : > { %v18769_v3 = vrot.slane %v14930_v12, 2  ;;  %v14951_v36 = vmul.f32 %v20361_v19, %v6891_v5  ;;  %v2598_v60 = vmul.f32 %v20391_v17, %v2486_v29  ;;  %v20392_v44 = vrot.slane %v14765_v61, 1  ;;  %v20395_v5 = vld [vmem:[#allocation54_spill] sm:$0xff]  ;;  %v20400_v61 = vld [vmem:[#allocation59_spill] sm:$0xff] }
 0x402   : > { %20389 = vst [vmem:[#allocation45_spill] sm:$0xff] %v14944_v0  ;;  %v7697_v4 = vmax.f32 %v7601_v28, 0.0  ;;  %v14962_v7 = vmul.f32 %v20393_v57, %v3540_v26  ;;  %v20396_v19 = vrot.slane %v20395_v5, 2  ;;  %v20397_v28 = vrot.slane %v14940_v50, 1 }
 0x403   : > { %20390 = vst [vmem:[#allocation47_spill] sm:$0xff] %v14951_v36  ;;  %v6558_v40 = vsel %vm2950_vm4, %v20392_v44, %v18767_v59  ;;  %v18771_v1 = vrot.slane %v14951_v36, 2  ;;  %v20399_v18 = vrot.slane %v20398_v15, 1  ;;  %v4246_v44 = vmul.f32 %v14880_v37, %v20400_v61  ;;  %v14977_v59 = vld [vmem:[#allocation2 + $0x158] sm:$0xff] }
 0x404   : > { %20394 = vst [vmem:[#allocation17_spill] sm:$0xff] %v14962_v7  ;;  %v3915_v29 = vsel %vm3788_vm5, %v20396_v19, %v18769_v3  ;;  %20401 = vst [vmem:[#allocation50_spill] sm:$0xff] %v14977_v59  ;;  %v7793_v26 = vmin.f32 %v7697_v4, 6.0  ;;  %v20402_v12 = vrot.slane %v14944_v0, 2  ;;  %v20403_v5 = vrot.slane %v14749_v43, 2  ;;  %v20405_v61 = vld [vmem:[#allocation35_spill] sm:$0xff] }
 0x405   : > { %v3079_v52 = vsel %vm2950_vm4, %v20399_v18, %v20397_v28  ;;  %v4141_v2 = vadd.f32 %v3915_v29, %v3303_v22  ;;  %v20404_v15 = vrot.slane %v14786_v38, 2  ;;  %v18779_v28 = vrot.slane %v14962_v7, 2  ;;  %v20407_v4 = vld [vmem:[#allocation44_spill] sm:$0xff]  ;;  %v20409_v38 = vld [vmem:[#allocation38_spill] sm:$0xff] }
 0x406   : > { %v5544_v19 = vsel %vm3788_vm5, %v20403_v5, %v20402_v12  ;;  %v3304_v3 = vadd.f32 %v3079_v52, %v2598_v60  ;;  %v4358_v46 = vmul.f32 %v20405_v61, %v4246_v44  ;;  %v14993_v22 = vmul.f32 %v20407_v4, %v20406_v20  ;;  %8047 = vmatmul.mubr.f32.gmra.mxu1 %v7793_v26  ;;  %v20408_v60 = vld [vmem:[#allocation5_spill] sm:$0xff]  ;;  %v20411_v5 = vld [vmem:[#allocation60_spill] sm:$0xff]  ;;  %v20418_v7 = vld [vmem:[#allocation14_spill] sm:$0xff] }
 0x407   : > { %v7266_v18 = vsel %vm3788_vm5, %v20404_v15, %v18771_v1  ;;  %v4453_v29 = vadd.f32 %v4357_v49, %v4141_v2  ;;  %v5170_v43 = vmul.f32 %v20407_v4, %v14910_v62  ;;  %v5875_v52 = vmul.f32 %v14880_v37, %v20408_v60  ;;  %v20413_v0 = vld [vmem:[#allocation36_spill] sm:$0xff] }
 0x408   : > { %v15001_v12 = vmul.f32 %v20409_v38, %v14977_v59  ;;  %v20412_v44 = vrot.slane %v20411_v5, 2  ;;  %v18783_v1 = vrot.slane %v14993_v22, 1  ;;  %v6892_v49 = vmul.f32 %v14977_v59, %v14910_v62  ;;  %v20415_v5 = vld [vmem:[#allocation56_spill] sm:$0xff] }
 0x409   : > { %v2484_v2 = vmul.f32 %v14774_v21, %v14880_v37  ;;  %v5062_v26 = vadd.f32 %v4836_v33, %v4453_v29  ;;  %v15014_v63 = vmul.f32 %v20413_v0, %v5170_v43  ;;  %v5987_v23 = vmul.f32 %v20414_v6, %v5875_v52  ;;  %v15028_v43 = vld [vmem:[#allocation2 + $0x210] sm:$0xff] }
 0x40a   : > { %20410 = vst [vmem:[#allocation48_spill] sm:$0xff] %v15001_v12  ;;  %v3917_v15 = vsel %vm3788_vm5, %v20412_v44, %v18779_v28  ;;  %v20416_v58 = vrot.slane %v20415_v5, 1  ;;  %v18784_v28 = vrot.slane %v15001_v12, 1  ;;  %v15024_v9 = vmul.f32 %v20417_v30, %v6892_v49  ;;  %20419 = vst [vmem:[#allocation58_spill] sm:$0xff] %v15028_v43  ;;  %v20420_v52 = vld [vmem:[#allocation6_spill] sm:$0xff] }
 0x40b   : > { %v4142_v36 = vadd.f32 %v3917_v15, %v3304_v3  ;;  %v2596_v21 = vmul.f32 %v20418_v7, %v2484_v2  ;;  %v5770_v33 = vadd.f32 %v5544_v19, %v5062_v26  ;;  %v18787_v29 = vrot.slane %v15014_v63, 2  ;;  %v20423_v26 = vld [vmem:[#allocation15_spill] sm:$0xff] }
 0x40c   : > { %v4838_v44 = vsel %vm2950_vm4, %v20416_v58, %v18783_v1  ;;  %v15032_v15 = vmul.f32 %v15028_v43, %v20420_v52  ;;  %v20421_v58 = vld [vmem:[#allocation11_spill] sm:$0xff]  ;;  %v18788_v49 = vrot.slane %v15024_v9, 2  ;;  %v3538_v19 = vmul.f32 %v15028_v43, %v14910_v62 }
 0x40d   : > { %v4454_v3 = vadd.f32 %v4358_v46, %v4142_v36  ;;  %v20422_v5 = vrot.slane %v20421_v58, 1  ;;  %v4244_v46 = vmul.f32 %v14880_v37, %v14304_v32  ;;  %v6082_v36 = vadd.f32 %v5986_v27, %v5770_v33  ;;  %v15063_v33 = vld [vmem:[#allocation2 + $0x78] sm:$0xff] }
 0x40e   : > { %v20424_v52 = vrot.slane %v20423_v26, 2  ;;  %v18799_v58 = vrot.slane %v15032_v15, 1  ;;  %v15056_v43 = vmul.f32 %v20054_v47, %v3538_v19  ;;  %v20427_v26 = vld [vmem:[#allocation19_spill] sm:$0xff] }
 0x40f   : > { %v6560_v1 = vsel %vm2950_vm4, %v20422_v5, %v18784_v28  ;;  %v5063_v2 = vadd.f32 %v4838_v44, %v4454_v3  ;;  %v20425_v5 = vld [vmem:[#allocation53_spill] sm:$0xff]  ;;  %v4356_v27 = vmul.f32 %v20307_v53, %v4244_v46  ;;  %v15061_v44 = vmul.f32 %v14572_v42, %v20115_v25 }
 0x410   : > { %v5546_v7 = vsel %vm3788_vm5, %v20424_v52, %v18787_v29  ;;  %v20426_v28 = vrot.slane %v20425_v5, 2  ;;  %v6784_v3 = vadd.f32 %v6558_v40, %v6082_v36  ;;  %v20428_v29 = vrot.slane %v20427_v26, 1 }
 0x411   : > { %v5771_v52 = vadd.f32 %v5546_v7, %v5063_v2  ;;  %v18797_v46 = vrot.slane %v15056_v43, 2  ;;  %v5873_v25 = vmul.f32 %v14880_v37, %v14811_v39  ;;  %v15081_v36 = vmul.f32 %v19304_v45, %v15063_v33 }
 0x412   : > { %v7268_v12 = vsel %vm3788_vm5, %v20426_v28, %v18788_v49  ;;  %v3075_v5 = vsel %vm2950_vm4, %v20428_v29, %v18799_v58  ;;  %v5168_v28 = vmul.f32 %v14572_v42, %v14910_v62  ;;  %v18795_v49 = vrot.slane %v15061_v44, 1  ;;  %v20448_v58 = vld [vmem:[#allocation23_spill] sm:$0xff] }
 0x413   : > { %v3302_v19 = vadd.f32 %v3075_v5, %v2596_v21  ;;  %v7492_v47 = vadd.f32 %v7266_v18, %v6784_v3  ;;  %v6083_v40 = vadd.f32 %v5987_v23, %v5771_v52  ;;  %v20429_v21 = vrot.slane %v14805_v51, 2 }
 0x414   : > { %v15077_v7 = vmul.f32 %v19239_v31, %v5168_v28  ;;  %v20430_v2 = vrot.slane %v14809_v13, 1  ;;  %v5985_v23 = vmul.f32 %v20183_v34, %v5873_v25  ;;  %v6890_v18 = vmul.f32 %v15063_v33, %v14910_v62 }
 0x415   : > { %v3913_v29 = vsel %vm3788_vm5, %v20429_v21, %v18797_v46  ;;  %v7605_v3 = vadd.f32 %v19364_v35, %v7492_v47  ;;  %v6785_v52 = vadd.f32 %v6560_v1, %v6083_v40  ;;  %v18791_v51 = vrot.slane %v15081_v36, 1  ;;  %v15104_v21 = vld [vmem:[#allocation2 + $0x228] sm:$0xff] }
 0x416   : > { %v4834_v37 = vsel %vm2950_vm4, %v20430_v2, %v18795_v49  ;;  %v4140_v26 = vadd.f32 %v3913_v29, %v3302_v19  ;;  %v18794_v5 = vrot.slane %v15077_v7, 2  ;;  %v15100_v28 = vmul.f32 %v19198_v24, %v6890_v18 }
 0x417   : > { %v2601_v13 = vmul.f32 %v14936_v11, %v20391_v17  ;;  %v15108_v25 = vmul.f32 %v15104_v21, %v20386_v55  ;;  %v7701_v62 = vmax.f32 %v7605_v3, 0.0  ;;  %v7493_v47 = vadd.f32 %v7268_v12, %v6785_v52  ;;  %v20473_v17 = vld [vmem:[#allocation6_spill] sm:$0xff] }
 0x418   : > { %v4452_v1 = vadd.f32 %v4356_v27, %v4140_v26  ;;  %v20432_v19 = vrot.slane %v14843_v14, 2  ;;  %v20433_v29 = vrot.slane %v14827_v41, 1  ;;  %v18793_v2 = vrot.slane %v15100_v28, 2  ;;  %v15130_v26 = vld [vmem:[#allocation2 + $0x358] sm:$0xff] }
 0x419   : > { %20431 = vst [vmem:[#allocation61_spill] sm:$0xff] %v15108_v25  ;;  %v18792_v18 = vrot.slane %v15108_v25, 1  ;;  %v15125_v12 = vsel %vm3378_vm2, %v14891_v48, %v19378_v54  ;;  %v7797_v27 = vmin.f32 %v7701_v62, 6.0  ;;  %v7606_v14 = vadd.f32 %v20313_v8, %v7493_v47  ;;  %20434 = vst [vmem:[#allocation54_spill] sm:$0xff] %v15130_v26 }
 0x41a   : > { %v5542_v40 = vsel %vm3788_vm5, %v20432_v19, %v18794_v5  ;;  %v6556_v11 = vsel %vm2950_vm4, %v20433_v29, %v18791_v51  ;;  %v5061_v3 = vadd.f32 %v4834_v37, %v4452_v1  ;;  %v3543_v52 = vmul.f32 %v15104_v21, %v15125_v12 }
 0x41b   : > { %v20435_v41 = vrot.slane %v14863_v10, 2  ;;  %v20436_v48 = vrot.slane %v14940_v50, 1  ;;  %v4361_v37 = vmul.f32 %v20407_v4, %v20405_v61  ;;  %v15146_v47 = vmul.f32 %v20408_v60, %v20406_v20  ;;  %8051 = vmatprep.mubr.f32.mxu1 %v7797_v27 }
 0x41c   : > { %v7702_v1 = vmax.f32 %v7606_v14, 0.0  ;;  %v5769_v29 = vadd.f32 %v5542_v40, %v5061_v3  ;;  %v15149_v10 = vmul.f32 %v20393_v57, %v3543_v52  ;;  %v5173_v50 = vmul.f32 %v20408_v60, %v15125_v12 }
 0x41d   : > { %v7264_v19 = vsel %vm3788_vm5, %v20435_v41, %v18793_v2  ;;  %v3085_v62 = vsel %vm2950_vm4, %v20436_v48, %v18792_v18  ;;  %20437 = vst [vmem:[#allocation46_spill] sm:$0xff] %v15146_v47  ;;  %v18796_v41 = vrot.slane %v15146_v47, 1  ;;  %v5990_v48 = vmul.f32 %v14977_v59, %v20414_v6  ;;  %v20449_v47 = vld [vmem:[#allocation52_spill] sm:$0xff] }
 0x41e   : > { %v3307_v51 = vadd.f32 %v3085_v62, %v2601_v13  ;;  %20438 = vst [vmem:[#allocation59_spill] sm:$0xff] %v15149_v10  ;;  %v15158_v18 = vmul.f32 %v20409_v38, %v15130_v26  ;;  %v7798_v2 = vmin.f32 %v7702_v1, 6.0  ;;  %v6081_v27 = vadd.f32 %v5985_v23, %v5769_v29  ;;  %v20442_v29 = vld [vmem:[#allocation17_spill] sm:$0xff]  ;;  %v20454_v6 = vld [vmem:[#allocation20_spill] sm:$0xff] }
 0x41f   : > { %v18798_v40 = vrot.slane %v15149_v10, 2  ;;  %v6895_v13 = vmul.f32 %v15130_v26, %v15125_v12  ;;  %v20440_v14 = vrot.slane %v14993_v22, 1  ;;  %v15169_v52 = vmul.f32 %v20413_v0, %v5173_v50  ;;  %v20445_v50 = vld [vmem:[#allocation4_spill] sm:$0xff] }
 0x420   : > { %20439 = vst [vmem:[#allocation44_spill] sm:$0xff] %v15158_v18  ;;  %v18803_v62 = vrot.slane %v15158_v18, 1  ;;  %v2600_v1 = vmul.f32 %v14866_v56, %v20327_v16  ;;  %8788 = vmatprep.mubr.f32.mxu0 %v7798_v2  ;;  %v6783_v23 = vadd.f32 %v6556_v11, %v6081_v27  ;;  %v20443_v5 = vrot.slane %v20442_v29, 2  ;;  %v20446_v11 = vld [vmem:[#allocation48_spill] sm:$0xff] }
 0x421   : > { %v4844_v3 = vsel %vm2950_vm4, %v20440_v14, %v18796_v41  ;;  %20441 = vst [vmem:[#allocation60_spill] sm:$0xff] %v15169_v52  ;;  %v15180_v22 = vmul.f32 %v20417_v30, %v6895_v13  ;;  %v15182_v14 = vld [vmem:[#allocation2 + $0x330] sm:$0xff]  ;;  %v18806_v56 = vrot.slane %v15169_v52, 2  ;;  %v20447_v2 = vrot.slane %v20446_v11, 1  ;;  %v20451_v18 = vld [vmem:[#allocation8_spill] sm:$0xff] }
 0x422   : > { %v3923_v49 = vsel %vm3788_vm5, %v20443_v5, %v18798_v40  ;;  %v15186_v41 = vmul.f32 %v15182_v14, %v20445_v50  ;;  %v3542_v5 = vmul.f32 %v15182_v14, %v15125_v12  ;;  %v7491_v13 = vadd.f32 %v7264_v19, %v6783_v23  ;;  %v15212_v23 = vld [vmem:[#allocation2 + $0x138] sm:$0xff]  ;;  %v20462_v59 = vld [vmem:[#allocation28_spill] sm:$0xff] }
 0x423   : > { %20444 = vst [vmem:[#allocation56_spill] sm:$0xff] %v15180_v22  ;;  %v4145_v46 = vadd.f32 %v3923_v49, %v3307_v51  ;;  %v6566_v27 = vsel %vm2950_vm4, %v20447_v2, %v18803_v62  ;;  %v4360_v30 = vmul.f32 %v20449_v47, %v20448_v58  ;;  %v20450_v51 = vrot.slane %v15014_v63, 2  ;;  %v20453_v62 = vld [vmem:[#allocation25_spill] sm:$0xff]  ;;  %20455 = vst [vmem:[#allocation15_spill] sm:$0xff] %v15212_v23  ;;  %v20456_v40 = vld [vmem:[#allocation39_spill] sm:$0xff] }
 0x424   : > { %v15206_v2 = vmul.f32 %v20451_v18, %v3542_v5  ;;  %v15210_v19 = vmul.f32 %v20454_v6, %v20453_v62  ;;  %v7604_v29 = vadd.f32 %v20456_v40, %v7491_v13  ;;  %v20457_v0 = vrot.slane %v15180_v22, 2 }
 0x425   : > { %v4457_v49 = vadd.f32 %v4361_v37, %v4145_v46  ;;  %v5552_v11 = vsel %vm3788_vm5, %v20450_v51, %v18806_v56  ;;  %v20458_v46 = vrot.slane %v15024_v9, 2  ;;  %v20459_v63 = vrot.slane %v15186_v41, 1  ;;  %v20460_v51 = vld [vmem:[#allocation21_spill] sm:$0xff] }
 0x426   : > { %20452 = vst [vmem:[#allocation11_spill] sm:$0xff] %v15206_v2  ;;  %v20461_v56 = vrot.slane %v20460_v51, 1  ;;  %v5172_v52 = vmul.f32 %v20454_v6, %v15125_v12  ;;  %v18821_v26 = vrot.slane %v15206_v2, 2  ;;  %v18823_v13 = vrot.slane %v15210_v19, 1  ;;  %v20465_v51 = vld [vmem:[#allocation31_spill] sm:$0xff]  ;;  %v20470_v2 = vld [vmem:[#allocation34_spill] sm:$0xff] }
 0x427   : > { %v7274_v37 = vsel %vm3788_vm5, %v20458_v46, %v20457_v0  ;;  %v5066_v38 = vadd.f32 %v4844_v3, %v4457_v49  ;;  %v7700_v22 = vmax.f32 %v7604_v29, 0.0  ;;  %v20463_v0 = vld [vmem:[#allocation30_spill] sm:$0xff]  ;;  %v20464_v46 = vld [vmem:[#allocation7_spill] sm:$0xff]  ;;  %v15236_v61 = vmul.f32 %v20465_v51, %v15212_v23  ;;  %v20466_v3 = vld [vmem:[#allocation57_spill] sm:$0xff] }
 0x428   : > { %v3083_v5 = vsel %vm2950_vm4, %v20461_v56, %v20459_v63  ;;  %v15230_v9 = vmul.f32 %v20462_v59, %v5172_v52  ;;  %v5989_v20 = vmul.f32 %v20464_v46, %v20463_v0  ;;  %v20468_v29 = vld [vmem:[#allocation51_spill] sm:$0xff] }
 0x429   : > { %v3306_v10 = vadd.f32 %v3083_v5, %v2600_v1  ;;  %v5774_v56 = vadd.f32 %v5552_v11, %v5066_v38  ;;  %v20467_v1 = vrot.slane %v20466_v3, 2  ;;  %v20469_v63 = vrot.slane %v20468_v29, 1 }
 0x42a   : > { %v6894_v5 = vmul.f32 %v15212_v23, %v15125_v12  ;;  %v7796_v60 = vmin.f32 %v7700_v22, 6.0  ;;  %v18824_v57 = vrot.slane %v15230_v9, 2  ;;  %v18825_v38 = vrot.slane %v15236_v61, 1 }
 0x42b   : > { %v3921_v49 = vsel %vm3788_vm5, %v20467_v1, %v18821_v26  ;;  %v4842_v52 = vsel %vm2950_vm4, %v20469_v63, %v18823_v13  ;;  %v6086_v11 = vadd.f32 %v5990_v48, %v5774_v56  ;;  %v20471_v1 = vld [vmem:[#allocation14_spill] sm:$0xff]  ;;  %v15259_v29 = vmul.f32 %v14304_v32, %v20473_v17  ;;  %v15271_v13 = vld [vmem:[#allocation2 + $0xc0] sm:$0xff] }
 0x42c   : > { %v4144_v25 = vadd.f32 %v3921_v49, %v3306_v10  ;;  %v15253_v3 = vmul.f32 %v20470_v2, %v6894_v5  ;;  %v20472_v26 = vld [vmem:[#allocation58_spill] sm:$0xff]  ;;  %8052 = vmatmul.mubr.f32.gmra.mxu1 %v7796_v60  ;;  %v20474_v10 = vld [vmem:[#allocation45_spill] sm:$0xff]  ;;  %v3541_v32 = vmul.f32 %v15271_v13, %v15125_v12 }
 0x42d   : > { %v2599_v40 = vmul.f32 %v20472_v26, %v20471_v1  ;;  %v20475_v22 = vrot.slane %v20474_v10, 2  ;;  %v20476_v48 = vld [vmem:[#allocation22_spill] sm:$0xff]  ;;  %v6788_v26 = vadd.f32 %v6566_v27, %v6086_v11  ;;  %v15288_v1 = vld [vmem:[#allocation2 + $0x58] sm:$0xff] }
 0x42e   : > { %v4456_v63 = vadd.f32 %v4360_v30, %v4144_v25  ;;  %v20477_v56 = vrot.slane %v20476_v48, 1  ;;  %v18831_v30 = vrot.slane %v15253_v3, 2  ;;  %v4359_v25 = vmul.f32 %v14572_v42, %v20307_v53  ;;  %v20479_v48 = vld [vmem:[#allocation24_spill] sm:$0xff]  ;;  %20480 = vst [vmem:[#allocation53_spill] sm:$0xff] %v15288_v1  ;;  %v20481_v11 = vld [vmem:[#allocation47_spill] sm:$0xff] }
 0x42f   : > { %v5550_v49 = vsel %vm3788_vm5, %v20475_v22, %v18824_v57  ;;  %v20478_v22 = vld [vmem:[#allocation12_spill] sm:$0xff]  ;;  %v7496_v27 = vadd.f32 %v7274_v37, %v6788_v26  ;;  %v20482_v60 = vrot.slane %v20481_v11, 2 }
 0x430   : > { %v6564_v5 = vsel %vm2950_vm4, %v20477_v56, %v18825_v38  ;;  %v5065_v10 = vadd.f32 %v4842_v52, %v4456_v63  ;;  %v15280_v57 = vmul.f32 %v20478_v22, %v3541_v32  ;;  %v15284_v56 = vmul.f32 %v14811_v39, %v20479_v48 }
 0x431   : > { %v5171_v38 = vmul.f32 %v14811_v39, %v15125_v12  ;;  %v7272_v53 = vsel %vm3788_vm5, %v20482_v60, %v18831_v30  ;;  %v20483_v52 = vrot.slane %v15259_v29, 1  ;;  %v20484_v63 = vrot.slane %v15032_v15, 1 }
 0x432   : > { %v5988_v22 = vmul.f32 %v15063_v33, %v20183_v34  ;;  %v5773_v48 = vadd.f32 %v5550_v49, %v5065_v10  ;;  %v18833_v42 = vrot.slane %v15280_v57, 2  ;;  %v18840_v37 = vrot.slane %v15284_v56, 1 }
 0x433   : > { %v3081_v32 = vsel %vm2950_vm4, %v20484_v63, %v20483_v52  ;;  %v7609_v26 = vadd.f32 %v20313_v8, %v7496_v27  ;;  %v15306_v11 = vmul.f32 %v19239_v31, %v5171_v38  ;;  %v15310_v60 = vmul.f32 %v19304_v45, %v15288_v1  ;;  %v20487_v27 = vld [vmem:[#allocation3_spill] sm:$0xff] }
 0x434   : > { %v3305_v39 = vadd.f32 %v3081_v32, %v2599_v40  ;;  %v6893_v15 = vmul.f32 %v15288_v1, %v15125_v12  ;;  %v6085_v52 = vadd.f32 %v5989_v20, %v5773_v48  ;;  %v20485_v40 = vrot.slane %v15056_v43, 2 }
 0x435   : > { %v20486_v10 = vrot.slane %v15061_v44, 1  ;;  %v1741_v63 = vadd.s32 176, %v20487_v27  ;;  %v7705_v32 = vmax.f32 %v7609_v26, 0.0  ;;  %v18839_v8 = vrot.slane %v15306_v11, 2 }
 0x436   : > { %v3919_v49 = vsel %vm3788_vm5, %v20485_v40, %v18833_v42  ;;  %v18838_v20 = vrot.slane %v15310_v60, 1  ;;  %v6787_v12 = vadd.f32 %v6564_v5, %v6085_v52  ;;  %v15328_v48 = vmul.f32 %v19198_v24, %v6893_v15 }
 0x437   : > { %v4840_v38 = vsel %vm2950_vm4, %v20486_v10, %v18840_v37  ;;  %v4143_v30 = vadd.f32 %v3919_v49, %v3305_v39  ;;  %v1742_v43 = vadd.s32 184, %v20487_v27  ;;  %v1909_v40 = vand.u32 15, %v1741_v63 }
 0x438   : > { %v7801_v42 = vmin.f32 %v7705_v32, 6.0  ;;  %v20488_v44 = vrot.slane %v15077_v7, 2  ;;  %v20489_v39 = vrot.slane %v15081_v36, 1  ;;  %v7495_v52 = vadd.f32 %v7272_v53, %v6787_v12 }
 0x439   : > { %v4455_v34 = vadd.f32 %v4359_v25, %v4143_v30  ;;  %v18837_v15 = vrot.slane %v15328_v48, 2  ;;  %v1916_v49 = vand.u32 15, %v1742_v43  ;;  %vm2157_vm7 = vcmp.gt.s32.totalorder %v1909_v40, 0  ;;  %v20490_v30 = vld [vmem:[#allocation55_spill] sm:$0xff] }
 0x43a   : > { %v5548_v26 = vsel %vm3788_vm5, %v20488_v44, %v18839_v8  ;;  %v6562_v5 = vsel %vm2950_vm4, %v20489_v39, %v18838_v20  ;;  %8789 = vmatmul.mubr.f32.gmra.mxu0 %v7801_v42  ;;  %v15343_v25 = vsel %vm2157_vm7, 1.0, %v20490_v30  ;;  %v15347_v7 = vmul.f32 %v20449_v47, %v20445_v50  ;;  %v20502_v8 = vld [vmem:[#allocation39_spill] sm:$0xff] }
 0x43b   : > { %v5064_v10 = vadd.f32 %v4840_v38, %v4455_v34  ;;  %v15351_v63 = vmul.f32 %v20464_v46, %v20453_v62  ;;  %v7608_v36 = vadd.f32 %v19364_v35, %v7495_v52  ;;  %v20493_v53 = vrot.slane %v15100_v28, 2 }
 0x43c   : > { %20491 = vst [vmem:[#allocation19_spill] sm:$0xff] %v15347_v7  ;;  %vm2254_vm1 = vcmp.lt.s32.totalorder %v1916_v49, 15  ;;  %v2491_v34 = vmul.f32 %v15182_v14, %v15343_v25  ;;  %v18836_v32 = vrot.slane %v15347_v7, 1  ;;  %v4251_v12 = vmul.f32 %v15343_v25, %v20454_v6 }
 0x43d   : > { %20492 = vst [vmem:[#allocation17_spill] sm:$0xff] %v15351_v63  ;;  %v7270_v42 = vsel %vm3788_vm5, %v20493_v53, %v18837_v15  ;;  %v5772_v38 = vadd.f32 %v5548_v26, %v5064_v10  ;;  %v8556_v47 = vsel %vm2254_vm1, 1.0, %v20490_v30  ;;  %v7704_v43 = vmax.f32 %v7608_v36, 0.0  ;;  %v15377_v10 = vld [vmem:[#allocation2 + $0x70] sm:$0xff] }
 0x43e   : > { %v2603_v40 = vmul.f32 %v20327_v16, %v2491_v34  ;;  %v15366_v44 = vrot.slane %v8556_v47, 6  ;;  %v18835_v28 = vrot.slane %v15351_v63, 1  ;;  %v20494_v14 = vrot.slane %v15186_v41, 1  ;;  %20495 = vst [vmem:[#allocation48_spill] sm:$0xff] %v15377_v10  ;;  %v15389_v47 = vld [vmem:[#allocation2 + $0x120] sm:$0xff]  ;;  %v20509_v63 = vld [vmem:[#allocation11_spill] sm:$0xff] }
 0x43f   : > { %v6084_v39 = vadd.f32 %v5988_v22, %v5772_v38  ;;  %v4363_v52 = vmul.f32 %v20448_v58, %v4251_v12  ;;  %v5880_v49 = vmul.f32 %v15343_v25, %v15212_v23  ;;  %v7800_v36 = vmin.f32 %v7704_v43, 6.0 }
 0x440   : > { %v3089_v26 = vsel %vm2950_vm4, %v20494_v14, %v18836_v32  ;;  %v15382_v34 = vsel %vm3378_vm2, %v19378_v54, %v15366_v44  ;;  %v20496_v41 = vrot.slane %v15210_v19, 1  ;;  %v15398_v14 = vmul.f32 %v20465_v51, %v15377_v10 }
 0x441   : > { %v3309_v53 = vadd.f32 %v3089_v26, %v2603_v40  ;;  %v6786_v38 = vadd.f32 %v6562_v5, %v6084_v39  ;;  %v3545_v12 = vmul.f32 %v15389_v47, %v15382_v34  ;;  %v5175_v43 = vmul.f32 %v20464_v46, %v15382_v34  ;;  %8056 = vmatprep.mubr.f32.mxu1 %v7800_v36 }
 0x442   : > { %v4848_v22 = vsel %vm2950_vm4, %v20496_v41, %v18835_v28  ;;  %v5992_v40 = vmul.f32 %v20463_v0, %v5880_v49  ;;  %20497 = vst [vmem:[#allocation52_spill] sm:$0xff] %v15398_v14  ;;  %v6897_v19 = vmul.f32 %v15377_v10, %v15382_v34  ;;  %v2492_v5 = vmul.f32 %v15104_v21, %v15343_v25  ;;  %v20501_v21 = vld [vmem:[#allocation18_spill] sm:$0xff]  ;;  %v20516_v10 = vld [vmem:[#allocation35_spill] sm:$0xff] }
 0x443   : > { %v15406_v39 = vmul.f32 %v20407_v4, %v20386_v55  ;;  %v7494_v26 = vadd.f32 %v7270_v42, %v6786_v38  ;;  %v15409_v41 = vmul.f32 %v20451_v18, %v3545_v12  ;;  %v15412_v49 = vmul.f32 %v20462_v59, %v5175_v43  ;;  %v20503_v43 = vld [vmem:[#allocation16_spill] sm:$0xff]  ;;  %v20507_v38 = vld [vmem:[#allocation5_spill] sm:$0xff]  ;;  %v20518_v0 = vld [vmem:[#allocation50_spill] sm:$0xff] }
 0x444   : > { %v3546_v36 = vmul.f32 %v20407_v4, %v15382_v34  ;;  %v18846_v28 = vrot.slane %v15398_v14, 1  ;;  %v15418_v32 = vmul.f32 %v20470_v2, %v6897_v19  ;;  %v2604_v15 = vmul.f32 %v20501_v21, %v2492_v5  ;;  %v20505_v5 = vld [vmem:[#allocation61_spill] sm:$0xff]  ;;  %v20523_v59 = vld [vmem:[#allocation36_spill] sm:$0xff] }
 0x445   : > { %20498 = vst [vmem:[#allocation20_spill] sm:$0xff] %v15409_v41  ;;  %20499 = vst [vmem:[#allocation21_spill] sm:$0xff] %v15412_v49  ;;  %v18848_v20 = vrot.slane %v15406_v39, 1  ;;  %v7607_v42 = vadd.f32 %v20502_v8, %v7494_v26  ;;  %v20504_v4 = vrot.slane %v15236_v61, 1  ;;  %v20506_v27 = vrot.slane %v20505_v5, 1  ;;  %v15451_v5 = vld [vmem:[#allocation2 + $0x180] sm:$0xff] }
 0x446   : > { %20500 = vst [vmem:[#allocation57_spill] sm:$0xff] %v15418_v32  ;;  %v15426_v37 = vmul.f32 %v20503_v43, %v3546_v36  ;;  %v4252_v12 = vmul.f32 %v15343_v25, %v20507_v38  ;;  %v20508_v36 = vrot.slane %v15409_v41, 2  ;;  %v20510_v14 = vrot.slane %v20509_v63, 2  ;;  %20513 = vst [vmem:[#allocation51_spill] sm:$0xff] %v15451_v5 }
 0x447   : > { %v6570_v19 = vsel %vm2950_vm4, %v20504_v4, %v18846_v28  ;;  %v3091_v26 = vsel %vm2950_vm4, %v20506_v27, %v18848_v20  ;;  %v7703_v2 = vmax.f32 %v7607_v42, 0.0  ;;  %v20511_v4 = vrot.slane %v15412_v49, 2  ;;  %v20517_v49 = vld [vmem:[#allocation32_spill] sm:$0xff] }
 0x448   : > { %v3927_v61 = vsel %vm3788_vm5, %v20510_v14, %v20508_v36  ;;  %v20512_v28 = vrot.slane %v15230_v9, 2  ;;  %v3310_v51 = vadd.f32 %v3091_v26, %v2604_v15  ;;  %v20514_v20 = vrot.slane %v15418_v32, 2 }
 0x449   : > { %v4147_v27 = vadd.f32 %v3927_v61, %v3309_v53  ;;  %v20515_v42 = vrot.slane %v15253_v3, 2  ;;  %v18858_v63 = vrot.slane %v15426_v37, 2  ;;  %v4364_v14 = vmul.f32 %v20516_v10, %v4252_v12  ;;  %v20520_v3 = vld [vmem:[#allocation59_spill] sm:$0xff]  ;;  %v20522_v12 = vld [vmem:[#allocation38_spill] sm:$0xff] }
 0x44a   : > { %v5556_v30 = vsel %vm3788_vm5, %v20512_v28, %v20511_v4  ;;  %v7799_v36 = vmin.f32 %v7703_v2, 6.0  ;;  %v15462_v9 = vmul.f32 %v20518_v0, %v20517_v49  ;;  %v5176_v15 = vmul.f32 %v20518_v0, %v15382_v34  ;;  %v20519_v28 = vld [vmem:[#allocation54_spill] sm:$0xff] }
 0x44b   : > { %v7278_v41 = vsel %vm3788_vm5, %v20515_v42, %v20514_v20  ;;  %v5881_v53 = vmul.f32 %v15343_v25, %v20519_v28  ;;  %v4459_v26 = vadd.f32 %v4363_v52, %v4147_v27  ;;  %v20521_v20 = vrot.slane %v20520_v3, 2  ;;  %v20524_v52 = vld [vmem:[#allocation41_spill] sm:$0xff] }
 0x44c   : > { %v15475_v2 = vmul.f32 %v20522_v12, %v15451_v5  ;;  %v6898_v4 = vmul.f32 %v15451_v5, %v15382_v34  ;;  %8057 = vmatmul.mubr.f32.gmra.mxu1 %v7799_v36  ;;  %v18863_v32 = vrot.slane %v15462_v9, 1  ;;  %v15481_v8 = vmul.f32 %v20523_v59, %v5176_v15 }
 0x44d   : > { %v3929_v61 = vsel %vm3788_vm5, %v20521_v20, %v18858_v63  ;;  %v5993_v27 = vmul.f32 %v20524_v52, %v5881_v53  ;;  %v5068_v23 = vadd.f32 %v4848_v22, %v4459_v26  ;;  %v20525_v20 = vld [vmem:[#allocation42_spill] sm:$0xff]  ;;  %v2490_v62 = vmul.f32 %v15271_v13, %v15343_v25  ;;  %v20528_v53 = vld [vmem:[#allocation13_spill] sm:$0xff] }
 0x44e   : > { %v4148_v42 = vadd.f32 %v3929_v61, %v3310_v51  ;;  %v18866_v3 = vrot.slane %v15475_v2, 1  ;;  %v15486_v63 = vmul.f32 %v20525_v20, %v6898_v4  ;;  %v20526_v51 = vld [vmem:[#allocation46_spill] sm:$0xff]  ;;  %v18867_v15 = vrot.slane %v15481_v8, 2  ;;  %v20530_v4 = vld [vmem:[#allocation44_spill] sm:$0xff] }
 0x44f   : > { %v20527_v36 = vrot.slane %v20526_v51, 1  ;;  %v15498_v22 = vmul.f32 %v20528_v53, %v20473_v17  ;;  %v5776_v26 = vadd.f32 %v5556_v30, %v5068_v23  ;;  %v20531_v46 = vrot.slane %v20530_v4, 1 }
 0x450   : > { %v4460_v7 = vadd.f32 %v4364_v14, %v4148_v42  ;;  %v18868_v14 = vrot.slane %v15486_v63, 2  ;;  %v20532_v42 = vld [vmem:[#allocation14_spill] sm:$0xff]  ;;  %v3544_v23 = vmul.f32 %v20528_v53, %v15382_v34  ;;  %v20540_v53 = vld [vmem:[#allocation12_spill] sm:$0xff] }
 0x451   : > { %v4850_v61 = vsel %vm2950_vm4, %v20527_v36, %v18863_v32  ;;  %20529 = vst [vmem:[#allocation58_spill] sm:$0xff] %v15498_v22  ;;  %v6572_v13 = vsel %vm2950_vm4, %v20531_v46, %v18866_v3  ;;  %v2602_v58 = vmul.f32 %v20532_v42, %v2490_v62  ;;  %v20533_v36 = vld [vmem:[#allocation60_spill] sm:$0xff]  ;;  %v18870_v17 = vrot.slane %v15498_v22, 1  ;;  %v20537_v62 = vld [vmem:[#allocation49_spill] sm:$0xff]  ;;  %v20541_v42 = vld [vmem:[#allocation26_spill] sm:$0xff] }
 0x452   : > { %v5069_v51 = vadd.f32 %v4850_v61, %v4460_v7  ;;  %v20534_v32 = vrot.slane %v20533_v36, 2  ;;  %v6088_v30 = vadd.f32 %v5992_v40, %v5776_v26  ;;  %v20535_v46 = vld [vmem:[#allocation56_spill] sm:$0xff]  ;;  %v4250_v7 = vmul.f32 %v15343_v25, %v20537_v62 }
 0x453   : > { %v20536_v4 = vrot.slane %v20535_v46, 2  ;;  %v20538_v61 = vld [vmem:[#allocation24_spill] sm:$0xff]  ;;  %v15532_v26 = vmul.f32 %v20540_v53, %v3544_v23  ;;  %v5174_v46 = vmul.f32 %v15063_v33, %v15382_v34 }
 0x454   : > { %v5558_v18 = vsel %vm3788_vm5, %v20534_v32, %v18867_v15  ;;  %v15524_v36 = vmul.f32 %v15063_v33, %v20538_v61  ;;  %v20539_v15 = vrot.slane %v15259_v29, 1  ;;  %v4362_v61 = vmul.f32 %v20541_v42, %v4250_v7 }
 0x455   : > { %v7280_v3 = vsel %vm3788_vm5, %v20536_v4, %v18868_v14  ;;  %v5777_v32 = vadd.f32 %v5558_v18, %v5069_v51  ;;  %v15536_v4 = vld [vmem:[#allocation2 + $0x60] sm:$0xff]  ;;  %v6790_v14 = vadd.f32 %v6570_v19, %v6088_v30  ;;  %v18873_v22 = vrot.slane %v15532_v26, 2 }
 0x456   : > { %v3087_v40 = vsel %vm2950_vm4, %v20539_v15, %v18870_v17  ;;  %v18877_v18 = vrot.slane %v15524_v36, 1  ;;  %v15542_v29 = vmul.f32 %v19239_v31, %v5174_v46  ;;  %v5879_v15 = vmul.f32 %v15343_v25, %v15288_v1 }
 0x457   : > { %v3308_v62 = vadd.f32 %v3087_v40, %v2602_v58  ;;  %v6089_v51 = vadd.f32 %v5993_v27, %v5777_v32  ;;  %v7498_v23 = vadd.f32 %v7278_v41, %v6790_v14  ;;  %v20542_v17 = vrot.slane %v15284_v56, 1  ;;  %v20544_v14 = vld [vmem:[#allocation29_spill] sm:$0xff] }
 0x458   : > { %v15553_v19 = vmul.f32 %v19304_v45, %v15536_v4  ;;  %v6896_v27 = vmul.f32 %v15536_v4, %v15382_v34  ;;  %v20543_v7 = vrot.slane %v15280_v57, 2  ;;  %v18872_v41 = vrot.slane %v15542_v29, 2 }
 0x459   : > { %v4846_v58 = vsel %vm2950_vm4, %v20542_v17, %v18877_v18  ;;  %v6791_v30 = vadd.f32 %v6572_v13, %v6089_v51  ;;  %v5991_v56 = vmul.f32 %v20544_v14, %v5879_v15  ;;  %v7611_v17 = vadd.f32 %v19364_v35, %v7498_v23  ;;  %v8881_v51 = vld [vmem:[#allocation2 + $0x38] sm:$0xff] }
 0x45a   : > { %v3925_v25 = vsel %vm3788_vm5, %v20543_v7, %v18873_v22  ;;  %v18871_v40 = vrot.slane %v15553_v19, 1  ;;  %v15567_v46 = vmul.f32 %v19198_v24, %v6896_v27  ;;  %v20545_v13 = vrot.slane %v15306_v11, 2  ;;  %v20548_v11 = vld [vmem:[#allocation43_spill] sm:$0xff] }
 0x45b   : > { %v4146_v32 = vadd.f32 %v3925_v25, %v3308_v62  ;;  %v7499_v34 = vadd.f32 %v7280_v3, %v6791_v30  ;;  %v2607_v7 = vmul.f32 %v8881_v51, %v20501_v21  ;;  %v15577_v15 = vmul.f32 %v20507_v38, %v20386_v55 }
 0x45c   : > { %v5554_v57 = vsel %vm3788_vm5, %v20545_v13, %v18872_v41  ;;  %v7707_v62 = vmax.f32 %v7611_v17, 0.0  ;;  %v20547_v27 = vrot.slane %v15310_v60, 1  ;;  %v18875_v30 = vrot.slane %v15567_v46, 2 }
 0x45d   : > { %20546 = vst [vmem:[#allocation45_spill] sm:$0xff] %v15577_v15  ;;  %v4458_v23 = vadd.f32 %v4362_v61, %v4146_v32  ;;  %v7612_v25 = vadd.f32 %v20548_v11, %v7499_v34  ;;  %v18874_v13 = vrot.slane %v15577_v15, 1  ;;  %v15590_v51 = vsel %vm3378_vm2, %v15366_v44, %v19378_v54  ;;  %v20582_v15 = vld [vmem:[#allocation14_spill] sm:$0xff] }
 0x45e   : > { %v6568_v3 = vsel %vm2950_vm4, %v20547_v27, %v18871_v40  ;;  %v4367_v61 = vmul.f32 %v20518_v0, %v20516_v10  ;;  %v7803_v17 = vmin.f32 %v7707_v62, 6.0  ;;  %v20549_v60 = vrot.slane %v15328_v48, 2  ;;  %v15601_v40 = vld [vmem:[#allocation2 + $0x68] sm:$0xff]  ;;  %v8882_v10 = vld [vmem:[#allocation2 + $0xb8] sm:$0xff] }
 0x45f   : > { %v5067_v32 = vadd.f32 %v4846_v58, %v4458_v23  ;;  %v3549_v34 = vmul.f32 %v20507_v38, %v15590_v51  ;;  %20550 = vst [vmem:[#allocation22_spill] sm:$0xff] %v15601_v40  ;;  %v7708_v41 = vmax.f32 %v7612_v25, 0.0  ;;  %v20551_v44 = vrot.slane %v15406_v39, 1 }
 0x460   : > { %v7276_v27 = vsel %vm3788_vm5, %v20549_v60, %v18875_v30  ;;  %v15610_v58 = vmul.f32 %v20519_v28, %v20517_v49  ;;  %v5179_v48 = vmul.f32 %v20519_v28, %v15590_v51  ;;  %8061 = vmatprep.mubr.f32.mxu1 %v7803_v17  ;;  %v5996_v25 = vmul.f32 %v15451_v5, %v20524_v52 }
 0x461   : > { %v3097_v22 = vsel %vm2950_vm4, %v20551_v44, %v18874_v13  ;;  %v5775_v62 = vadd.f32 %v5554_v57, %v5067_v32  ;;  %v15615_v38 = vmul.f32 %v20503_v43, %v3549_v34  ;;  %v7804_v60 = vmin.f32 %v7708_v41, 6.0 }
 0x462   : > { %20552 = vst [vmem:[#allocation47_spill] sm:$0xff] %v15610_v58  ;;  %v3313_v23 = vadd.f32 %v3097_v22, %v2607_v7  ;;  %v18876_v39 = vrot.slane %v15610_v58, 1  ;;  %v15621_v44 = vmul.f32 %v20523_v59, %v5179_v48  ;;  %v15625_v13 = vmul.f32 %v20522_v12, %v15601_v40  ;;  %v20573_v59 = vld [vmem:[#allocation28_spill] sm:$0xff] }
 0x463   : > { %20553 = vst [vmem:[#allocation18_spill] sm:$0xff] %v15615_v38  ;;  %v6087_v30 = vadd.f32 %v5991_v56, %v5775_v62  ;;  %v18878_v57 = vrot.slane %v15615_v38, 2  ;;  %v6901_v22 = vmul.f32 %v15601_v40, %v15590_v51  ;;  %v2606_v7 = vmul.f32 %v15389_v47, %v20327_v16  ;;  %8791 = vmatprep.mubr.f32.mxu0 %v7804_v60  ;;  %v20574_v38 = vld [vmem:[#allocation30_spill] sm:$0xff]  ;;  %v20575_v12 = vld [vmem:[#allocation48_spill] sm:$0xff] }
 0x464   : > { %20554 = vst [vmem:[#allocation61_spill] sm:$0xff] %v15621_v44  ;;  %20555 = vst [vmem:[#allocation5_spill] sm:$0xff] %v15625_v13  ;;  %v20556_v41 = vrot.slane %v15462_v9, 1  ;;  %v18880_v32 = vrot.slane %v15621_v44, 2  ;;  %v18882_v34 = vrot.slane %v15625_v13, 1  ;;  %v15641_v56 = vmul.f32 %v20454_v6, %v20445_v50  ;;  %v20567_v13 = vld [vmem:[#allocation25_spill] sm:$0xff] }
 0x465   : > { %v6789_v48 = vadd.f32 %v6568_v3, %v6087_v30  ;;  %v20557_v47 = vrot.slane %v15426_v37, 2  ;;  %v15649_v60 = vmul.f32 %v20525_v20, %v6901_v22  ;;  %v3548_v9 = vmul.f32 %v20454_v6, %v15590_v51 }
 0x466   : > { %v4856_v17 = vsel %vm2950_vm4, %v20556_v41, %v18876_v39  ;;  %v20559_v39 = vrot.slane %v15481_v8, 2  ;;  %v20560_v3 = vrot.slane %v15475_v2, 1  ;;  %v18884_v30 = vrot.slane %v15641_v56, 1 }
 0x467   : > { %v3935_v62 = vsel %vm3788_vm5, %v20557_v47, %v18878_v57  ;;  %20558 = vst [vmem:[#allocation11_spill] sm:$0xff] %v15649_v60  ;;  %v7497_v22 = vadd.f32 %v7276_v27, %v6789_v48  ;;  %v20561_v57 = vld [vmem:[#allocation8_spill] sm:$0xff]  ;;  %v20571_v20 = vrot.slane %v15649_v60, 2  ;;  %v5995_v40 = vmul.f32 %v20575_v12, %v20574_v38 }
 0x468   : > { %v4151_v41 = vadd.f32 %v3935_v62, %v3313_v23  ;;  %v5564_v18 = vsel %vm3788_vm5, %v20559_v39, %v18880_v32  ;;  %v6578_v37 = vsel %vm2950_vm4, %v20560_v3, %v18882_v34  ;;  %v15666_v6 = vmul.f32 %v20561_v57, %v3548_v9  ;;  %v20563_v23 = vld [vmem:[#allocation23_spill] sm:$0xff]  ;;  %v15681_v48 = vld [vmem:[#allocation2 + $0x2c0] sm:$0xff] }
 0x469   : > { %v20564_v62 = vld [vmem:[#allocation7_spill] sm:$0xff]  ;;  %20569 = vst [vmem:[#allocation59_spill] sm:$0xff] %v15681_v48  ;;  %v2605_v43 = vmul.f32 %v8882_v10, %v20582_v15 }
 0x46a   : > { %20562 = vst [vmem:[#allocation50_spill] sm:$0xff] %v15666_v6  ;;  %v4366_v44 = vmul.f32 %v20564_v62, %v20563_v23  ;;  %v4463_v8 = vadd.f32 %v4367_v61, %v4151_v41  ;;  %v20565_v39 = vld [vmem:[#allocation19_spill] sm:$0xff]  ;;  %v20572_v61 = vrot.slane %v15486_v63, 2 }
 0x46b   : > { %v20566_v32 = vrot.slane %v20565_v39, 1  ;;  %v20568_v3 = vld [vmem:[#allocation15_spill] sm:$0xff] }
 0x46c   : > { %v15677_v34 = vmul.f32 %v20568_v3, %v20567_v13  ;;  %v5178_v27 = vmul.f32 %v20568_v3, %v15590_v51  ;;  %v20570_v9 = vld [vmem:[#allocation39_spill] sm:$0xff]  ;;  %v7286_v41 = vsel %vm3788_vm5, %v20572_v61, %v20571_v20 }
 0x46d   : > { %v3095_v2 = vsel %vm2950_vm4, %v20566_v32, %v18884_v30  ;;  %v7610_v47 = vadd.f32 %v20570_v9, %v7497_v22  ;;  %v18896_v32 = vrot.slane %v15666_v6, 2  ;;  %v5072_v30 = vadd.f32 %v4856_v17, %v4463_v8  ;;  %v20576_v22 = vld [vmem:[#allocation20_spill] sm:$0xff]  ;;  %v20578_v20 = vld [vmem:[#allocation31_spill] sm:$0xff] }
 0x46e   : > { %v3312_v39 = vadd.f32 %v3095_v2, %v2606_v7  ;;  %v18901_v52 = vrot.slane %v15677_v34, 1  ;;  %v15692_v58 = vmul.f32 %v20573_v59, %v5178_v27  ;;  %v20577_v60 = vrot.slane %v20576_v22, 2  ;;  %v20579_v27 = vld [vmem:[#allocation17_spill] sm:$0xff] }
 0x46f   : > { %v7706_v5 = vmax.f32 %v7610_v47, 0.0  ;;  %v15703_v7 = vmul.f32 %v20578_v20, %v15681_v48  ;;  %v6900_v17 = vmul.f32 %v15681_v48, %v15590_v51  ;;  %v5780_v8 = vadd.f32 %v5564_v18, %v5072_v30  ;;  %v20583_v30 = vld [vmem:[#allocation21_spill] sm:$0xff] }
 0x470   : > { %v3933_v63 = vsel %vm3788_vm5, %v20577_v60, %v18896_v32  ;;  %v20580_v61 = vrot.slane %v20579_v27, 1  ;;  %v18903_v6 = vrot.slane %v15692_v58, 2  ;;  %v20581_v32 = vld [vmem:[#allocation34_spill] sm:$0xff] }
 0x471   : > { %v4150_v2 = vadd.f32 %v3933_v63, %v3312_v39  ;;  %v7802_v22 = vmin.f32 %v7706_v5, 6.0  ;;  %v18904_v60 = vrot.slane %v15703_v7, 1  ;;  %v15715_v49 = vmul.f32 %v20581_v32, %v6900_v17  ;;  %v20585_v27 = vld [vmem:[#allocation6_spill] sm:$0xff]  ;;  %v20587_v5 = vld [vmem:[#allocation52_spill] sm:$0xff] }
 0x472   : > { %v4854_v47 = vsel %vm2950_vm4, %v20580_v61, %v18901_v52  ;;  %v6092_v9 = vadd.f32 %v5996_v25, %v5780_v8  ;;  %v20584_v39 = vrot.slane %v20583_v30, 2  ;;  %v20586_v61 = vld [vmem:[#allocation49_spill] sm:$0xff]  ;;  %v20588_v17 = vrot.slane %v20587_v5, 1 }
 0x473   : > { %v4462_v18 = vadd.f32 %v4366_v44, %v4150_v2  ;;  %v15725_v52 = vmul.f32 %v20586_v61, %v20585_v27  ;;  %8062 = vmatmul.mubr.f32.gmra.mxu1 %v7802_v22  ;;  %v18906_v10 = vrot.slane %v15715_v49, 2  ;;  %v3547_v25 = vmul.f32 %v20586_v61, %v15590_v51  ;;  %v20590_v5 = vld [vmem:[#allocation57_spill] sm:$0xff] }
 0x474   : > { %v5562_v63 = vsel %vm3788_vm5, %v20584_v39, %v18903_v6  ;;  %v6576_v28 = vsel %vm2950_vm4, %v20588_v17, %v18904_v60  ;;  %v4365_v44 = vmul.f32 %v15063_v33, %v20541_v42  ;;  %v6794_v8 = vadd.f32 %v6578_v37, %v6092_v9  ;;  %v20589_v39 = vld [vmem:[#allocation24_spill] sm:$0xff]  ;;  %v15742_v6 = vld [vmem:[#allocation2 + $0x230] sm:$0xff] }
 0x475   : > { %v5071_v2 = vadd.f32 %v4854_v47, %v4462_v18  ;;  %v18909_v30 = vrot.slane %v15725_v52, 1  ;;  %v15740_v22 = vmul.f32 %v15288_v1, %v20589_v39  ;;  %v20591_v17 = vrot.slane %v20590_v5, 2  ;;  %v20592_v42 = vld [vmem:[#allocation58_spill] sm:$0xff] }
 0x476   : > { %v15750_v61 = vmul.f32 %v20540_v53, %v3547_v25  ;;  %v5177_v37 = vmul.f32 %v15288_v1, %v15590_v51  ;;  %v5994_v9 = vmul.f32 %v15536_v4, %v20544_v14  ;;  %v7502_v47 = vadd.f32 %v7286_v41, %v6794_v8 }
 0x477   : > { %v7284_v60 = vsel %vm3788_vm5, %v20591_v17, %v18906_v10  ;;  %v5779_v18 = vadd.f32 %v5562_v63, %v5071_v2  ;;  %v20593_v39 = vrot.slane %v20592_v42, 1  ;;  %v18910_v5 = vrot.slane %v15740_v22, 1 }
 0x478   : > { %v18911_v25 = vrot.slane %v15750_v61, 2  ;;  %v15764_v10 = vmul.f32 %v19239_v31, %v5177_v37  ;;  %v15768_v1 = vmul.f32 %v19304_v45, %v15742_v6  ;;  %v7615_v41 = vadd.f32 %v20548_v11, %v7502_v47 }
 0x479   : > { %v3093_v15 = vsel %vm2950_vm4, %v20593_v39, %v18909_v30  ;;  %v6091_v63 = vadd.f32 %v5995_v40, %v5779_v18  ;;  %v20594_v42 = vrot.slane %v15524_v36, 1  ;;  %v20596_v40 = vld [vmem:[#allocation3_spill] sm:$0xff] }
 0x47a   : > { %v3311_v17 = vadd.f32 %v3093_v15, %v2605_v43  ;;  %v6899_v43 = vmul.f32 %v15742_v6, %v15590_v51  ;;  %v20595_v15 = vrot.slane %v15532_v26, 2  ;;  %v18913_v39 = vrot.slane %v15764_v10, 2 }
 0x47b   : > { %v4852_v8 = vsel %vm2950_vm4, %v20594_v42, %v18910_v5  ;;  %v18914_v37 = vrot.slane %v15768_v1, 1  ;;  %v1743_v47 = vadd.s32 192, %v20596_v40  ;;  %v7711_v18 = vmax.f32 %v7615_v41, 0.0 }
 0x47c   : > { %v3931_v2 = vsel %vm3788_vm5, %v20595_v15, %v18911_v25  ;;  %v6793_v30 = vadd.f32 %v6576_v28, %v6091_v63  ;;  %v15787_v42 = vmul.f32 %v19198_v24, %v6899_v43  ;;  %v20597_v51 = vrot.slane %v15542_v29, 2 }
 0x47d   : > { %v4149_v36 = vadd.f32 %v3931_v2, %v3311_v17  ;;  %v20598_v15 = vrot.slane %v15553_v19, 1  ;;  %v1744_v25 = vadd.s32 200, %v20596_v40  ;;  %v1923_v41 = vand.u32 15, %v1743_v47  ;;  %v8883_v47 = vld [vmem:[#allocation2 + $0x1d8] sm:$0xff]  ;;  %v15901_v40 = vld [vmem:[#allocation2 + $0x280] sm:$0xff] }
 0x47e   : > { %v5560_v26 = vsel %vm3788_vm5, %v20597_v51, %v18913_v39  ;;  %v7807_v28 = vmin.f32 %v7711_v18, 6.0  ;;  %v7501_v17 = vadd.f32 %v7284_v60, %v6793_v30  ;;  %v18912_v43 = vrot.slane %v15787_v42, 2  ;;  %v20602_v30 = vld [vmem:[#allocation55_spill] sm:$0xff] }
 0x47f   : > { %v6574_v5 = vsel %vm2950_vm4, %v20598_v15, %v18914_v37  ;;  %v4461_v63 = vadd.f32 %v4365_v44, %v4149_v36  ;;  %v1930_v2 = vand.u32 15, %v1744_v25  ;;  %vm2159_vm3 = vcmp.gt.s32.totalorder %v1923_v41, 0 }
 0x480   : > { %v15803_v29 = vmul.f32 %v20564_v62, %v20445_v50  ;;  %v15807_v51 = vmul.f32 %v20575_v12, %v20567_v13  ;;  %8792 = vmatmul.mubr.f32.gmra.mxu0 %v7807_v28  ;;  %v7614_v19 = vadd.f32 %v19364_v35, %v7501_v17  ;;  %v20601_v60 = vrot.slane %v15567_v46, 2 }
 0x481   : > { %v5070_v15 = vadd.f32 %v4852_v8, %v4461_v63  ;;  %v15816_v25 = vsel %vm2159_vm3, 1.0, %v20602_v30  ;;  %vm2256_vm6 = vcmp.lt.s32.totalorder %v1930_v2, 15  ;;  %v15824_v63 = vld [vmem:[#allocation2 + $0x160] sm:$0xff]  ;;  %v20604_v2 = vrot.slane %v15641_v56, 1 }
 0x482   : > { %20599 = vst [vmem:[#allocation46_spill] sm:$0xff] %v15803_v29  ;;  %20600 = vst [vmem:[#allocation13_spill] sm:$0xff] %v15807_v51  ;;  %v7282_v44 = vsel %vm3788_vm5, %v20601_v60, %v18912_v43  ;;  %v2497_v18 = vmul.f32 %v8883_v47, %v15816_v25  ;;  %v18916_v36 = vrot.slane %v15803_v29, 1  ;;  %v4257_v41 = vmul.f32 %v15816_v25, %v20568_v3  ;;  %v8885_v3 = vld [vmem:[#allocation2 + $0x208] sm:$0xff] }
 0x483   : > { %v7710_v28 = vmax.f32 %v7614_v19, 0.0  ;;  %v5778_v8 = vadd.f32 %v5560_v26, %v5070_v15  ;;  %v8557_v17 = vsel %vm2256_vm6, 1.0, %v20602_v30  ;;  %v18915_v46 = vrot.slane %v15807_v51, 1  ;;  %20603 = vst [vmem:[#allocation44_spill] sm:$0xff] %v15824_v63  ;;  %v20613_v51 = vld [vmem:[#allocation16_spill] sm:$0xff] }
 0x484   : > { %v2609_v60 = vmul.f32 %v20327_v16, %v2497_v18  ;;  %v3101_v47 = vsel %vm2950_vm4, %v20604_v2, %v18916_v36  ;;  %v15832_v43 = vrot.slane %v8557_v17, 6  ;;  %v4369_v39 = vmul.f32 %v20563_v23, %v4257_v41  ;;  %v20612_v36 = vld [vmem:[#allocation39_spill] sm:$0xff] }
 0x485   : > { %v7806_v19 = vmin.f32 %v7710_v28, 6.0  ;;  %v6090_v26 = vadd.f32 %v5994_v9, %v5778_v8  ;;  %v20605_v15 = vrot.slane %v15677_v34, 1  ;;  %v5886_v18 = vmul.f32 %v15816_v25, %v15681_v48  ;;  %v8884_v9 = vld [vmem:[#allocation2 + $0x18] sm:$0xff] }
 0x486   : > { %v3315_v37 = vadd.f32 %v3101_v47, %v2609_v60  ;;  %v15845_v56 = vsel %vm3378_vm2, %v19378_v54, %v15832_v43  ;;  %v15849_v41 = vmul.f32 %v20578_v20, %v15824_v63  ;;  %v2498_v28 = vmul.f32 %v8884_v9, %v15816_v25 }
 0x487   : > { %v4860_v30 = vsel %vm2950_vm4, %v20605_v15, %v18915_v46  ;;  %8066 = vmatprep.mubr.f32.mxu1 %v7806_v19  ;;  %v6792_v34 = vadd.f32 %v6574_v5, %v6090_v26  ;;  %v3551_v8 = vmul.f32 %v20564_v62, %v15845_v56  ;;  %v5181_v17 = vmul.f32 %v20575_v12, %v15845_v56 }
 0x488   : > { %20606 = vst [vmem:[#allocation60_spill] sm:$0xff] %v15849_v41  ;;  %v5998_v60 = vmul.f32 %v20574_v38, %v5886_v18  ;;  %v18920_v2 = vrot.slane %v15849_v41, 1  ;;  %v6903_v47 = vmul.f32 %v15824_v63, %v15845_v56  ;;  %v2610_v15 = vmul.f32 %v20501_v21, %v2498_v28  ;;  %v20618_v63 = vld [vmem:[#allocation51_spill] sm:$0xff]  ;;  %v20620_v38 = vld [vmem:[#allocation50_spill] sm:$0xff] }
 0x489   : > { %v15863_v9 = vmul.f32 %v20518_v0, %v20386_v55  ;;  %v7500_v5 = vadd.f32 %v7282_v44, %v6792_v34  ;;  %v15866_v19 = vmul.f32 %v20561_v57, %v3551_v8  ;;  %v15869_v62 = vmul.f32 %v20573_v59, %v5181_v17  ;;  %v20611_v34 = vld [vmem:[#allocation54_spill] sm:$0xff]  ;;  %v20617_v59 = vld [vmem:[#allocation32_spill] sm:$0xff] }
 0x48a   : > { %v3552_v26 = vmul.f32 %v20518_v0, %v15845_v56  ;;  %v20609_v18 = vrot.slane %v15703_v7, 1  ;;  %v15879_v46 = vmul.f32 %v20581_v32, %v6903_v47  ;;  %v4258_v8 = vmul.f32 %v15816_v25, %v20611_v34  ;;  %v20614_v47 = vld [vmem:[#allocation45_spill] sm:$0xff]  ;;  %v20616_v32 = vld [vmem:[#allocation35_spill] sm:$0xff] }
 0x48b   : > { %20607 = vst [vmem:[#allocation56_spill] sm:$0xff] %v15866_v19  ;;  %20608 = vst [vmem:[#allocation43_spill] sm:$0xff] %v15869_v62  ;;  %v18930_v44 = vrot.slane %v15863_v9, 1  ;;  %v7613_v17 = vadd.f32 %v20612_v36, %v7500_v5  ;;  %v15899_v5 = vmul.f32 %v20618_v63, %v20617_v59  ;;  %v20621_v48 = vrot.slane %v20620_v38, 2 }
 0x48c   : > { %v6582_v28 = vsel %vm2950_vm4, %v20609_v18, %v18920_v2  ;;  %20610 = vst [vmem:[#allocation7_spill] sm:$0xff] %v15879_v46  ;;  %v15888_v41 = vmul.f32 %v20613_v51, %v3552_v26  ;;  %v20615_v18 = vrot.slane %v20614_v47, 1  ;;  %v4370_v20 = vmul.f32 %v20616_v32, %v4258_v8 }
 0x48d   : > { %v7709_v0 = vmax.f32 %v7613_v17, 0.0  ;;  %v20619_v26 = vrot.slane %v15866_v19, 2  ;;  %v20622_v13 = vrot.slane %v15869_v62, 2  ;;  %v20623_v47 = vrot.slane %v15692_v58, 2  ;;  %v20633_v62 = vld [vmem:[#allocation36_spill] sm:$0xff] }
 0x48e   : > { %v3103_v2 = vsel %vm2950_vm4, %v20615_v18, %v18930_v44  ;;  %v20624_v29 = vrot.slane %v15879_v46, 2  ;;  %v20625_v57 = vrot.slane %v15715_v49, 2  ;;  %v18938_v19 = vrot.slane %v15888_v41, 2  ;;  %v20629_v49 = vld [vmem:[#allocation18_spill] sm:$0xff] }
 0x48f   : > { %v3939_v7 = vsel %vm3788_vm5, %v20621_v48, %v20619_v26  ;;  %v5568_v18 = vsel %vm3788_vm5, %v20623_v47, %v20622_v13  ;;  %v3316_v8 = vadd.f32 %v3103_v2, %v2610_v15  ;;  %v18940_v38 = vrot.slane %v15899_v5, 1  ;;  %v20626_v26 = vld [vmem:[#allocation22_spill] sm:$0xff]  ;;  %v20631_v15 = vld [vmem:[#allocation47_spill] sm:$0xff] }
 0x490   : > { %v4153_v44 = vadd.f32 %v3939_v7, %v3315_v37  ;;  %v7290_v17 = vsel %vm3788_vm5, %v20625_v57, %v20624_v29  ;;  %v7805_v36 = vmin.f32 %v7709_v0, 6.0  ;;  %v5182_v48 = vmul.f32 %v20618_v63, %v15845_v56  ;;  %v20627_v13 = vld [vmem:[#allocation38_spill] sm:$0xff] }
 0x491   : > { %v5887_v58 = vmul.f32 %v15816_v25, %v20626_v26  ;;  %v15926_v37 = vmul.f32 %v20627_v13, %v15901_v40  ;;  %v20630_v57 = vrot.slane %v20629_v49, 2  ;;  %v20632_v0 = vrot.slane %v20631_v15, 1 }
 0x492   : > { %v4465_v2 = vadd.f32 %v4369_v39, %v4153_v44  ;;  %v6904_v47 = vmul.f32 %v15901_v40, %v15845_v56  ;;  %8067 = vmatmul.mubr.f32.gmra.mxu1 %v7805_v36  ;;  %v15941_v12 = vmul.f32 %v20633_v62, %v5182_v48  ;;  %v20634_v39 = vld [vmem:[#allocation41_spill] sm:$0xff]  ;;  %v2496_v15 = vmul.f32 %v8885_v3, %v15816_v25  ;;  %v20638_v3 = vld [vmem:[#allocation14_spill] sm:$0xff] }
 0x493   : > { %20628 = vst [vmem:[#allocation19_spill] sm:$0xff] %v15926_v37  ;;  %v3941_v29 = vsel %vm3788_vm5, %v20630_v57, %v18938_v19  ;;  %v4862_v7 = vsel %vm2950_vm4, %v20632_v0, %v18940_v38  ;;  %v5999_v44 = vmul.f32 %v20634_v39, %v5887_v58  ;;  %v18943_v49 = vrot.slane %v15926_v37, 1  ;;  %v20635_v57 = vld [vmem:[#allocation42_spill] sm:$0xff]  ;;  %v20636_v48 = vld [vmem:[#allocation5_spill] sm:$0xff] }
 0x494   : > { %v4154_v46 = vadd.f32 %v3941_v29, %v3316_v8  ;;  %v5074_v23 = vadd.f32 %v4860_v30, %v4465_v2  ;;  %v15946_v19 = vmul.f32 %v20635_v57, %v6904_v47  ;;  %v15951_v0 = vmul.f32 %v15063_v33, %v20585_v27 }
 0x495   : > { %v18944_v8 = vrot.slane %v15941_v12, 2  ;;  %v20637_v58 = vrot.slane %v20636_v48, 1  ;;  %v3550_v30 = vmul.f32 %v15063_v33, %v15845_v56  ;;  %v2608_v38 = vmul.f32 %v20638_v3, %v2496_v15 }
 0x496   : > { %v4466_v36 = vadd.f32 %v4370_v20, %v4154_v46  ;;  %v5782_v2 = vadd.f32 %v5568_v18, %v5074_v23  ;;  %v18947_v47 = vrot.slane %v15946_v19, 2  ;;  %v18946_v27 = vrot.slane %v15951_v0, 1  ;;  %v20639_v20 = vld [vmem:[#allocation61_spill] sm:$0xff]  ;;  %v20642_v18 = vld [vmem:[#allocation11_spill] sm:$0xff] }
 0x497   : > { %v6584_v29 = vsel %vm2950_vm4, %v20637_v58, %v18943_v49  ;;  %v20640_v46 = vrot.slane %v20639_v20, 2  ;;  %v15970_v48 = vmul.f32 %v20540_v53, %v3550_v30  ;;  %v20641_v58 = vld [vmem:[#allocation53_spill] sm:$0xff]  ;;  %v20643_v15 = vrot.slane %v20642_v18, 2  ;;  %v20645_v20 = vld [vmem:[#allocation24_spill] sm:$0xff]  ;;  %v20646_v53 = vld [vmem:[#allocation26_spill] sm:$0xff] }
 0x498   : > { %v5075_v57 = vadd.f32 %v4862_v7, %v4466_v36  ;;  %v4256_v33 = vmul.f32 %v15816_v25, %v20641_v58  ;;  %v6094_v23 = vadd.f32 %v5998_v60, %v5782_v2  ;;  %v20644_v7 = vrot.slane %v15725_v52, 1 }
 0x499   : > { %v5570_v37 = vsel %vm3788_vm5, %v20640_v46, %v18944_v8  ;;  %v7292_v49 = vsel %vm3788_vm5, %v20643_v15, %v18947_v47  ;;  %v15986_v30 = vmul.f32 %v15536_v4, %v20645_v20  ;;  %v15988_v46 = vld [vmem:[#allocation2 + $0x340] sm:$0xff]  ;;  %v18955_v2 = vrot.slane %v15970_v48, 2 }
 0x49a   : > { %v3099_v36 = vsel %vm2950_vm4, %v20644_v7, %v18946_v27  ;;  %v5783_v8 = vadd.f32 %v5570_v37, %v5075_v57  ;;  %v4368_v18 = vmul.f32 %v20646_v53, %v4256_v33  ;;  %v6796_v58 = vadd.f32 %v6582_v28, %v6094_v23 }
 0x49b   : > { %v3314_v60 = vadd.f32 %v3099_v36, %v2608_v38  ;;  %v18953_v15 = vrot.slane %v15986_v30, 1  ;;  %v5180_v52 = vmul.f32 %v15536_v4, %v15845_v56  ;;  %v5885_v7 = vmul.f32 %v15816_v25, %v15742_v6 }
 0x49c   : > { %v6095_v27 = vadd.f32 %v5999_v44, %v5783_v8  ;;  %v20647_v47 = vrot.slane %v15750_v61, 2  ;;  %v16004_v37 = vmul.f32 %v19304_v45, %v15988_v46  ;;  %v6902_v28 = vmul.f32 %v15988_v46, %v15845_v56 }
 0x49d   : > { %v7504_v57 = vadd.f32 %v7290_v17, %v6796_v58  ;;  %v20648_v25 = vrot.slane %v15740_v22, 1  ;;  %v16014_v8 = vmul.f32 %v19239_v31, %v5180_v52 }
 0x49e   : > { %v3937_v38 = vsel %vm3788_vm5, %v20647_v47, %v18955_v2  ;;  %v6797_v61 = vadd.f32 %v6584_v29, %v6095_v27  ;;  %v5997_v47 = vmul.f32 %v20544_v14, %v5885_v7  ;;  %v18949_v23 = vrot.slane %v16004_v37, 1 }
 0x49f   : > { %v4152_v33 = vadd.f32 %v3937_v38, %v3314_v60  ;;  %v4858_v44 = vsel %vm2950_vm4, %v20648_v25, %v18953_v15  ;;  %v16019_v36 = vmul.f32 %v19198_v24, %v6902_v28  ;;  %v7617_v56 = vadd.f32 %v19364_v35, %v7504_v57  ;;  %v8886_v60 = vld [vmem:[#allocation2 + $0x158] sm:$0xff] }
 0x4a0   : > { %v18952_v58 = vrot.slane %v16014_v8, 2  ;;  %v2613_v22 = vmul.f32 %v8886_v60, %v20501_v21  ;;  %v7505_v38 = vadd.f32 %v7292_v49, %v6797_v61  ;;  %v20649_v27 = vrot.slane %v15768_v1, 1 }
 0x4a1   : > { %v4464_v17 = vadd.f32 %v4368_v18, %v4152_v33  ;;  %v18948_v52 = vrot.slane %v16019_v36, 2  ;;  %v16032_v7 = vmul.f32 %v20611_v34, %v20386_v55  ;;  %v7713_v28 = vmax.f32 %v7617_v56, 0.0 }
 0x4a2   : > { %v6580_v29 = vsel %vm2950_vm4, %v20649_v27, %v18949_v23  ;;  %v20650_v57 = vrot.slane %v15764_v10, 2  ;;  %v16042_v1 = vsel %vm3378_vm2, %v15832_v43, %v19378_v54  ;;  %v7618_v33 = vadd.f32 %v20548_v11, %v7505_v38  ;;  %v16059_v38 = vld [vmem:[#allocation2 + $0x2f8] sm:$0xff] }
 0x4a3   : > { %v5073_v18 = vadd.f32 %v4858_v44, %v4464_v17  ;;  %v20651_v25 = vrot.slane %v15787_v42, 2  ;;  %v18951_v44 = vrot.slane %v16032_v7, 1  ;;  %v3555_v10 = vmul.f32 %v20611_v34, %v16042_v1 }
 0x4a4   : > { %v5566_v49 = vsel %vm3788_vm5, %v20650_v57, %v18952_v58  ;;  %v7809_v56 = vmin.f32 %v7713_v28, 6.0  ;;  %v4373_v60 = vmul.f32 %v20618_v63, %v20616_v32  ;;  %v16057_v43 = vmul.f32 %v20626_v26, %v20617_v59  ;;  %v20660_v58 = vld [vmem:[#allocation42_spill] sm:$0xff] }
 0x4a5   : > { %v7288_v61 = vsel %vm3788_vm5, %v20651_v25, %v18948_v52  ;;  %v5781_v17 = vadd.f32 %v5566_v49, %v5073_v18  ;;  %v7714_v27 = vmax.f32 %v7618_v33, 0.0  ;;  %v20652_v42 = vrot.slane %v15863_v9, 1 }
 0x4a6   : > { %v16067_v34 = vmul.f32 %v20613_v51, %v3555_v10  ;;  %v5185_v28 = vmul.f32 %v20626_v26, %v16042_v1  ;;  %8071 = vmatprep.mubr.f32.mxu1 %v7809_v56  ;;  %v18950_v25 = vrot.slane %v16057_v43, 1  ;;  %v6002_v33 = vmul.f32 %v15901_v40, %v20634_v39 }
 0x4a7   : > { %v3109_v57 = vsel %vm2950_vm4, %v20652_v42, %v18951_v44  ;;  %v6093_v18 = vadd.f32 %v5997_v47, %v5781_v17  ;;  %v7810_v52 = vmin.f32 %v7714_v27, 6.0  ;;  %v16080_v10 = vmul.f32 %v20627_v13, %v16059_v38  ;;  %v8887_v17 = vld [vmem:[#allocation2 + $0x1e8] sm:$0xff] }
 0x4a8   : > { %20653 = vst [vmem:[#allocation20_spill] sm:$0xff] %v16067_v34  ;;  %v3319_v49 = vadd.f32 %v3109_v57, %v2613_v22  ;;  %v18954_v23 = vrot.slane %v16067_v34, 2  ;;  %v16076_v9 = vmul.f32 %v20633_v62, %v5185_v28  ;;  %v20656_v47 = vrot.slane %v15899_v5, 1  ;;  %v20658_v5 = vld [vmem:[#allocation15_spill] sm:$0xff] }
 0x4a9   : > { %20655 = vst [vmem:[#allocation21_spill] sm:$0xff] %v16080_v10  ;;  %v6795_v42 = vadd.f32 %v6580_v29, %v6093_v18  ;;  %v6907_v56 = vmul.f32 %v16059_v38, %v16042_v1  ;;  %v2612_v27 = vmul.f32 %v8887_v17, %v20327_v16  ;;  %8794 = vmatprep.mubr.f32.mxu0 %v7810_v52  ;;  %v20657_v57 = vrot.slane %v15888_v41, 2  ;;  %v20667_v16 = vld [vmem:[#allocation8_spill] sm:$0xff] }
 0x4aa   : > { %20654 = vst [vmem:[#allocation17_spill] sm:$0xff] %v16076_v9  ;;  %v4868_v22 = vsel %vm2950_vm4, %v20656_v47, %v18950_v25  ;;  %v18959_v29 = vrot.slane %v16076_v9, 2  ;;  %v18960_v18 = vrot.slane %v16080_v10, 1  ;;  %v16099_v47 = vmul.f32 %v20658_v5, %v20445_v50 }
 0x4ab   : > { %v3947_v28 = vsel %vm3788_vm5, %v20657_v57, %v18954_v23  ;;  %v7503_v25 = vadd.f32 %v7288_v61, %v6795_v42  ;;  %v16102_v15 = vmul.f32 %v20660_v58, %v6907_v56  ;;  %v3554_v52 = vmul.f32 %v20658_v5, %v16042_v1  ;;  %v20662_v57 = vld [vmem:[#allocation19_spill] sm:$0xff]  ;;  %v20665_v42 = vld [vmem:[#allocation48_spill] sm:$0xff] }
 0x4ac   : > { %20659 = vst [vmem:[#allocation49_spill] sm:$0xff] %v16099_v47  ;;  %v4157_v44 = vadd.f32 %v3947_v28, %v3319_v49  ;;  %v20661_v41 = vrot.slane %v15941_v12, 2  ;;  %v20663_v23 = vrot.slane %v20662_v57, 1  ;;  %v18963_v61 = vrot.slane %v16099_v47, 1  ;;  %v20664_v49 = vld [vmem:[#allocation23_spill] sm:$0xff]  ;;  %v20670_v57 = vld [vmem:[#allocation46_spill] sm:$0xff] }
 0x4ad   : > { %v4372_v56 = vmul.f32 %v20665_v42, %v20664_v49  ;;  %v20666_v28 = vld [vmem:[#allocation39_spill] sm:$0xff]  ;;  %v16122_v12 = vmul.f32 %v20667_v16, %v3554_v52  ;;  %v20676_v16 = vrot.slane %v16102_v15, 2  ;;  %v20677_v47 = vrot.slane %v15946_v19, 2 }
 0x4ae   : > { %v5576_v17 = vsel %vm3788_vm5, %v20661_v41, %v18959_v29  ;;  %v6590_v2 = vsel %vm2950_vm4, %v20663_v23, %v18960_v18  ;;  %v7616_v34 = vadd.f32 %v20666_v28, %v7503_v25  ;;  %v4469_v5 = vadd.f32 %v4373_v60, %v4157_v44  ;;  %v16124_v41 = vld [vmem:[#allocation2 + $0x278] sm:$0xff]  ;;  %v20672_v18 = vld [vmem:[#allocation25_spill] sm:$0xff]  ;;  %v20674_v60 = vld [vmem:[#allocation30_spill] sm:$0xff] }
 0x4af   : > { %20668 = vst [vmem:[#allocation52_spill] sm:$0xff] %v16122_v12  ;;  %20669 = vst [vmem:[#allocation57_spill] sm:$0xff] %v16124_v41  ;;  %v20671_v29 = vrot.slane %v20670_v57, 1  ;;  %v20673_v58 = vld [vmem:[#allocation59_spill] sm:$0xff]  ;;  %v20675_v25 = vld [vmem:[#allocation44_spill] sm:$0xff]  ;;  %v7298_v57 = vsel %vm3788_vm5, %v20677_v47, %v20676_v16 }
 0x4b0   : > { %v16133_v10 = vmul.f32 %v20673_v58, %v20672_v18  ;;  %v5184_v44 = vmul.f32 %v20673_v58, %v16042_v1  ;;  %v6001_v9 = vmul.f32 %v20675_v25, %v20674_v60  ;;  %v7712_v52 = vmax.f32 %v7616_v34, 0.0  ;;  %v20678_v18 = vld [vmem:[#allocation28_spill] sm:$0xff]  ;;  %v20679_v58 = vld [vmem:[#allocation31_spill] sm:$0xff] }
 0x4b1   : > { %v3107_v23 = vsel %vm2950_vm4, %v20671_v29, %v18963_v61  ;;  %v5078_v49 = vadd.f32 %v4868_v22, %v4469_v5  ;;  %v18971_v29 = vrot.slane %v16122_v12, 2  ;;  %v16151_v50 = vmul.f32 %v20679_v58, %v16124_v41  ;;  %v8888_v19 = vld [vmem:[#allocation2 + $0x78] sm:$0xff] }
 0x4b2   : > { %v3318_v28 = vadd.f32 %v3107_v23, %v2612_v27  ;;  %v18970_v61 = vrot.slane %v16133_v10, 1  ;;  %v16147_v42 = vmul.f32 %v20678_v18, %v5184_v44  ;;  %v7808_v34 = vmin.f32 %v7712_v52, 6.0  ;;  %v20680_v27 = vld [vmem:[#allocation56_spill] sm:$0xff]  ;;  %v20682_v44 = vld [vmem:[#allocation13_spill] sm:$0xff] }
 0x4b3   : > { %v5786_v22 = vadd.f32 %v5576_v17, %v5078_v49  ;;  %v6906_v5 = vmul.f32 %v16124_v41, %v16042_v1  ;;  %v2611_v16 = vmul.f32 %v8888_v19, %v20638_v3  ;;  %v20681_v47 = vrot.slane %v20680_v27, 2  ;;  %v20684_v19 = vld [vmem:[#allocation34_spill] sm:$0xff]  ;;  %v20686_v27 = vld [vmem:[#allocation53_spill] sm:$0xff] }
 0x4b4   : > { %v20683_v60 = vrot.slane %v20682_v44, 1  ;;  %v18972_v17 = vrot.slane %v16147_v42, 2  ;;  %v18973_v49 = vrot.slane %v16151_v50, 1  ;;  %8072 = vmatmul.mubr.f32.gmra.mxu1 %v7808_v34  ;;  %v20685_v41 = vld [vmem:[#allocation6_spill] sm:$0xff]  ;;  %v4371_v34 = vmul.f32 %v15536_v4, %v20646_v53 }
 0x4b5   : > { %v3945_v23 = vsel %vm3788_vm5, %v20681_v47, %v18971_v29  ;;  %v6098_v52 = vadd.f32 %v6002_v33, %v5786_v22  ;;  %v16169_v3 = vmul.f32 %v20684_v19, %v6906_v5  ;;  %v16173_v12 = vmul.f32 %v20686_v27, %v20685_v41  ;;  %v20687_v47 = vld [vmem:[#allocation43_spill] sm:$0xff]  ;;  %v20691_v41 = vld [vmem:[#allocation12_spill] sm:$0xff] }
 0x4b6   : > { %v4866_v18 = vsel %vm2950_vm4, %v20683_v60, %v18970_v61  ;;  %v4156_v58 = vadd.f32 %v3945_v23, %v3318_v28  ;;  %v20688_v44 = vrot.slane %v20687_v47, 2  ;;  %v20689_v61 = vld [vmem:[#allocation60_spill] sm:$0xff]  ;;  %v3553_v28 = vmul.f32 %v20686_v27, %v16042_v1 }
 0x4b7   : > { %v20690_v29 = vrot.slane %v20689_v61, 1  ;;  %v6800_v22 = vadd.f32 %v6590_v2, %v6098_v52  ;;  %v18980_v23 = vrot.slane %v16169_v3, 2  ;;  %v18977_v47 = vrot.slane %v16173_v12, 1 }
 0x4b8   : > { %v5574_v60 = vsel %vm3788_vm5, %v20688_v44, %v18972_v17  ;;  %v4468_v5 = vadd.f32 %v4372_v56, %v4156_v58  ;;  %v16192_v44 = vmul.f32 %v20691_v41, %v3553_v28  ;;  %v16196_v61 = vmul.f32 %v15742_v6, %v20645_v20  ;;  %v16202_v17 = vld [vmem:[#allocation2 + $0x1c8] sm:$0xff]  ;;  %v20695_v56 = vld [vmem:[#allocation7_spill] sm:$0xff] }
 0x4b9   : > { %v6588_v33 = vsel %vm2950_vm4, %v20690_v29, %v18973_v49  ;;  %v5183_v29 = vmul.f32 %v15742_v6, %v16042_v1  ;;  %v6000_v27 = vmul.f32 %v15988_v46, %v20544_v14  ;;  %20694 = vst [vmem:[#allocation54_spill] sm:$0xff] %v16202_v17  ;;  %v7508_v2 = vadd.f32 %v7298_v57, %v6800_v22 }
 0x4ba   : > { %20692 = vst [vmem:[#allocation58_spill] sm:$0xff] %v16192_v44  ;;  %20693 = vst [vmem:[#allocation55_spill] sm:$0xff] %v16196_v61  ;;  %v5077_v58 = vadd.f32 %v4866_v18, %v4468_v5  ;;  %v20696_v52 = vrot.slane %v20695_v56, 2  ;;  %v20697_v49 = vrot.slane %v15951_v0, 1  ;;  %v18978_v20 = vrot.slane %v16192_v44, 2  ;;  %v16365_v44 = vld [vmem:[#allocation2 + $0x288] sm:$0xff] }
 0x4bb   : > { %v18979_v14 = vrot.slane %v16196_v61, 1  ;;  %v16217_v57 = vmul.f32 %v19239_v31, %v5183_v29  ;;  %v7621_v18 = vadd.f32 %v20548_v11, %v7508_v2  ;;  %v16222_v5 = vmul.f32 %v19304_v45, %v16202_v17  ;;  %v20702_v2 = vld [vmem:[#allocation3_spill] sm:$0xff] }
 0x4bc   : > { %v7296_v28 = vsel %vm3788_vm5, %v20696_v52, %v18980_v23  ;;  %v3105_v53 = vsel %vm2950_vm4, %v20697_v49, %v18977_v47  ;;  %v5785_v22 = vadd.f32 %v5574_v60, %v5077_v58  ;;  %v6905_v0 = vmul.f32 %v16202_v17, %v16042_v1 }
 0x4bd   : > { %v3317_v41 = vadd.f32 %v3105_v53, %v2611_v16  ;;  %20698 = vst [vmem:[#allocation45_spill] sm:$0xff] %v16217_v57  ;;  %20699 = vst [vmem:[#allocation35_spill] sm:$0xff] %v16222_v5  ;;  %v20700_v53 = vrot.slane %v15970_v48, 2  ;;  %v20701_v49 = vrot.slane %v15986_v30, 1  ;;  %v18983_v60 = vrot.slane %v16217_v57, 2 }
 0x4be   : > { %v1745_v58 = vadd.s32 208, %v20702_v2  ;;  %v7717_v56 = vmax.f32 %v7621_v18, 0.0  ;;  %v6097_v52 = vadd.f32 %v6001_v9, %v5785_v22  ;;  %v18984_v1 = vrot.slane %v16222_v5, 1 }
 0x4bf   : > { %v3943_v16 = vsel %vm3788_vm5, %v20700_v53, %v18978_v20  ;;  %v4864_v29 = vsel %vm2950_vm4, %v20701_v49, %v18979_v14  ;;  %v20703_v48 = vrot.slane %v16014_v8, 2  ;;  %v16245_v20 = vmul.f32 %v19198_v24, %v6905_v0 }
 0x4c0   : > { %v4155_v47 = vadd.f32 %v3943_v16, %v3317_v41  ;;  %v1746_v30 = vadd.s32 216, %v20702_v2  ;;  %v1937_v49 = vand.u32 15, %v1745_v58  ;;  %v7813_v14 = vmin.f32 %v7717_v56, 6.0  ;;  %v16258_v58 = vld [vmem:[#allocation2 + $0x2b0] sm:$0xff]  ;;  %v8890_v56 = vld [vmem:[#allocation2 + $0x358] sm:$0xff]  ;;  %v20718_v2 = vld [vmem:[#allocation8_spill] sm:$0xff] }
 0x4c1   : > { %v5572_v53 = vsel %vm3788_vm5, %v20703_v48, %v18983_v60  ;;  %20704 = vst [vmem:[#allocation51_spill] sm:$0xff] %v16245_v20  ;;  %v6799_v23 = vadd.f32 %v6588_v33, %v6097_v52  ;;  %v20705_v9 = vrot.slane %v16004_v37, 1  ;;  %v18982_v18 = vrot.slane %v16245_v20, 2  ;;  %20706 = vst [vmem:[#allocation50_spill] sm:$0xff] %v16258_v58  ;;  %v20715_v20 = vld [vmem:[#allocation42_spill] sm:$0xff] }
 0x4c2   : > { %v4467_v31 = vadd.f32 %v4371_v34, %v4155_v47  ;;  %v1944_v8 = vand.u32 15, %v1746_v30  ;;  %vm2161_vm8 = vcmp.gt.s32.totalorder %v1937_v49, 0  ;;  %v16256_v22 = vmul.f32 %v20618_v63, %v20386_v55  ;;  %8795 = vmatmul.mubr.f32.gmra.mxu0 %v7813_v14 }
 0x4c3   : > { %v6586_v41 = vsel %vm2950_vm4, %v20705_v9, %v18984_v1  ;;  %v7507_v0 = vadd.f32 %v7296_v28, %v6799_v23  ;;  %v16261_v33 = vsel %vm2161_vm8, 1.0, %v16258_v58  ;;  %v16265_v37 = vmul.f32 %v15901_v40, %v20617_v59  ;;  %v20711_v1 = vld [vmem:[#allocation48_spill] sm:$0xff] }
 0x4c4   : > { %v5076_v16 = vadd.f32 %v4864_v29, %v4467_v31  ;;  %v20707_v34 = vrot.slane %v16019_v36, 2  ;;  %vm2258_vm9 = vcmp.lt.s32.totalorder %v1944_v8, 15  ;;  %v2504_v14 = vmul.f32 %v8890_v56, %v16261_v33 }
 0x4c5   : > { %v18986_v31 = vrot.slane %v16256_v22, 1  ;;  %v7620_v23 = vadd.f32 %v19364_v35, %v7507_v0  ;;  %v8558_v29 = vsel %vm2258_vm9, 1.0, %v16258_v58  ;;  %v4264_v52 = vmul.f32 %v16261_v33, %v20626_v26 }
 0x4c6   : > { %v7294_v47 = vsel %vm3788_vm5, %v20707_v34, %v18982_v18  ;;  %v5784_v28 = vadd.f32 %v5572_v53, %v5076_v16  ;;  %v2616_v48 = vmul.f32 %v20501_v21, %v2504_v14  ;;  %v20708_v36 = vrot.slane %v16032_v7, 1  ;;  %v16290_v34 = vld [vmem:[#allocation2 + $0x238] sm:$0xff] }
 0x4c7   : > { %v16284_v49 = vrot.slane %v8558_v29, 6  ;;  %v18985_v9 = vrot.slane %v16265_v37, 1  ;;  %v7716_v8 = vmax.f32 %v7620_v23, 0.0  ;;  %v4376_v53 = vmul.f32 %v20616_v32, %v4264_v52 }
 0x4c8   : > { %v3115_v30 = vsel %vm2950_vm4, %v20708_v36, %v18986_v31  ;;  %v6096_v0 = vadd.f32 %v6000_v27, %v5784_v28  ;;  %v5893_v16 = vmul.f32 %v16261_v33, %v16059_v38  ;;  %v20709_v14 = vrot.slane %v16057_v43, 1 }
 0x4c9   : > { %v3322_v56 = vadd.f32 %v3115_v30, %v2616_v48  ;;  %v16295_v7 = vsel %vm3378_vm2, %v19378_v54, %v16284_v49  ;;  %v16304_v27 = vmul.f32 %v20627_v13, %v16290_v34  ;;  %v7812_v28 = vmin.f32 %v7716_v8, 6.0 }
 0x4ca   : > { %v4874_v23 = vsel %vm2950_vm4, %v20709_v14, %v18985_v9  ;;  %v6798_v29 = vadd.f32 %v6586_v41, %v6096_v0  ;;  %v3558_v52 = vmul.f32 %v20618_v63, %v16295_v7  ;;  %v5188_v48 = vmul.f32 %v15901_v40, %v16295_v7  ;;  %v8891_v14 = vld [vmem:[#allocation2 + $0x138] sm:$0xff]  ;;  %v20710_v0 = vld [vmem:[#allocation4_spill] sm:$0xff] }
 0x4cb   : > { %v6005_v36 = vmul.f32 %v20634_v39, %v5893_v16  ;;  %v18993_v30 = vrot.slane %v16304_v27, 1  ;;  %v6910_v43 = vmul.f32 %v16290_v34, %v16295_v7  ;;  %v2503_v18 = vmul.f32 %v8891_v14, %v16261_v33  ;;  %8076 = vmatprep.mubr.f32.mxu1 %v7812_v28  ;;  %v20713_v16 = vld [vmem:[#allocation21_spill] sm:$0xff] }
 0x4cc   : > { %v7506_v60 = vadd.f32 %v7294_v47, %v6798_v29  ;;  %v16316_v41 = vmul.f32 %v20613_v51, %v3558_v52  ;;  %v16319_v8 = vmul.f32 %v20633_v62, %v5188_v48  ;;  %v16323_v9 = vmul.f32 %v20711_v1, %v20710_v0  ;;  %v20716_v47 = vld [vmem:[#allocation9_spill] sm:$0xff]  ;;  %v20717_v52 = vld [vmem:[#allocation39_spill] sm:$0xff] }
 0x4cd   : > { %v20714_v31 = vrot.slane %v20713_v16, 1  ;;  %v16331_v14 = vmul.f32 %v20715_v20, %v6910_v43  ;;  %v2615_v28 = vmul.f32 %v20716_v47, %v2503_v18  ;;  %v3557_v29 = vmul.f32 %v20711_v1, %v16295_v7  ;;  %v20720_v43 = vld [vmem:[#allocation59_spill] sm:$0xff]  ;;  %v20721_v18 = vld [vmem:[#allocation25_spill] sm:$0xff] }
 0x4ce   : > { %20712 = vst [vmem:[#allocation22_spill] sm:$0xff] %v16323_v9  ;;  %v7619_v48 = vadd.f32 %v20717_v52, %v7506_v60  ;;  %v18998_v57 = vrot.slane %v16316_v41, 2  ;;  %v16348_v47 = vmul.f32 %v20675_v25, %v20721_v18  ;;  %v20722_v60 = vld [vmem:[#allocation20_spill] sm:$0xff]  ;;  %v20724_v5 = vrot.slane %v16319_v8, 2  ;;  %v20725_v16 = vld [vmem:[#allocation17_spill] sm:$0xff] }
 0x4cf   : > { %v6596_v58 = vsel %vm2950_vm4, %v20714_v31, %v18993_v30  ;;  %v16342_v31 = vmul.f32 %v20718_v2, %v3557_v29  ;;  %v4263_v30 = vmul.f32 %v16261_v33, %v20720_v43  ;;  %v20723_v52 = vrot.slane %v20722_v60, 2  ;;  %v20728_v43 = vld [vmem:[#allocation49_spill] sm:$0xff] }
 0x4d0   : > { %v7715_v1 = vmax.f32 %v7619_v48, 0.0  ;;  %v20726_v24 = vrot.slane %v20725_v16, 2  ;;  %v20727_v2 = vrot.slane %v16323_v9, 1  ;;  %v20729_v61 = vrot.slane %v20728_v43, 1  ;;  %v20735_v43 = vld [vmem:[#allocation57_spill] sm:$0xff] }
 0x4d1   : > { %20719 = vst [vmem:[#allocation18_spill] sm:$0xff] %v16342_v31  ;;  %v3953_v0 = vsel %vm3788_vm5, %v20723_v52, %v18998_v57  ;;  %v20730_v45 = vrot.slane %v16331_v14, 2  ;;  %v20731_v60 = vrot.slane %v16102_v15, 2  ;;  %v19002_v16 = vrot.slane %v16342_v31, 2 }
 0x4d2   : > { %v5582_v29 = vsel %vm3788_vm5, %v20726_v24, %v20724_v5  ;;  %v3113_v18 = vsel %vm2950_vm4, %v20729_v61, %v20727_v2  ;;  %v4160_v48 = vadd.f32 %v3953_v0, %v3322_v56  ;;  %v7811_v17 = vmin.f32 %v7715_v1, 6.0  ;;  %v20732_v24 = vld [vmem:[#allocation23_spill] sm:$0xff]  ;;  %v20733_v56 = vld [vmem:[#allocation52_spill] sm:$0xff] }
 0x4d3   : > { %v7304_v52 = vsel %vm3788_vm5, %v20731_v60, %v20730_v45  ;;  %v3321_v57 = vadd.f32 %v3113_v18, %v2615_v28  ;;  %v4375_v5 = vmul.f32 %v20732_v24, %v4263_v30  ;;  %v19006_v9 = vrot.slane %v16348_v47, 1  ;;  %v20736_v28 = vld [vmem:[#allocation31_spill] sm:$0xff] }
 0x4d4   : > { %v5187_v61 = vmul.f32 %v20675_v25, %v16295_v7  ;;  %v4472_v2 = vadd.f32 %v4376_v53, %v4160_v48  ;;  %v20734_v0 = vrot.slane %v20733_v56, 2  ;;  %v5892_v45 = vmul.f32 %v16261_v33, %v20735_v43  ;;  %8077 = vmatmul.mubr.f32.gmra.mxu1 %v7811_v17  ;;  %v20738_v48 = vld [vmem:[#allocation28_spill] sm:$0xff] }
 0x4d5   : > { %v16386_v18 = vmul.f32 %v20736_v28, %v16365_v44  ;;  %v20737_v1 = vrot.slane %v16133_v10, 1  ;;  %v6909_v56 = vmul.f32 %v16365_v44, %v16295_v7  ;;  %v2619_v17 = vmul.f32 %v20618_v63, %v20501_v21 }
 0x4d6   : > { %v3951_v15 = vsel %vm3788_vm5, %v20734_v0, %v19002_v16  ;;  %v16394_v60 = vmul.f32 %v20738_v48, %v5187_v61  ;;  %v5081_v0 = vadd.f32 %v4874_v23, %v4472_v2  ;;  %v20739_v16 = vld [vmem:[#allocation30_spill] sm:$0xff]  ;;  %v16408_v61 = vmul.f32 %v20626_v26, %v20386_v55 }
 0x4d7   : > { %v4159_v30 = vadd.f32 %v3951_v15, %v3321_v57  ;;  %v4872_v53 = vsel %vm2950_vm4, %v20737_v1, %v19006_v9  ;;  %v6004_v31 = vmul.f32 %v20739_v16, %v5892_v45  ;;  %v19004_v28 = vrot.slane %v16386_v18, 1 }
 0x4d8   : > { %v19005_v15 = vrot.slane %v16394_v60, 2  ;;  %v16404_v10 = vmul.f32 %v20684_v19, %v6909_v56  ;;  %v5789_v1 = vadd.f32 %v5582_v29, %v5081_v0  ;;  %v20741_v23 = vrot.slane %v16151_v50, 1 }
 0x4d9   : > { %v4471_v57 = vadd.f32 %v4375_v5, %v4159_v30  ;;  %v16418_v63 = vsel %vm3378_vm2, %v16284_v49, %v19378_v54  ;;  %v4379_v5 = vmul.f32 %v15901_v40, %v20616_v32  ;;  %v20742_v30 = vrot.slane %v16147_v42, 2 }
 0x4da   : > { %20740 = vst [vmem:[#allocation47_spill] sm:$0xff] %v16404_v10  ;;  %v6594_v2 = vsel %vm2950_vm4, %v20741_v23, %v19004_v28  ;;  %v19007_v56 = vrot.slane %v16404_v10, 2  ;;  %v19008_v50 = vrot.slane %v16408_v61, 1  ;;  %v6101_v0 = vadd.f32 %v6005_v36, %v5789_v1  ;;  %v20748_v10 = vld [vmem:[#allocation6_spill] sm:$0xff] }
 0x4db   : > { %v5080_v45 = vadd.f32 %v4872_v53, %v4471_v57  ;;  %v5580_v29 = vsel %vm3788_vm5, %v20742_v30, %v19005_v15  ;;  %v3561_v23 = vmul.f32 %v20626_v26, %v16418_v63  ;;  %v16433_v49 = vmul.f32 %v16059_v38, %v20617_v59 }
 0x4dc   : > { %v5191_v53 = vmul.f32 %v16059_v38, %v16418_v63  ;;  %v20743_v42 = vrot.slane %v16169_v3, 2  ;;  %v20744_v36 = vrot.slane %v16256_v22, 1  ;;  %v6008_v1 = vmul.f32 %v16290_v34, %v20634_v39 }
 0x4dd   : > { %v5788_v57 = vadd.f32 %v5580_v29, %v5080_v45  ;;  %v6803_v28 = vadd.f32 %v6596_v58, %v6101_v0  ;;  %v16450_v9 = vmul.f32 %v20613_v51, %v3561_v23  ;;  %v19009_v45 = vrot.slane %v16433_v49, 1  ;;  %v16453_v29 = vld [vmem:[#allocation2 + $0x110] sm:$0xff] }
 0x4de   : > { %v7302_v30 = vsel %vm3788_vm5, %v20743_v42, %v19007_v56  ;;  %v3121_v26 = vsel %vm2950_vm4, %v20744_v36, %v19008_v50  ;;  %v16456_v42 = vmul.f32 %v20633_v62, %v5191_v53  ;;  %v16460_v22 = vmul.f32 %v20627_v13, %v16453_v29 }
 0x4df   : > { %v3325_v15 = vadd.f32 %v3121_v26, %v2619_v17  ;;  %v6100_v3 = vadd.f32 %v6004_v31, %v5788_v57  ;;  %v6913_v36 = vmul.f32 %v16453_v29, %v16418_v63  ;;  %v7511_v58 = vadd.f32 %v7304_v52, %v6803_v28  ;;  %v8892_v31 = vld [vmem:[#allocation2 + $0x58] sm:$0xff] }
 0x4e0   : > { %v19011_v17 = vrot.slane %v16450_v9, 2  ;;  %v20745_v0 = vrot.slane %v16265_v37, 1  ;;  %v2502_v53 = vmul.f32 %v8892_v31, %v16261_v33  ;;  %v19012_v26 = vrot.slane %v16456_v42, 2 }
 0x4e1   : > { %v6802_v57 = vadd.f32 %v6594_v2, %v6100_v3  ;;  %v19013_v56 = vrot.slane %v16460_v22, 1  ;;  %v16474_v50 = vmul.f32 %v20715_v20, %v6913_v36  ;;  %v7624_v52 = vadd.f32 %v20548_v11, %v7511_v58 }
 0x4e2   : > { %v4880_v23 = vsel %vm2950_vm4, %v20745_v0, %v19009_v45  ;;  %v20746_v28 = vrot.slane %v16316_v41, 2  ;;  %v20747_v0 = vld [vmem:[#allocation14_spill] sm:$0xff]  ;;  %v16485_v2 = vmul.f32 %v15536_v4, %v20748_v10  ;;  %v20750_v36 = vrot.slane %v16319_v8, 2  ;;  %v16499_v10 = vld [vmem:[#allocation2 + $0x60] sm:$0xff] }
 0x4e3   : > { %v2614_v45 = vmul.f32 %v20747_v0, %v2502_v53  ;;  %v7510_v3 = vadd.f32 %v7302_v30, %v6802_v57  ;;  %v20751_v41 = vrot.slane %v16304_v27, 1  ;;  %v19016_v53 = vrot.slane %v16474_v50, 2  ;;  %20752 = vst [vmem:[#allocation61_spill] sm:$0xff] %v16499_v10 }
 0x4e4   : > { %v3959_v37 = vsel %vm3788_vm5, %v20746_v28, %v19011_v17  ;;  %20749 = vst [vmem:[#allocation5_spill] sm:$0xff] %v16485_v2  ;;  %v5588_v58 = vsel %vm3788_vm5, %v20750_v36, %v19012_v26  ;;  %v7720_v17 = vmax.f32 %v7624_v52, 0.0  ;;  %v19017_v4 = vrot.slane %v16485_v2, 1  ;;  %v20762_v2 = vld [vmem:[#allocation33_spill] sm:$0xff] }
 0x4e5   : > { %v4163_v31 = vadd.f32 %v3959_v37, %v3325_v15  ;;  %v6602_v28 = vsel %vm2950_vm4, %v20751_v41, %v19013_v56  ;;  %v3556_v15 = vmul.f32 %v16499_v10, %v16295_v7  ;;  %v7623_v8 = vadd.f32 %v19364_v35, %v7510_v3  ;;  %v20753_v37 = vld [vmem:[#allocation24_spill] sm:$0xff]  ;;  %v20760_v35 = vld [vmem:[#allocation26_spill] sm:$0xff] }
 0x4e6   : > { %v4262_v57 = vmul.f32 %v16261_v33, %v15742_v6  ;;  %v16508_v27 = vmul.f32 %v15988_v46, %v20753_v37  ;;  %v7816_v52 = vmin.f32 %v7720_v17, 6.0  ;;  %v20755_v36 = vrot.slane %v16331_v14, 2  ;;  %v20757_v3 = vld [vmem:[#allocation12_spill] sm:$0xff] }
 0x4e7   : > { %v4475_v30 = vadd.f32 %v4379_v5, %v4163_v31  ;;  %v20756_v26 = vrot.slane %v16173_v12, 1  ;;  %v16521_v31 = vmul.f32 %v20757_v3, %v3556_v15  ;;  %v16523_v6 = vld [vmem:[#allocation2 + $0x300] sm:$0xff]  ;;  %v7719_v56 = vmax.f32 %v7623_v8, 0.0 }
 0x4e8   : > { %20754 = vst [vmem:[#allocation11_spill] sm:$0xff] %v16508_v27  ;;  %v7310_v41 = vsel %vm3788_vm5, %v20755_v36, %v19016_v53  ;;  %20759 = vst [vmem:[#allocation19_spill] sm:$0xff] %v16523_v6  ;;  %v4374_v10 = vmul.f32 %v20760_v35, %v4262_v57  ;;  %8797 = vmatprep.mubr.f32.mxu0 %v7816_v52  ;;  %v19024_v36 = vrot.slane %v16508_v27, 1  ;;  %v20761_v53 = vld [vmem:[#allocation54_spill] sm:$0xff]  ;;  %v20766_v52 = vld [vmem:[#allocation55_spill] sm:$0xff] }
 0x4e9   : > { %v3111_v5 = vsel %vm2950_vm4, %v20756_v26, %v19017_v4  ;;  %20758 = vst [vmem:[#allocation15_spill] sm:$0xff] %v16521_v31  ;;  %v5084_v37 = vadd.f32 %v4880_v23, %v4475_v30  ;;  %v19022_v14 = vrot.slane %v16521_v31, 2  ;;  %v5186_v12 = vmul.f32 %v15988_v46, %v16295_v7  ;;  %v20764_v23 = vld [vmem:[#allocation58_spill] sm:$0xff] }
 0x4ea   : > { %v3320_v17 = vadd.f32 %v3111_v5, %v2614_v45  ;;  %v5891_v26 = vmul.f32 %v16261_v33, %v20761_v53  ;;  %v7815_v15 = vmin.f32 %v7719_v56, 6.0  ;;  %v16534_v8 = vmul.f32 %v20762_v2, %v16523_v6  ;;  %v20768_v56 = vld [vmem:[#allocation27_spill] sm:$0xff] }
 0x4eb   : > { %v5792_v4 = vadd.f32 %v5588_v58, %v5084_v37  ;;  %v6908_v45 = vmul.f32 %v16523_v6, %v16295_v7  ;;  %v20765_v30 = vrot.slane %v20764_v23, 2  ;;  %v20767_v5 = vrot.slane %v20766_v52, 1  ;;  %v20770_v37 = vld [vmem:[#allocation29_spill] sm:$0xff] }
 0x4ec   : > { %20763 = vst [vmem:[#allocation46_spill] sm:$0xff] %v16534_v8  ;;  %v16549_v58 = vmul.f32 %v20768_v56, %v5186_v12  ;;  %v6003_v2 = vmul.f32 %v20770_v37, %v5891_v26  ;;  %8081 = vmatprep.mubr.f32.mxu1 %v7815_v15  ;;  %v19026_v31 = vrot.slane %v16534_v8, 1  ;;  %v20771_v6 = vld [vmem:[#allocation37_spill] sm:$0xff]  ;;  %v16561_v12 = vmul.f32 %v15901_v40, %v20386_v55 }
 0x4ed   : > { %v3949_v57 = vsel %vm3788_vm5, %v20765_v30, %v19022_v14  ;;  %v4870_v33 = vsel %vm2950_vm4, %v20767_v5, %v19024_v36  ;;  %v6104_v53 = vadd.f32 %v6008_v1, %v5792_v4  ;;  %v16554_v23 = vmul.f32 %v20771_v6, %v6908_v45  ;;  %v20773_v14 = vld [vmem:[#allocation3_spill] sm:$0xff]  ;;  %v20776_v45 = vld [vmem:[#allocation45_spill] sm:$0xff] }
 0x4ee   : > { %20769 = vst [vmem:[#allocation44_spill] sm:$0xff] %v16549_v58  ;;  %v4158_v7 = vadd.f32 %v3949_v57, %v3320_v17  ;;  %v19028_v30 = vrot.slane %v16549_v58, 2  ;;  %v1747_v27 = vadd.s32 224, %v20773_v14  ;;  %v1748_v52 = vadd.s32 232, %v20773_v14  ;;  %v20774_v1 = vld [vmem:[#allocation35_spill] sm:$0xff] }
 0x4ef   : > { %20772 = vst [vmem:[#allocation56_spill] sm:$0xff] %v16554_v23  ;;  %v6806_v5 = vadd.f32 %v6602_v28, %v6104_v53  ;;  %v20775_v4 = vrot.slane %v20774_v1, 1  ;;  %v19027_v15 = vrot.slane %v16554_v23, 2  ;;  %v20777_v57 = vrot.slane %v20776_v45, 2  ;;  %v20778_v53 = vld [vmem:[#allocation51_spill] sm:$0xff] }
 0x4f0   : > { %v4470_v26 = vadd.f32 %v4374_v10, %v4158_v7  ;;  %v1951_v14 = vand.u32 15, %v1747_v27  ;;  %v1958_v6 = vand.u32 15, %v1748_v52  ;;  %v19029_v56 = vrot.slane %v16561_v12, 1 }
 0x4f1   : > { %v6592_v17 = vsel %vm2950_vm4, %v20775_v4, %v19026_v31  ;;  %v5578_v36 = vsel %vm3788_vm5, %v20777_v57, %v19028_v30  ;;  %v7514_v28 = vadd.f32 %v7310_v41, %v6806_v5  ;;  %v20779_v7 = vrot.slane %v20778_v53, 2  ;;  %v16584_v31 = vld [vmem:[#allocation2 + $0x178] sm:$0xff] }
 0x4f2   : > { %v5079_v10 = vadd.f32 %v4870_v33, %v4470_v26  ;;  %v16582_v4 = vmul.f32 %v16290_v34, %v20617_v59  ;;  %vm2163_vm10 = vcmp.gt.s32.totalorder %v1951_v14, 0  ;;  %vm2260_vm11 = vcmp.lt.s32.totalorder %v1958_v6, 15  ;;  %v20781_v26 = vld [vmem:[#allocation50_spill] sm:$0xff]  ;;  %v8894_v14 = vld [vmem:[#allocation2 + $0x68] sm:$0xff] }
 0x4f3   : > { %v7300_v1 = vsel %vm3788_vm5, %v20779_v7, %v19027_v15  ;;  %v20780_v27 = vrot.slane %v16408_v61, 1  ;;  %v16593_v33 = vmul.f32 %v20627_v13, %v16584_v31  ;;  %v7627_v52 = vadd.f32 %v20548_v11, %v7514_v28 }
 0x4f4   : > { %v5787_v5 = vadd.f32 %v5578_v36, %v5079_v10  ;;  %v16597_v45 = vsel %vm2163_vm10, 1.0, %v20781_v26  ;;  %v8559_v57 = vsel %vm2260_vm11, 1.0, %v20781_v26  ;;  %v19034_v7 = vrot.slane %v16582_v4, 1 }
 0x4f5   : > { %v3127_v41 = vsel %vm2950_vm4, %v20780_v27, %v19029_v56  ;;  %20782 = vst [vmem:[#allocation13_spill] sm:$0xff] %v16597_v45  ;;  %v2510_v6 = vmul.f32 %v8894_v14, %v16597_v45  ;;  %v16601_v53 = vrot.slane %v8559_v57, 6  ;;  %v4270_v61 = vmul.f32 %v16597_v45, %v16059_v38 }
 0x4f6   : > { %v7723_v27 = vmax.f32 %v7627_v52, 0.0  ;;  %v6099_v15 = vadd.f32 %v6003_v2, %v5787_v5  ;;  %v5899_v36 = vmul.f32 %v16597_v45, %v16453_v29  ;;  %v20784_v30 = vrot.slane %v16433_v49, 1 }
 0x4f7   : > { %v2622_v10 = vmul.f32 %v20501_v21, %v2510_v6  ;;  %v16613_v14 = vsel %vm3378_vm2, %v19378_v54, %v16601_v53  ;;  %v4382_v57 = vmul.f32 %v20616_v32, %v4270_v61  ;;  %v20785_v26 = vrot.slane %v16593_v33, 1 }
 0x4f8   : > { %20783 = vst [vmem:[#allocation34_spill] sm:$0xff] %v16613_v14  ;;  %v4886_v2 = vsel %vm2950_vm4, %v20784_v30, %v19034_v7  ;;  %v7819_v52 = vmin.f32 %v7723_v27, 6.0  ;;  %v6801_v5 = vadd.f32 %v6592_v17, %v6099_v15  ;;  %v3564_v56 = vmul.f32 %v15901_v40, %v16613_v14  ;;  %v20787_v27 = vld [vmem:[#allocation9_spill] sm:$0xff] }
 0x4f9   : > { %v5194_v6 = vmul.f32 %v16290_v34, %v16613_v14  ;;  %v3328_v28 = vadd.f32 %v3127_v41, %v2622_v10  ;;  %v6011_v45 = vmul.f32 %v20634_v39, %v5899_v36  ;;  %v20786_v61 = vrot.slane %v16460_v22, 1  ;;  %v8895_v41 = vld [vmem:[#allocation2 + $0x70] sm:$0xff]  ;;  %v16645_v22 = vld [vmem:[#allocation2 + $0x2c0] sm:$0xff] }
 0x4fa   : > { %v6916_v49 = vmul.f32 %v16584_v31, %v16613_v14  ;;  %8798 = vmatmul.mubr.f32.gmra.mxu0 %v7819_v52  ;;  %v7509_v30 = vadd.f32 %v7300_v1, %v6801_v5  ;;  %v16636_v17 = vmul.f32 %v20613_v51, %v3564_v56  ;;  %v2618_v36 = vmul.f32 %v8895_v41, %v20787_v27  ;;  %v20790_v52 = vld [vmem:[#allocation39_spill] sm:$0xff]  ;;  %v16678_v14 = vld [vmem:[#allocation2 + $0x1b0] sm:$0xff] }
 0x4fb   : > { %v16631_v23 = vsel %vm2950_vm4, %v20786_v61, %v20785_v26  ;;  %v16639_v15 = vmul.f32 %v20633_v62, %v5194_v6  ;;  %20788 = vst [vmem:[#allocation53_spill] sm:$0xff] %v16645_v22  ;;  %v20789_v26 = vld [vmem:[#allocation4_spill] sm:$0xff]  ;;  %v3560_v1 = vmul.f32 %v16645_v22, %v16418_v63  ;;  %v4378_v56 = vmul.f32 %v20675_v25, %v20732_v24 }
 0x4fc   : > { %v16643_v10 = vmul.f32 %v20715_v20, %v6916_v49  ;;  %v16649_v61 = vmul.f32 %v16645_v22, %v20789_v26  ;;  %v7622_v5 = vadd.f32 %v20790_v52, %v7509_v30  ;;  %v3964_v6 = vrot.slane %v16636_v17, 2  ;;  %v20791_v49 = vld [vmem:[#allocation25_spill] sm:$0xff]  ;;  %v20792_v26 = vld [vmem:[#allocation8_spill] sm:$0xff] }
 0x4fd   : > { %v19042_v41 = vrot.slane %v16639_v15, 2  ;;  %v16660_v7 = vmul.f32 %v20735_v43, %v20791_v49  ;;  %v16665_v58 = vmul.f32 %v20792_v26, %v3560_v1  ;;  %v5190_v25 = vmul.f32 %v20735_v43, %v16418_v63 }
 0x4fe   : > { %v7718_v24 = vmax.f32 %v7622_v5, 0.0  ;;  %v20793_v30 = vrot.slane %v16450_v9, 2  ;;  %v20794_v49 = vrot.slane %v16456_v42, 2  ;;  %v20795_v26 = vrot.slane %v16643_v10, 2 }
 0x4ff   : > { %v19043_v27 = vrot.slane %v16660_v7, 1  ;;  %v20796_v43 = vrot.slane %v16474_v50, 2  ;;  %v20797_v9 = vrot.slane %v16649_v61, 1  ;;  %v19046_v42 = vrot.slane %v16665_v58, 2 }
 0x500   : > { %v3965_v17 = vsel %vm3788_vm5, %v20793_v30, %v3964_v6  ;;  %v5594_v52 = vsel %vm3788_vm5, %v20794_v49, %v19042_v41  ;;  %v20798_v30 = vld [vmem:[#allocation22_spill] sm:$0xff]  ;;  %v7814_v49 = vmin.f32 %v7718_v24, 6.0  ;;  %v16697_v50 = vmul.f32 %v20738_v48, %v5190_v25 }
 0x501   : > { %v4166_v1 = vadd.f32 %v3965_v17, %v3328_v28  ;;  %v7316_v5 = vsel %vm3788_vm5, %v20796_v43, %v20795_v26  ;;  %v20799_v22 = vrot.slane %v20798_v30, 1  ;;  %v20800_v28 = vrot.slane %v16348_v47, 1  ;;  %v20802_v26 = vld [vmem:[#allocation18_spill] sm:$0xff] }
 0x502   : > { %20801 = vst [vmem:[#allocation43_spill] sm:$0xff] %v16697_v50  ;;  %v20803_v30 = vrot.slane %v20802_v26, 2  ;;  %v6007_v24 = vmul.f32 %v16365_v44, %v20739_v16  ;;  %8082 = vmatmul.mubr.f32.gmra.mxu1 %v7814_v49  ;;  %v2625_v25 = vmul.f32 %v15901_v40, %v20501_v21  ;;  %v16718_v26 = vmul.f32 %v16059_v38, %v20386_v55 }
 0x503   : > { %v3119_v8 = vsel %vm2950_vm4, %v20799_v22, %v20797_v9  ;;  %v4878_v17 = vsel %vm2950_vm4, %v20800_v28, %v19043_v27  ;;  %v4478_v43 = vadd.f32 %v4382_v57, %v4166_v1  ;;  %v19044_v9 = vrot.slane %v16697_v50, 2 }
 0x504   : > { %v3324_v41 = vadd.f32 %v3119_v8, %v2618_v36  ;;  %v3957_v22 = vsel %vm3788_vm5, %v20803_v30, %v19046_v42  ;;  %v20804_v8 = vld [vmem:[#allocation31_spill] sm:$0xff]  ;;  %v6912_v57 = vmul.f32 %v16678_v14, %v16418_v63  ;;  %v16723_v49 = vsel %vm3378_vm2, %v16601_v53, %v19378_v54 }
 0x505   : > { %v16708_v36 = vmul.f32 %v20804_v8, %v16678_v14  ;;  %v5087_v1 = vadd.f32 %v4886_v2, %v4478_v43  ;;  %20806 = vst [vmem:[#allocation7_spill] sm:$0xff] %v16723_v49  ;;  %v20807_v30 = vrot.slane %v16394_v60, 2  ;;  %v3567_v2 = vmul.f32 %v16059_v38, %v16723_v49  ;;  %v20812_v42 = vld [vmem:[#allocation47_spill] sm:$0xff] }
 0x506   : > { %v4162_v47 = vadd.f32 %v3957_v22, %v3324_v41  ;;  %v16731_v40 = vmul.f32 %v20684_v19, %v6912_v57  ;;  %v20809_v27 = vrot.slane %v16386_v18, 1  ;;  %v4385_v60 = vmul.f32 %v16290_v34, %v20616_v32  ;;  %v16753_v18 = vpop.f32.mrf.mxu1 }
 0x507   : > { %20805 = vst [vmem:[#allocation60_spill] sm:$0xff] %v16708_v36  ;;  %v19045_v28 = vrot.slane %v16708_v36, 1  ;;  %v5586_v22 = vsel %vm3788_vm5, %v20807_v30, %v19044_v9  ;;  %v5795_v43 = vadd.f32 %v5594_v52, %v5087_v1  ;;  %v16745_v57 = vmul.f32 %v20613_v51, %v3567_v2  ;;  %v16751_v1 = vld [vmem:[#allocation2 + $0x218] sm:$0xff]  ;;  %20810 = vst [vmem:[#allocation21_spill] sm:$0xff] %v16753_v18 }
 0x508   : > { %v4474_v41 = vadd.f32 %v4378_v56, %v4162_v47  ;;  %20808 = vst [vmem:[#allocation48_spill] sm:$0xff] %v16731_v40  ;;  %v19049_v56 = vrot.slane %v16718_v26, 1  ;;  %v19050_v30 = vrot.slane %v16731_v40, 2  ;;  %v16749_v52 = vmul.f32 %v16453_v29, %v20617_v59  ;;  %v7955_v36 = vpop.f32.mrf.mxu1 }
 0x509   : > { %v6600_v53 = vsel %vm2950_vm4, %v20809_v27, %v19045_v28  ;;  %v6107_v27 = vadd.f32 %v6011_v45, %v5795_v43  ;;  %v20811_v9 = vrot.slane %v16561_v12, 1  ;;  %v6014_v2 = vmul.f32 %v16584_v31, %v20634_v39  ;;  %v20814_v36 = vld [vmem:[#allocation61_spill] sm:$0xff] }
 0x50a   : > { %v5083_v47 = vadd.f32 %v4878_v17, %v4474_v41  ;;  %v5197_v41 = vmul.f32 %v16453_v29, %v16723_v49  ;;  %v20813_v50 = vrot.slane %v20812_v42, 2  ;;  %v19051_v43 = vrot.slane %v16745_v57, 2 }
 0x50b   : > { %v3133_v17 = vsel %vm2950_vm4, %v20811_v9, %v19049_v56  ;;  %v6809_v12 = vadd.f32 %v16631_v23, %v6107_v27  ;;  %v19054_v9 = vrot.slane %v16749_v52, 1  ;;  %v2617_v23 = vmul.f32 %v20814_v36, %v20747_v0  ;;  %v20817_v36 = vld [vmem:[#allocation6_spill] sm:$0xff] }
 0x50c   : > { %v5791_v28 = vadd.f32 %v5586_v22, %v5083_v47  ;;  %v7308_v18 = vsel %vm3788_vm5, %v20813_v50, %v19050_v30  ;;  %v3331_v45 = vadd.f32 %v3133_v17, %v2625_v25  ;;  %v16773_v56 = vmul.f32 %v20633_v62, %v5197_v41  ;;  %v16786_v25 = vpop.f32.mrf.mxu1 }
 0x50d   : > { %v16777_v22 = vmul.f32 %v20627_v13, %v16751_v1  ;;  %v3971_v42 = vsel %vm3788_vm5, %v3964_v6, %v19051_v43  ;;  %v6919_v50 = vmul.f32 %v16751_v1, %v16723_v49  ;;  %20815 = vst [vmem:[#allocation59_spill] sm:$0xff] %v16786_v25  ;;  %v7517_v27 = vadd.f32 %v7316_v5, %v6809_v12  ;;  %v16798_v49 = vld [vmem:[#allocation2 + $0x230] sm:$0xff] }
 0x50e   : > { %v6103_v47 = vadd.f32 %v6007_v24, %v5791_v28  ;;  %v4169_v17 = vadd.f32 %v3971_v42, %v3331_v45  ;;  %v20816_v41 = vrot.slane %v16582_v4, 1  ;;  %v19055_v28 = vrot.slane %v16773_v56, 2  ;;  %v7960_v45 = vpop.f32.mrf.mxu1  ;;  %v16841_v25 = vld [vmem:[#allocation2 + $0x250] sm:$0xff] }
 0x50f   : > { %v19056_v6 = vrot.slane %v16777_v22, 1  ;;  %v16796_v43 = vmul.f32 %v20715_v20, %v6919_v50  ;;  %v16802_v5 = vmul.f32 %v16798_v49, %v20817_v36  ;;  %v7630_v12 = vadd.f32 %v20548_v11, %v7517_v27 }
 0x510   : > { %v4892_v24 = vsel %vm2950_vm4, %v20816_v41, %v19054_v9  ;;  %v6805_v30 = vadd.f32 %v6600_v53, %v6103_v47  ;;  %v4481_v4 = vadd.f32 %v4385_v60, %v4169_v17  ;;  %v20819_v42 = vrot.slane %v16639_v15, 2  ;;  %v16819_v27 = vpop.f32.mrf.mxu1 }
 0x511   : > { %20818 = vst [vmem:[#allocation20_spill] sm:$0xff] %v16802_v5  ;;  %v3559_v47 = vmul.f32 %v16798_v49, %v16418_v63  ;;  %v20820_v41 = vrot.slane %v16593_v33, 1  ;;  %v19060_v45 = vrot.slane %v16796_v43, 2  ;;  %v19059_v60 = vrot.slane %v16802_v5, 1  ;;  %20821 = vst [vmem:[#allocation17_spill] sm:$0xff] %v16819_v27 }
 0x512   : > { %v5600_v53 = vsel %vm3788_vm5, %v20819_v42, %v19055_v28  ;;  %v7513_v50 = vadd.f32 %v7308_v18, %v6805_v30  ;;  %v7726_v17 = vmax.f32 %v7630_v12, 0.0  ;;  %v5090_v15 = vadd.f32 %v4892_v24, %v4481_v4  ;;  %v20823_v18 = vld [vmem:[#allocation40_spill] sm:$0xff]  ;;  %v20828_v4 = vld [vmem:[#allocation54_spill] sm:$0xff] }
 0x513   : > { %v6614_v9 = vsel %vm2950_vm4, %v20820_v41, %v19056_v6  ;;  %v16822_v42 = vmul.f32 %v20757_v3, %v3559_v47  ;;  %v4377_v30 = vmul.f32 %v15988_v46, %v20760_v35  ;;  %v20824_v33 = vrot.slane %v16643_v10, 2  ;;  %v20825_v6 = vld [vmem:[#allocation5_spill] sm:$0xff]  ;;  %v20827_v12 = vld [vmem:[#allocation24_spill] sm:$0xff]  ;;  %v7965_v46 = vpop.f32.mrf.mxu1 }
 0x514   : > { %v7626_v28 = vadd.f32 %v20823_v18, %v7513_v50  ;;  %v20826_v27 = vrot.slane %v20825_v6, 1  ;;  %v16839_v47 = vmul.f32 %v20828_v4, %v20827_v12  ;;  %v7822_v50 = vmin.f32 %v7726_v17, 6.0  ;;  %v20831_v17 = vld [vmem:[#allocation15_spill] sm:$0xff] }
 0x515   : > { %20822 = vst [vmem:[#allocation49_spill] sm:$0xff] %v16822_v42  ;;  %v7322_v41 = vsel %vm3788_vm5, %v20824_v33, %v19060_v45  ;;  %v5798_v18 = vadd.f32 %v5600_v53, %v5090_v15  ;;  %v19064_v10 = vrot.slane %v16822_v42, 2  ;;  %v5189_v6 = vmul.f32 %v20828_v4, %v16418_v63  ;;  %v16849_v45 = vpop.f32.mrf.mxu1  ;;  %v20839_v12 = vld [vmem:[#allocation3_spill] sm:$0xff] }
 0x516   : > { %v3117_v24 = vsel %vm2950_vm4, %v20826_v27, %v19059_v60  ;;  %v7722_v40 = vmax.f32 %v7626_v28, 0.0  ;;  %v20829_v27 = vld [vmem:[#allocation19_spill] sm:$0xff]  ;;  %20830 = vst [vmem:[#allocation52_spill] sm:$0xff] %v16849_v45  ;;  %8800 = vmatprep.mubr.f32.mxu0 %v7822_v50  ;;  %v20832_v53 = vrot.slane %v20831_v17, 2  ;;  %v20833_v28 = vld [vmem:[#allocation33_spill] sm:$0xff] }
 0x517   : > { %v3323_v35 = vadd.f32 %v3117_v24, %v2617_v23  ;;  %v6006_v60 = vmul.f32 %v20829_v27, %v20770_v37  ;;  %v6110_v5 = vadd.f32 %v6014_v2, %v5798_v18  ;;  %v16858_v15 = vmul.f32 %v20833_v28, %v16841_v25  ;;  %v20835_v45 = vld [vmem:[#allocation11_spill] sm:$0xff]  ;;  %v7970_v17 = vpop.f32.mrf.mxu1  ;;  %v20838_v28 = vld [vmem:[#allocation37_spill] sm:$0xff] }
 0x518   : > { %v3955_v23 = vsel %vm3788_vm5, %v20832_v53, %v19064_v10  ;;  %v6911_v24 = vmul.f32 %v16841_v25, %v16418_v63  ;;  %v7818_v46 = vmin.f32 %v7722_v40, 6.0  ;;  %v20834_v37 = vrot.slane %v16839_v47, 1  ;;  %v20837_v18 = vld [vmem:[#allocation27_spill] sm:$0xff] }
 0x519   : > { %v4161_v33 = vadd.f32 %v3955_v23, %v3323_v35  ;;  %v20836_v50 = vrot.slane %v20835_v45, 1  ;;  %v16868_v42 = vmul.f32 %v20837_v18, %v5189_v6  ;;  %v6812_v53 = vadd.f32 %v6614_v9, %v6110_v5  ;;  %v16881_v6 = vpop.f32.mrf.mxu1  ;;  %v20842_v5 = vld [vmem:[#allocation46_spill] sm:$0xff] }
 0x51a   : > { %v19066_v10 = vrot.slane %v16858_v15, 1  ;;  %v16872_v27 = vmul.f32 %v20838_v28, %v6911_v24  ;;  %v1749_v63 = vadd.s32 240, %v20839_v12  ;;  %8086 = vmatprep.mubr.f32.mxu1 %v7818_v46  ;;  %v1750_v45 = vadd.s32 248, %v20839_v12  ;;  %20841 = vst [vmem:[#allocation14_spill] sm:$0xff] %v16881_v6  ;;  %v20844_v12 = vld [vmem:[#allocation44_spill] sm:$0xff] }
 0x51b   : > { %v4876_v2 = vsel %vm2950_vm4, %v20836_v50, %v20834_v37  ;;  %v4473_v35 = vadd.f32 %v4377_v30, %v4161_v33  ;;  %v19069_v40 = vrot.slane %v16868_v42, 2  ;;  %v16879_v37 = vmul.f32 %v16290_v34, %v20386_v55 }
 0x51c   : > { %v7520_v9 = vadd.f32 %v7322_v41, %v6812_v53  ;;  %v20843_v23 = vrot.slane %v20842_v5, 1  ;;  %v19068_v46 = vrot.slane %v16872_v27, 2  ;;  %v1965_v30 = vand.u32 15, %v1749_v63  ;;  %v7975_v41 = vpop.f32.mrf.mxu1  ;;  %v20846_v5 = vld [vmem:[#allocation56_spill] sm:$0xff] }
 0x51d   : > { %20840 = vst [vmem:[#allocation28_spill] sm:$0xff] %v16879_v37  ;;  %v5082_v33 = vadd.f32 %v4876_v2, %v4473_v35  ;;  %v20845_v50 = vrot.slane %v20844_v12, 2  ;;  %v1972_v55 = vand.u32 15, %v1750_v45  ;;  %v19067_v6 = vrot.slane %v16879_v37, 1  ;;  %v20849_v35 = vld [vmem:[#allocation50_spill] sm:$0xff] }
 0x51e   : > { %v6598_v24 = vsel %vm2950_vm4, %v20843_v23, %v19066_v10  ;;  %v7633_v53 = vadd.f32 %v20548_v11, %v7520_v9  ;;  %v20847_v23 = vrot.slane %v20846_v5, 2  ;;  %vm2165_vm12 = vcmp.gt.s32.totalorder %v1965_v30, 0 }
 0x51f   : > { %v5584_v17 = vsel %vm3788_vm5, %v20845_v50, %v19069_v40  ;;  %v16903_v2 = vmul.f32 %v16584_v31, %v20617_v59  ;;  %v16906_v12 = vsel %vm2165_vm12, 1.0, %v20849_v35  ;;  %vm2262_vm13 = vcmp.lt.s32.totalorder %v1972_v55, 15  ;;  %v16913_v50 = vpop.f32.mrf.mxu1 }
 0x520   : > { %v7306_v10 = vsel %vm3788_vm5, %v20847_v23, %v19068_v46  ;;  %v5790_v63 = vadd.f32 %v5584_v17, %v5082_v33  ;;  %20850 = vst [vmem:[#allocation55_spill] sm:$0xff] %v16906_v12  ;;  %v20851_v45 = vrot.slane %v16718_v26, 1  ;;  %20852 = vst [vmem:[#allocation35_spill] sm:$0xff] %v16913_v50  ;;  %v7729_v41 = vmax.f32 %v7633_v53, 0.0  ;;  %v20866_v50 = vld [vmem:[#allocation39_spill] sm:$0xff] }
 0x521   : > { %20848 = vst [vmem:[#allocation58_spill] sm:$0xff] %v16903_v2  ;;  %v8560_v30 = vsel %vm2262_vm13, 1.0, %v20849_v35  ;;  %v2516_v5 = vmul.f32 %v16906_v12, %v16059_v38  ;;  %v4276_v33 = vmul.f32 %v16906_v12, %v16453_v29  ;;  %v19070_v55 = vrot.slane %v16903_v2, 1 }
 0x522   : > { %v3139_v9 = vsel %vm2950_vm4, %v20851_v45, %v19067_v6  ;;  %v6102_v17 = vadd.f32 %v6006_v60, %v5790_v63  ;;  %v16920_v23 = vrot.slane %v8560_v30, 6  ;;  %v5905_v26 = vmul.f32 %v16906_v12, %v16751_v1  ;;  %v7980_v45 = vpop.f32.mrf.mxu1 }
 0x523   : > { %v7825_v6 = vmin.f32 %v7729_v41, 6.0  ;;  %v2628_v53 = vmul.f32 %v20501_v21, %v2516_v5  ;;  %v4388_v46 = vmul.f32 %v20616_v32, %v4276_v33  ;;  %v16929_v38 = vmul.f32 %v20849_v35, %v20627_v13  ;;  %v20871_v13 = vld [vmem:[#allocation57_spill] sm:$0xff] }
 0x524   : > { %v6804_v40 = vadd.f32 %v6598_v24, %v6102_v17  ;;  %v16934_v29 = vsel %vm3378_vm2, %v19378_v54, %v16920_v23  ;;  %v20855_v1 = vrot.slane %v16749_v52, 1  ;;  %v16942_v63 = vmul.f32 %v20634_v39, %v5905_v26  ;;  %v16944_v41 = vpop.f32.mrf.mxu1  ;;  %v20858_v17 = vld [vmem:[#allocation13_spill] sm:$0xff] }
 0x525   : > { %20853 = vst [vmem:[#allocation45_spill] sm:$0xff] %v16929_v38  ;;  %20854 = vst [vmem:[#allocation51_spill] sm:$0xff] %v16934_v29  ;;  %8801 = vmatmul.mubr.f32.gmra.mxu0 %v7825_v6  ;;  %v3334_v30 = vadd.f32 %v3139_v9, %v2628_v53  ;;  %v3570_v24 = vmul.f32 %v16290_v34, %v16934_v29  ;;  %v5200_v54 = vmul.f32 %v16584_v31, %v16934_v29  ;;  %v20859_v26 = vld [vmem:[#allocation53_spill] sm:$0xff]  ;;  %v20860_v6 = vld [vmem:[#allocation4_spill] sm:$0xff] }
 0x526   : > { %v4898_v60 = vsel %vm2950_vm4, %v20855_v1, %v19070_v55  ;;  %20856 = vst [vmem:[#allocation22_spill] sm:$0xff] %v16944_v41  ;;  %v7512_v33 = vadd.f32 %v7306_v10, %v6804_v40  ;;  %v16953_v52 = vmul.f32 %v20849_v35, %v16934_v29  ;;  %v2509_v45 = vmul.f32 %v20859_v26, %v20858_v17  ;;  %v16957_v1 = vld [vmem:[#allocation2 + $0x160] sm:$0xff]  ;;  %v7985_v53 = vpop.f32.mrf.mxu1  ;;  %v20865_v26 = vld [vmem:[#allocation34_spill] sm:$0xff] }
 0x527   : > { %v16961_v9 = vmul.f32 %v16957_v1, %v20860_v6  ;;  %v16964_v55 = vmul.f32 %v20613_v51, %v3570_v24  ;;  %v16967_v5 = vmul.f32 %v20633_v62, %v5200_v54  ;;  %v20863_v10 = vrot.slane %v16929_v38, 1  ;;  %v20868_v24 = vld [vmem:[#allocation9_spill] sm:$0xff] }
 0x528   : > { %20857 = vst [vmem:[#allocation18_spill] sm:$0xff] %v16953_v52  ;;  %v20864_v40 = vrot.slane %v16777_v22, 1  ;;  %v3563_v41 = vmul.f32 %v16957_v1, %v20865_v26  ;;  %v7625_v29 = vadd.f32 %v20866_v50, %v7512_v33  ;;  %v16981_v53 = vmul.f32 %v20715_v20, %v16953_v52  ;;  %v16985_v2 = vpop.f32.mrf.mxu1 }
 0x529   : > { %20861 = vst [vmem:[#allocation31_spill] sm:$0xff] %v16964_v55  ;;  %20862 = vst [vmem:[#allocation47_spill] sm:$0xff] %v16967_v5  ;;  %v2621_v12 = vmul.f32 %v20868_v24, %v2509_v45  ;;  %v19084_v54 = vrot.slane %v16961_v9, 1  ;;  %v4269_v33 = vmul.f32 %v20858_v17, %v20871_v13  ;;  %v20872_v45 = vrot.slane %v16649_v61, 1 }
 0x52a   : > { %v16974_v35 = vsel %vm2950_vm4, %v20864_v40, %v20863_v10  ;;  %20867 = vst [vmem:[#allocation61_spill] sm:$0xff] %v16981_v53  ;;  %20869 = vst [vmem:[#allocation5_spill] sm:$0xff] %v16985_v2  ;;  %v20870_v40 = vld [vmem:[#allocation8_spill] sm:$0xff]  ;;  %v7721_v62 = vmax.f32 %v7625_v29, 0.0  ;;  %v20873_v2 = vld [vmem:[#allocation25_spill] sm:$0xff]  ;;  %v7990_v10 = vpop.f32.mrf.mxu1  ;;  %v20875_v39 = vrot.slane %v16745_v57, 2 }
 0x52b   : > { %v16990_v38 = vmul.f32 %v20870_v40, %v3563_v41  ;;  %v3125_v20 = vsel %vm2950_vm4, %v20872_v45, %v19084_v54  ;;  %v17002_v22 = vmul.f32 %v16365_v44, %v20873_v2  ;;  %v20874_v41 = vrot.slane %v16964_v55, 2  ;;  %v17015_v54 = vld [vmem:[#allocation2 + $0x20] sm:$0xff] }
 0x52c   : > { %v20876_v29 = vrot.slane %v16967_v5, 2  ;;  %v20877_v52 = vrot.slane %v16773_v56, 2  ;;  %v3327_v61 = vadd.f32 %v3125_v20, %v2621_v12  ;;  %v7817_v59 = vmin.f32 %v7721_v62, 6.0  ;;  %v17023_v5 = vpop.f32.mrf.mxu1 }
 0x52d   : > { %v3977_v13 = vsel %vm3788_vm5, %v20875_v39, %v20874_v41  ;;  %v19089_v45 = vrot.slane %v16990_v38, 2  ;;  %v20878_v10 = vrot.slane %v16981_v53, 2  ;;  %v20879_v55 = vrot.slane %v16796_v43, 2  ;;  %v20880_v39 = vld [vmem:[#allocation23_spill] sm:$0xff]  ;;  %20881 = vst [vmem:[#allocation54_spill] sm:$0xff] %v17023_v5 }
 0x52e   : > { %v5606_v37 = vsel %vm3788_vm5, %v20877_v52, %v20876_v29  ;;  %v4172_v51 = vadd.f32 %v3977_v13, %v3334_v30  ;;  %v4381_v41 = vmul.f32 %v20880_v39, %v4269_v33  ;;  %v20882_v20 = vrot.slane %v16665_v58, 2  ;;  %8087 = vmatmul.mubr.f32.gmra.mxu1 %v7817_v59  ;;  %v7995_v33 = vpop.f32.mrf.mxu1 }
 0x52f   : > { %v7328_v57 = vsel %vm3788_vm5, %v20879_v55, %v20878_v10  ;;  %v19090_v12 = vrot.slane %v17002_v22, 1  ;;  %v5193_v62 = vmul.f32 %v16365_v44, %v20865_v26  ;;  %v5898_v43 = vmul.f32 %v20858_v17, %v16678_v14 }
 0x530   : > { %v3963_v56 = vsel %vm3788_vm5, %v20882_v20, %v19089_v45  ;;  %v4484_v55 = vadd.f32 %v4388_v46, %v4172_v51  ;;  %v17037_v52 = vmul.f32 %v20804_v8, %v17015_v54  ;;  %v6915_v58 = vmul.f32 %v17015_v54, %v20865_v26  ;;  %v17056_v33 = vpop.f32.mrf.mxu1 }
 0x531   : > { %v4165_v30 = vadd.f32 %v3963_v56, %v3327_v61  ;;  %v20883_v13 = vrot.slane %v16660_v7, 1  ;;  %v17047_v10 = vmul.f32 %v20738_v48, %v5193_v62  ;;  %v6010_v59 = vmul.f32 %v20739_v16, %v5898_v43  ;;  %20884 = vst [vmem:[#allocation15_spill] sm:$0xff] %v17056_v33  ;;  %v17060_v62 = vld [vmem:[#allocation2 + $0x340] sm:$0xff] }
 0x532   : > { %v2508_v51 = vmul.f32 %v16798_v49, %v20858_v17  ;;  %v5093_v46 = vadd.f32 %v4898_v60, %v4484_v55  ;;  %v19092_v20 = vrot.slane %v17037_v52, 1  ;;  %v17054_v56 = vmul.f32 %v20684_v19, %v6915_v58  ;;  %v20886_v55 = vld [vmem:[#allocation60_spill] sm:$0xff] }
 0x533   : > { %v4884_v29 = vsel %vm2950_vm4, %v20883_v13, %v19090_v12  ;;  %v4477_v61 = vadd.f32 %v4381_v41, %v4165_v30  ;;  %v19093_v7 = vrot.slane %v17047_v10, 2  ;;  %v17064_v43 = vmul.f32 %v17060_v62, %v20817_v36  ;;  %v20888_v12 = vld [vmem:[#allocation43_spill] sm:$0xff] }
 0x534   : > { %v2620_v13 = vmul.f32 %v20747_v0, %v2508_v51  ;;  %v3562_v49 = vmul.f32 %v17060_v62, %v20865_v26  ;;  %v5801_v60 = vadd.f32 %v5606_v37, %v5093_v46  ;;  %v20887_v30 = vrot.slane %v20886_v55, 1  ;;  %v8000_v51 = vpop.f32.mrf.mxu1  ;;  %v20890_v55 = vld [vmem:[#allocation48_spill] sm:$0xff] }
 0x535   : > { %20885 = vst [vmem:[#allocation11_spill] sm:$0xff] %v17064_v43  ;;  %v5086_v41 = vadd.f32 %v4884_v29, %v4477_v61  ;;  %v19095_v45 = vrot.slane %v17054_v56, 2  ;;  %v20889_v33 = vrot.slane %v20888_v12, 2  ;;  %v19098_v53 = vrot.slane %v17064_v43, 1  ;;  %v20892_v12 = vld [vmem:[#allocation24_spill] sm:$0xff]  ;;  %v20898_v43 = vld [vmem:[#allocation49_spill] sm:$0xff] }
 0x536   : > { %v6606_v58 = vsel %vm2950_vm4, %v20887_v30, %v19092_v20  ;;  %v17081_v37 = vmul.f32 %v20757_v3, %v3562_v49  ;;  %v4268_v29 = vmul.f32 %v20858_v17, %v20828_v4  ;;  %v6113_v46 = vadd.f32 %v16942_v63, %v5801_v60  ;;  %v20893_v20 = vld [vmem:[#allocation19_spill] sm:$0xff]  ;;  %v17097_v49 = vpop.f32.mrf.mxu1  ;;  %v20895_v4 = vld [vmem:[#allocation20_spill] sm:$0xff]  ;;  %v20897_v60 = vld [vmem:[#allocation26_spill] sm:$0xff] }
 0x537   : > { %v5592_v5 = vsel %vm3788_vm5, %v20889_v33, %v19093_v7  ;;  %v20891_v30 = vrot.slane %v20890_v55, 2  ;;  %v17093_v33 = vmul.f32 %v20893_v20, %v20892_v12  ;;  %v17095_v7 = vld [vmem:[#allocation2 + $0x80] sm:$0xff]  ;;  %20894 = vst [vmem:[#allocation27_spill] sm:$0xff] %v17097_v49  ;;  %v20896_v3 = vrot.slane %v20895_v4, 1 }
 0x538   : > { %v5794_v61 = vadd.f32 %v5592_v5, %v5086_v41  ;;  %v19100_v5 = vrot.slane %v17081_v37, 2  ;;  %v4380_v41 = vmul.f32 %v20897_v60, %v4268_v29  ;;  %v5192_v55 = vmul.f32 %v20893_v20, %v20865_v26  ;;  %v8005_v49 = vpop.f32.mrf.mxu1  ;;  %v20900_v20 = vld [vmem:[#allocation33_spill] sm:$0xff] }
 0x539   : > { %v7314_v51 = vsel %vm3788_vm5, %v20891_v30, %v19095_v45  ;;  %v3123_v63 = vsel %vm2950_vm4, %v20896_v3, %v19098_v53  ;;  %v6815_v30 = vadd.f32 %v16974_v35, %v6113_v46  ;;  %v19103_v36 = vrot.slane %v17093_v33, 1 }
 0x53a   : > { %v6106_v45 = vadd.f32 %v6010_v59, %v5794_v61  ;;  %v3326_v12 = vadd.f32 %v3123_v63, %v2620_v13  ;;  %v20899_v4 = vrot.slane %v20898_v43, 2  ;;  %v17116_v53 = vmul.f32 %v20837_v18, %v5192_v55  ;;  %v17129_v49 = vpop.f32.mrf.mxu1  ;;  %v20903_v55 = vld [vmem:[#allocation29_spill] sm:$0xff] }
 0x53b   : > { %v5897_v29 = vmul.f32 %v20858_v17, %v16841_v25  ;;  %v17122_v35 = vmul.f32 %v20900_v20, %v17095_v7  ;;  %v7523_v59 = vadd.f32 %v7328_v57, %v6815_v30  ;;  %v20901_v61 = vrot.slane %v16839_v47, 1  ;;  %20902 = vst [vmem:[#allocation37_spill] sm:$0xff] %v17129_v49 }
 0x53c   : > { %v3961_v3 = vsel %vm3788_vm5, %v20899_v4, %v19100_v5  ;;  %v6808_v13 = vadd.f32 %v6606_v58, %v6106_v45  ;;  %v19102_v63 = vrot.slane %v17116_v53, 2  ;;  %v6914_v5 = vmul.f32 %v17095_v7, %v20865_v26 }
 0x53d   : > { %v4164_v46 = vadd.f32 %v3961_v3, %v3326_v12  ;;  %v4882_v43 = vsel %vm2950_vm4, %v20901_v61, %v19103_v36  ;;  %v6009_v4 = vmul.f32 %v20903_v55, %v5897_v29  ;;  %v19101_v17 = vrot.slane %v17122_v35, 1  ;;  %v8010_v12 = vpop.f32.mrf.mxu1  ;;  %v20907_v61 = vld [vmem:[#allocation7_spill] sm:$0xff] }
 0x53e   : > { %v7636_v45 = vadd.f32 %v20548_v11, %v7523_v59  ;;  %v7516_v57 = vadd.f32 %v7314_v51, %v6808_v13  ;;  %v2624_v47 = vmul.f32 %v16957_v1, %v20868_v24  ;;  %v20904_v30 = vrot.slane %v16868_v42, 2  ;;  %v17152_v51 = vld [vmem:[#allocation2 + $0x278] sm:$0xff]  ;;  %v20906_v13 = vld [vmem:[#allocation40_spill] sm:$0xff] }
 0x53f   : > { %v4476_v58 = vadd.f32 %v4380_v41, %v4164_v46  ;;  %v20905_v29 = vrot.slane %v16858_v15, 1  ;;  %v17150_v59 = vmul.f32 %v20838_v28, %v6914_v5  ;;  %v17156_v1 = vmul.f32 %v17152_v51, %v20860_v6 }
 0x540   : > { %v5590_v3 = vsel %vm3788_vm5, %v20904_v30, %v19102_v63  ;;  %v7732_v41 = vmax.f32 %v7636_v45, 0.0  ;;  %v7629_v42 = vadd.f32 %v20906_v13, %v7516_v57  ;;  %v3566_v12 = vmul.f32 %v17152_v51, %v20907_v61  ;;  %v17161_v30 = vpop.f32.mrf.mxu1 }
 0x541   : > { %v6604_v26 = vsel %vm2950_vm4, %v20905_v29, %v19101_v17  ;;  %v5085_v46 = vadd.f32 %v4882_v43, %v4476_v58  ;;  %20908 = vst [vmem:[#allocation3_spill] sm:$0xff] %v17161_v30  ;;  %v19107_v15 = vrot.slane %v17150_v59, 2  ;;  %v4384_v29 = vmul.f32 %v16365_v44, %v20880_v39  ;;  %v17174_v58 = vld [vmem:[#allocation2 + $0x188] sm:$0xff] }
 0x542   : > { %v17169_v17 = vmul.f32 %v16678_v14, %v20873_v2  ;;  %v7828_v45 = vmin.f32 %v7732_v41, 6.0  ;;  %v7725_v63 = vmax.f32 %v7629_v42, 0.0  ;;  %v17172_v43 = vmul.f32 %v20870_v40, %v3566_v12  ;;  %v8015_v36 = vpop.f32.mrf.mxu1 }
 0x543   : > { %v5793_v57 = vadd.f32 %v5590_v3, %v5085_v46  ;;  %v20909_v5 = vrot.slane %v16872_v27, 2  ;;  %v20910_v44 = vrot.slane %v17156_v1, 1  ;;  %v20911_v49 = vrot.slane %v16961_v9, 1  ;;  %v2735_v27 = vld [vmem:[#allocation2 + $0x110] sm:$0x1] }
 0x544   : > { %v19106_v3 = vrot.slane %v17169_v17, 1  ;;  %v5196_v42 = vmul.f32 %v16678_v14, %v20907_v61  ;;  %8803 = vmatprep.mubr.f32.mxu0 %v7828_v45  ;;  %v7821_v46 = vmin.f32 %v7725_v63, 6.0  ;;  %v19108_v39 = vrot.slane %v17172_v43, 2  ;;  %v17190_v40 = vpop.f32.mrf.mxu1 }
 0x545   : > { %v7312_v30 = vsel %vm3788_vm5, %v20909_v5, %v19107_v15  ;;  %v3131_v41 = vsel %vm2950_vm4, %v20911_v49, %v20910_v44  ;;  %v6105_v36 = vadd.f32 %v6009_v4, %v5793_v57  ;;  %20912 = vst [vmem:[#allocation46_spill] sm:$0xff] %v17190_v40  ;;  %v20913_v9 = vrot.slane %v17002_v22, 1  ;;  %v3345_v4 = vld [vmem:[#allocation2 + $0x110] sm:$0x3] }
 0x546   : > { %v3330_v12 = vadd.f32 %v3131_v41, %v2624_v47  ;;  %v17198_v5 = vmul.f32 %v20738_v48, %v5196_v42  ;;  %v6013_v45 = vmul.f32 %v17015_v54, %v20739_v16  ;;  %v17204_v63 = vmul.f32 %v20804_v8, %v17174_v58  ;;  %8091 = vmatprep.mubr.f32.mxu1 %v7821_v46  ;;  %v8020_v42 = vpop.f32.mrf.mxu1  ;;  %v20917_v46 = vld [vmem:[#allocation10_spill] sm:$0xff]  ;;  %v5104_v16 = vld [vmem:[#allocation2 + $0x218] sm:$0x3] }
 0x547   : > { %v4890_v49 = vsel %vm2950_vm4, %v20913_v9, %v19106_v3  ;;  %v6807_v47 = vadd.f32 %v6604_v26, %v6105_v36  ;;  %v20916_v57 = vrot.slane %v16990_v38, 2  ;;  %v6918_v44 = vmul.f32 %v17174_v58, %v20907_v61  ;;  %v4495_v36 = vld [vmem:[#allocation2 + $0x218] sm:$0x1]  ;;  %v20924_v42 = vld [vmem:[#allocation32_spill] sm:$0xff] }
 0x548   : > { %20914 = vst [vmem:[#allocation44_spill] sm:$0xff] %v17198_v5  ;;  %20915 = vst [vmem:[#allocation56_spill] sm:$0xff] %v17204_v63  ;;  %v2631_v41 = vmul.f32 %v16290_v34, %v20501_v21  ;;  %v19110_v3 = vrot.slane %v17198_v5, 2  ;;  %v19111_v15 = vrot.slane %v17204_v63, 1  ;;  %v2850_v26 = vmul.f32 %v20917_v46, %v2735_v27  ;;  %v17224_v21 = vpop.f32.mrf.mxu1 }
 0x549   : > { %v3969_v22 = vsel %vm3788_vm5, %v20916_v57, %v19108_v39  ;;  %v7515_v40 = vadd.f32 %v7312_v30, %v6807_v47  ;;  %v17219_v38 = vmul.f32 %v20684_v19, %v6918_v44  ;;  %v3573_v57 = vmul.f32 %v16920_v23, %v3345_v4  ;;  %20919 = vst [vmem:[#allocation13_spill] sm:$0xff] %v17224_v21 }
 0x54a   : > { %v4168_v9 = vadd.f32 %v3969_v22, %v3330_v12  ;;  %v4391_v39 = vmul.f32 %v16584_v31, %v20616_v32  ;;  %v20920_v12 = vrot.slane %v17047_v10, 2  ;;  %v20921_v30 = vrot.slane %v17037_v52, 1  ;;  %v17236_v22 = vpop.f32.mrf.mxu0  ;;  %v6217_v10 = vld [vmem:[#allocation2 + $0x148] sm:$0x1]  ;;  %v8025_v46 = vpop.f32.mrf.mxu1 }
 0x54b   : > { %20918 = vst [vmem:[#allocation50_spill] sm:$0xff] %v17219_v38  ;;  %v3144_v4 = vrot.slane %v2850_v26, 1  ;;  %20922 = vst [vmem:[#allocation53_spill] sm:$0xff] %v17236_v22  ;;  %v7628_v32 = vadd.f32 %v20866_v50, %v7515_v40  ;;  %v17246_v26 = vld [vmem:[#allocation2 + $0x2b0] sm:$0xff]  ;;  %v6826_v22 = vld [vmem:[#allocation2 + $0x148] sm:$0x3] }
 0x54c   : > { %v4480_v34 = vadd.f32 %v4384_v29, %v4168_v9  ;;  %v5598_v27 = vsel %vm3788_vm5, %v20920_v12, %v19110_v3  ;;  %v6612_v47 = vsel %vm2950_vm4, %v20921_v30, %v19111_v15  ;;  %v20923_v29 = vld [vmem:[#allocation16_spill] sm:$0xff]  ;;  %v4610_v9 = vmul.f32 %v20924_v42, %v4495_v36  ;;  %v20927_v15 = vld [vmem:[#allocation41_spill] sm:$0xff]  ;;  %v20932_v46 = vld [vmem:[#allocation38_spill] sm:$0xff]  ;;  %v17259_v63 = vpop.f32.mrf.mxu0 }
 0x54d   : > { %v3688_v44 = vmul.f32 %v20923_v29, %v3573_v57  ;;  %v20925_v3 = vld [vmem:[#allocation28_spill] sm:$0xff]  ;;  %v5203_v30 = vmul.f32 %v5104_v16, %v16920_v23  ;;  %v6020_v40 = vmul.f32 %v17246_v26, %v20927_v15  ;;  %v7724_v31 = vmax.f32 %v7628_v32, 0.0  ;;  %20933 = vst [vmem:[#allocation34_spill] sm:$0xff] %v17259_v63  ;;  %v20934_v32 = vld [vmem:[#allocation31_spill] sm:$0xff] }
 0x54e   : > { %v5089_v12 = vadd.f32 %v4890_v49, %v4480_v34  ;;  %v20926_v21 = vrot.slane %v20925_v3, 1  ;;  %v20928_v57 = vrot.slane %v17219_v38, 2  ;;  %v20929_v36 = vrot.slane %v17054_v56, 2  ;;  %v17255_v3 = vpop.f32.mrf.mxu1  ;;  %v20931_v16 = vld [vmem:[#allocation36_spill] sm:$0xff] }
 0x54f   : > { %v3982_v34 = vrot.slane %v3688_v44, 2  ;;  %20930 = vst [vmem:[#allocation4_spill] sm:$0xff] %v17255_v3  ;;  %v5318_v42 = vmul.f32 %v20931_v16, %v5203_v30  ;;  %v6332_v50 = vmul.f32 %v20932_v46, %v6217_v10  ;;  %v7820_v15 = vmin.f32 %v7724_v31, 6.0 }
 0x550   : > { %v3145_v52 = vsel %vm2950_vm4, %v20926_v21, %v3144_v4  ;;  %v7320_v29 = vsel %vm3788_vm5, %v20929_v36, %v20928_v57  ;;  %v5797_v21 = vadd.f32 %v5598_v27, %v5089_v12  ;;  %v4903_v4 = vrot.slane %v4610_v9, 1  ;;  %v8030_v44 = vpop.f32.mrf.mxu1  ;;  %v20936_v9 = vld [vmem:[#allocation58_spill] sm:$0xff]  ;;  %v17270_v57 = vpop.f32.mrf.mxu0 }
 0x551   : > { %v3337_v49 = vadd.f32 %v3145_v52, %v2631_v41  ;;  %v20935_v5 = vrot.slane %v20934_v32, 2  ;;  %v6925_v56 = vmul.f32 %v6826_v22, %v16920_v23  ;;  %v2623_v41 = vmul.f32 %v17060_v62, %v20747_v0  ;;  %20938 = vst [vmem:[#allocation9_spill] sm:$0xff] %v17270_v57  ;;  %8092 = vmatmul.mubr.f32.gmra.mxu1 %v7820_v15  ;;  %v20939_v36 = vld [vmem:[#allocation42_spill] sm:$0xff]  ;;  %v20945_v15 = vld [vmem:[#allocation45_spill] sm:$0xff] }
 0x552   : > { %v6109_v52 = vadd.f32 %v6013_v45, %v5797_v21  ;;  %v20937_v12 = vrot.slane %v20936_v9, 1  ;;  %v5611_v10 = vrot.slane %v5318_v42, 2  ;;  %v6625_v31 = vrot.slane %v6332_v50, 1  ;;  %v20940_v22 = vld [vmem:[#allocation6_spill] sm:$0xff]  ;;  %v17281_v45 = vpop.f32.mrf.mxu1  ;;  %v20942_v21 = vld [vmem:[#allocation47_spill] sm:$0xff] }
 0x553   : > { %v3983_v38 = vsel %vm3788_vm5, %v20935_v5, %v3982_v34  ;;  %v7040_v16 = vmul.f32 %v20939_v36, %v6925_v56  ;;  %v17273_v5 = vld [vmem:[#allocation2 + $0x1c8] sm:$0xff]  ;;  %20941 = vst [vmem:[#allocation57_spill] sm:$0xff] %v17281_v45  ;;  %v20944_v50 = vld [vmem:[#allocation19_spill] sm:$0xff]  ;;  %v20946_v32 = vrot.slane %v20945_v15, 1 }
 0x554   : > { %v4175_v27 = vadd.f32 %v3983_v38, %v3337_v49  ;;  %v4904_v30 = vsel %vm2950_vm4, %v20937_v12, %v4903_v4  ;;  %v17277_v34 = vmul.f32 %v17273_v5, %v20940_v22  ;;  %v3565_v62 = vmul.f32 %v17273_v5, %v20907_v61  ;;  %v20947_v12 = vld [vmem:[#allocation12_spill] sm:$0xff]  ;;  %v8035_v45 = vpop.f32.mrf.mxu1 }
 0x555   : > { %v6811_v38 = vadd.f32 %v6612_v47, %v6109_v52  ;;  %v20943_v4 = vrot.slane %v20942_v21, 2  ;;  %v4383_v46 = vmul.f32 %v20944_v50, %v20897_v60  ;;  %v6626_v56 = vsel %vm2950_vm4, %v20946_v32, %v6625_v31  ;;  %v20948_v52 = vld [vmem:[#allocation24_spill] sm:$0xff]  ;;  %v17301_v21 = vld [vmem:[#allocation2 + $0x248] sm:$0xff] }
 0x556   : > { %v4487_v49 = vadd.f32 %v4391_v39, %v4175_v27  ;;  %v7333_v44 = vrot.slane %v7040_v16, 2  ;;  %v19116_v9 = vrot.slane %v17277_v34, 1  ;;  %v17293_v36 = vmul.f32 %v20947_v12, %v3565_v62  ;;  %v20950_v31 = vld [vmem:[#allocation61_spill] sm:$0xff]  ;;  %v20952_v62 = vld [vmem:[#allocation11_spill] sm:$0xff] }
 0x557   : > { %v5612_v42 = vsel %vm3788_vm5, %v20943_v4, %v5611_v10  ;;  %v7519_v47 = vadd.f32 %v7320_v29, %v6811_v38  ;;  %v17297_v27 = vmul.f32 %v16841_v25, %v20948_v52  ;;  %v5195_v10 = vmul.f32 %v16841_v25, %v20907_v61  ;;  %v17303_v4 = vpop.f32.mrf.mxu0 }
 0x558   : > { %v5096_v39 = vadd.f32 %v4904_v30, %v4487_v49  ;;  %20949 = vst [vmem:[#allocation25_spill] sm:$0xff] %v17303_v4  ;;  %v20951_v16 = vrot.slane %v20950_v31, 2  ;;  %v20953_v29 = vrot.slane %v20952_v62, 1  ;;  %v19117_v45 = vrot.slane %v17293_v36, 2  ;;  %v17316_v49 = vpop.f32.mrf.mxu1 }
 0x559   : > { %v6012_v38 = vmul.f32 %v17095_v7, %v20903_v55  ;;  %20954 = vst [vmem:[#allocation60_spill] sm:$0xff] %v17316_v49  ;;  %v7632_v15 = vadd.f32 %v20906_v13, %v7519_v47  ;;  %v19118_v31 = vrot.slane %v17297_v27, 1 }
 0x55a   : > { %v7334_v50 = vsel %vm3788_vm5, %v20951_v16, %v7333_v44  ;;  %v3129_v30 = vsel %vm2950_vm4, %v20953_v29, %v19116_v9  ;;  %v5804_v32 = vadd.f32 %v5612_v42, %v5096_v39  ;;  %v17320_v44 = vpop.f32.mrf.mxu0  ;;  %v20956_v16 = vrot.slane %v17081_v37, 2  ;;  %v8040_v42 = vpop.f32.mrf.mxu1 }
 0x55b   : > { %v3329_v3 = vadd.f32 %v3129_v30, %v2623_v41  ;;  %20955 = vst [vmem:[#allocation43_spill] sm:$0xff] %v17320_v44  ;;  %v17328_v29 = vmul.f32 %v20837_v18, %v5195_v10  ;;  %v17332_v9 = vmul.f32 %v20900_v20, %v17301_v21  ;;  %v6917_v41 = vmul.f32 %v17301_v21, %v20907_v61  ;;  %v20958_v44 = vld [vmem:[#allocation55_spill] sm:$0xff] }
 0x55c   : > { %v3967_v62 = vsel %vm3788_vm5, %v20956_v16, %v19117_v45  ;;  %v7728_v47 = vmax.f32 %v7632_v15, 0.0  ;;  %v6116_v39 = vadd.f32 %v6020_v40, %v5804_v32  ;;  %v20957_v37 = vrot.slane %v17093_v33, 1  ;;  %v17348_v42 = vpop.f32.mrf.mxu1  ;;  %v17350_v32 = vld [vmem:[#allocation2 + $0x288] sm:$0xff] }
 0x55d   : > { %v4167_v30 = vadd.f32 %v3967_v62, %v3329_v3  ;;  %v19121_v10 = vrot.slane %v17328_v29, 2  ;;  %v19120_v45 = vrot.slane %v17332_v9, 1  ;;  %v17344_v49 = vmul.f32 %v20838_v28, %v6917_v41  ;;  %20959 = vst [vmem:[#allocation48_spill] sm:$0xff] %v17348_v42  ;;  %v17356_v62 = vpop.f32.mrf.mxu0 }
 0x55e   : > { %v4888_v16 = vsel %vm2950_vm4, %v20957_v37, %v19118_v31  ;;  %v2515_v61 = vmul.f32 %v17152_v51, %v20958_v44  ;;  %v7824_v40 = vmin.f32 %v7728_v47, 6.0  ;;  %v6818_v3 = vadd.f32 %v6626_v56, %v6116_v39  ;;  %20960 = vst [vmem:[#allocation20_spill] sm:$0xff] %v17356_v62  ;;  %v8045_v39 = vpop.f32.mrf.mxu1  ;;  %v20963_v62 = vld [vmem:[#allocation51_spill] sm:$0xff] }
 0x55f   : > { %v4479_v15 = vadd.f32 %v4383_v46, %v4167_v30  ;;  %v17354_v33 = vmul.f32 %v17350_v32, %v20860_v6  ;;  %v20961_v41 = vrot.slane %v17116_v53, 2  ;;  %v20962_v51 = vrot.slane %v17122_v35, 1 }
 0x560   : > { %v19119_v56 = vrot.slane %v17344_v49, 2  ;;  %v2627_v47 = vmul.f32 %v20868_v24, %v2515_v61  ;;  %8096 = vmatprep.mubr.f32.mxu1 %v7824_v40  ;;  %v7526_v30 = vadd.f32 %v7334_v50, %v6818_v3  ;;  %v3569_v53 = vmul.f32 %v17350_v32, %v20963_v62  ;;  %v17388_v40 = vpop.f32.mrf.mxu1 }
 0x561   : > { %v5596_v37 = vsel %vm3788_vm5, %v20961_v41, %v19121_v10  ;;  %v6610_v46 = vsel %vm2950_vm4, %v20962_v51, %v19120_v45  ;;  %v5088_v31 = vadd.f32 %v4888_v16, %v4479_v15  ;;  %v19123_v42 = vrot.slane %v17354_v33, 1  ;;  %v17373_v41 = vpop.f32.mrf.mxu0  ;;  %20966 = vst [vmem:[#allocation49_spill] sm:$0xff] %v17388_v40  ;;  %v20969_v45 = vld [vmem:[#allocation23_spill] sm:$0xff] }
 0x562   : > { %20964 = vst [vmem:[#allocation26_spill] sm:$0xff] %v17373_v41  ;;  %v20965_v35 = vrot.slane %v17150_v59, 2  ;;  %v4275_v61 = vmul.f32 %v20958_v44, %v16678_v14  ;;  %v17384_v50 = vmul.f32 %v17015_v54, %v20873_v2  ;;  %v5199_v16 = vmul.f32 %v17015_v54, %v20963_v62  ;;  %v8050_v40 = vpop.f32.mrf.mxu1 }
 0x563   : > { %v7639_v3 = vadd.f32 %v20548_v11, %v7526_v30  ;;  %v5796_v15 = vadd.f32 %v5596_v37, %v5088_v31  ;;  %v20967_v59 = vrot.slane %v17156_v1, 1  ;;  %v5904_v1 = vmul.f32 %v20958_v44, %v17174_v58  ;;  %v17407_v30 = vpop.f32.mrf.mxu0 }
 0x564   : > { %v7318_v51 = vsel %vm3788_vm5, %v20965_v35, %v19119_v56  ;;  %v20968_v35 = vld [vmem:[#allocation8_spill] sm:$0xff]  ;;  %v4387_v10 = vmul.f32 %v20969_v45, %v4275_v61  ;;  %v19122_v41 = vrot.slane %v17384_v50, 1  ;;  %v17402_v57 = vmul.f32 %v20738_v48, %v5199_v16  ;;  %20970 = vst [vmem:[#allocation33_spill] sm:$0xff] %v17407_v30 }
 0x565   : > { %v3137_v39 = vsel %vm2950_vm4, %v20967_v59, %v19123_v42  ;;  %v17397_v14 = vmul.f32 %v20968_v35, %v3569_v53  ;;  %v7735_v11 = vmax.f32 %v7639_v3, 0.0  ;;  %v6108_v31 = vadd.f32 %v6012_v38, %v5796_v15  ;;  %v20972_v38 = vld [vmem:[#allocation18_spill] sm:$0xff]  ;;  %v17423_v3 = vpop.f32.mrf.mxu1  ;;  %v20978_v30 = vld [vmem:[#allocation44_spill] sm:$0xff] }
 0x566   : > { %v3333_v56 = vadd.f32 %v3137_v39, %v2627_v47  ;;  %v20971_v47 = vrot.slane %v17169_v17, 1  ;;  %v19124_v61 = vrot.slane %v17402_v57, 2  ;;  %v17417_v16 = vmul.f32 %v17246_v26, %v20804_v8  ;;  %20974 = vst [vmem:[#allocation40_spill] sm:$0xff] %v17423_v3  ;;  %v20976_v39 = vld [vmem:[#allocation30_spill] sm:$0xff]  ;;  %v20985_v3 = vld [vmem:[#allocation39_spill] sm:$0xff] }
 0x567   : > { %v19125_v37 = vrot.slane %v17397_v14, 2  ;;  %v17421_v40 = vmul.f32 %v20684_v19, %v20972_v38  ;;  %v7831_v58 = vmin.f32 %v7735_v11, 6.0  ;;  %v6810_v15 = vadd.f32 %v6610_v46, %v6108_v31  ;;  %v8055_v31 = vpop.f32.mrf.mxu1 }
 0x568   : > { %v4896_v53 = vsel %vm2950_vm4, %v20971_v47, %v19122_v41  ;;  %v20975_v17 = vrot.slane %v17172_v43, 2  ;;  %v6016_v47 = vmul.f32 %v20976_v39, %v5904_v1  ;;  %v17431_v41 = vpop.f32.mrf.mxu0  ;;  %v20979_v4 = vrot.slane %v20978_v30, 2  ;;  %v17442_v1 = vld [vmem:[#allocation2 + $0x300] sm:$0xff] }
 0x569   : > { %20973 = vst [vmem:[#allocation29_spill] sm:$0xff] %v17421_v40  ;;  %20977 = vst [vmem:[#allocation7_spill] sm:$0xff] %v17431_v41  ;;  %v19126_v11 = vrot.slane %v17417_v16, 1  ;;  %v19127_v46 = vrot.slane %v17421_v40, 2  ;;  %8804 = vmatmul.mubr.f32.gmra.mxu0 %v7831_v58  ;;  %v7518_v43 = vadd.f32 %v7318_v51, %v6810_v15  ;;  %v3568_v30 = vmul.f32 %v17442_v1, %v20963_v62  ;;  %v20982_v51 = vld [vmem:[#allocation50_spill] sm:$0xff] }
 0x56a   : > { %v3975_v59 = vsel %vm3788_vm5, %v20975_v17, %v19125_v37  ;;  %v5604_v63 = vsel %vm3788_vm5, %v20979_v4, %v19124_v61  ;;  %v2514_v17 = vmul.f32 %v17273_v5, %v20958_v44  ;;  %v20983_v5 = vrot.slane %v20982_v51, 2  ;;  %v17462_v37 = vpop.f32.mrf.mxu1 }
 0x56b   : > { %v4171_v42 = vadd.f32 %v3975_v59, %v3333_v56  ;;  %v17446_v56 = vmul.f32 %v17442_v1, %v20940_v22  ;;  %v20980_v59 = vld [vmem:[#allocation56_spill] sm:$0xff]  ;;  %v4274_v31 = vmul.f32 %v20958_v44, %v16841_v25  ;;  %20984 = vst [vmem:[#allocation10_spill] sm:$0xff] %v17462_v37  ;;  %v7631_v41 = vadd.f32 %v20985_v3, %v7518_v43 }
 0x56c   : > { %v20981_v61 = vrot.slane %v20980_v59, 1  ;;  %v7326_v15 = vsel %vm3788_vm5, %v20983_v5, %v19127_v46  ;;  %v17468_v59 = vmul.f32 %v20947_v12, %v3568_v30  ;;  %v17475_v5 = vmul.f32 %v17095_v7, %v20948_v52  ;;  %v8060_v43 = vpop.f32.mrf.mxu1 }
 0x56d   : > { %v4483_v4 = vadd.f32 %v4387_v10, %v4171_v42  ;;  %v2626_v10 = vmul.f32 %v20747_v0, %v2514_v17  ;;  %v19129_v42 = vrot.slane %v17446_v56, 1  ;;  %v4386_v51 = vmul.f32 %v20897_v60, %v4274_v31 }
 0x56e   : > { %v6618_v58 = vsel %vm2950_vm4, %v20981_v61, %v19126_v11  ;;  %v17470_v61 = vpop.f32.mrf.mxu0  ;;  %v5198_v25 = vmul.f32 %v17095_v7, %v20963_v62  ;;  %v7727_v46 = vmax.f32 %v7631_v41, 0.0  ;;  %v20987_v17 = vrot.slane %v17277_v34, 1  ;;  %v2734_v41 = vld [vmem:[#allocation2 + $0x1b0] sm:$0x1]  ;;  %v17493_v43 = vpop.f32.mrf.mxu1 }
 0x56f   : > { %20986 = vst [vmem:[#allocation16_spill] sm:$0xff] %v17470_v61  ;;  %v5092_v11 = vadd.f32 %v4896_v53, %v4483_v4  ;;  %v19131_v37 = vrot.slane %v17468_v59, 2  ;;  %v5903_v53 = vmul.f32 %v20958_v44, %v17301_v21  ;;  %v19130_v40 = vrot.slane %v17475_v5, 1  ;;  %v3344_v44 = vld [vmem:[#allocation2 + $0x1b0] sm:$0x3] }
 0x570   : > { %v3135_v30 = vsel %vm2950_vm4, %v20987_v17, %v19129_v42  ;;  %v17487_v4 = vpop.f32.mrf.mxu0  ;;  %v17491_v62 = vmul.f32 %v20837_v18, %v5198_v25  ;;  %v7823_v34 = vmin.f32 %v7727_v46, 6.0  ;;  %v20988_v17 = vrot.slane %v17293_v36, 2  ;;  %v8065_v36 = vpop.f32.mrf.mxu1 }
 0x571   : > { %v5800_v31 = vadd.f32 %v5604_v63, %v5092_v11  ;;  %v3332_v61 = vadd.f32 %v3135_v30, %v2626_v10  ;;  %v6015_v21 = vmul.f32 %v20903_v55, %v5903_v53  ;;  %v17503_v63 = vmul.f32 %v17246_v26, %v20900_v20 }
 0x572   : > { %v3973_v42 = vsel %vm3788_vm5, %v20988_v17, %v19131_v37  ;;  %v20989_v25 = vrot.slane %v17297_v27, 1  ;;  %v19132_v30 = vrot.slane %v17491_v62, 2  ;;  %8097 = vmatmul.mubr.f32.gmra.mxu1 %v7823_v34  ;;  %v17514_v53 = vmul.f32 %v20838_v28, %v20972_v38  ;;  %v5103_v38 = vld [vmem:[#allocation2 + $0x188] sm:$0x3]  ;;  %v17527_v37 = vpop.f32.mrf.mxu1 }
 0x573   : > { %v6112_v11 = vadd.f32 %v6016_v47, %v5800_v31  ;;  %v4170_v10 = vadd.f32 %v3973_v42, %v3332_v61  ;;  %v6615_v17 = vrot.slane %v17503_v63, 1  ;;  %v2630_v47 = vmul.f32 %v17350_v32, %v20868_v24  ;;  %v4494_v61 = vld [vmem:[#allocation2 + $0x188] sm:$0x1]  ;;  %v17519_v31 = vpop.f32.mrf.mxu0  ;;  %20991 = vst [vmem:[#allocation32_spill] sm:$0xff] %v17527_v37  ;;  %v21011_v63 = vld [vmem:[#allocation52_spill] sm:$0xff] }
 0x574   : > { %v4894_v46 = vsel %vm2950_vm4, %v20989_v25, %v19130_v40  ;;  %v2849_v42 = vmul.f32 %v20860_v6, %v2734_v41  ;;  %v20990_v34 = vrot.slane %v17328_v29, 2  ;;  %v3572_v40 = vmul.f32 %v16920_v23, %v3344_v44  ;;  %v8070_v37 = vpop.f32.mrf.mxu1 }
 0x575   : > { %v6814_v27 = vadd.f32 %v6618_v58, %v6112_v11  ;;  %v4482_v25 = vadd.f32 %v4386_v51, %v4170_v10  ;;  %v20992_v6 = vrot.slane %v17332_v9, 1  ;;  %v7323_v32 = vrot.slane %v17514_v53, 2  ;;  %v17537_v29 = vpop.f32.mrf.mxu0 }
 0x576   : > { %v5602_v36 = vsel %vm3788_vm5, %v20990_v34, %v19132_v30  ;;  %v3142_v58 = vrot.slane %v2849_v42, 1  ;;  %v4390_v51 = vmul.f32 %v17015_v54, %v20969_v45  ;;  %v3687_v44 = vmul.f32 %v20968_v35, %v3572_v40  ;;  %v6216_v34 = vld [vmem:[#allocation2 + $0x1a8] sm:$0x1] }
 0x577   : > { %v6616_v24 = vsel %vm2950_vm4, %v20992_v6, %v6615_v17  ;;  %v7522_v41 = vadd.f32 %v7326_v15, %v6814_v27  ;;  %v5091_v11 = vadd.f32 %v4894_v46, %v4482_v25  ;;  %v4609_v10 = vmul.f32 %v20873_v2, %v4494_v61  ;;  %v6825_v30 = vld [vmem:[#allocation2 + $0x1a8] sm:$0x3]  ;;  %v17556_v25 = vpop.f32.mrf.mxu0 }
 0x578   : > { %v20993_v9 = vrot.slane %v17344_v49, 2  ;;  %v20994_v6 = vrot.slane %v17354_v33, 1  ;;  %v5202_v45 = vmul.f32 %v5103_v38, %v16920_v23  ;;  %v6019_v35 = vmul.f32 %v17246_v26, %v20976_v39  ;;  %v2733_v33 = vld [vmem:[#allocation2 + $0x250] sm:$0x1] }
 0x579   : > { %v7635_v2 = vadd.f32 %v20906_v13, %v7522_v41  ;;  %v5799_v40 = vadd.f32 %v5602_v36, %v5091_v11  ;;  %v3980_v37 = vrot.slane %v3687_v44, 2  ;;  %v4901_v46 = vrot.slane %v4609_v10, 1  ;;  %v3343_v36 = vld [vmem:[#allocation2 + $0x250] sm:$0x3]  ;;  %v17566_v44 = vpop.f32.mrf.mxu0 }
 0x57a   : > { %v7324_v42 = vsel %vm3788_vm5, %v20993_v9, %v7323_v32  ;;  %v3143_v54 = vsel %vm2950_vm4, %v20994_v6, %v3142_v58  ;;  %v5317_v61 = vmul.f32 %v20738_v48, %v5202_v45  ;;  %v6331_v49 = vmul.f32 %v20804_v8, %v6216_v34  ;;  %v4493_v6 = vld [vmem:[#allocation2 + $0x248] sm:$0x1] }
 0x57b   : > { %v3336_v15 = vadd.f32 %v3143_v54, %v2630_v47  ;;  %v6924_v27 = vmul.f32 %v6825_v30, %v16920_v23  ;;  %v7731_v58 = vmax.f32 %v7635_v2, 0.0  ;;  %v6111_v38 = vadd.f32 %v6015_v21, %v5799_v40  ;;  %v5102_v54 = vld [vmem:[#allocation2 + $0x248] sm:$0x3] }
 0x57c   : > { %v20995_v9 = vrot.slane %v17397_v14, 2  ;;  %v2629_v47 = vmul.f32 %v17442_v1, %v20747_v0  ;;  %v20996_v48 = vrot.slane %v17384_v50, 1  ;;  %v5609_v11 = vrot.slane %v5317_v61, 2  ;;  %v6215_v61 = vld [vmem:[#allocation2 + $0x298] sm:$0x1] }
 0x57d   : > { %v6623_v30 = vrot.slane %v6331_v49, 1  ;;  %v7827_v10 = vmin.f32 %v7731_v58, 6.0  ;;  %v6813_v34 = vadd.f32 %v6616_v24, %v6111_v38  ;;  %v7039_v21 = vmul.f32 %v20684_v19, %v6924_v27  ;;  %v17582_v49 = vpop.f32.mrf.mxu0 }
 0x57e   : > { %v3981_v39 = vsel %vm3788_vm5, %v20995_v9, %v3980_v37  ;;  %v4902_v8 = vsel %vm2950_vm4, %v20996_v48, %v4901_v46  ;;  %v2848_v14 = vmul.f32 %v20940_v22, %v2733_v33  ;;  %v20997_v0 = vrot.slane %v17402_v57, 2  ;;  %v20999_v33 = vld [vmem:[#allocation29_spill] sm:$0xff] }
 0x57f   : > { %v4174_v41 = vadd.f32 %v3981_v39, %v3336_v15  ;;  %v20998_v50 = vrot.slane %v17417_v16, 1  ;;  %v3571_v40 = vmul.f32 %v16920_v23, %v3343_v36  ;;  %8101 = vmatprep.mubr.f32.mxu1 %v7827_v10  ;;  %v7521_v15 = vadd.f32 %v7324_v42, %v6813_v34  ;;  %v6824_v16 = vld [vmem:[#allocation2 + $0x298] sm:$0x3]  ;;  %v21004_v34 = vld [vmem:[#allocation21_spill] sm:$0xff] }
 0x580   : > { %v5610_v1 = vsel %vm3788_vm5, %v20997_v0, %v5609_v11  ;;  %v7331_v24 = vrot.slane %v7039_v21, 2  ;;  %v3140_v37 = vrot.slane %v2848_v14, 1  ;;  %v4389_v19 = vmul.f32 %v17095_v7, %v20897_v60 }
 0x581   : > { %v4486_v45 = vadd.f32 %v4390_v51, %v4174_v41  ;;  %v6624_v2 = vsel %vm2950_vm4, %v20998_v50, %v6623_v30  ;;  %v3686_v51 = vmul.f32 %v20947_v12, %v3571_v40  ;;  %v4608_v57 = vmul.f32 %v20948_v52, %v4493_v6  ;;  %v17596_v12 = vld [vmem:[%s17821_s6] ss:$0 sm:$0xff]  ;;  %v17598_v41 = vpop.f32.mrf.mxu0  ;;  %v21008_v40 = vld [vmem:[#allocation17_spill] sm:$0xff] }
 0x582   : > { %v5201_v46 = vmul.f32 %v5102_v54, %v16920_v23  ;;  %v7634_v27 = vadd.f32 %v20985_v3, %v7521_v15  ;;  %v21000_v42 = vrot.slane %v20999_v33, 2  ;;  %v21001_v38 = vrot.slane %v17446_v56, 1 }
 0x583   : > { %v5095_v22 = vadd.f32 %v4902_v8, %v4486_v45  ;;  %v6018_v60 = vmul.f32 %v17246_v26, %v20903_v55  ;;  %v3978_v39 = vrot.slane %v3686_v51, 2  ;;  %v4899_v36 = vrot.slane %v4608_v57, 1  ;;  %v21009_v57 = vld [vmem:[#allocation53_spill] sm:$0xff] }
 0x584   : > { %v7332_v58 = vsel %vm3788_vm5, %v21000_v42, %v7331_v24  ;;  %v3141_v7 = vsel %vm2950_vm4, %v21001_v38, %v3140_v37  ;;  %v7730_v48 = vmax.f32 %v7634_v27, 0.0  ;;  %v5316_v8 = vmul.f32 %v20837_v18, %v5201_v46  ;;  %v8906_v38 = vld [vmem:[%s9089_s30 + $0x8] sm:$0xff] }
 0x585   : > { %v5803_v52 = vadd.f32 %v5610_v1, %v5095_v22  ;;  %v3335_v9 = vadd.f32 %v3141_v7, %v2629_v47  ;;  %v6330_v56 = vmul.f32 %v20900_v20, %v6215_v61  ;;  %v6923_v11 = vmul.f32 %v6824_v16, %v16920_v23  ;;  %v17615_v1 = vpop.f32.mrf.mxu0  ;;  %v8905_v22 = vld [vmem:[%s9089_s30] sm:$0xff]  ;;  %v21010_v61 = vld [vmem:[#allocation25_spill] sm:$0xff] }
 0x586   : > { %v21002_v26 = vrot.slane %v17468_v59, 2  ;;  %v21003_v10 = vrot.slane %v17475_v5, 1  ;;  %v7954_v21 = vadd.f32 %v17596_v12, %v21004_v34  ;;  %v7826_v14 = vmin.f32 %v7730_v48, 6.0  ;;  %v21006_v59 = vld [vmem:[#allocation59_spill] sm:$0xff] }
 0x587   : > { %v6115_v55 = vadd.f32 %v6019_v35, %v5803_v52  ;;  %v5607_v18 = vrot.slane %v5316_v8, 2  ;;  %v6621_v54 = vrot.slane %v6330_v56, 1  ;;  %v7038_v23 = vmul.f32 %v20838_v28, %v6923_v11  ;;  %v21005_v35 = vld [vmem:[#allocation34_spill] sm:$0xff]  ;;  %v17634_v46 = vpop.f32.mrf.mxu0  ;;  %v21013_v52 = vld [vmem:[#allocation35_spill] sm:$0xff]  ;;  %v21014_v8 = vld [vmem:[#allocation9_spill] sm:$0xff] }
 0x588   : > { %v3979_v30 = vsel %vm3788_vm5, %v21002_v26, %v3978_v39  ;;  %v4900_v47 = vsel %vm2950_vm4, %v21003_v10, %v4899_v36  ;;  %v8179_v45 = vadd.f32 %v21005_v35, %v7954_v21  ;;  %v7959_v0 = vadd.f32 %v17596_v12, %v21006_v59  ;;  %8102 = vmatmul.mubr.f32.gmra.mxu1 %v7826_v14  ;;  %v8907_v36 = vld [vmem:[%s9089_s30 + $0x10] sm:$0xff]  ;;  %v21018_v10 = vld [vmem:[#allocation5_spill] sm:$0xff]  ;;  %v8908_v14 = vld [vmem:[%s9089_s30 + $0x18] sm:$0xff] }
 0x589   : > { %v4173_v6 = vadd.f32 %v3979_v30, %v3335_v9  ;;  %v6817_v20 = vadd.f32 %v6624_v2, %v6115_v55  ;;  %v21007_v50 = vrot.slane %v17491_v62, 2  ;;  %v6622_v2 = vsel %vm2950_vm4, %v6615_v17, %v6621_v54  ;;  %v21012_v17 = vld [vmem:[#allocation14_spill] sm:$0xff]  ;;  %v17660_v34 = vpop.f32.mrf.mxu0 }
 0x58a   : > { %v7964_v15 = vadd.f32 %v17596_v12, %v21008_v40  ;;  %v7329_v37 = vrot.slane %v7038_v23, 2  ;;  %v8337_v51 = vadd.f32 %v8905_v22, %v8179_v45  ;;  %v7969_v27 = vadd.f32 %v17596_v12, %v21011_v63  ;;  %v21017_v26 = vld [vmem:[#allocation22_spill] sm:$0xff]  ;;  %v8910_v45 = vld [vmem:[%s9089_s30 + $0x28] sm:$0xff] }
 0x58b   : > { %v4485_v5 = vadd.f32 %v4389_v19, %v4173_v6  ;;  %v5608_v28 = vsel %vm3788_vm5, %v21007_v50, %v5607_v18  ;;  %v7525_v24 = vadd.f32 %v7332_v58, %v6817_v20  ;;  %v8184_v19 = vadd.f32 %v21009_v57, %v7959_v0  ;;  %v8909_v18 = vld [vmem:[%s9089_s30 + $0x20] sm:$0xff]  ;;  %v21019_v20 = vld [vmem:[#allocation54_spill] sm:$0xff]  ;;  %v21020_v0 = vld [vmem:[#allocation33_spill] sm:$0xff] }
 0x58c   : > { %v8189_v16 = vadd.f32 %v21010_v61, %v7964_v15  ;;  %v7974_v33 = vadd.f32 %v17596_v12, %v21012_v17  ;;  %v7330_v58 = vsel %vm3788_vm5, %v7323_v32, %v7329_v37  ;;  %8369 = vst.msk [vmem:[%s17622_s23] sm:$0xff] %vm352_vm0, %v8337_v51  ;;  %v7979_v9 = vadd.f32 %v17596_v12, %v21013_v52  ;;  %v21016_v32 = vld [vmem:[#allocation43_spill] sm:$0xff]  ;;  %v21021_v50 = vld [vmem:[#allocation26_spill] sm:$0xff]  ;;  %v21022_v15 = vld [vmem:[#allocation16_spill] sm:$0xff] }
 0x58d   : > { %v5094_v62 = vadd.f32 %v4900_v47, %v4485_v5  ;;  %v7638_v42 = vadd.f32 %v20906_v13, %v7525_v24  ;;  %v8338_v7 = vadd.f32 %v8906_v38, %v8184_v19  ;;  %v8194_v56 = vadd.f32 %v21014_v8, %v7969_v27  ;;  %v21015_v13 = vld [vmem:[#allocation20_spill] sm:$0xff]  ;;  %v21023_v37 = vld [vmem:[#allocation15_spill] sm:$0xff]  ;;  %v8911_v19 = vld [vmem:[%s9089_s30 + $0x30] sm:$0xff] }
 0x58e   : > { %v8339_v48 = vadd.f32 %v8907_v36, %v8189_v16  ;;  %v8199_v53 = vadd.f32 %v21015_v13, %v7974_v33  ;;  %v8204_v55 = vadd.f32 %v21016_v32, %v7979_v9  ;;  %v7984_v30 = vadd.f32 %v17596_v12, %v21017_v26  ;;  %v21024_v51 = vld [vmem:[#allocation27_spill] sm:$0xff]  ;;  %v21025_v16 = vld [vmem:[#allocation37_spill] sm:$0xff] }
 0x58f   : > { %v5802_v39 = vadd.f32 %v5608_v28, %v5094_v62  ;;  %v7734_v11 = vmax.f32 %v7638_v42, 0.0  ;;  %8370 = vst.msk [vmem:[%s17622_s23 + $0x8] sm:$0xff] %vm352_vm0, %v8338_v7  ;;  %v7989_v47 = vadd.f32 %v17596_v12, %v21018_v10  ;;  %v8340_v6 = vadd.f32 %v8908_v14, %v8194_v56  ;;  %v21026_v27 = vld [vmem:[#allocation3_spill] sm:$0xff]  ;;  %v8913_v42 = vld [vmem:[%s9089_s30 + $0x40] sm:$0xff]  ;;  %v21029_v56 = vld [vmem:[#allocation13_spill] sm:$0xff] }
 0x590   : > { %8371 = vst.msk [vmem:[%s17622_s23 + $0x10] sm:$0xff] %vm352_vm0, %v8339_v48  ;;  %v8341_v54 = vadd.f32 %v8909_v18, %v8199_v53  ;;  %v7994_v23 = vadd.f32 %v17596_v12, %v21019_v20  ;;  %v8342_v59 = vadd.f32 %v8910_v45, %v8204_v55  ;;  %v8209_v5 = vadd.f32 %v21020_v0, %v7984_v30  ;;  %v21027_v7 = vld [vmem:[#allocation7_spill] sm:$0xff]  ;;  %v8915_v55 = vld [vmem:[%s9089_s30 + $0x50] sm:$0xff]  ;;  %v21032_v45 = vld [vmem:[#allocation60_spill] sm:$0xff] }
 0x591   : > { %v6114_v21 = vadd.f32 %v6018_v60, %v5802_v39  ;;  %v7830_v35 = vmin.f32 %v7734_v11, 6.0  ;;  %v8214_v28 = vadd.f32 %v21021_v50, %v7989_v47  ;;  %v17671_v60 = vpop.f32.mrf.mxu0  ;;  %8372 = vst.msk [vmem:[%s17622_s23 + $0x18] sm:$0xff] %vm352_vm0, %v8340_v6  ;;  %v7999_v22 = vadd.f32 %v17596_v12, %v21023_v37  ;;  %v17693_v39 = vpop.f32.mrf.mxu1  ;;  %v8914_v11 = vld [vmem:[%s9089_s30 + $0x48] sm:$0xff]  ;;  %v8916_v10 = vld [vmem:[%s9089_s30 + $0x58] sm:$0xff]  ;;  %v8919_v0 = vld [vmem:[%s9089_s30 + $0x70] sm:$0xff] }
 0x592   : > { %8373 = vst.msk [vmem:[%s17622_s23 + $0x20] sm:$0xff] %vm352_vm0, %v8341_v54  ;;  %v8219_v24 = vadd.f32 %v21022_v15, %v7994_v23  ;;  %v8004_v57 = vadd.f32 %v17596_v12, %v21024_v51  ;;  %8374 = vst.msk [vmem:[%s17622_s23 + $0x28] sm:$0xff] %vm352_vm0, %v8342_v59  ;;  %v8343_v62 = vadd.f32 %v8911_v19, %v8209_v5  ;;  %v21031_v23 = vld [vmem:[#allocation57_spill] sm:$0xff]  ;;  %v21033_v50 = vld [vmem:[#allocation48_spill] sm:$0xff] }
 0x593   : > { %v6816_v40 = vadd.f32 %v6622_v2, %v6114_v21  ;;  %8106 = vmatprep.mubr.f32.mxu1 %v7830_v35  ;;  %v8912_v2 = vld [vmem:[%s9089_s30 + $0x38] sm:$0xff]  ;;  %v8009_v63 = vadd.f32 %v17596_v12, %v21025_v16  ;;  %v8014_v17 = vadd.f32 %v17596_v12, %v21026_v27  ;;  %v8224_v52 = vadd.f32 %v21027_v7, %v7999_v22  ;;  %v8278_v53 = vpop.f32.mrf.mxu0  ;;  %v8075_v30 = vpop.f32.mrf.mxu1  ;;  %v8917_v21 = vld [vmem:[%s9089_s30 + $0x60] sm:$0xff]  ;;  %v8922_v27 = vld [vmem:[%s9089_s30 + $0x88] sm:$0xff] }
 0x594   : > { %v8344_v61 = vadd.f32 %v8912_v2, %v8214_v28  ;;  %v8345_v38 = vadd.f32 %v8913_v42, %v8219_v24  ;;  %v8229_v9 = vadd.f32 %v17519_v31, %v8004_v57  ;;  %8375 = vst.msk [vmem:[%s17622_s23 + $0x30] sm:$0xff] %vm352_vm0, %v8343_v62  ;;  %v8024_v13 = vadd.f32 %v17596_v12, %v21029_v56  ;;  %v21034_v28 = vld [vmem:[#allocation49_spill] sm:$0xff]  ;;  %v8920_v24 = vld [vmem:[%s9089_s30 + $0x78] sm:$0xff]  ;;  %v21035_v62 = vld [vmem:[#allocation40_spill] sm:$0xff] }
 0x595   : > { %v7524_v33 = vadd.f32 %v7330_v58, %v6816_v40  ;;  %v8234_v36 = vadd.f32 %v17487_v4, %v8009_v63  ;;  %v8239_v48 = vadd.f32 %v17556_v25, %v8014_v17  ;;  %v21028_v58 = vld [vmem:[#allocation46_spill] sm:$0xff]  ;;  %v8346_v32 = vadd.f32 %v8914_v11, %v8224_v52  ;;  %v21030_v4 = vld [vmem:[#allocation4_spill] sm:$0xff]  ;;  %v8793_v18 = vpop.f32.mrf.mxu0  ;;  %v8924_v7 = vld [vmem:[%s9089_s30 + $0x98] sm:$0xff]  ;;  %v8078_v30 = vpop.f32.mrf.mxu1 }
 0x596   : > { %8376 = vst.msk [vmem:[%s17622_s23 + $0x38] sm:$0xff] %vm352_vm0, %v8344_v61  ;;  %v8019_v8 = vadd.f32 %v17596_v12, %v21028_v58  ;;  %8377 = vst.msk [vmem:[%s17622_s23 + $0x40] sm:$0xff] %vm352_vm0, %v8345_v38  ;;  %v8347_v26 = vadd.f32 %v8915_v55, %v8229_v9  ;;  %v8029_v25 = vadd.f32 %v17596_v12, %v21030_v4  ;;  %v21036_v61 = vld [vmem:[#allocation10_spill] sm:$0xff]  ;;  %v21037_v17 = vld [vmem:[#allocation32_spill] sm:$0xff] }
 0x597   : > { %v7637_v31 = vadd.f32 %v20985_v3, %v7524_v33  ;;  %v8348_v47 = vadd.f32 %v8916_v10, %v8234_v36  ;;  %v8349_v3 = vadd.f32 %v8917_v21, %v8239_v48  ;;  %v8249_v6 = vadd.f32 %v17582_v49, %v8024_v13  ;;  %8378 = vst.msk [vmem:[%s17622_s23 + $0x48] sm:$0xff] %vm352_vm0, %v8346_v32  ;;  %v8923_v42 = vld [vmem:[%s9089_s30 + $0x90] sm:$0xff]  ;;  %v8925_v58 = vld [vmem:[%s9089_s30 + $0xa0] sm:$0xff]  ;;  %v8926_v56 = vld [vmem:[%s9089_s30 + $0xa8] sm:$0xff] }
 0x598   : > { %v8244_v14 = vadd.f32 %v17537_v29, %v8019_v8  ;;  %8379 = vst.msk [vmem:[%s17622_s23 + $0x50] sm:$0xff] %vm352_vm0, %v8347_v26  ;;  %v8254_v20 = vadd.f32 %v17566_v44, %v8029_v25  ;;  %v8034_v35 = vadd.f32 %v17596_v12, %v21031_v23  ;;  %v8039_v59 = vadd.f32 %v17596_v12, %v21032_v45  ;;  %v8918_v29 = vld [vmem:[%s9089_s30 + $0x68] sm:$0xff]  ;;  %v8928_v11 = vld [vmem:[%s9089_s30 + $0xb8] sm:$0xff]  ;;  %v8929_v25 = vld [vmem:[%s9089_s30 + $0xc0] sm:$0xff] }
 0x599   : > { %v7733_v54 = vmax.f32 %v7637_v31, 0.0  ;;  %8380 = vst.msk [vmem:[%s17622_s23 + $0x58] sm:$0xff] %vm352_vm0, %v8348_v47  ;;  %8381 = vst.msk [vmem:[%s17622_s23 + $0x60] sm:$0xff] %vm352_vm0, %v8349_v3  ;;  %v8351_v5 = vadd.f32 %v8919_v0, %v8249_v6  ;;  %v8044_v44 = vadd.f32 %v17596_v12, %v21033_v50  ;;  %v8049_v40 = vadd.f32 %v17596_v12, %v21034_v28  ;;  %v8080_v47 = vpop.f32.mrf.mxu1  ;;  %v8930_v3 = vld [vmem:[%s9089_s30 + $0xc8] sm:$0xff]  ;;  %v8931_v45 = vld [vmem:[%s9089_s30 + $0xd0] sm:$0xff] }
 0x59a   : > { %v8350_v49 = vadd.f32 %v8918_v29, %v8244_v14  ;;  %v8352_v37 = vadd.f32 %v8920_v24, %v8254_v20  ;;  %v8259_v22 = vadd.f32 %v17615_v1, %v8034_v35  ;;  %v8264_v51 = vadd.f32 %v17598_v41, %v8039_v59  ;;  %v8288_v1 = vpop.f32.mrf.mxu0  ;;  %v8921_v41 = vld [vmem:[%s9089_s30 + $0x80] sm:$0xff]  ;;  %v8932_v50 = vld [vmem:[%s9089_s30 + $0xd8] sm:$0xff] }
 0x59b   : > { %v7829_v15 = vmin.f32 %v7733_v54, 6.0  ;;  %8383 = vst.msk [vmem:[%s17622_s23 + $0x70] sm:$0xff] %vm352_vm0, %v8351_v5  ;;  %v8269_v57 = vadd.f32 %v17660_v34, %v8044_v44  ;;  %v8274_v19 = vadd.f32 %v17634_v46, %v8049_v40  ;;  %v8054_v2 = vadd.f32 %v17596_v12, %v21035_v62 }
 0x59c   : > { %8382 = vst.msk [vmem:[%s17622_s23 + $0x68] sm:$0xff] %vm352_vm0, %v8350_v49  ;;  %v8059_v16 = vadd.f32 %v17596_v12, %v21036_v61  ;;  %8384 = vst.msk [vmem:[%s17622_s23 + $0x78] sm:$0xff] %vm352_vm0, %v8352_v37  ;;  %v8353_v63 = vadd.f32 %v8921_v41, %v8259_v22  ;;  %v8354_v34 = vadd.f32 %v8922_v27, %v8264_v51  ;;  %v8796_v55 = vpop.f32.mrf.mxu0  ;;  %v8933_v51 = vld [vmem:[%s9089_s30 + $0xe0] sm:$0xff] }
 0x59d   : > { %8107 = vmatmul.mubr.f32.gmra.mxu1 %v7829_v15  ;;  %v8064_v46 = vadd.f32 %v17596_v12, %v17493_v43  ;;  %v8069_v33 = vadd.f32 %v17596_v12, %v21037_v17  ;;  %v8355_v38 = vadd.f32 %v8923_v42, %v8269_v57  ;;  %v8356_v52 = vadd.f32 %v8924_v7, %v8274_v19 }
 0x59e   : > { %v8279_v9 = vadd.f32 %v8278_v53, %v8054_v2  ;;  %v8284_v36 = vadd.f32 %v17671_v60, %v8059_v16  ;;  %8385 = vst.msk [vmem:[%s17622_s23 + $0x80] sm:$0xff] %vm352_vm0, %v8353_v63  ;;  %8386 = vst.msk [vmem:[%s17622_s23 + $0x88] sm:$0xff] %vm352_vm0, %v8354_v34  ;;  %v8074_v13 = vadd.f32 %v17596_v12, %v17693_v39  ;;  %v8927_v53 = vld [vmem:[%s9089_s30 + $0xb0] sm:$0xff]  ;;  %v8298_v26 = vpop.f32.mrf.mxu0  ;;  %v8934_v16 = vld [vmem:[%s9089_s30 + $0xe8] sm:$0xff] }
 0x59f   : > { %v8289_v43 = vadd.f32 %v8288_v1, %v8064_v46  ;;  %v8294_v48 = vadd.f32 %v8793_v18, %v8069_v33  ;;  %8387 = vst.msk [vmem:[%s17622_s23 + $0x90] sm:$0xff] %vm352_vm0, %v8355_v38  ;;  %8388 = vst.msk [vmem:[%s17622_s23 + $0x98] sm:$0xff] %vm352_vm0, %v8356_v52  ;;  %v8079_v10 = vadd.f32 %v17596_v12, %v8078_v30  ;;  %v8935_v33 = vld [vmem:[%s9089_s30 + $0xf0] sm:$0xff] }
 0x5a0   : > { %v8357_v8 = vadd.f32 %v8925_v58, %v8279_v9  ;;  %v8358_v60 = vadd.f32 %v8926_v56, %v8284_v36  ;;  %v8299_v4 = vadd.f32 %v8298_v26, %v8074_v13  ;;  %v8936_v36 = vld [vmem:[%s9089_s30 + $0xf8] sm:$0xff] }
 0x5a1   : > { %v8359_v31 = vadd.f32 %v8927_v53, %v8289_v43  ;;  %v8360_v32 = vadd.f32 %v8928_v11, %v8294_v48  ;;  %v8304_v21 = vadd.f32 %v8796_v55, %v8079_v10 }
 0x5a2   : > { %8389 = vst.msk [vmem:[%s17622_s23 + $0xa0] sm:$0xff] %vm352_vm0, %v8357_v8  ;;  %8390 = vst.msk [vmem:[%s17622_s23 + $0xa8] sm:$0xff] %vm352_vm0, %v8358_v60  ;;  %v8361_v39 = vadd.f32 %v8929_v25, %v8299_v4 }
 0x5a3   : > { %8391 = vst.msk [vmem:[%s17622_s23 + $0xb0] sm:$0xff] %vm352_vm0, %v8359_v31  ;;  %8392 = vst.msk [vmem:[%s17622_s23 + $0xb8] sm:$0xff] %vm352_vm0, %v8360_v32  ;;  %v8362_v14 = vadd.f32 %v8930_v3, %v8304_v21 }
 0x5a4   : > { %8393 = vst.msk [vmem:[%s17622_s23 + $0xc0] sm:$0xff] %vm352_vm0, %v8361_v39 }
 0x5a5   : > { %8394 = vst.msk [vmem:[%s17622_s23 + $0xc8] sm:$0xff] %vm352_vm0, %v8362_v14 }
 0x5ba   : > { %v8799_v6 = vpop.f32.mrf.mxu0 }
 0x5bc   : > { %v8308_v54 = vpop.f32.mrf.mxu0 }
 0x5c2   : > { %v8083_v18 = vpop.f32.mrf.mxu1 }
 0x5c3   : > { %v8084_v20 = vadd.f32 %v17596_v12, %v8083_v18 }
 0x5c4   : > { %v8085_v23 = vpop.f32.mrf.mxu1 }
 0x5c5   : > { %v8309_v35 = vadd.f32 %v8308_v54, %v8084_v20 }
 0x5c7   : > { %v8363_v59 = vadd.f32 %v8931_v45, %v8309_v35 }
 0x5c9   : > { %8395 = vst.msk [vmem:[%s17622_s23 + $0xd0] sm:$0xff] %vm352_vm0, %v8363_v59 }
 0x5e5   : > { %v8802_v28 = vpop.f32.mrf.mxu0 }
 0x5e7   : > { %v8318_v24 = vpop.f32.mrf.mxu0 }
 0x5ee   : > { %v8088_v29 = vpop.f32.mrf.mxu1 }
 0x5ef   : > { %v8089_v49 = vadd.f32 %v17596_v12, %v8088_v29 }
 0x5f0   : > { %v8090_v0 = vpop.f32.mrf.mxu1 }
 0x5f1   : > { %v8314_v5 = vadd.f32 %v8799_v6, %v8089_v49 }
 0x5f3   : > { %v8364_v44 = vadd.f32 %v8932_v50, %v8314_v5 }
 0x5f5   : > { %8396 = vst.msk [vmem:[%s17622_s23 + $0xd8] sm:$0xff] %vm352_vm0, %v8364_v44 }
 0x611   : > { %v8093_v40 = vpop.f32.mrf.mxu1 }
 0x612   : > { %v8094_v15 = vadd.f32 %v17596_v12, %v8093_v40 }
 0x613   : > { %v8095_v37 = vpop.f32.mrf.mxu1 }
 0x614   : > { %v8319_v22 = vadd.f32 %v8318_v24, %v8094_v15 }
 0x616   : > { %v8365_v57 = vadd.f32 %v8933_v51, %v8319_v22 }
 0x618   : > { %8397 = vst.msk [vmem:[%s17622_s23 + $0xe0] sm:$0xff] %vm352_vm0, %v8365_v57 }
 0x629   : > { %v8805_v41 = vpop.f32.mrf.mxu0 }
 0x62b   : > { %v8328_v34 = vpop.f32.mrf.mxu0 }
 0x632   : > { %v8098_v19 = vpop.f32.mrf.mxu1 }
 0x633   : > { %v8099_v62 = vadd.f32 %v17596_v12, %v8098_v19 }
 0x634   : > { %v8100_v2 = vpop.f32.mrf.mxu1 }
 0x635   : > { %v8324_v61 = vadd.f32 %v8802_v28, %v8099_v62 }
 0x637   : > { %v8366_v1 = vadd.f32 %v8934_v16, %v8324_v61 }
 0x639   : > { %8398 = vst.msk [vmem:[%s17622_s23 + $0xe8] sm:$0xff] %vm352_vm0, %v8366_v1 }
 0x648   : > { %v8103_v63 = vpop.f32.mrf.mxu1 }
 0x649   : > { %v8104_v27 = vadd.f32 %v17596_v12, %v8103_v63 }
 0x64a   : > { %v8105_v46 = vpop.f32.mrf.mxu1 }
 0x64b   : > { %v8329_v17 = vadd.f32 %v8328_v34, %v8104_v27 }
 0x64d   : > { %v8367_v42 = vadd.f32 %v8935_v33, %v8329_v17 }
 0x64f   : > { %8399 = vst.msk [vmem:[%s17622_s23 + $0xf0] sm:$0xff] %vm352_vm0, %v8367_v42 }
 0x65d   : > { %v8108_v38 = vpop.f32.mrf.mxu1 }
 0x65e   : > { %v8109_v7 = vadd.f32 %v17596_v12, %v8108_v38 }
 0x65f   : > { %v8110_v52 = vpop.f32.mrf.mxu1 }
 0x660   : > { %v8334_v9 = vadd.f32 %v8805_v41, %v8109_v7 }
 0x662   : > { %v8368_v43 = vadd.f32 %v8936_v36, %v8334_v9 }
 0x664   : > { %8400 = vst.msk [vmem:[%s17622_s23 + $0xf8] sm:$0xff] %vm352_vm0, %v8368_v43 }
 0x665 PF: > { %s17_s24 = sadd.s32 1, %s8943_s24  }
 0x666   : > { %p14_p4 = scmp.ge.s32.totalorder %s17_s24, 4  }
 0x668   :  { %16 = sbr.rel (!%p14_p4) target bundleno = 1 (0x1), region = 86 }

</bundles_post_ra>
